<compile_context>
chip_gen: v7x
topology: tpu7x:2x2x1
jax: 0.10.0
libtpu: 0.0.40
codegen_flags: <defaults>
</compile_context>

<pallas_src>
import functools
import math

import jax
import jax.numpy as jnp
from jax.experimental import pallas as pl
from jax.experimental.pallas import tpu as pltpu

LANE = 128


def _vmem_limit_bytes():
    # Raise the scoped-VMEM limit (defaults 16 MiB v5e / 32 MiB v6e,v7x) with
    # headroom below physical capacity (128 MiB v5e/v6e, 64 MiB v7x).
    try:
        return int(pltpu.get_tpu_info().vmem_capacity_bytes * 3 // 4)
    except Exception:
        return 64 * 1024 * 1024


_VMEM_LIMIT = _vmem_limit_bytes()


# ----------------------------------------------------------------------------
# Kernel 1: global-average-pool branches.  relu(mean(x) @ Wpool + bpool) is
# immediately projected by conv1's pool-rows, producing a per-batch bias for
# the ASPP+conv1 kernel (the bilinear upsample from 1x1 is an exact broadcast,
# realized as a bias add instead of an HBM broadcast).
# ----------------------------------------------------------------------------
def _pool_proj_kernel(xm_ref, w_ref, b_ref, wp_ref, o_ref):
    z = jnp.dot(xm_ref[...], w_ref[...],
                preferred_element_type=jnp.float32) + b_ref[...]
    z = jnp.maximum(z, 0.0).astype(wp_ref.dtype)
    o_ref[...] = jnp.dot(z, wp_ref[...],
                         preferred_element_type=jnp.float32).astype(o_ref.dtype)


def pool_proj(xm, w, b, wp):
    B, C = xm.shape
    N = w.shape[-1]
    Np = wp.shape[-1]
    return pl.pallas_call(
        _pool_proj_kernel,
        out_shape=jax.ShapeDtypeStruct((B, Np), jnp.float32),
        grid_spec=pltpu.PrefetchScalarGridSpec(
            num_scalar_prefetch=0,
            grid=(1,),
            in_specs=[
                pl.BlockSpec((B, C), lambda i: (0, 0)),
                pl.BlockSpec((C, N), lambda i: (0, 0)),
                pl.BlockSpec((1, N), lambda i: (0, 0)),
                pl.BlockSpec((N, Np), lambda i: (0, 0)),
            ],
            out_specs=pl.BlockSpec((B, Np), lambda i: (0, 0)),
        ),
        compiler_params=pltpu.CompilerParams(
            dimension_semantics=("arbitrary",),
            vmem_limit_bytes=_VMEM_LIMIT),
    )(xm, w, b, wp)


# ----------------------------------------------------------------------------
# Kernel 2: fused ASPP (all 24 ConvBNReLU branches) + decoder conv1 + ReLU.
# Grid = (batch, branch).  The max-padded NHWC slab has a constant block index
# along the branch axis (DMA'd once per batch); per-branch 3x3 weights and the
# matching conv1 K-slices are streamed per branch step.  The onex (1x1)
# branches are computed from the slab centre window at branch 0 and the pooled
# contribution enters as a per-batch bias, so conv1's big HBM concat is never
# materialized.  Each tap is a single windowed slice + one MXU matmul.
# ----------------------------------------------------------------------------
def _aspp_conv1_kernel(xp_ref, pool_ref, w1x_ref, b1x_ref, w1o_ref, b1c_ref,
                       w3_ref, b3_ref, w1b_ref, o_ref, acc_ref,
                       *, H, W, pad, dils):
    m = pl.program_id(1)
    C = xp_ref.shape[-1]

    def patch(r0, c0):  # windowed slice of the padded slab, flattened to (HW,C)
        return xp_ref[r0:r0 + H, c0:c0 + W, :].reshape(H * W, C)

    @pl.when(m == 0)
    def _():
        # All 1x1 branches that read x directly, projected by conv1's rows,
        # plus conv1's bias and the pooled per-batch contribution.
        xc = patch(pad, pad)
        z = jnp.dot(xc, w1x_ref[...],
                    preferred_element_type=jnp.float32) + b1x_ref[...]
        z = jnp.maximum(z, 0.0).astype(w1o_ref.dtype)
        acc_ref[...] = (jnp.dot(z, w1o_ref[...],
                                preferred_element_type=jnp.float32)
                        + b1c_ref[...] + pool_ref[...])

    # One statically-unrolled tap loop per branch (dilations are compile-time).
    for k, d in enumerate(dils):
        @pl.when(m == k)
        def _(d=d):
            acc = None
            for t in range(9):
                i, j = divmod(t, 3)
                p = patch(pad + (i - 1) * d, pad + (j - 1) * d)
                c = jnp.dot(p, w3_ref[t], preferred_element_type=jnp.float32)
                acc = c if acc is None else acc + c
            z = jnp.maximum(acc + b3_ref[...], 0.0).astype(w1b_ref.dtype)
            acc_ref[...] += jnp.dot(z, w1b_ref[...],
                                    preferred_element_type=jnp.float32)

    @pl.when(m == len(dils) - 1)
    def _():
        o_ref[...] = jnp.maximum(acc_ref[...], 0.0).astype(o_ref.dtype)


def aspp_conv1(xp, pool_part, params, H, W):
    B, Hp, Wp, C = xp.shape
    c_mid = params['w1_onex'].shape[-1]
    n1x = params['onex_w'].shape[-1]
    nbr, _, _, nb = params['br_w'].shape
    pad = params['pad']
    kernel = functools.partial(_aspp_conv1_kernel, H=H, W=W, pad=pad,
                               dils=params['dils'])
    return pl.pallas_call(
        kernel,
        out_shape=jax.ShapeDtypeStruct((B, H * W, c_mid), jnp.bfloat16),
        grid_spec=pltpu.PrefetchScalarGridSpec(
            num_scalar_prefetch=0,
            grid=(B, nbr),
            in_specs=[
                pl.BlockSpec((None, Hp, Wp, C), lambda b, m: (b, 0, 0, 0)),
                pl.BlockSpec((None, 1, c_mid), lambda b, m: (b, 0, 0)),
                pl.BlockSpec((C, n1x), lambda b, m: (0, 0)),
                pl.BlockSpec((1, n1x), lambda b, m: (0, 0)),
                pl.BlockSpec((n1x, c_mid), lambda b, m: (0, 0)),
                pl.BlockSpec((1, c_mid), lambda b, m: (0, 0)),
                pl.BlockSpec((None, 9, C, nb), lambda b, m: (m, 0, 0, 0)),
                pl.BlockSpec((None, 1, nb), lambda b, m: (m, 0, 0)),
                pl.BlockSpec((None, nb, c_mid), lambda b, m: (m, 0, 0)),
            ],
            out_specs=pl.BlockSpec((None, H * W, c_mid), lambda b, m: (b, 0, 0)),
            scratch_shapes=[pltpu.VMEM((H * W, c_mid), jnp.float32)],
        ),
        compiler_params=pltpu.CompilerParams(
            dimension_semantics=("parallel", "arbitrary"),
            vmem_limit_bytes=_VMEM_LIMIT),
    )(xp, pool_part, params['onex_w'], params['onex_b'],
      params['w1_onex'], params['b1'], params['br_w'], params['br_b'],
      params['w1_br'])


# ----------------------------------------------------------------------------
# Kernel 3: decoder conv2 (3x3 + BN + ReLU) with split-K inputs (y1 | low, so
# the channel concat is never written to HBM) and conv3 (1x1 classifier)
# fused as a lane-dense padded projection epilogue.
# ----------------------------------------------------------------------------
def _conv2_cls_kernel(ap_ref, bp_ref, w2a_ref, w2b_ref, b2_ref, w3_ref, b3_ref,
                      o_ref, *, H, W):
    Ca = ap_ref.shape[-1]
    Cb = bp_ref.shape[-1]
    acc = None
    for t in range(9):
        i, j = divmod(t, 3)
        pa = ap_ref[i:i + H, j:j + W, :].reshape(H * W, Ca)
        pb = bp_ref[i:i + H, j:j + W, :].reshape(H * W, Cb)
        c = (jnp.dot(pa, w2a_ref[t], preferred_element_type=jnp.float32)
             + jnp.dot(pb, w2b_ref[t], preferred_element_type=jnp.float32))
        acc = c if acc is None else acc + c
    z = jnp.maximum(acc + b2_ref[...], 0.0).astype(w3_ref.dtype)
    y = jnp.dot(z, w3_ref[...], preferred_element_type=jnp.float32) + b3_ref[...]
    o_ref[...] = y.astype(o_ref.dtype)


def conv2_cls(y1p, lowp, params, H, W):
    B, Hp, Wp, Ca = y1p.shape
    Cb = lowp.shape[-1]
    c_mid = params['conv2a'].shape[-1]
    ncls_p = params['conv3'].shape[-1]
    kernel = functools.partial(_conv2_cls_kernel, H=H, W=W)
    return pl.pallas_call(
        kernel,
        out_shape=jax.ShapeDtypeStruct((B, H * W, ncls_p), jnp.float32),
        grid_spec=pltpu.PrefetchScalarGridSpec(
            num_scalar_prefetch=0,
            grid=(B,),
            in_specs=[
                pl.BlockSpec((None, Hp, Wp, Ca), lambda b: (b, 0, 0, 0)),
                pl.BlockSpec((None, Hp, Wp, Cb), lambda b: (b, 0, 0, 0)),
                pl.BlockSpec((9, Ca, c_mid), lambda b: (0, 0, 0)),
                pl.BlockSpec((9, Cb, c_mid), lambda b: (0, 0, 0)),
                pl.BlockSpec((1, c_mid), lambda b: (0, 0)),
                pl.BlockSpec((c_mid, ncls_p), lambda b: (0, 0)),
                pl.BlockSpec((1, ncls_p), lambda b: (0, 0)),
            ],
            out_specs=pl.BlockSpec((None, H * W, ncls_p), lambda b: (b, 0, 0)),
        ),
        compiler_params=pltpu.CompilerParams(
            dimension_semantics=("parallel",),
            vmem_limit_bytes=_VMEM_LIMIT),
    )(y1p, lowp, params['conv2a'], params['conv2b'], params['b2'],
      params['conv3'], params['b3'])


# ----------------------------------------------------------------------------
# Plain-JAX glue: bilinear align_corners=True resize on NHWC.
# ----------------------------------------------------------------------------
def bilinear_resize_nhwc(x, out_h, out_w):
    n, h, w, c = x.shape
    if (h, w) == (out_h, out_w):
        return x

    def coords(out_s, in_s):
        if out_s == 1 or in_s == 1:
            return jnp.zeros((out_s,), jnp.float32)
        return jnp.arange(out_s, dtype=jnp.float32) * ((in_s - 1) / (out_s - 1))

    ys, xs = coords(out_h, h), coords(out_w, w)
    y0 = jnp.floor(ys).astype(jnp.int32)
    y1 = jnp.minimum(y0 + 1, h - 1)
    wy = (ys - y0.astype(jnp.float32))[None, :, None, None]
    x0 = jnp.floor(xs).astype(jnp.int32)
    x1 = jnp.minimum(x0 + 1, w - 1)
    wx = (xs - x0.astype(jnp.float32))[None, None, :, None]
    v = x[:, y0, :, :] * (1.0 - wy) + x[:, y1, :, :] * wy
    return v[:, :, x0, :] * (1.0 - wx) + v[:, :, x1, :] * wx


# ----------------------------------------------------------------------------
# Parameter construction: Conv+BN folded to (w, bias); weights cast to bf16,
# biases kept f32; conv1's 1x1 weight is sliced by K into the branch groups it
# is fused with (a fixed permutation of the reference concat; exact for a 1x1).
# ----------------------------------------------------------------------------
def _init_conv_bn_folded(key, c_in, c_out, kh, kw, groups=1, conv_bias=True,
                         bn=True):
    k1, k2, k3, k4, k5, k6 = jax.random.split(key, 6)
    fan_in = (c_in // groups) * kh * kw
    w = jax.random.normal(k1, (kh * kw, c_in, c_out), jnp.float32) / math.sqrt(fan_in)
    if groups > 1:
        gmask = ((jnp.arange(c_in) // (c_in // groups))[:, None]
                 == (jnp.arange(c_out) // (c_out // groups))[None, :])
        w = w * gmask.astype(jnp.float32)[None]
    b_conv = (0.01 * jax.random.normal(k2, (c_out,), jnp.float32)
              if conv_bias else jnp.zeros((c_out,), jnp.float32))
    if bn:
        gamma = 1.0 + 0.1 * jax.random.normal(k3, (c_out,), jnp.float32)
        beta = 0.1 * jax.random.normal(k4, (c_out,), jnp.float32)
        mean = 0.1 * jax.random.normal(k5, (c_out,), jnp.float32)
        var = 0.5 + jnp.abs(jax.random.normal(k6, (c_out,), jnp.float32))
        scale = gamma / jnp.sqrt(var + 1e-5)
        bias = beta + scale * (b_conv - mean)
    else:
        scale = jnp.ones((c_out,), jnp.float32)
        bias = b_conv
    return w * scale[None, None, :], bias


def init_decoder(key, c_in, c_mid, c_low, num_classes, dils=(1, 6, 12, 18)):
    # TODO(synk): reference passes dilation=0 for aspp1 and padding=1 for the
    #   dilated branches; clamped/normalized to 'same' padding (= dilation).
    keys = iter(jax.random.split(key, 40))
    bf = lambda a: a.astype(jnp.bfloat16)

    onex_w, onex_b, pool_w, pool_b, br_w, br_b = [], [], [], [], [], []
    for m, _ in enumerate(dils):
        ks = 1 if m == 0 else 3
        w1, b1 = _init_conv_bn_folded(next(keys), c_in, c_mid, ks, ks)
        w2, b2 = _init_conv_bn_folded(next(keys), c_in, c_mid, 1, 1)
        w3, b3 = _init_conv_bn_folded(next(keys), c_in, c_mid, 3, 3, groups=4)
        w4, b4 = _init_conv_bn_folded(next(keys), c_in, c_mid, 3, 3, groups=8)
        w5, b5 = _init_conv_bn_folded(next(keys), c_in, c_mid, 3, 3, groups=16)
        wp, bp = _init_conv_bn_folded(next(keys), c_in, c_mid, 1, 1)
        if ks == 1:                                  # aspp1: conv1 is a 1x1
            onex_w += [w1[0], w2[0]]
            onex_b += [b1, b2]
            gw = jnp.concatenate([w3, w4, w5], -1)
            gb = jnp.concatenate([b3, b4, b5], -1)
        else:                                        # conv1 joins the 3x3 group
            onex_w += [w2[0]]
            onex_b += [b2]
            gw = jnp.concatenate([w1, w3, w4, w5], -1)
            gb = jnp.concatenate([b1, b3, b4, b5], -1)
        br_w.append(gw)
        br_b.append(gb)
        pool_w.append(wp[0])
        pool_b.append(bp)

    # decoder-level global_avg_pool branch (conv bias=False)
    wg, bg = _init_conv_bn_folded(next(keys), c_in, c_mid, 1, 1, conv_bias=False)
    pool_w.append(wg[0])
    pool_b.append(bg)

    onex_wc = jnp.concatenate(onex_w, -1)            # (c_in, 5*c_mid)
    onex_bc = jnp.concatenate(onex_b, -1)
    pool_wc = jnp.concatenate(pool_w, -1)            # (c_in, 5*c_mid)
    pool_bc = jnp.concatenate(pool_b, -1)

    widths = [w.shape[-1] for w in br_w]
    nb = max(widths)                                  # 4*c_mid (pad 3*c_mid group)
    concat_width = onex_wc.shape[-1] + sum(widths) + pool_wc.shape[-1]

    # decoder conv1 (1x1, bias=False).  TODO(synk): original hardcodes 1280
    # in-channels which is inconsistent with the concat width; made consistent.
    w_c1, b_c1 = _init_conv_bn_folded(next(keys), concat_width, c_mid, 1, 1,
                                      conv_bias=False)
    w_c1 = w_c1[0]
    off = 0
    n1x = onex_wc.shape[-1]
    w1_onex = w_c1[off:off + n1x]; off += n1x
    w3_stk, b3_stk, w1_br = [], [], []
    for gw, gb, wdt in zip(br_w, br_b, widths):
        w1s = w_c1[off:off + wdt]; off += wdt
        if wdt < nb:  # zero-pad -> exact (padded cols feed zero conv1 rows)
            gw = jnp.pad(gw, ((0, 0), (0, 0), (0, nb - wdt)))
            gb = jnp.pad(gb, ((0, nb - wdt),))
            w1s = jnp.pad(w1s, ((0, nb - wdt), (0, 0)))
        w3_stk.append(gw); b3_stk.append(gb); w1_br.append(w1s)
    w1_pool = w_c1[off:off + pool_wc.shape[-1]]; off += pool_wc.shape[-1]
    assert off == concat_width

    # decoder conv2 (3x3, bias=False), K split between [y1 | low]; conv3
    # classifier padded to a lane-dense width for the fused epilogue.
    w_c2, b_c2 = _init_conv_bn_folded(next(keys), c_mid + c_low, c_mid, 3, 3,
                                      conv_bias=False)
    w_c3, b_c3 = _init_conv_bn_folded(next(keys), c_mid, num_classes, 1, 1,
                                      conv_bias=True, bn=False)
    ncls_p = ((num_classes + LANE - 1) // LANE) * LANE
    w_c3p = jnp.zeros((c_mid, ncls_p), jnp.float32).at[:, :num_classes].set(w_c3[0])
    b_c3p = jnp.zeros((ncls_p,), jnp.float32).at[:num_classes].set(b_c3)

    return {
        'dils': tuple(int(d) for d in dils),
        'pad': int(max(dils)),
        'onex_w': bf(onex_wc), 'onex_b': onex_bc.reshape(1, -1),
        'pool_w': bf(pool_wc), 'pool_b': pool_bc.reshape(1, -1),
        'w1_onex': bf(w1_onex), 'w1_pool': bf(w1_pool),
        'b1': b_c1.reshape(1, -1),
        'br_w': bf(jnp.stack(w3_stk)),                # (4, 9, c_in, nb)
        'br_b': jnp.stack(b3_stk)[:, None, :],        # (4, 1, nb) f32
        'w1_br': bf(jnp.stack(w1_br)),                # (4, nb, c_mid)
        'conv2a': bf(w_c2[:, :c_mid, :]),             # (9, c_mid, c_mid)
        'conv2b': bf(w_c2[:, c_mid:, :]),             # (9, c_low, c_mid)
        'b2': b_c2.reshape(1, -1),
        'conv3': bf(w_c3p), 'b3': b_c3p.reshape(1, -1),
    }


def decoder_forward(params, x_nchw, low_nchw, num_classes):
    B, C_in, H, W = x_nchw.shape
    c_mid = params['w1_onex'].shape[-1]

    # NCHW -> NHWC once at the boundary; bf16 activations internally.
    x = jnp.transpose(x_nchw, (0, 2, 3, 1)).astype(jnp.bfloat16)
    low = jnp.transpose(low_nchw, (0, 2, 3, 1)).astype(jnp.float32)
    low = bilinear_resize_nhwc(low, H, W).astype(jnp.bfloat16)     # (B,H,W,Clow)

    # Global-average-pool branches -> per-batch bias for the ASPP+conv1 kernel.
    xm = jnp.mean(x.astype(jnp.float32), axis=(1, 2)).astype(jnp.bfloat16)
    pool_part = pool_proj(xm, params['pool_w'], params['pool_b'],
                          params['w1_pool']).reshape(B, 1, c_mid)

    # One shared max-padded NHWC slab serves all dilations; fused ASPP + conv1.
    pad = params['pad']
    xp = jnp.pad(x, ((0, 0), (pad, pad), (pad, pad), (0, 0)))
    y1 = aspp_conv1(xp, pool_part, params, H, W)                   # (B,HW,c_mid)
    # F.interpolate(concat, size=low.shape[2:]) is an identity here because
    # `low` was already resized to x's spatial size above.
    y1 = y1.reshape(B, H, W, c_mid)

    # conv2 (3x3+BN+ReLU, split-K over [y1 | low]) + conv3 (1x1 classifier).
    y1p = jnp.pad(y1, ((0, 0), (1, 1), (1, 1), (0, 0)))
    lowp = jnp.pad(low, ((0, 0), (1, 1), (1, 1), (0, 0)))
    out = conv2_cls(y1p, lowp, params, H, W)                       # (B,HW,128) f32
    out = out[:, :, :num_classes].reshape(B, H, W, num_classes)
    # Final F.interpolate back to x's spatial size is an identity here.
    return jnp.transpose(out, (0, 3, 1, 2))


if __name__ == "__main__":
    key = jax.random.PRNGKey(0)
    kx, klow, kp = jax.random.split(key, 3)

    # Small shapes consistent with the module structure (channels scaled down:
    # 2048 -> 64, 256 -> 32; low-level features at higher spatial resolution).
    B, C_IN, H, W = 2, 64, 8, 8
    C_LOW, HL, WL = 32, 16, 16
    C_MID, NUM_CLASSES = 32, 5

    x = jax.random.normal(kx, (B, C_IN, H, W), jnp.float32)
    low = jax.random.normal(klow, (B, C_LOW, HL, WL), jnp.float32)
    params = init_decoder(kp, C_IN, C_MID, C_LOW, NUM_CLASSES)

    fwd = jax.jit(lambda a, b: decoder_forward(params, a, b, NUM_CLASSES))
    out = jax.block_until_ready(fwd(x, low))

    assert out.shape == (B, NUM_CLASSES, H, W), out.shape
    assert bool(jnp.all(jnp.isfinite(out)))
    print("KERNEL_OK")
</pallas_src>

<mosaic_0001>
module attributes {stable_mosaic.version = 11 : i64} {
  func.func @_aspp_conv1_kernel(%arg0: i32, %arg1: i32, %arg2: memref<1x44x44x64xbf16, #tpu.memory_space<vmem>>, %arg3: memref<1x1x32xf32, #tpu.memory_space<vmem>>, %arg4: memref<64x160xbf16, #tpu.memory_space<vmem>>, %arg5: memref<1x160xf32, #tpu.memory_space<vmem>>, %arg6: memref<160x32xbf16, #tpu.memory_space<vmem>>, %arg7: memref<1x32xf32, #tpu.memory_space<vmem>>, %arg8: memref<1x9x64x128xbf16, #tpu.memory_space<vmem>>, %arg9: memref<1x1x128xf32, #tpu.memory_space<vmem>>, %arg10: memref<1x128x32xbf16, #tpu.memory_space<vmem>>, %arg11: memref<1x64x32xbf16, #tpu.memory_space<vmem>>, %arg12: memref<64x32xf32, #tpu.memory_space<vmem>>) attributes {dimension_semantics = [#tpu.dimension_semantics<parallel>, #tpu.dimension_semantics<arbitrary>], iteration_bounds = array<i64: 2, 4>, scalar_prefetch = 0 : i64, scratch_operands = 1 : i64, tpu.core_type = #tpu.core_type<tc>, window_params = [{transform_indices = @transform_0, window_bounds = array<i64: 1, 44, 44, 64>}, {transform_indices = @transform_1, window_bounds = array<i64: 1, 1, 32>}, {pipeline_mode = #tpu.pipeline_mode<synchronous>, transform_indices = @transform_2, window_bounds = array<i64: 64, 160>}, {pipeline_mode = #tpu.pipeline_mode<synchronous>, transform_indices = @transform_3, window_bounds = array<i64: 1, 160>}, {pipeline_mode = #tpu.pipeline_mode<synchronous>, transform_indices = @transform_4, window_bounds = array<i64: 160, 32>}, {pipeline_mode = #tpu.pipeline_mode<synchronous>, transform_indices = @transform_5, window_bounds = array<i64: 1, 32>}, {transform_indices = @transform_6, window_bounds = array<i64: 1, 9, 64, 128>}, {transform_indices = @transform_7, window_bounds = array<i64: 1, 1, 128>}, {transform_indices = @transform_8, window_bounds = array<i64: 1, 128, 32>}, {transform_indices = @transform_9, window_bounds = array<i64: 1, 64, 32>}]} {
    %c0_i32 = arith.constant 0 : i32
    %0 = arith.cmpi eq, %arg1, %c0_i32 : i32
    %1 = arith.extui %0 : i1 to i32
    %c0_i32_0 = arith.constant 0 : i32
    %2 = arith.cmpi ne, %1, %c0_i32_0 : i32
    scf.if %2 {
      %c0 = arith.constant 0 : index
      %c18 = arith.constant 18 : index
      %c18_8 = arith.constant 18 : index
      %c0_9 = arith.constant 0 : index
      %18 = vector.load %arg2[%c0, %c18, %c18_8, %c0_9] : memref<1x44x44x64xbf16, #tpu.memory_space<vmem>>, vector<1x8x8x64xbf16>
      %19 = vector.shape_cast %18 : vector<1x8x8x64xbf16> to vector<8x8x64xbf16>
      %20 = vector.shape_cast %19 : vector<8x8x64xbf16> to vector<64x64xbf16>
      %c0_10 = arith.constant 0 : index
      %c0_11 = arith.constant 0 : index
      %21 = vector.load %arg4[%c0_10, %c0_11] : memref<64x160xbf16, #tpu.memory_space<vmem>>, vector<64x160xbf16>
      %cst = arith.constant dense<0.000000e+00> : vector<64x160xf32>
      %22 = tpu.matmul %20, %21, %cst {dimension_numbers = #tpu.dot_dimension_numbers<[1], [0], [0], [1], [0, 0, 1, 1], [], []>} : vector<64x64xbf16>, vector<64x160xbf16>, vector<64x160xf32> -> vector<64x160xf32>
      %c0_12 = arith.constant 0 : index
      %c0_13 = arith.constant 0 : index
      %23 = vector.load %arg5[%c0_12, %c0_13] : memref<1x160xf32, #tpu.memory_space<vmem>>, vector<1x160xf32>
      %24 = vector.broadcast %23 : vector<1x160xf32> to vector<64x160xf32>
      %25 = arith.addf %22, %24 : vector<64x160xf32>
      %cst_14 = arith.constant 0.000000e+00 : f32
      %26 = vector.broadcast %cst_14 : f32 to vector<64x160xf32>
      %27 = arith.maximumf %25, %26 : vector<64x160xf32>
      %28 = arith.truncf %27 : vector<64x160xf32> to vector<64x160xbf16>
      %c0_15 = arith.constant 0 : index
      %c0_16 = arith.constant 0 : index
      %29 = vector.load %arg6[%c0_15, %c0_16] : memref<160x32xbf16, #tpu.memory_space<vmem>>, vector<160x32xbf16>
      %cst_17 = arith.constant dense<0.000000e+00> : vector<64x32xf32>
      %30 = tpu.matmul %28, %29, %cst_17 {dimension_numbers = #tpu.dot_dimension_numbers<[1], [0], [0], [1], [0, 0, 1, 1], [], []>} : vector<64x160xbf16>, vector<160x32xbf16>, vector<64x32xf32> -> vector<64x32xf32>
      %c0_18 = arith.constant 0 : index
      %c0_19 = arith.constant 0 : index
      %31 = vector.load %arg7[%c0_18, %c0_19] : memref<1x32xf32, #tpu.memory_space<vmem>>, vector<1x32xf32>
      %32 = vector.broadcast %31 : vector<1x32xf32> to vector<64x32xf32>
      %33 = arith.addf %30, %32 : vector<64x32xf32>
      %c0_20 = arith.constant 0 : index
      %c0_21 = arith.constant 0 : index
      %c0_22 = arith.constant 0 : index
      %34 = vector.load %arg3[%c0_20, %c0_21, %c0_22] : memref<1x1x32xf32, #tpu.memory_space<vmem>>, vector<1x1x32xf32>
      %35 = vector.shape_cast %34 : vector<1x1x32xf32> to vector<1x32xf32>
      %36 = vector.broadcast %35 : vector<1x32xf32> to vector<64x32xf32>
      %37 = arith.addf %33, %36 : vector<64x32xf32>
      %c0_23 = arith.constant 0 : index
      %c0_24 = arith.constant 0 : index
      %38 = vector.load %arg12[%c0_23, %c0_24] : memref<64x32xf32, #tpu.memory_space<vmem>>, vector<64x32xf32>
      tpu.vector_store %arg12[%c0_23, %c0_24], %37 {strides = array<i32>} : memref<64x32xf32, #tpu.memory_space<vmem>>, vector<64x32xf32>,
    } else {
    }
    %c0_i32_1 = arith.constant 0 : i32
    %3 = arith.cmpi eq, %arg1, %c0_i32_1 : i32
    %4 = arith.extui %3 : i1 to i32
    %c0_i32_2 = arith.constant 0 : i32
    %5 = arith.cmpi ne, %4, %c0_i32_2 : i32
    scf.if %5 {
      %c0 = arith.constant 0 : index
      %c17 = arith.constant 17 : index
      %c17_8 = arith.constant 17 : index
      %c0_9 = arith.constant 0 : index
      %18 = vector.load %arg2[%c0, %c17, %c17_8, %c0_9] : memref<1x44x44x64xbf16, #tpu.memory_space<vmem>>, vector<1x8x8x64xbf16>
      %19 = vector.shape_cast %18 : vector<1x8x8x64xbf16> to vector<8x8x64xbf16>
      %20 = vector.shape_cast %19 : vector<8x8x64xbf16> to vector<64x64xbf16>
      %c0_10 = arith.constant 0 : index
      %c0_11 = arith.constant 0 : index
      %c0_12 = arith.constant 0 : index
      %c0_13 = arith.constant 0 : index
      %21 = vector.load %arg8[%c0_10, %c0_11, %c0_12, %c0_13] : memref<1x9x64x128xbf16, #tpu.memory_space<vmem>>, vector<1x1x64x128xbf16>
      %22 = vector.shape_cast %21 : vector<1x1x64x128xbf16> to vector<64x128xbf16>
      %cst = arith.constant dense<0.000000e+00> : vector<64x128xf32>
      %23 = tpu.matmul %20, %22, %cst {dimension_numbers = #tpu.dot_dimension_numbers<[1], [0], [0], [1], [0, 0, 1, 1], [], []>} : vector<64x64xbf16>, vector<64x128xbf16>, vector<64x128xf32> -> vector<64x128xf32>
      %c0_14 = arith.constant 0 : index
      %c17_15 = arith.constant 17 : index
      %c18 = arith.constant 18 : index
      %c0_16 = arith.constant 0 : index
      %24 = vector.load %arg2[%c0_14, %c17_15, %c18, %c0_16] : memref<1x44x44x64xbf16, #tpu.memory_space<vmem>>, vector<1x8x8x64xbf16>
      %25 = vector.shape_cast %24 : vector<1x8x8x64xbf16> to vector<8x8x64xbf16>
      %26 = vector.shape_cast %25 : vector<8x8x64xbf16> to vector<64x64xbf16>
      %c0_17 = arith.constant 0 : index
      %c1 = arith.constant 1 : index
      %c0_18 = arith.constant 0 : index
      %c0_19 = arith.constant 0 : index
      %27 = vector.load %arg8[%c0_17, %c1, %c0_18, %c0_19] : memref<1x9x64x128xbf16, #tpu.memory_space<vmem>>, vector<1x1x64x128xbf16>
      %28 = vector.shape_cast %27 : vector<1x1x64x128xbf16> to vector<64x128xbf16>
      %cst_20 = arith.constant dense<0.000000e+00> : vector<64x128xf32>
      %29 = tpu.matmul %26, %28, %cst_20 {dimension_numbers = #tpu.dot_dimension_numbers<[1], [0], [0], [1], [0, 0, 1, 1], [], []>} : vector<64x64xbf16>, vector<64x128xbf16>, vector<64x128xf32> -> vector<64x128xf32>
      %30 = arith.addf %23, %29 : vector<64x128xf32>
      %c0_21 = arith.constant 0 : index
      %c17_22 = arith.constant 17 : index
      %c19 = arith.constant 19 : index
      %c0_23 = arith.constant 0 : index
      %31 = vector.load %arg2[%c0_21, %c17_22, %c19, %c0_23] : memref<1x44x44x64xbf16, #tpu.memory_space<vmem>>, vector<1x8x8x64xbf16>
      %32 = vector.shape_cast %31 : vector<1x8x8x64xbf16> to vector<8x8x64xbf16>
      %33 = vector.shape_cast %32 : vector<8x8x64xbf16> to vector<64x64xbf16>
      %c0_24 = arith.constant 0 : index
      %c2 = arith.constant 2 : index
      %c0_25 = arith.constant 0 : index
      %c0_26 = arith.constant 0 : index
      %34 = vector.load %arg8[%c0_24, %c2, %c0_25, %c0_26] : memref<1x9x64x128xbf16, #tpu.memory_space<vmem>>, vector<1x1x64x128xbf16>
      %35 = vector.shape_cast %34 : vector<1x1x64x128xbf16> to vector<64x128xbf16>
      %cst_27 = arith.constant dense<0.000000e+00> : vector<64x128xf32>
      %36 = tpu.matmul %33, %35, %cst_27 {dimension_numbers = #tpu.dot_dimension_numbers<[1], [0], [0], [1], [0, 0, 1, 1], [], []>} : vector<64x64xbf16>, vector<64x128xbf16>, vector<64x128xf32> -> vector<64x128xf32>
      %37 = arith.addf %30, %36 : vector<64x128xf32>
      %c0_28 = arith.constant 0 : index
      %c18_29 = arith.constant 18 : index
      %c17_30 = arith.constant 17 : index
      %c0_31 = arith.constant 0 : index
      %38 = vector.load %arg2[%c0_28, %c18_29, %c17_30, %c0_31] : memref<1x44x44x64xbf16, #tpu.memory_space<vmem>>, vector<1x8x8x64xbf16>
      %39 = vector.shape_cast %38 : vector<1x8x8x64xbf16> to vector<8x8x64xbf16>
      %40 = vector.shape_cast %39 : vector<8x8x64xbf16> to vector<64x64xbf16>
      %c0_32 = arith.constant 0 : index
      %c3 = arith.constant 3 : index
      %c0_33 = arith.constant 0 : index
      %c0_34 = arith.constant 0 : index
      %41 = vector.load %arg8[%c0_32, %c3, %c0_33, %c0_34] : memref<1x9x64x128xbf16, #tpu.memory_space<vmem>>, vector<1x1x64x128xbf16>
      %42 = vector.shape_cast %41 : vector<1x1x64x128xbf16> to vector<64x128xbf16>
      %cst_35 = arith.constant dense<0.000000e+00> : vector<64x128xf32>
      %43 = tpu.matmul %40, %42, %cst_35 {dimension_numbers = #tpu.dot_dimension_numbers<[1], [0], [0], [1], [0, 0, 1, 1], [], []>} : vector<64x64xbf16>, vector<64x128xbf16>, vector<64x128xf32> -> vector<64x128xf32>
      %44 = arith.addf %37, %43 : vector<64x128xf32>
      %c0_36 = arith.constant 0 : index
      %c18_37 = arith.constant 18 : index
      %c18_38 = arith.constant 18 : index
      %c0_39 = arith.constant 0 : index
      %45 = vector.load %arg2[%c0_36, %c18_37, %c18_38, %c0_39] : memref<1x44x44x64xbf16, #tpu.memory_space<vmem>>, vector<1x8x8x64xbf16>
      %46 = vector.shape_cast %45 : vector<1x8x8x64xbf16> to vector<8x8x64xbf16>
      %47 = vector.shape_cast %46 : vector<8x8x64xbf16> to vector<64x64xbf16>
      %c0_40 = arith.constant 0 : index
      %c4 = arith.constant 4 : index
      %c0_41 = arith.constant 0 : index
      %c0_42 = arith.constant 0 : index
      %48 = vector.load %arg8[%c0_40, %c4, %c0_41, %c0_42] : memref<1x9x64x128xbf16, #tpu.memory_space<vmem>>, vector<1x1x64x128xbf16>
      %49 = vector.shape_cast %48 : vector<1x1x64x128xbf16> to vector<64x128xbf16>
      %cst_43 = arith.constant dense<0.000000e+00> : vector<64x128xf32>
      %50 = tpu.matmul %47, %49, %cst_43 {dimension_numbers = #tpu.dot_dimension_numbers<[1], [0], [0], [1], [0, 0, 1, 1], [], []>} : vector<64x64xbf16>, vector<64x128xbf16>, vector<64x128xf32> -> vector<64x128xf32>
      %51 = arith.addf %44, %50 : vector<64x128xf32>
      %c0_44 = arith.constant 0 : index
      %c18_45 = arith.constant 18 : index
      %c19_46 = arith.constant 19 : index
      %c0_47 = arith.constant 0 : index
      %52 = vector.load %arg2[%c0_44, %c18_45, %c19_46, %c0_47] : memref<1x44x44x64xbf16, #tpu.memory_space<vmem>>, vector<1x8x8x64xbf16>
      %53 = vector.shape_cast %52 : vector<1x8x8x64xbf16> to vector<8x8x64xbf16>
      %54 = vector.shape_cast %53 : vector<8x8x64xbf16> to vector<64x64xbf16>
      %c0_48 = arith.constant 0 : index
      %c5 = arith.constant 5 : index
      %c0_49 = arith.constant 0 : index
      %c0_50 = arith.constant 0 : index
      %55 = vector.load %arg8[%c0_48, %c5, %c0_49, %c0_50] : memref<1x9x64x128xbf16, #tpu.memory_space<vmem>>, vector<1x1x64x128xbf16>
      %56 = vector.shape_cast %55 : vector<1x1x64x128xbf16> to vector<64x128xbf16>
      %cst_51 = arith.constant dense<0.000000e+00> : vector<64x128xf32>
      %57 = tpu.matmul %54, %56, %cst_51 {dimension_numbers = #tpu.dot_dimension_numbers<[1], [0], [0], [1], [0, 0, 1, 1], [], []>} : vector<64x64xbf16>, vector<64x128xbf16>, vector<64x128xf32> -> vector<64x128xf32>
      %58 = arith.addf %51, %57 : vector<64x128xf32>
      %c0_52 = arith.constant 0 : index
      %c19_53 = arith.constant 19 : index
      %c17_54 = arith.constant 17 : index
      %c0_55 = arith.constant 0 : index
      %59 = vector.load %arg2[%c0_52, %c19_53, %c17_54, %c0_55] : memref<1x44x44x64xbf16, #tpu.memory_space<vmem>>, vector<1x8x8x64xbf16>
      %60 = vector.shape_cast %59 : vector<1x8x8x64xbf16> to vector<8x8x64xbf16>
      %61 = vector.shape_cast %60 : vector<8x8x64xbf16> to vector<64x64xbf16>
      %c0_56 = arith.constant 0 : index
      %c6 = arith.constant 6 : index
      %c0_57 = arith.constant 0 : index
      %c0_58 = arith.constant 0 : index
      %62 = vector.load %arg8[%c0_56, %c6, %c0_57, %c0_58] : memref<1x9x64x128xbf16, #tpu.memory_space<vmem>>, vector<1x1x64x128xbf16>
      %63 = vector.shape_cast %62 : vector<1x1x64x128xbf16> to vector<64x128xbf16>
      %cst_59 = arith.constant dense<0.000000e+00> : vector<64x128xf32>
      %64 = tpu.matmul %61, %63, %cst_59 {dimension_numbers = #tpu.dot_dimension_numbers<[1], [0], [0], [1], [0, 0, 1, 1], [], []>} : vector<64x64xbf16>, vector<64x128xbf16>, vector<64x128xf32> -> vector<64x128xf32>
      %65 = arith.addf %58, %64 : vector<64x128xf32>
      %c0_60 = arith.constant 0 : index
      %c19_61 = arith.constant 19 : index
      %c18_62 = arith.constant 18 : index
      %c0_63 = arith.constant 0 : index
      %66 = vector.load %arg2[%c0_60, %c19_61, %c18_62, %c0_63] : memref<1x44x44x64xbf16, #tpu.memory_space<vmem>>, vector<1x8x8x64xbf16>
      %67 = vector.shape_cast %66 : vector<1x8x8x64xbf16> to vector<8x8x64xbf16>
      %68 = vector.shape_cast %67 : vector<8x8x64xbf16> to vector<64x64xbf16>
      %c0_64 = arith.constant 0 : index
      %c7 = arith.constant 7 : index
      %c0_65 = arith.constant 0 : index
      %c0_66 = arith.constant 0 : index
      %69 = vector.load %arg8[%c0_64, %c7, %c0_65, %c0_66] : memref<1x9x64x128xbf16, #tpu.memory_space<vmem>>, vector<1x1x64x128xbf16>
      %70 = vector.shape_cast %69 : vector<1x1x64x128xbf16> to vector<64x128xbf16>
      %cst_67 = arith.constant dense<0.000000e+00> : vector<64x128xf32>
      %71 = tpu.matmul %68, %70, %cst_67 {dimension_numbers = #tpu.dot_dimension_numbers<[1], [0], [0], [1], [0, 0, 1, 1], [], []>} : vector<64x64xbf16>, vector<64x128xbf16>, vector<64x128xf32> -> vector<64x128xf32>
      %72 = arith.addf %65, %71 : vector<64x128xf32>
      %c0_68 = arith.constant 0 : index
      %c19_69 = arith.constant 19 : index
      %c19_70 = arith.constant 19 : index
      %c0_71 = arith.constant 0 : index
      %73 = vector.load %arg2[%c0_68, %c19_69, %c19_70, %c0_71] : memref<1x44x44x64xbf16, #tpu.memory_space<vmem>>, vector<1x8x8x64xbf16>
      %74 = vector.shape_cast %73 : vector<1x8x8x64xbf16> to vector<8x8x64xbf16>
      %75 = vector.shape_cast %74 : vector<8x8x64xbf16> to vector<64x64xbf16>
      %c0_72 = arith.constant 0 : index
      %c8 = arith.constant 8 : index
      %c0_73 = arith.constant 0 : index
      %c0_74 = arith.constant 0 : index
      %76 = vector.load %arg8[%c0_72, %c8, %c0_73, %c0_74] : memref<1x9x64x128xbf16, #tpu.memory_space<vmem>>, vector<1x1x64x128xbf16>
      %77 = vector.shape_cast %76 : vector<1x1x64x128xbf16> to vector<64x128xbf16>
      %cst_75 = arith.constant dense<0.000000e+00> : vector<64x128xf32>
      %78 = tpu.matmul %75, %77, %cst_75 {dimension_numbers = #tpu.dot_dimension_numbers<[1], [0], [0], [1], [0, 0, 1, 1], [], []>} : vector<64x64xbf16>, vector<64x128xbf16>, vector<64x128xf32> -> vector<64x128xf32>
      %79 = arith.addf %72, %78 : vector<64x128xf32>
      %c0_76 = arith.constant 0 : index
      %c0_77 = arith.constant 0 : index
      %c0_78 = arith.constant 0 : index
      %80 = vector.load %arg9[%c0_76, %c0_77, %c0_78] : memref<1x1x128xf32, #tpu.memory_space<vmem>>, vector<1x1x128xf32>
      %81 = vector.shape_cast %80 : vector<1x1x128xf32> to vector<1x128xf32>
      %82 = vector.broadcast %81 : vector<1x128xf32> to vector<64x128xf32>
      %83 = arith.addf %79, %82 : vector<64x128xf32>
      %cst_79 = arith.constant 0.000000e+00 : f32
      %84 = vector.broadcast %cst_79 : f32 to vector<64x128xf32>
      %85 = arith.maximumf %83, %84 : vector<64x128xf32>
      %86 = arith.truncf %85 : vector<64x128xf32> to vector<64x128xbf16>
      %c0_80 = arith.constant 0 : index
      %c0_81 = arith.constant 0 : index
      %87 = vector.load %arg12[%c0_80, %c0_81] : memref<64x32xf32, #tpu.memory_space<vmem>>, vector<64x32xf32>
      %c0_82 = arith.constant 0 : index
      %c0_83 = arith.constant 0 : index
      %c0_84 = arith.constant 0 : index
      %88 = vector.load %arg10[%c0_82, %c0_83, %c0_84] : memref<1x128x32xbf16, #tpu.memory_space<vmem>>, vector<1x128x32xbf16>
      %89 = vector.shape_cast %88 : vector<1x128x32xbf16> to vector<128x32xbf16>
      %cst_85 = arith.constant dense<0.000000e+00> : vector<64x32xf32>
      %90 = tpu.matmul %86, %89, %cst_85 {dimension_numbers = #tpu.dot_dimension_numbers<[1], [0], [0], [1], [0, 0, 1, 1], [], []>} : vector<64x128xbf16>, vector<128x32xbf16>, vector<64x32xf32> -> vector<64x32xf32>
      %91 = arith.addf %87, %90 : vector<64x32xf32>
      %c0_86 = arith.constant 0 : index
      %c0_87 = arith.constant 0 : index
      %92 = vector.load %arg12[%c0_86, %c0_87] : memref<64x32xf32, #tpu.memory_space<vmem>>, vector<64x32xf32>
      tpu.vector_store %arg12[%c0_86, %c0_87], %91 {strides = array<i32>} : memref<64x32xf32, #tpu.memory_space<vmem>>, vector<64x32xf32>,
    } else {
    }
    %c1_i32 = arith.constant 1 : i32
    %6 = arith.cmpi eq, %arg1, %c1_i32 : i32
    %7 = arith.extui %6 : i1 to i32
    %c0_i32_3 = arith.constant 0 : i32
    %8 = arith.cmpi ne, %7, %c0_i32_3 : i32
    scf.if %8 {
      %c0 = arith.constant 0 : index
      %c12 = arith.constant 12 : index
      %c12_8 = arith.constant 12 : index
      %c0_9 = arith.constant 0 : index
      %18 = vector.load %arg2[%c0, %c12, %c12_8, %c0_9] : memref<1x44x44x64xbf16, #tpu.memory_space<vmem>>, vector<1x8x8x64xbf16>
      %19 = vector.shape_cast %18 : vector<1x8x8x64xbf16> to vector<8x8x64xbf16>
      %20 = vector.shape_cast %19 : vector<8x8x64xbf16> to vector<64x64xbf16>
      %c0_10 = arith.constant 0 : index
      %c0_11 = arith.constant 0 : index
      %c0_12 = arith.constant 0 : index
      %c0_13 = arith.constant 0 : index
      %21 = vector.load %arg8[%c0_10, %c0_11, %c0_12, %c0_13] : memref<1x9x64x128xbf16, #tpu.memory_space<vmem>>, vector<1x1x64x128xbf16>
      %22 = vector.shape_cast %21 : vector<1x1x64x128xbf16> to vector<64x128xbf16>
      %cst = arith.constant dense<0.000000e+00> : vector<64x128xf32>
      %23 = tpu.matmul %20, %22, %cst {dimension_numbers = #tpu.dot_dimension_numbers<[1], [0], [0], [1], [0, 0, 1, 1], [], []>} : vector<64x64xbf16>, vector<64x128xbf16>, vector<64x128xf32> -> vector<64x128xf32>
      %c0_14 = arith.constant 0 : index
      %c12_15 = arith.constant 12 : index
      %c18 = arith.constant 18 : index
      %c0_16 = arith.constant 0 : index
      %24 = vector.load %arg2[%c0_14, %c12_15, %c18, %c0_16] : memref<1x44x44x64xbf16, #tpu.memory_space<vmem>>, vector<1x8x8x64xbf16>
      %25 = vector.shape_cast %24 : vector<1x8x8x64xbf16> to vector<8x8x64xbf16>
      %26 = vector.shape_cast %25 : vector<8x8x64xbf16> to vector<64x64xbf16>
      %c0_17 = arith.constant 0 : index
      %c1 = arith.constant 1 : index
      %c0_18 = arith.constant 0 : index
      %c0_19 = arith.constant 0 : index
      %27 = vector.load %arg8[%c0_17, %c1, %c0_18, %c0_19] : memref<1x9x64x128xbf16, #tpu.memory_space<vmem>>, vector<1x1x64x128xbf16>
      %28 = vector.shape_cast %27 : vector<1x1x64x128xbf16> to vector<64x128xbf16>
      %cst_20 = arith.constant dense<0.000000e+00> : vector<64x128xf32>
      %29 = tpu.matmul %26, %28, %cst_20 {dimension_numbers = #tpu.dot_dimension_numbers<[1], [0], [0], [1], [0, 0, 1, 1], [], []>} : vector<64x64xbf16>, vector<64x128xbf16>, vector<64x128xf32> -> vector<64x128xf32>
      %30 = arith.addf %23, %29 : vector<64x128xf32>
      %c0_21 = arith.constant 0 : index
      %c12_22 = arith.constant 12 : index
      %c24 = arith.constant 24 : index
      %c0_23 = arith.constant 0 : index
      %31 = vector.load %arg2[%c0_21, %c12_22, %c24, %c0_23] : memref<1x44x44x64xbf16, #tpu.memory_space<vmem>>, vector<1x8x8x64xbf16>
      %32 = vector.shape_cast %31 : vector<1x8x8x64xbf16> to vector<8x8x64xbf16>
      %33 = vector.shape_cast %32 : vector<8x8x64xbf16> to vector<64x64xbf16>
      %c0_24 = arith.constant 0 : index
      %c2 = arith.constant 2 : index
      %c0_25 = arith.constant 0 : index
      %c0_26 = arith.constant 0 : index
      %34 = vector.load %arg8[%c0_24, %c2, %c0_25, %c0_26] : memref<1x9x64x128xbf16, #tpu.memory_space<vmem>>, vector<1x1x64x128xbf16>
      %35 = vector.shape_cast %34 : vector<1x1x64x128xbf16> to vector<64x128xbf16>
      %cst_27 = arith.constant dense<0.000000e+00> : vector<64x128xf32>
      %36 = tpu.matmul %33, %35, %cst_27 {dimension_numbers = #tpu.dot_dimension_numbers<[1], [0], [0], [1], [0, 0, 1, 1], [], []>} : vector<64x64xbf16>, vector<64x128xbf16>, vector<64x128xf32> -> vector<64x128xf32>
      %37 = arith.addf %30, %36 : vector<64x128xf32>
      %c0_28 = arith.constant 0 : index
      %c18_29 = arith.constant 18 : index
      %c12_30 = arith.constant 12 : index
      %c0_31 = arith.constant 0 : index
      %38 = vector.load %arg2[%c0_28, %c18_29, %c12_30, %c0_31] : memref<1x44x44x64xbf16, #tpu.memory_space<vmem>>, vector<1x8x8x64xbf16>
      %39 = vector.shape_cast %38 : vector<1x8x8x64xbf16> to vector<8x8x64xbf16>
      %40 = vector.shape_cast %39 : vector<8x8x64xbf16> to vector<64x64xbf16>
      %c0_32 = arith.constant 0 : index
      %c3 = arith.constant 3 : index
      %c0_33 = arith.constant 0 : index
      %c0_34 = arith.constant 0 : index
      %41 = vector.load %arg8[%c0_32, %c3, %c0_33, %c0_34] : memref<1x9x64x128xbf16, #tpu.memory_space<vmem>>, vector<1x1x64x128xbf16>
      %42 = vector.shape_cast %41 : vector<1x1x64x128xbf16> to vector<64x128xbf16>
      %cst_35 = arith.constant dense<0.000000e+00> : vector<64x128xf32>
      %43 = tpu.matmul %40, %42, %cst_35 {dimension_numbers = #tpu.dot_dimension_numbers<[1], [0], [0], [1], [0, 0, 1, 1], [], []>} : vector<64x64xbf16>, vector<64x128xbf16>, vector<64x128xf32> -> vector<64x128xf32>
      %44 = arith.addf %37, %43 : vector<64x128xf32>
      %c0_36 = arith.constant 0 : index
      %c18_37 = arith.constant 18 : index
      %c18_38 = arith.constant 18 : index
      %c0_39 = arith.constant 0 : index
      %45 = vector.load %arg2[%c0_36, %c18_37, %c18_38, %c0_39] : memref<1x44x44x64xbf16, #tpu.memory_space<vmem>>, vector<1x8x8x64xbf16>
      %46 = vector.shape_cast %45 : vector<1x8x8x64xbf16> to vector<8x8x64xbf16>
      %47 = vector.shape_cast %46 : vector<8x8x64xbf16> to vector<64x64xbf16>
      %c0_40 = arith.constant 0 : index
      %c4 = arith.constant 4 : index
      %c0_41 = arith.constant 0 : index
      %c0_42 = arith.constant 0 : index
      %48 = vector.load %arg8[%c0_40, %c4, %c0_41, %c0_42] : memref<1x9x64x128xbf16, #tpu.memory_space<vmem>>, vector<1x1x64x128xbf16>
      %49 = vector.shape_cast %48 : vector<1x1x64x128xbf16> to vector<64x128xbf16>
      %cst_43 = arith.constant dense<0.000000e+00> : vector<64x128xf32>
      %50 = tpu.matmul %47, %49, %cst_43 {dimension_numbers = #tpu.dot_dimension_numbers<[1], [0], [0], [1], [0, 0, 1, 1], [], []>} : vector<64x64xbf16>, vector<64x128xbf16>, vector<64x128xf32> -> vector<64x128xf32>
      %51 = arith.addf %44, %50 : vector<64x128xf32>
      %c0_44 = arith.constant 0 : index
      %c18_45 = arith.constant 18 : index
      %c24_46 = arith.constant 24 : index
      %c0_47 = arith.constant 0 : index
      %52 = vector.load %arg2[%c0_44, %c18_45, %c24_46, %c0_47] : memref<1x44x44x64xbf16, #tpu.memory_space<vmem>>, vector<1x8x8x64xbf16>
      %53 = vector.shape_cast %52 : vector<1x8x8x64xbf16> to vector<8x8x64xbf16>
      %54 = vector.shape_cast %53 : vector<8x8x64xbf16> to vector<64x64xbf16>
      %c0_48 = arith.constant 0 : index
      %c5 = arith.constant 5 : index
      %c0_49 = arith.constant 0 : index
      %c0_50 = arith.constant 0 : index
      %55 = vector.load %arg8[%c0_48, %c5, %c0_49, %c0_50] : memref<1x9x64x128xbf16, #tpu.memory_space<vmem>>, vector<1x1x64x128xbf16>
      %56 = vector.shape_cast %55 : vector<1x1x64x128xbf16> to vector<64x128xbf16>
      %cst_51 = arith.constant dense<0.000000e+00> : vector<64x128xf32>
      %57 = tpu.matmul %54, %56, %cst_51 {dimension_numbers = #tpu.dot_dimension_numbers<[1], [0], [0], [1], [0, 0, 1, 1], [], []>} : vector<64x64xbf16>, vector<64x128xbf16>, vector<64x128xf32> -> vector<64x128xf32>
      %58 = arith.addf %51, %57 : vector<64x128xf32>
      %c0_52 = arith.constant 0 : index
      %c24_53 = arith.constant 24 : index
      %c12_54 = arith.constant 12 : index
      %c0_55 = arith.constant 0 : index
      %59 = vector.load %arg2[%c0_52, %c24_53, %c12_54, %c0_55] : memref<1x44x44x64xbf16, #tpu.memory_space<vmem>>, vector<1x8x8x64xbf16>
      %60 = vector.shape_cast %59 : vector<1x8x8x64xbf16> to vector<8x8x64xbf16>
      %61 = vector.shape_cast %60 : vector<8x8x64xbf16> to vector<64x64xbf16>
      %c0_56 = arith.constant 0 : index
      %c6 = arith.constant 6 : index
      %c0_57 = arith.constant 0 : index
      %c0_58 = arith.constant 0 : index
      %62 = vector.load %arg8[%c0_56, %c6, %c0_57, %c0_58] : memref<1x9x64x128xbf16, #tpu.memory_space<vmem>>, vector<1x1x64x128xbf16>
      %63 = vector.shape_cast %62 : vector<1x1x64x128xbf16> to vector<64x128xbf16>
      %cst_59 = arith.constant dense<0.000000e+00> : vector<64x128xf32>
      %64 = tpu.matmul %61, %63, %cst_59 {dimension_numbers = #tpu.dot_dimension_numbers<[1], [0], [0], [1], [0, 0, 1, 1], [], []>} : vector<64x64xbf16>, vector<64x128xbf16>, vector<64x128xf32> -> vector<64x128xf32>
      %65 = arith.addf %58, %64 : vector<64x128xf32>
      %c0_60 = arith.constant 0 : index
      %c24_61 = arith.constant 24 : index
      %c18_62 = arith.constant 18 : index
      %c0_63 = arith.constant 0 : index
      %66 = vector.load %arg2[%c0_60, %c24_61, %c18_62, %c0_63] : memref<1x44x44x64xbf16, #tpu.memory_space<vmem>>, vector<1x8x8x64xbf16>
      %67 = vector.shape_cast %66 : vector<1x8x8x64xbf16> to vector<8x8x64xbf16>
      %68 = vector.shape_cast %67 : vector<8x8x64xbf16> to vector<64x64xbf16>
      %c0_64 = arith.constant 0 : index
      %c7 = arith.constant 7 : index
      %c0_65 = arith.constant 0 : index
      %c0_66 = arith.constant 0 : index
      %69 = vector.load %arg8[%c0_64, %c7, %c0_65, %c0_66] : memref<1x9x64x128xbf16, #tpu.memory_space<vmem>>, vector<1x1x64x128xbf16>
      %70 = vector.shape_cast %69 : vector<1x1x64x128xbf16> to vector<64x128xbf16>
      %cst_67 = arith.constant dense<0.000000e+00> : vector<64x128xf32>
      %71 = tpu.matmul %68, %70, %cst_67 {dimension_numbers = #tpu.dot_dimension_numbers<[1], [0], [0], [1], [0, 0, 1, 1], [], []>} : vector<64x64xbf16>, vector<64x128xbf16>, vector<64x128xf32> -> vector<64x128xf32>
      %72 = arith.addf %65, %71 : vector<64x128xf32>
      %c0_68 = arith.constant 0 : index
      %c24_69 = arith.constant 24 : index
      %c24_70 = arith.constant 24 : index
      %c0_71 = arith.constant 0 : index
      %73 = vector.load %arg2[%c0_68, %c24_69, %c24_70, %c0_71] : memref<1x44x44x64xbf16, #tpu.memory_space<vmem>>, vector<1x8x8x64xbf16>
      %74 = vector.shape_cast %73 : vector<1x8x8x64xbf16> to vector<8x8x64xbf16>
      %75 = vector.shape_cast %74 : vector<8x8x64xbf16> to vector<64x64xbf16>
      %c0_72 = arith.constant 0 : index
      %c8 = arith.constant 8 : index
      %c0_73 = arith.constant 0 : index
      %c0_74 = arith.constant 0 : index
      %76 = vector.load %arg8[%c0_72, %c8, %c0_73, %c0_74] : memref<1x9x64x128xbf16, #tpu.memory_space<vmem>>, vector<1x1x64x128xbf16>
      %77 = vector.shape_cast %76 : vector<1x1x64x128xbf16> to vector<64x128xbf16>
      %cst_75 = arith.constant dense<0.000000e+00> : vector<64x128xf32>
      %78 = tpu.matmul %75, %77, %cst_75 {dimension_numbers = #tpu.dot_dimension_numbers<[1], [0], [0], [1], [0, 0, 1, 1], [], []>} : vector<64x64xbf16>, vector<64x128xbf16>, vector<64x128xf32> -> vector<64x128xf32>
      %79 = arith.addf %72, %78 : vector<64x128xf32>
      %c0_76 = arith.constant 0 : index
      %c0_77 = arith.constant 0 : index
      %c0_78 = arith.constant 0 : index
      %80 = vector.load %arg9[%c0_76, %c0_77, %c0_78] : memref<1x1x128xf32, #tpu.memory_space<vmem>>, vector<1x1x128xf32>
      %81 = vector.shape_cast %80 : vector<1x1x128xf32> to vector<1x128xf32>
      %82 = vector.broadcast %81 : vector<1x128xf32> to vector<64x128xf32>
      %83 = arith.addf %79, %82 : vector<64x128xf32>
      %cst_79 = arith.constant 0.000000e+00 : f32
      %84 = vector.broadcast %cst_79 : f32 to vector<64x128xf32>
      %85 = arith.maximumf %83, %84 : vector<64x128xf32>
      %86 = arith.truncf %85 : vector<64x128xf32> to vector<64x128xbf16>
      %c0_80 = arith.constant 0 : index
      %c0_81 = arith.constant 0 : index
      %87 = vector.load %arg12[%c0_80, %c0_81] : memref<64x32xf32, #tpu.memory_space<vmem>>, vector<64x32xf32>
      %c0_82 = arith.constant 0 : index
      %c0_83 = arith.constant 0 : index
      %c0_84 = arith.constant 0 : index
      %88 = vector.load %arg10[%c0_82, %c0_83, %c0_84] : memref<1x128x32xbf16, #tpu.memory_space<vmem>>, vector<1x128x32xbf16>
      %89 = vector.shape_cast %88 : vector<1x128x32xbf16> to vector<128x32xbf16>
      %cst_85 = arith.constant dense<0.000000e+00> : vector<64x32xf32>
      %90 = tpu.matmul %86, %89, %cst_85 {dimension_numbers = #tpu.dot_dimension_numbers<[1], [0], [0], [1], [0, 0, 1, 1], [], []>} : vector<64x128xbf16>, vector<128x32xbf16>, vector<64x32xf32> -> vector<64x32xf32>
      %91 = arith.addf %87, %90 : vector<64x32xf32>
      %c0_86 = arith.constant 0 : index
      %c0_87 = arith.constant 0 : index
      %92 = vector.load %arg12[%c0_86, %c0_87] : memref<64x32xf32, #tpu.memory_space<vmem>>, vector<64x32xf32>
      tpu.vector_store %arg12[%c0_86, %c0_87], %91 {strides = array<i32>} : memref<64x32xf32, #tpu.memory_space<vmem>>, vector<64x32xf32>,
    } else {
    }
    %c2_i32 = arith.constant 2 : i32
    %9 = arith.cmpi eq, %arg1, %c2_i32 : i32
    %10 = arith.extui %9 : i1 to i32
    %c0_i32_4 = arith.constant 0 : i32
    %11 = arith.cmpi ne, %10, %c0_i32_4 : i32
    scf.if %11 {
      %c0 = arith.constant 0 : index
      %c6 = arith.constant 6 : index
      %c6_8 = arith.constant 6 : index
      %c0_9 = arith.constant 0 : index
      %18 = vector.load %arg2[%c0, %c6, %c6_8, %c0_9] : memref<1x44x44x64xbf16, #tpu.memory_space<vmem>>, vector<1x8x8x64xbf16>
      %19 = vector.shape_cast %18 : vector<1x8x8x64xbf16> to vector<8x8x64xbf16>
      %20 = vector.shape_cast %19 : vector<8x8x64xbf16> to vector<64x64xbf16>
      %c0_10 = arith.constant 0 : index
      %c0_11 = arith.constant 0 : index
      %c0_12 = arith.constant 0 : index
      %c0_13 = arith.constant 0 : index
      %21 = vector.load %arg8[%c0_10, %c0_11, %c0_12, %c0_13] : memref<1x9x64x128xbf16, #tpu.memory_space<vmem>>, vector<1x1x64x128xbf16>
      %22 = vector.shape_cast %21 : vector<1x1x64x128xbf16> to vector<64x128xbf16>
      %cst = arith.constant dense<0.000000e+00> : vector<64x128xf32>
      %23 = tpu.matmul %20, %22, %cst {dimension_numbers = #tpu.dot_dimension_numbers<[1], [0], [0], [1], [0, 0, 1, 1], [], []>} : vector<64x64xbf16>, vector<64x128xbf16>, vector<64x128xf32> -> vector<64x128xf32>
      %c0_14 = arith.constant 0 : index
      %c6_15 = arith.constant 6 : index
      %c18 = arith.constant 18 : index
      %c0_16 = arith.constant 0 : index
      %24 = vector.load %arg2[%c0_14, %c6_15, %c18, %c0_16] : memref<1x44x44x64xbf16, #tpu.memory_space<vmem>>, vector<1x8x8x64xbf16>
      %25 = vector.shape_cast %24 : vector<1x8x8x64xbf16> to vector<8x8x64xbf16>
      %26 = vector.shape_cast %25 : vector<8x8x64xbf16> to vector<64x64xbf16>
      %c0_17 = arith.constant 0 : index
      %c1 = arith.constant 1 : index
      %c0_18 = arith.constant 0 : index
      %c0_19 = arith.constant 0 : index
      %27 = vector.load %arg8[%c0_17, %c1, %c0_18, %c0_19] : memref<1x9x64x128xbf16, #tpu.memory_space<vmem>>, vector<1x1x64x128xbf16>
      %28 = vector.shape_cast %27 : vector<1x1x64x128xbf16> to vector<64x128xbf16>
      %cst_20 = arith.constant dense<0.000000e+00> : vector<64x128xf32>
      %29 = tpu.matmul %26, %28, %cst_20 {dimension_numbers = #tpu.dot_dimension_numbers<[1], [0], [0], [1], [0, 0, 1, 1], [], []>} : vector<64x64xbf16>, vector<64x128xbf16>, vector<64x128xf32> -> vector<64x128xf32>
      %30 = arith.addf %23, %29 : vector<64x128xf32>
      %c0_21 = arith.constant 0 : index
      %c6_22 = arith.constant 6 : index
      %c30 = arith.constant 30 : index
      %c0_23 = arith.constant 0 : index
      %31 = vector.load %arg2[%c0_21, %c6_22, %c30, %c0_23] : memref<1x44x44x64xbf16, #tpu.memory_space<vmem>>, vector<1x8x8x64xbf16>
      %32 = vector.shape_cast %31 : vector<1x8x8x64xbf16> to vector<8x8x64xbf16>
      %33 = vector.shape_cast %32 : vector<8x8x64xbf16> to vector<64x64xbf16>
      %c0_24 = arith.constant 0 : index
      %c2 = arith.constant 2 : index
      %c0_25 = arith.constant 0 : index
      %c0_26 = arith.constant 0 : index
      %34 = vector.load %arg8[%c0_24, %c2, %c0_25, %c0_26] : memref<1x9x64x128xbf16, #tpu.memory_space<vmem>>, vector<1x1x64x128xbf16>
      %35 = vector.shape_cast %34 : vector<1x1x64x128xbf16> to vector<64x128xbf16>
      %cst_27 = arith.constant dense<0.000000e+00> : vector<64x128xf32>
      %36 = tpu.matmul %33, %35, %cst_27 {dimension_numbers = #tpu.dot_dimension_numbers<[1], [0], [0], [1], [0, 0, 1, 1], [], []>} : vector<64x64xbf16>, vector<64x128xbf16>, vector<64x128xf32> -> vector<64x128xf32>
      %37 = arith.addf %30, %36 : vector<64x128xf32>
      %c0_28 = arith.constant 0 : index
      %c18_29 = arith.constant 18 : index
      %c6_30 = arith.constant 6 : index
      %c0_31 = arith.constant 0 : index
      %38 = vector.load %arg2[%c0_28, %c18_29, %c6_30, %c0_31] : memref<1x44x44x64xbf16, #tpu.memory_space<vmem>>, vector<1x8x8x64xbf16>
      %39 = vector.shape_cast %38 : vector<1x8x8x64xbf16> to vector<8x8x64xbf16>
      %40 = vector.shape_cast %39 : vector<8x8x64xbf16> to vector<64x64xbf16>
      %c0_32 = arith.constant 0 : index
      %c3 = arith.constant 3 : index
      %c0_33 = arith.constant 0 : index
      %c0_34 = arith.constant 0 : index
      %41 = vector.load %arg8[%c0_32, %c3, %c0_33, %c0_34] : memref<1x9x64x128xbf16, #tpu.memory_space<vmem>>, vector<1x1x64x128xbf16>
      %42 = vector.shape_cast %41 : vector<1x1x64x128xbf16> to vector<64x128xbf16>
      %cst_35 = arith.constant dense<0.000000e+00> : vector<64x128xf32>
      %43 = tpu.matmul %40, %42, %cst_35 {dimension_numbers = #tpu.dot_dimension_numbers<[1], [0], [0], [1], [0, 0, 1, 1], [], []>} : vector<64x64xbf16>, vector<64x128xbf16>, vector<64x128xf32> -> vector<64x128xf32>
      %44 = arith.addf %37, %43 : vector<64x128xf32>
      %c0_36 = arith.constant 0 : index
      %c18_37 = arith.constant 18 : index
      %c18_38 = arith.constant 18 : index
      %c0_39 = arith.constant 0 : index
      %45 = vector.load %arg2[%c0_36, %c18_37, %c18_38, %c0_39] : memref<1x44x44x64xbf16, #tpu.memory_space<vmem>>, vector<1x8x8x64xbf16>
      %46 = vector.shape_cast %45 : vector<1x8x8x64xbf16> to vector<8x8x64xbf16>
      %47 = vector.shape_cast %46 : vector<8x8x64xbf16> to vector<64x64xbf16>
      %c0_40 = arith.constant 0 : index
      %c4 = arith.constant 4 : index
      %c0_41 = arith.constant 0 : index
      %c0_42 = arith.constant 0 : index
      %48 = vector.load %arg8[%c0_40, %c4, %c0_41, %c0_42] : memref<1x9x64x128xbf16, #tpu.memory_space<vmem>>, vector<1x1x64x128xbf16>
      %49 = vector.shape_cast %48 : vector<1x1x64x128xbf16> to vector<64x128xbf16>
      %cst_43 = arith.constant dense<0.000000e+00> : vector<64x128xf32>
      %50 = tpu.matmul %47, %49, %cst_43 {dimension_numbers = #tpu.dot_dimension_numbers<[1], [0], [0], [1], [0, 0, 1, 1], [], []>} : vector<64x64xbf16>, vector<64x128xbf16>, vector<64x128xf32> -> vector<64x128xf32>
      %51 = arith.addf %44, %50 : vector<64x128xf32>
      %c0_44 = arith.constant 0 : index
      %c18_45 = arith.constant 18 : index
      %c30_46 = arith.constant 30 : index
      %c0_47 = arith.constant 0 : index
      %52 = vector.load %arg2[%c0_44, %c18_45, %c30_46, %c0_47] : memref<1x44x44x64xbf16, #tpu.memory_space<vmem>>, vector<1x8x8x64xbf16>
      %53 = vector.shape_cast %52 : vector<1x8x8x64xbf16> to vector<8x8x64xbf16>
      %54 = vector.shape_cast %53 : vector<8x8x64xbf16> to vector<64x64xbf16>
      %c0_48 = arith.constant 0 : index
      %c5 = arith.constant 5 : index
      %c0_49 = arith.constant 0 : index
      %c0_50 = arith.constant 0 : index
      %55 = vector.load %arg8[%c0_48, %c5, %c0_49, %c0_50] : memref<1x9x64x128xbf16, #tpu.memory_space<vmem>>, vector<1x1x64x128xbf16>
      %56 = vector.shape_cast %55 : vector<1x1x64x128xbf16> to vector<64x128xbf16>
      %cst_51 = arith.constant dense<0.000000e+00> : vector<64x128xf32>
      %57 = tpu.matmul %54, %56, %cst_51 {dimension_numbers = #tpu.dot_dimension_numbers<[1], [0], [0], [1], [0, 0, 1, 1], [], []>} : vector<64x64xbf16>, vector<64x128xbf16>, vector<64x128xf32> -> vector<64x128xf32>
      %58 = arith.addf %51, %57 : vector<64x128xf32>
      %c0_52 = arith.constant 0 : index
      %c30_53 = arith.constant 30 : index
      %c6_54 = arith.constant 6 : index
      %c0_55 = arith.constant 0 : index
      %59 = vector.load %arg2[%c0_52, %c30_53, %c6_54, %c0_55] : memref<1x44x44x64xbf16, #tpu.memory_space<vmem>>, vector<1x8x8x64xbf16>
      %60 = vector.shape_cast %59 : vector<1x8x8x64xbf16> to vector<8x8x64xbf16>
      %61 = vector.shape_cast %60 : vector<8x8x64xbf16> to vector<64x64xbf16>
      %c0_56 = arith.constant 0 : index
      %c6_57 = arith.constant 6 : index
      %c0_58 = arith.constant 0 : index
      %c0_59 = arith.constant 0 : index
      %62 = vector.load %arg8[%c0_56, %c6_57, %c0_58, %c0_59] : memref<1x9x64x128xbf16, #tpu.memory_space<vmem>>, vector<1x1x64x128xbf16>
      %63 = vector.shape_cast %62 : vector<1x1x64x128xbf16> to vector<64x128xbf16>
      %cst_60 = arith.constant dense<0.000000e+00> : vector<64x128xf32>
      %64 = tpu.matmul %61, %63, %cst_60 {dimension_numbers = #tpu.dot_dimension_numbers<[1], [0], [0], [1], [0, 0, 1, 1], [], []>} : vector<64x64xbf16>, vector<64x128xbf16>, vector<64x128xf32> -> vector<64x128xf32>
      %65 = arith.addf %58, %64 : vector<64x128xf32>
      %c0_61 = arith.constant 0 : index
      %c30_62 = arith.constant 30 : index
      %c18_63 = arith.constant 18 : index
      %c0_64 = arith.constant 0 : index
      %66 = vector.load %arg2[%c0_61, %c30_62, %c18_63, %c0_64] : memref<1x44x44x64xbf16, #tpu.memory_space<vmem>>, vector<1x8x8x64xbf16>
      %67 = vector.shape_cast %66 : vector<1x8x8x64xbf16> to vector<8x8x64xbf16>
      %68 = vector.shape_cast %67 : vector<8x8x64xbf16> to vector<64x64xbf16>
      %c0_65 = arith.constant 0 : index
      %c7 = arith.constant 7 : index
      %c0_66 = arith.constant 0 : index
      %c0_67 = arith.constant 0 : index
      %69 = vector.load %arg8[%c0_65, %c7, %c0_66, %c0_67] : memref<1x9x64x128xbf16, #tpu.memory_space<vmem>>, vector<1x1x64x128xbf16>
      %70 = vector.shape_cast %69 : vector<1x1x64x128xbf16> to vector<64x128xbf16>
      %cst_68 = arith.constant dense<0.000000e+00> : vector<64x128xf32>
      %71 = tpu.matmul %68, %70, %cst_68 {dimension_numbers = #tpu.dot_dimension_numbers<[1], [0], [0], [1], [0, 0, 1, 1], [], []>} : vector<64x64xbf16>, vector<64x128xbf16>, vector<64x128xf32> -> vector<64x128xf32>
      %72 = arith.addf %65, %71 : vector<64x128xf32>
      %c0_69 = arith.constant 0 : index
      %c30_70 = arith.constant 30 : index
      %c30_71 = arith.constant 30 : index
      %c0_72 = arith.constant 0 : index
      %73 = vector.load %arg2[%c0_69, %c30_70, %c30_71, %c0_72] : memref<1x44x44x64xbf16, #tpu.memory_space<vmem>>, vector<1x8x8x64xbf16>
      %74 = vector.shape_cast %73 : vector<1x8x8x64xbf16> to vector<8x8x64xbf16>
      %75 = vector.shape_cast %74 : vector<8x8x64xbf16> to vector<64x64xbf16>
      %c0_73 = arith.constant 0 : index
      %c8 = arith.constant 8 : index
      %c0_74 = arith.constant 0 : index
      %c0_75 = arith.constant 0 : index
      %76 = vector.load %arg8[%c0_73, %c8, %c0_74, %c0_75] : memref<1x9x64x128xbf16, #tpu.memory_space<vmem>>, vector<1x1x64x128xbf16>
      %77 = vector.shape_cast %76 : vector<1x1x64x128xbf16> to vector<64x128xbf16>
      %cst_76 = arith.constant dense<0.000000e+00> : vector<64x128xf32>
      %78 = tpu.matmul %75, %77, %cst_76 {dimension_numbers = #tpu.dot_dimension_numbers<[1], [0], [0], [1], [0, 0, 1, 1], [], []>} : vector<64x64xbf16>, vector<64x128xbf16>, vector<64x128xf32> -> vector<64x128xf32>
      %79 = arith.addf %72, %78 : vector<64x128xf32>
      %c0_77 = arith.constant 0 : index
      %c0_78 = arith.constant 0 : index
      %c0_79 = arith.constant 0 : index
      %80 = vector.load %arg9[%c0_77, %c0_78, %c0_79] : memref<1x1x128xf32, #tpu.memory_space<vmem>>, vector<1x1x128xf32>
      %81 = vector.shape_cast %80 : vector<1x1x128xf32> to vector<1x128xf32>
      %82 = vector.broadcast %81 : vector<1x128xf32> to vector<64x128xf32>
      %83 = arith.addf %79, %82 : vector<64x128xf32>
      %cst_80 = arith.constant 0.000000e+00 : f32
      %84 = vector.broadcast %cst_80 : f32 to vector<64x128xf32>
      %85 = arith.maximumf %83, %84 : vector<64x128xf32>
      %86 = arith.truncf %85 : vector<64x128xf32> to vector<64x128xbf16>
      %c0_81 = arith.constant 0 : index
      %c0_82 = arith.constant 0 : index
      %87 = vector.load %arg12[%c0_81, %c0_82] : memref<64x32xf32, #tpu.memory_space<vmem>>, vector<64x32xf32>
      %c0_83 = arith.constant 0 : index
      %c0_84 = arith.constant 0 : index
      %c0_85 = arith.constant 0 : index
      %88 = vector.load %arg10[%c0_83, %c0_84, %c0_85] : memref<1x128x32xbf16, #tpu.memory_space<vmem>>, vector<1x128x32xbf16>
      %89 = vector.shape_cast %88 : vector<1x128x32xbf16> to vector<128x32xbf16>
      %cst_86 = arith.constant dense<0.000000e+00> : vector<64x32xf32>
      %90 = tpu.matmul %86, %89, %cst_86 {dimension_numbers = #tpu.dot_dimension_numbers<[1], [0], [0], [1], [0, 0, 1, 1], [], []>} : vector<64x128xbf16>, vector<128x32xbf16>, vector<64x32xf32> -> vector<64x32xf32>
      %91 = arith.addf %87, %90 : vector<64x32xf32>
      %c0_87 = arith.constant 0 : index
      %c0_88 = arith.constant 0 : index
      %92 = vector.load %arg12[%c0_87, %c0_88] : memref<64x32xf32, #tpu.memory_space<vmem>>, vector<64x32xf32>
      tpu.vector_store %arg12[%c0_87, %c0_88], %91 {strides = array<i32>} : memref<64x32xf32, #tpu.memory_space<vmem>>, vector<64x32xf32>,
    } else {
    }
    %c3_i32 = arith.constant 3 : i32
    %12 = arith.cmpi eq, %arg1, %c3_i32 : i32
    %13 = arith.extui %12 : i1 to i32
    %c0_i32_5 = arith.constant 0 : i32
    %14 = arith.cmpi ne, %13, %c0_i32_5 : i32
    scf.if %14 {
      %c0 = arith.constant 0 : index
      %c0_8 = arith.constant 0 : index
      %c0_9 = arith.constant 0 : index
      %c0_10 = arith.constant 0 : index
      %18 = vector.load %arg2[%c0, %c0_8, %c0_9, %c0_10] : memref<1x44x44x64xbf16, #tpu.memory_space<vmem>>, vector<1x8x8x64xbf16>
      %19 = vector.shape_cast %18 : vector<1x8x8x64xbf16> to vector<8x8x64xbf16>
      %20 = vector.shape_cast %19 : vector<8x8x64xbf16> to vector<64x64xbf16>
      %c0_11 = arith.constant 0 : index
      %c0_12 = arith.constant 0 : index
      %c0_13 = arith.constant 0 : index
      %c0_14 = arith.constant 0 : index
      %21 = vector.load %arg8[%c0_11, %c0_12, %c0_13, %c0_14] : memref<1x9x64x128xbf16, #tpu.memory_space<vmem>>, vector<1x1x64x128xbf16>
      %22 = vector.shape_cast %21 : vector<1x1x64x128xbf16> to vector<64x128xbf16>
      %cst = arith.constant dense<0.000000e+00> : vector<64x128xf32>
      %23 = tpu.matmul %20, %22, %cst {dimension_numbers = #tpu.dot_dimension_numbers<[1], [0], [0], [1], [0, 0, 1, 1], [], []>} : vector<64x64xbf16>, vector<64x128xbf16>, vector<64x128xf32> -> vector<64x128xf32>
      %c0_15 = arith.constant 0 : index
      %c0_16 = arith.constant 0 : index
      %c18 = arith.constant 18 : index
      %c0_17 = arith.constant 0 : index
      %24 = vector.load %arg2[%c0_15, %c0_16, %c18, %c0_17] : memref<1x44x44x64xbf16, #tpu.memory_space<vmem>>, vector<1x8x8x64xbf16>
      %25 = vector.shape_cast %24 : vector<1x8x8x64xbf16> to vector<8x8x64xbf16>
      %26 = vector.shape_cast %25 : vector<8x8x64xbf16> to vector<64x64xbf16>
      %c0_18 = arith.constant 0 : index
      %c1 = arith.constant 1 : index
      %c0_19 = arith.constant 0 : index
      %c0_20 = arith.constant 0 : index
      %27 = vector.load %arg8[%c0_18, %c1, %c0_19, %c0_20] : memref<1x9x64x128xbf16, #tpu.memory_space<vmem>>, vector<1x1x64x128xbf16>
      %28 = vector.shape_cast %27 : vector<1x1x64x128xbf16> to vector<64x128xbf16>
      %cst_21 = arith.constant dense<0.000000e+00> : vector<64x128xf32>
      %29 = tpu.matmul %26, %28, %cst_21 {dimension_numbers = #tpu.dot_dimension_numbers<[1], [0], [0], [1], [0, 0, 1, 1], [], []>} : vector<64x64xbf16>, vector<64x128xbf16>, vector<64x128xf32> -> vector<64x128xf32>
      %30 = arith.addf %23, %29 : vector<64x128xf32>
      %c0_22 = arith.constant 0 : index
      %c0_23 = arith.constant 0 : index
      %c36 = arith.constant 36 : index
      %c0_24 = arith.constant 0 : index
      %31 = vector.load %arg2[%c0_22, %c0_23, %c36, %c0_24] : memref<1x44x44x64xbf16, #tpu.memory_space<vmem>>, vector<1x8x8x64xbf16>
      %32 = vector.shape_cast %31 : vector<1x8x8x64xbf16> to vector<8x8x64xbf16>
      %33 = vector.shape_cast %32 : vector<8x8x64xbf16> to vector<64x64xbf16>
      %c0_25 = arith.constant 0 : index
      %c2 = arith.constant 2 : index
      %c0_26 = arith.constant 0 : index
      %c0_27 = arith.constant 0 : index
      %34 = vector.load %arg8[%c0_25, %c2, %c0_26, %c0_27] : memref<1x9x64x128xbf16, #tpu.memory_space<vmem>>, vector<1x1x64x128xbf16>
      %35 = vector.shape_cast %34 : vector<1x1x64x128xbf16> to vector<64x128xbf16>
      %cst_28 = arith.constant dense<0.000000e+00> : vector<64x128xf32>
      %36 = tpu.matmul %33, %35, %cst_28 {dimension_numbers = #tpu.dot_dimension_numbers<[1], [0], [0], [1], [0, 0, 1, 1], [], []>} : vector<64x64xbf16>, vector<64x128xbf16>, vector<64x128xf32> -> vector<64x128xf32>
      %37 = arith.addf %30, %36 : vector<64x128xf32>
      %c0_29 = arith.constant 0 : index
      %c18_30 = arith.constant 18 : index
      %c0_31 = arith.constant 0 : index
      %c0_32 = arith.constant 0 : index
      %38 = vector.load %arg2[%c0_29, %c18_30, %c0_31, %c0_32] : memref<1x44x44x64xbf16, #tpu.memory_space<vmem>>, vector<1x8x8x64xbf16>
      %39 = vector.shape_cast %38 : vector<1x8x8x64xbf16> to vector<8x8x64xbf16>
      %40 = vector.shape_cast %39 : vector<8x8x64xbf16> to vector<64x64xbf16>
      %c0_33 = arith.constant 0 : index
      %c3 = arith.constant 3 : index
      %c0_34 = arith.constant 0 : index
      %c0_35 = arith.constant 0 : index
      %41 = vector.load %arg8[%c0_33, %c3, %c0_34, %c0_35] : memref<1x9x64x128xbf16, #tpu.memory_space<vmem>>, vector<1x1x64x128xbf16>
      %42 = vector.shape_cast %41 : vector<1x1x64x128xbf16> to vector<64x128xbf16>
      %cst_36 = arith.constant dense<0.000000e+00> : vector<64x128xf32>
      %43 = tpu.matmul %40, %42, %cst_36 {dimension_numbers = #tpu.dot_dimension_numbers<[1], [0], [0], [1], [0, 0, 1, 1], [], []>} : vector<64x64xbf16>, vector<64x128xbf16>, vector<64x128xf32> -> vector<64x128xf32>
      %44 = arith.addf %37, %43 : vector<64x128xf32>
      %c0_37 = arith.constant 0 : index
      %c18_38 = arith.constant 18 : index
      %c18_39 = arith.constant 18 : index
      %c0_40 = arith.constant 0 : index
      %45 = vector.load %arg2[%c0_37, %c18_38, %c18_39, %c0_40] : memref<1x44x44x64xbf16, #tpu.memory_space<vmem>>, vector<1x8x8x64xbf16>
      %46 = vector.shape_cast %45 : vector<1x8x8x64xbf16> to vector<8x8x64xbf16>
      %47 = vector.shape_cast %46 : vector<8x8x64xbf16> to vector<64x64xbf16>
      %c0_41 = arith.constant 0 : index
      %c4 = arith.constant 4 : index
      %c0_42 = arith.constant 0 : index
      %c0_43 = arith.constant 0 : index
      %48 = vector.load %arg8[%c0_41, %c4, %c0_42, %c0_43] : memref<1x9x64x128xbf16, #tpu.memory_space<vmem>>, vector<1x1x64x128xbf16>
      %49 = vector.shape_cast %48 : vector<1x1x64x128xbf16> to vector<64x128xbf16>
      %cst_44 = arith.constant dense<0.000000e+00> : vector<64x128xf32>
      %50 = tpu.matmul %47, %49, %cst_44 {dimension_numbers = #tpu.dot_dimension_numbers<[1], [0], [0], [1], [0, 0, 1, 1], [], []>} : vector<64x64xbf16>, vector<64x128xbf16>, vector<64x128xf32> -> vector<64x128xf32>
      %51 = arith.addf %44, %50 : vector<64x128xf32>
      %c0_45 = arith.constant 0 : index
      %c18_46 = arith.constant 18 : index
      %c36_47 = arith.constant 36 : index
      %c0_48 = arith.constant 0 : index
      %52 = vector.load %arg2[%c0_45, %c18_46, %c36_47, %c0_48] : memref<1x44x44x64xbf16, #tpu.memory_space<vmem>>, vector<1x8x8x64xbf16>
      %53 = vector.shape_cast %52 : vector<1x8x8x64xbf16> to vector<8x8x64xbf16>
      %54 = vector.shape_cast %53 : vector<8x8x64xbf16> to vector<64x64xbf16>
      %c0_49 = arith.constant 0 : index
      %c5 = arith.constant 5 : index
      %c0_50 = arith.constant 0 : index
      %c0_51 = arith.constant 0 : index
      %55 = vector.load %arg8[%c0_49, %c5, %c0_50, %c0_51] : memref<1x9x64x128xbf16, #tpu.memory_space<vmem>>, vector<1x1x64x128xbf16>
      %56 = vector.shape_cast %55 : vector<1x1x64x128xbf16> to vector<64x128xbf16>
      %cst_52 = arith.constant dense<0.000000e+00> : vector<64x128xf32>
      %57 = tpu.matmul %54, %56, %cst_52 {dimension_numbers = #tpu.dot_dimension_numbers<[1], [0], [0], [1], [0, 0, 1, 1], [], []>} : vector<64x64xbf16>, vector<64x128xbf16>, vector<64x128xf32> -> vector<64x128xf32>
      %58 = arith.addf %51, %57 : vector<64x128xf32>
      %c0_53 = arith.constant 0 : index
      %c36_54 = arith.constant 36 : index
      %c0_55 = arith.constant 0 : index
      %c0_56 = arith.constant 0 : index
      %59 = vector.load %arg2[%c0_53, %c36_54, %c0_55, %c0_56] : memref<1x44x44x64xbf16, #tpu.memory_space<vmem>>, vector<1x8x8x64xbf16>
      %60 = vector.shape_cast %59 : vector<1x8x8x64xbf16> to vector<8x8x64xbf16>
      %61 = vector.shape_cast %60 : vector<8x8x64xbf16> to vector<64x64xbf16>
      %c0_57 = arith.constant 0 : index
      %c6 = arith.constant 6 : index
      %c0_58 = arith.constant 0 : index
      %c0_59 = arith.constant 0 : index
      %62 = vector.load %arg8[%c0_57, %c6, %c0_58, %c0_59] : memref<1x9x64x128xbf16, #tpu.memory_space<vmem>>, vector<1x1x64x128xbf16>
      %63 = vector.shape_cast %62 : vector<1x1x64x128xbf16> to vector<64x128xbf16>
      %cst_60 = arith.constant dense<0.000000e+00> : vector<64x128xf32>
      %64 = tpu.matmul %61, %63, %cst_60 {dimension_numbers = #tpu.dot_dimension_numbers<[1], [0], [0], [1], [0, 0, 1, 1], [], []>} : vector<64x64xbf16>, vector<64x128xbf16>, vector<64x128xf32> -> vector<64x128xf32>
      %65 = arith.addf %58, %64 : vector<64x128xf32>
      %c0_61 = arith.constant 0 : index
      %c36_62 = arith.constant 36 : index
      %c18_63 = arith.constant 18 : index
      %c0_64 = arith.constant 0 : index
      %66 = vector.load %arg2[%c0_61, %c36_62, %c18_63, %c0_64] : memref<1x44x44x64xbf16, #tpu.memory_space<vmem>>, vector<1x8x8x64xbf16>
      %67 = vector.shape_cast %66 : vector<1x8x8x64xbf16> to vector<8x8x64xbf16>
      %68 = vector.shape_cast %67 : vector<8x8x64xbf16> to vector<64x64xbf16>
      %c0_65 = arith.constant 0 : index
      %c7 = arith.constant 7 : index
      %c0_66 = arith.constant 0 : index
      %c0_67 = arith.constant 0 : index
      %69 = vector.load %arg8[%c0_65, %c7, %c0_66, %c0_67] : memref<1x9x64x128xbf16, #tpu.memory_space<vmem>>, vector<1x1x64x128xbf16>
      %70 = vector.shape_cast %69 : vector<1x1x64x128xbf16> to vector<64x128xbf16>
      %cst_68 = arith.constant dense<0.000000e+00> : vector<64x128xf32>
      %71 = tpu.matmul %68, %70, %cst_68 {dimension_numbers = #tpu.dot_dimension_numbers<[1], [0], [0], [1], [0, 0, 1, 1], [], []>} : vector<64x64xbf16>, vector<64x128xbf16>, vector<64x128xf32> -> vector<64x128xf32>
      %72 = arith.addf %65, %71 : vector<64x128xf32>
      %c0_69 = arith.constant 0 : index
      %c36_70 = arith.constant 36 : index
      %c36_71 = arith.constant 36 : index
      %c0_72 = arith.constant 0 : index
      %73 = vector.load %arg2[%c0_69, %c36_70, %c36_71, %c0_72] : memref<1x44x44x64xbf16, #tpu.memory_space<vmem>>, vector<1x8x8x64xbf16>
      %74 = vector.shape_cast %73 : vector<1x8x8x64xbf16> to vector<8x8x64xbf16>
      %75 = vector.shape_cast %74 : vector<8x8x64xbf16> to vector<64x64xbf16>
      %c0_73 = arith.constant 0 : index
      %c8 = arith.constant 8 : index
      %c0_74 = arith.constant 0 : index
      %c0_75 = arith.constant 0 : index
      %76 = vector.load %arg8[%c0_73, %c8, %c0_74, %c0_75] : memref<1x9x64x128xbf16, #tpu.memory_space<vmem>>, vector<1x1x64x128xbf16>
      %77 = vector.shape_cast %76 : vector<1x1x64x128xbf16> to vector<64x128xbf16>
      %cst_76 = arith.constant dense<0.000000e+00> : vector<64x128xf32>
      %78 = tpu.matmul %75, %77, %cst_76 {dimension_numbers = #tpu.dot_dimension_numbers<[1], [0], [0], [1], [0, 0, 1, 1], [], []>} : vector<64x64xbf16>, vector<64x128xbf16>, vector<64x128xf32> -> vector<64x128xf32>
      %79 = arith.addf %72, %78 : vector<64x128xf32>
      %c0_77 = arith.constant 0 : index
      %c0_78 = arith.constant 0 : index
      %c0_79 = arith.constant 0 : index
      %80 = vector.load %arg9[%c0_77, %c0_78, %c0_79] : memref<1x1x128xf32, #tpu.memory_space<vmem>>, vector<1x1x128xf32>
      %81 = vector.shape_cast %80 : vector<1x1x128xf32> to vector<1x128xf32>
      %82 = vector.broadcast %81 : vector<1x128xf32> to vector<64x128xf32>
      %83 = arith.addf %79, %82 : vector<64x128xf32>
      %cst_80 = arith.constant 0.000000e+00 : f32
      %84 = vector.broadcast %cst_80 : f32 to vector<64x128xf32>
      %85 = arith.maximumf %83, %84 : vector<64x128xf32>
      %86 = arith.truncf %85 : vector<64x128xf32> to vector<64x128xbf16>
      %c0_81 = arith.constant 0 : index
      %c0_82 = arith.constant 0 : index
      %87 = vector.load %arg12[%c0_81, %c0_82] : memref<64x32xf32, #tpu.memory_space<vmem>>, vector<64x32xf32>
      %c0_83 = arith.constant 0 : index
      %c0_84 = arith.constant 0 : index
      %c0_85 = arith.constant 0 : index
      %88 = vector.load %arg10[%c0_83, %c0_84, %c0_85] : memref<1x128x32xbf16, #tpu.memory_space<vmem>>, vector<1x128x32xbf16>
      %89 = vector.shape_cast %88 : vector<1x128x32xbf16> to vector<128x32xbf16>
      %cst_86 = arith.constant dense<0.000000e+00> : vector<64x32xf32>
      %90 = tpu.matmul %86, %89, %cst_86 {dimension_numbers = #tpu.dot_dimension_numbers<[1], [0], [0], [1], [0, 0, 1, 1], [], []>} : vector<64x128xbf16>, vector<128x32xbf16>, vector<64x32xf32> -> vector<64x32xf32>
      %91 = arith.addf %87, %90 : vector<64x32xf32>
      %c0_87 = arith.constant 0 : index
      %c0_88 = arith.constant 0 : index
      %92 = vector.load %arg12[%c0_87, %c0_88] : memref<64x32xf32, #tpu.memory_space<vmem>>, vector<64x32xf32>
      tpu.vector_store %arg12[%c0_87, %c0_88], %91 {strides = array<i32>} : memref<64x32xf32, #tpu.memory_space<vmem>>, vector<64x32xf32>,
    } else {
    }
    %c3_i32_6 = arith.constant 3 : i32
    %15 = arith.cmpi eq, %arg1, %c3_i32_6 : i32
    %16 = arith.extui %15 : i1 to i32
    %c0_i32_7 = arith.constant 0 : i32
    %17 = arith.cmpi ne, %16, %c0_i32_7 : i32
    scf.if %17 {
      %c0 = arith.constant 0 : index
      %c0_8 = arith.constant 0 : index
      %18 = vector.load %arg12[%c0, %c0_8] : memref<64x32xf32, #tpu.memory_space<vmem>>, vector<64x32xf32>
      %cst = arith.constant 0.000000e+00 : f32
      %19 = vector.broadcast %cst : f32 to vector<64x32xf32>
      %20 = arith.maximumf %18, %19 : vector<64x32xf32>
      %21 = arith.truncf %20 : vector<64x32xf32> to vector<64x32xbf16>
      %c0_9 = arith.constant 0 : index
      %c0_10 = arith.constant 0 : index
      %c0_11 = arith.constant 0 : index
      %22 = vector.load %arg11[%c0_9, %c0_10, %c0_11] : memref<1x64x32xbf16, #tpu.memory_space<vmem>>, vector<1x64x32xbf16>
      %23 = vector.shape_cast %22 : vector<1x64x32xbf16> to vector<64x32xbf16>
      %24 = vector.shape_cast %21 : vector<64x32xbf16> to vector<1x64x32xbf16>
      tpu.vector_store %arg11[%c0_9, %c0_10, %c0_11], %24 {strides = array<i32>} : memref<1x64x32xbf16, #tpu.memory_space<vmem>>, vector<1x64x32xbf16>,
    } else {
    }
    return
  }
  func.func @transform_0(%arg0: i32, %arg1: i32) -> (i32, i32, i32, i32) {
    %c0_i32 = arith.constant 0 : i32
    %c0_i32_0 = arith.constant 0 : i32
    %c0_i32_1 = arith.constant 0 : i32
    %c0_i32_2 = arith.constant 0 : i32
    return %arg0, %c0_i32, %c0_i32_0, %c0_i32_1 : i32, i32, i32, i32
  }
  func.func @transform_1(%arg0: i32, %arg1: i32) -> (i32, i32, i32) {
    %c0_i32 = arith.constant 0 : i32
    %c0_i32_0 = arith.constant 0 : i32
    %c0_i32_1 = arith.constant 0 : i32
    return %arg0, %c0_i32, %c0_i32_0 : i32, i32, i32
  }
  func.func @transform_2(%arg0: i32, %arg1: i32) -> (i32, i32) {
    %c0_i32 = arith.constant 0 : i32
    %c0_i32_0 = arith.constant 0 : i32
    %c0_i32_1 = arith.constant 0 : i32
    return %c0_i32, %c0_i32_0 : i32, i32
  }
  func.func @transform_3(%arg0: i32, %arg1: i32) -> (i32, i32) {
    %c0_i32 = arith.constant 0 : i32
    %c0_i32_0 = arith.constant 0 : i32
    %c0_i32_1 = arith.constant 0 : i32
    return %c0_i32, %c0_i32_0 : i32, i32
  }
  func.func @transform_4(%arg0: i32, %arg1: i32) -> (i32, i32) {
    %c0_i32 = arith.constant 0 : i32
    %c0_i32_0 = arith.constant 0 : i32
    %c0_i32_1 = arith.constant 0 : i32
    return %c0_i32, %c0_i32_0 : i32, i32
  }
  func.func @transform_5(%arg0: i32, %arg1: i32) -> (i32, i32) {
    %c0_i32 = arith.constant 0 : i32
    %c0_i32_0 = arith.constant 0 : i32
    %c0_i32_1 = arith.constant 0 : i32
    return %c0_i32, %c0_i32_0 : i32, i32
  }
  func.func @transform_6(%arg0: i32, %arg1: i32) -> (i32, i32, i32, i32) {
    %c0_i32 = arith.constant 0 : i32
    %c0_i32_0 = arith.constant 0 : i32
    %c0_i32_1 = arith.constant 0 : i32
    %c0_i32_2 = arith.constant 0 : i32
    return %arg1, %c0_i32, %c0_i32_0, %c0_i32_1 : i32, i32, i32, i32
  }
  func.func @transform_7(%arg0: i32, %arg1: i32) -> (i32, i32, i32) {
    %c0_i32 = arith.constant 0 : i32
    %c0_i32_0 = arith.constant 0 : i32
    %c0_i32_1 = arith.constant 0 : i32
    return %arg1, %c0_i32, %c0_i32_0 : i32, i32, i32
  }
  func.func @transform_8(%arg0: i32, %arg1: i32) -> (i32, i32, i32) {
    %c0_i32 = arith.constant 0 : i32
    %c0_i32_0 = arith.constant 0 : i32
    %c0_i32_1 = arith.constant 0 : i32
    return %arg1, %c0_i32, %c0_i32_0 : i32, i32, i32
  }
  func.func @transform_9(%arg0: i32, %arg1: i32) -> (i32, i32, i32) {
    %c0_i32 = arith.constant 0 : i32
    %c0_i32_0 = arith.constant 0 : i32
    %c0_i32_1 = arith.constant 0 : i32
    return %arg0, %c0_i32, %c0_i32_0 : i32, i32, i32
  }
}

module attributes {stable_mosaic.version = 11 : i64} {
  func.func @_pool_proj_kernel(%arg0: i32, %arg1: memref<2x64xbf16, #tpu.memory_space<vmem>>, %arg2: memref<64x160xbf16, #tpu.memory_space<vmem>>, %arg3: memref<1x160xf32, #tpu.memory_space<vmem>>, %arg4: memref<160x32xbf16, #tpu.memory_space<vmem>>, %arg5: memref<2x32xf32, #tpu.memory_space<vmem>>) attributes {dimension_semantics = [#tpu.dimension_semantics<arbitrary>], iteration_bounds = array<i64: 1>, scalar_prefetch = 0 : i64, scratch_operands = 0 : i64, tpu.core_type = #tpu.core_type<tc>, window_params = [{pipeline_mode = #tpu.pipeline_mode<synchronous>, transform_indices = @transform_0, window_bounds = array<i64: 2, 64>}, {pipeline_mode = #tpu.pipeline_mode<synchronous>, transform_indices = @transform_1, window_bounds = array<i64: 64, 160>}, {pipeline_mode = #tpu.pipeline_mode<synchronous>, transform_indices = @transform_2, window_bounds = array<i64: 1, 160>}, {pipeline_mode = #tpu.pipeline_mode<synchronous>, transform_indices = @transform_3, window_bounds = array<i64: 160, 32>}, {pipeline_mode = #tpu.pipeline_mode<synchronous>, transform_indices = @transform_4, window_bounds = array<i64: 2, 32>}]} {
    %c0 = arith.constant 0 : index
    %c0_0 = arith.constant 0 : index
    %0 = vector.load %arg1[%c0, %c0_0] : memref<2x64xbf16, #tpu.memory_space<vmem>>, vector<2x64xbf16>
    %c0_1 = arith.constant 0 : index
    %c0_2 = arith.constant 0 : index
    %1 = vector.load %arg2[%c0_1, %c0_2] : memref<64x160xbf16, #tpu.memory_space<vmem>>, vector<64x160xbf16>
    %cst = arith.constant dense<0.000000e+00> : vector<2x160xf32>
    %2 = tpu.matmul %0, %1, %cst {dimension_numbers = #tpu.dot_dimension_numbers<[1], [0], [0], [1], [0, 0, 1, 1], [], []>} : vector<2x64xbf16>, vector<64x160xbf16>, vector<2x160xf32> -> vector<2x160xf32>
    %c0_3 = arith.constant 0 : index
    %c0_4 = arith.constant 0 : index
    %3 = vector.load %arg3[%c0_3, %c0_4] : memref<1x160xf32, #tpu.memory_space<vmem>>, vector<1x160xf32>
    %4 = vector.broadcast %3 : vector<1x160xf32> to vector<2x160xf32>
    %5 = arith.addf %2, %4 : vector<2x160xf32>
    %cst_5 = arith.constant 0.000000e+00 : f32
    %6 = vector.broadcast %cst_5 : f32 to vector<2x160xf32>
    %7 = arith.maximumf %5, %6 : vector<2x160xf32>
    %8 = arith.truncf %7 : vector<2x160xf32> to vector<2x160xbf16>
    %c0_6 = arith.constant 0 : index
    %c0_7 = arith.constant 0 : index
    %9 = vector.load %arg4[%c0_6, %c0_7] : memref<160x32xbf16, #tpu.memory_space<vmem>>, vector<160x32xbf16>
    %cst_8 = arith.constant dense<0.000000e+00> : vector<2x32xf32>
    %10 = tpu.matmul %8, %9, %cst_8 {dimension_numbers = #tpu.dot_dimension_numbers<[1], [0], [0], [1], [0, 0, 1, 1], [], []>} : vector<2x160xbf16>, vector<160x32xbf16>, vector<2x32xf32> -> vector<2x32xf32>
    %c0_9 = arith.constant 0 : index
    %c0_10 = arith.constant 0 : index
    %11 = vector.load %arg5[%c0_9, %c0_10] : memref<2x32xf32, #tpu.memory_space<vmem>>, vector<2x32xf32>
    tpu.vector_store %arg5[%c0_9, %c0_10], %10 {strides = array<i32>} : memref<2x32xf32, #tpu.memory_space<vmem>>, vector<2x32xf32>,
    return
  }
  func.func @transform_0(%arg0: i32) -> (i32, i32) {
    %c0_i32 = arith.constant 0 : i32
    %c0_i32_0 = arith.constant 0 : i32
    %c0_i32_1 = arith.constant 0 : i32
    return %c0_i32, %c0_i32_0 : i32, i32
  }
  func.func @transform_1(%arg0: i32) -> (i32, i32) {
    %c0_i32 = arith.constant 0 : i32
    %c0_i32_0 = arith.constant 0 : i32
    %c0_i32_1 = arith.constant 0 : i32
    return %c0_i32, %c0_i32_0 : i32, i32
  }
  func.func @transform_2(%arg0: i32) -> (i32, i32) {
    %c0_i32 = arith.constant 0 : i32
    %c0_i32_0 = arith.constant 0 : i32
    %c0_i32_1 = arith.constant 0 : i32
    return %c0_i32, %c0_i32_0 : i32, i32
  }
  func.func @transform_3(%arg0: i32) -> (i32, i32) {
    %c0_i32 = arith.constant 0 : i32
    %c0_i32_0 = arith.constant 0 : i32
    %c0_i32_1 = arith.constant 0 : i32
    return %c0_i32, %c0_i32_0 : i32, i32
  }
  func.func @transform_4(%arg0: i32) -> (i32, i32) {
    %c0_i32 = arith.constant 0 : i32
    %c0_i32_0 = arith.constant 0 : i32
    %c0_i32_1 = arith.constant 0 : i32
    return %c0_i32, %c0_i32_0 : i32, i32
  }
}

module attributes {stable_mosaic.version = 11 : i64} {
  func.func @_conv2_cls_kernel(%arg0: i32, %arg1: memref<1x10x10x32xbf16, #tpu.memory_space<vmem>>, %arg2: memref<1x10x10x32xbf16, #tpu.memory_space<vmem>>, %arg3: memref<9x32x32xbf16, #tpu.memory_space<vmem>>, %arg4: memref<9x32x32xbf16, #tpu.memory_space<vmem>>, %arg5: memref<1x32xf32, #tpu.memory_space<vmem>>, %arg6: memref<32x128xbf16, #tpu.memory_space<vmem>>, %arg7: memref<1x128xf32, #tpu.memory_space<vmem>>, %arg8: memref<1x64x128xf32, #tpu.memory_space<vmem>>) attributes {dimension_semantics = [#tpu.dimension_semantics<parallel>], iteration_bounds = array<i64: 2>, scalar_prefetch = 0 : i64, scratch_operands = 0 : i64, tpu.core_type = #tpu.core_type<tc>, window_params = [{transform_indices = @transform_0, window_bounds = array<i64: 1, 10, 10, 32>}, {transform_indices = @transform_1, window_bounds = array<i64: 1, 10, 10, 32>}, {pipeline_mode = #tpu.pipeline_mode<synchronous>, transform_indices = @transform_2, window_bounds = array<i64: 9, 32, 32>}, {pipeline_mode = #tpu.pipeline_mode<synchronous>, transform_indices = @transform_3, window_bounds = array<i64: 9, 32, 32>}, {pipeline_mode = #tpu.pipeline_mode<synchronous>, transform_indices = @transform_4, window_bounds = array<i64: 1, 32>}, {pipeline_mode = #tpu.pipeline_mode<synchronous>, transform_indices = @transform_5, window_bounds = array<i64: 32, 128>}, {pipeline_mode = #tpu.pipeline_mode<synchronous>, transform_indices = @transform_6, window_bounds = array<i64: 1, 128>}, {transform_indices = @transform_7, window_bounds = array<i64: 1, 64, 128>}]} {
    %c0 = arith.constant 0 : index
    %c0_0 = arith.constant 0 : index
    %c0_1 = arith.constant 0 : index
    %c0_2 = arith.constant 0 : index
    %0 = vector.load %arg1[%c0, %c0_0, %c0_1, %c0_2] : memref<1x10x10x32xbf16, #tpu.memory_space<vmem>>, vector<1x8x8x32xbf16>
    %1 = vector.shape_cast %0 : vector<1x8x8x32xbf16> to vector<8x8x32xbf16>
    %2 = vector.shape_cast %1 : vector<8x8x32xbf16> to vector<64x32xbf16>
    %c0_3 = arith.constant 0 : index
    %c0_4 = arith.constant 0 : index
    %c0_5 = arith.constant 0 : index
    %c0_6 = arith.constant 0 : index
    %3 = vector.load %arg2[%c0_3, %c0_4, %c0_5, %c0_6] : memref<1x10x10x32xbf16, #tpu.memory_space<vmem>>, vector<1x8x8x32xbf16>
    %4 = vector.shape_cast %3 : vector<1x8x8x32xbf16> to vector<8x8x32xbf16>
    %5 = vector.shape_cast %4 : vector<8x8x32xbf16> to vector<64x32xbf16>
    %c0_7 = arith.constant 0 : index
    %c0_8 = arith.constant 0 : index
    %c0_9 = arith.constant 0 : index
    %6 = vector.load %arg3[%c0_7, %c0_8, %c0_9] : memref<9x32x32xbf16, #tpu.memory_space<vmem>>, vector<1x32x32xbf16>
    %7 = vector.shape_cast %6 : vector<1x32x32xbf16> to vector<32x32xbf16>
    %cst = arith.constant dense<0.000000e+00> : vector<64x32xf32>
    %8 = tpu.matmul %2, %7, %cst {dimension_numbers = #tpu.dot_dimension_numbers<[1], [0], [0], [1], [0, 0, 1, 1], [], []>} : vector<64x32xbf16>, vector<32x32xbf16>, vector<64x32xf32> -> vector<64x32xf32>
    %c0_10 = arith.constant 0 : index
    %c0_11 = arith.constant 0 : index
    %c0_12 = arith.constant 0 : index
    %9 = vector.load %arg4[%c0_10, %c0_11, %c0_12] : memref<9x32x32xbf16, #tpu.memory_space<vmem>>, vector<1x32x32xbf16>
    %10 = vector.shape_cast %9 : vector<1x32x32xbf16> to vector<32x32xbf16>
    %cst_13 = arith.constant dense<0.000000e+00> : vector<64x32xf32>
    %11 = tpu.matmul %5, %10, %cst_13 {dimension_numbers = #tpu.dot_dimension_numbers<[1], [0], [0], [1], [0, 0, 1, 1], [], []>} : vector<64x32xbf16>, vector<32x32xbf16>, vector<64x32xf32> -> vector<64x32xf32>
    %12 = arith.addf %8, %11 : vector<64x32xf32>
    %c0_14 = arith.constant 0 : index
    %c0_15 = arith.constant 0 : index
    %c1 = arith.constant 1 : index
    %c0_16 = arith.constant 0 : index
    %13 = vector.load %arg1[%c0_14, %c0_15, %c1, %c0_16] : memref<1x10x10x32xbf16, #tpu.memory_space<vmem>>, vector<1x8x8x32xbf16>
    %14 = vector.shape_cast %13 : vector<1x8x8x32xbf16> to vector<8x8x32xbf16>
    %15 = vector.shape_cast %14 : vector<8x8x32xbf16> to vector<64x32xbf16>
    %c0_17 = arith.constant 0 : index
    %c0_18 = arith.constant 0 : index
    %c1_19 = arith.constant 1 : index
    %c0_20 = arith.constant 0 : index
    %16 = vector.load %arg2[%c0_17, %c0_18, %c1_19, %c0_20] : memref<1x10x10x32xbf16, #tpu.memory_space<vmem>>, vector<1x8x8x32xbf16>
    %17 = vector.shape_cast %16 : vector<1x8x8x32xbf16> to vector<8x8x32xbf16>
    %18 = vector.shape_cast %17 : vector<8x8x32xbf16> to vector<64x32xbf16>
    %c1_21 = arith.constant 1 : index
    %c0_22 = arith.constant 0 : index
    %c0_23 = arith.constant 0 : index
    %19 = vector.load %arg3[%c1_21, %c0_22, %c0_23] : memref<9x32x32xbf16, #tpu.memory_space<vmem>>, vector<1x32x32xbf16>
    %20 = vector.shape_cast %19 : vector<1x32x32xbf16> to vector<32x32xbf16>
    %cst_24 = arith.constant dense<0.000000e+00> : vector<64x32xf32>
    %21 = tpu.matmul %15, %20, %cst_24 {dimension_numbers = #tpu.dot_dimension_numbers<[1], [0], [0], [1], [0, 0, 1, 1], [], []>} : vector<64x32xbf16>, vector<32x32xbf16>, vector<64x32xf32> -> vector<64x32xf32>
    %c1_25 = arith.constant 1 : index
    %c0_26 = arith.constant 0 : index
    %c0_27 = arith.constant 0 : index
    %22 = vector.load %arg4[%c1_25, %c0_26, %c0_27] : memref<9x32x32xbf16, #tpu.memory_space<vmem>>, vector<1x32x32xbf16>
    %23 = vector.shape_cast %22 : vector<1x32x32xbf16> to vector<32x32xbf16>
    %cst_28 = arith.constant dense<0.000000e+00> : vector<64x32xf32>
    %24 = tpu.matmul %18, %23, %cst_28 {dimension_numbers = #tpu.dot_dimension_numbers<[1], [0], [0], [1], [0, 0, 1, 1], [], []>} : vector<64x32xbf16>, vector<32x32xbf16>, vector<64x32xf32> -> vector<64x32xf32>
    %25 = arith.addf %21, %24 : vector<64x32xf32>
    %26 = arith.addf %12, %25 : vector<64x32xf32>
    %c0_29 = arith.constant 0 : index
    %c0_30 = arith.constant 0 : index
    %c2 = arith.constant 2 : index
    %c0_31 = arith.constant 0 : index
    %27 = vector.load %arg1[%c0_29, %c0_30, %c2, %c0_31] : memref<1x10x10x32xbf16, #tpu.memory_space<vmem>>, vector<1x8x8x32xbf16>
    %28 = vector.shape_cast %27 : vector<1x8x8x32xbf16> to vector<8x8x32xbf16>
    %29 = vector.shape_cast %28 : vector<8x8x32xbf16> to vector<64x32xbf16>
    %c0_32 = arith.constant 0 : index
    %c0_33 = arith.constant 0 : index
    %c2_34 = arith.constant 2 : index
    %c0_35 = arith.constant 0 : index
    %30 = vector.load %arg2[%c0_32, %c0_33, %c2_34, %c0_35] : memref<1x10x10x32xbf16, #tpu.memory_space<vmem>>, vector<1x8x8x32xbf16>
    %31 = vector.shape_cast %30 : vector<1x8x8x32xbf16> to vector<8x8x32xbf16>
    %32 = vector.shape_cast %31 : vector<8x8x32xbf16> to vector<64x32xbf16>
    %c2_36 = arith.constant 2 : index
    %c0_37 = arith.constant 0 : index
    %c0_38 = arith.constant 0 : index
    %33 = vector.load %arg3[%c2_36, %c0_37, %c0_38] : memref<9x32x32xbf16, #tpu.memory_space<vmem>>, vector<1x32x32xbf16>
    %34 = vector.shape_cast %33 : vector<1x32x32xbf16> to vector<32x32xbf16>
    %cst_39 = arith.constant dense<0.000000e+00> : vector<64x32xf32>
    %35 = tpu.matmul %29, %34, %cst_39 {dimension_numbers = #tpu.dot_dimension_numbers<[1], [0], [0], [1], [0, 0, 1, 1], [], []>} : vector<64x32xbf16>, vector<32x32xbf16>, vector<64x32xf32> -> vector<64x32xf32>
    %c2_40 = arith.constant 2 : index
    %c0_41 = arith.constant 0 : index
    %c0_42 = arith.constant 0 : index
    %36 = vector.load %arg4[%c2_40, %c0_41, %c0_42] : memref<9x32x32xbf16, #tpu.memory_space<vmem>>, vector<1x32x32xbf16>
    %37 = vector.shape_cast %36 : vector<1x32x32xbf16> to vector<32x32xbf16>
    %cst_43 = arith.constant dense<0.000000e+00> : vector<64x32xf32>
    %38 = tpu.matmul %32, %37, %cst_43 {dimension_numbers = #tpu.dot_dimension_numbers<[1], [0], [0], [1], [0, 0, 1, 1], [], []>} : vector<64x32xbf16>, vector<32x32xbf16>, vector<64x32xf32> -> vector<64x32xf32>
    %39 = arith.addf %35, %38 : vector<64x32xf32>
    %40 = arith.addf %26, %39 : vector<64x32xf32>
    %c0_44 = arith.constant 0 : index
    %c1_45 = arith.constant 1 : index
    %c0_46 = arith.constant 0 : index
    %c0_47 = arith.constant 0 : index
    %41 = vector.load %arg1[%c0_44, %c1_45, %c0_46, %c0_47] : memref<1x10x10x32xbf16, #tpu.memory_space<vmem>>, vector<1x8x8x32xbf16>
    %42 = vector.shape_cast %41 : vector<1x8x8x32xbf16> to vector<8x8x32xbf16>
    %43 = vector.shape_cast %42 : vector<8x8x32xbf16> to vector<64x32xbf16>
    %c0_48 = arith.constant 0 : index
    %c1_49 = arith.constant 1 : index
    %c0_50 = arith.constant 0 : index
    %c0_51 = arith.constant 0 : index
    %44 = vector.load %arg2[%c0_48, %c1_49, %c0_50, %c0_51] : memref<1x10x10x32xbf16, #tpu.memory_space<vmem>>, vector<1x8x8x32xbf16>
    %45 = vector.shape_cast %44 : vector<1x8x8x32xbf16> to vector<8x8x32xbf16>
    %46 = vector.shape_cast %45 : vector<8x8x32xbf16> to vector<64x32xbf16>
    %c3 = arith.constant 3 : index
    %c0_52 = arith.constant 0 : index
    %c0_53 = arith.constant 0 : index
    %47 = vector.load %arg3[%c3, %c0_52, %c0_53] : memref<9x32x32xbf16, #tpu.memory_space<vmem>>, vector<1x32x32xbf16>
    %48 = vector.shape_cast %47 : vector<1x32x32xbf16> to vector<32x32xbf16>
    %cst_54 = arith.constant dense<0.000000e+00> : vector<64x32xf32>
    %49 = tpu.matmul %43, %48, %cst_54 {dimension_numbers = #tpu.dot_dimension_numbers<[1], [0], [0], [1], [0, 0, 1, 1], [], []>} : vector<64x32xbf16>, vector<32x32xbf16>, vector<64x32xf32> -> vector<64x32xf32>
    %c3_55 = arith.constant 3 : index
    %c0_56 = arith.constant 0 : index
    %c0_57 = arith.constant 0 : index
    %50 = vector.load %arg4[%c3_55, %c0_56, %c0_57] : memref<9x32x32xbf16, #tpu.memory_space<vmem>>, vector<1x32x32xbf16>
    %51 = vector.shape_cast %50 : vector<1x32x32xbf16> to vector<32x32xbf16>
    %cst_58 = arith.constant dense<0.000000e+00> : vector<64x32xf32>
    %52 = tpu.matmul %46, %51, %cst_58 {dimension_numbers = #tpu.dot_dimension_numbers<[1], [0], [0], [1], [0, 0, 1, 1], [], []>} : vector<64x32xbf16>, vector<32x32xbf16>, vector<64x32xf32> -> vector<64x32xf32>
    %53 = arith.addf %49, %52 : vector<64x32xf32>
    %54 = arith.addf %40, %53 : vector<64x32xf32>
    %c0_59 = arith.constant 0 : index
    %c1_60 = arith.constant 1 : index
    %c1_61 = arith.constant 1 : index
    %c0_62 = arith.constant 0 : index
    %55 = vector.load %arg1[%c0_59, %c1_60, %c1_61, %c0_62] : memref<1x10x10x32xbf16, #tpu.memory_space<vmem>>, vector<1x8x8x32xbf16>
    %56 = vector.shape_cast %55 : vector<1x8x8x32xbf16> to vector<8x8x32xbf16>
    %57 = vector.shape_cast %56 : vector<8x8x32xbf16> to vector<64x32xbf16>
    %c0_63 = arith.constant 0 : index
    %c1_64 = arith.constant 1 : index
    %c1_65 = arith.constant 1 : index
    %c0_66 = arith.constant 0 : index
    %58 = vector.load %arg2[%c0_63, %c1_64, %c1_65, %c0_66] : memref<1x10x10x32xbf16, #tpu.memory_space<vmem>>, vector<1x8x8x32xbf16>
    %59 = vector.shape_cast %58 : vector<1x8x8x32xbf16> to vector<8x8x32xbf16>
    %60 = vector.shape_cast %59 : vector<8x8x32xbf16> to vector<64x32xbf16>
    %c4 = arith.constant 4 : index
    %c0_67 = arith.constant 0 : index
    %c0_68 = arith.constant 0 : index
    %61 = vector.load %arg3[%c4, %c0_67, %c0_68] : memref<9x32x32xbf16, #tpu.memory_space<vmem>>, vector<1x32x32xbf16>
    %62 = vector.shape_cast %61 : vector<1x32x32xbf16> to vector<32x32xbf16>
    %cst_69 = arith.constant dense<0.000000e+00> : vector<64x32xf32>
    %63 = tpu.matmul %57, %62, %cst_69 {dimension_numbers = #tpu.dot_dimension_numbers<[1], [0], [0], [1], [0, 0, 1, 1], [], []>} : vector<64x32xbf16>, vector<32x32xbf16>, vector<64x32xf32> -> vector<64x32xf32>
    %c4_70 = arith.constant 4 : index
    %c0_71 = arith.constant 0 : index
    %c0_72 = arith.constant 0 : index
    %64 = vector.load %arg4[%c4_70, %c0_71, %c0_72] : memref<9x32x32xbf16, #tpu.memory_space<vmem>>, vector<1x32x32xbf16>
    %65 = vector.shape_cast %64 : vector<1x32x32xbf16> to vector<32x32xbf16>
    %cst_73 = arith.constant dense<0.000000e+00> : vector<64x32xf32>
    %66 = tpu.matmul %60, %65, %cst_73 {dimension_numbers = #tpu.dot_dimension_numbers<[1], [0], [0], [1], [0, 0, 1, 1], [], []>} : vector<64x32xbf16>, vector<32x32xbf16>, vector<64x32xf32> -> vector<64x32xf32>
    %67 = arith.addf %63, %66 : vector<64x32xf32>
    %68 = arith.addf %54, %67 : vector<64x32xf32>
    %c0_74 = arith.constant 0 : index
    %c1_75 = arith.constant 1 : index
    %c2_76 = arith.constant 2 : index
    %c0_77 = arith.constant 0 : index
    %69 = vector.load %arg1[%c0_74, %c1_75, %c2_76, %c0_77] : memref<1x10x10x32xbf16, #tpu.memory_space<vmem>>, vector<1x8x8x32xbf16>
    %70 = vector.shape_cast %69 : vector<1x8x8x32xbf16> to vector<8x8x32xbf16>
    %71 = vector.shape_cast %70 : vector<8x8x32xbf16> to vector<64x32xbf16>
    %c0_78 = arith.constant 0 : index
    %c1_79 = arith.constant 1 : index
    %c2_80 = arith.constant 2 : index
    %c0_81 = arith.constant 0 : index
    %72 = vector.load %arg2[%c0_78, %c1_79, %c2_80, %c0_81] : memref<1x10x10x32xbf16, #tpu.memory_space<vmem>>, vector<1x8x8x32xbf16>
    %73 = vector.shape_cast %72 : vector<1x8x8x32xbf16> to vector<8x8x32xbf16>
    %74 = vector.shape_cast %73 : vector<8x8x32xbf16> to vector<64x32xbf16>
    %c5 = arith.constant 5 : index
    %c0_82 = arith.constant 0 : index
    %c0_83 = arith.constant 0 : index
    %75 = vector.load %arg3[%c5, %c0_82, %c0_83] : memref<9x32x32xbf16, #tpu.memory_space<vmem>>, vector<1x32x32xbf16>
    %76 = vector.shape_cast %75 : vector<1x32x32xbf16> to vector<32x32xbf16>
    %cst_84 = arith.constant dense<0.000000e+00> : vector<64x32xf32>
    %77 = tpu.matmul %71, %76, %cst_84 {dimension_numbers = #tpu.dot_dimension_numbers<[1], [0], [0], [1], [0, 0, 1, 1], [], []>} : vector<64x32xbf16>, vector<32x32xbf16>, vector<64x32xf32> -> vector<64x32xf32>
    %c5_85 = arith.constant 5 : index
    %c0_86 = arith.constant 0 : index
    %c0_87 = arith.constant 0 : index
    %78 = vector.load %arg4[%c5_85, %c0_86, %c0_87] : memref<9x32x32xbf16, #tpu.memory_space<vmem>>, vector<1x32x32xbf16>
    %79 = vector.shape_cast %78 : vector<1x32x32xbf16> to vector<32x32xbf16>
    %cst_88 = arith.constant dense<0.000000e+00> : vector<64x32xf32>
    %80 = tpu.matmul %74, %79, %cst_88 {dimension_numbers = #tpu.dot_dimension_numbers<[1], [0], [0], [1], [0, 0, 1, 1], [], []>} : vector<64x32xbf16>, vector<32x32xbf16>, vector<64x32xf32> -> vector<64x32xf32>
    %81 = arith.addf %77, %80 : vector<64x32xf32>
    %82 = arith.addf %68, %81 : vector<64x32xf32>
    %c0_89 = arith.constant 0 : index
    %c2_90 = arith.constant 2 : index
    %c0_91 = arith.constant 0 : index
    %c0_92 = arith.constant 0 : index
    %83 = vector.load %arg1[%c0_89, %c2_90, %c0_91, %c0_92] : memref<1x10x10x32xbf16, #tpu.memory_space<vmem>>, vector<1x8x8x32xbf16>
    %84 = vector.shape_cast %83 : vector<1x8x8x32xbf16> to vector<8x8x32xbf16>
    %85 = vector.shape_cast %84 : vector<8x8x32xbf16> to vector<64x32xbf16>
    %c0_93 = arith.constant 0 : index
    %c2_94 = arith.constant 2 : index
    %c0_95 = arith.constant 0 : index
    %c0_96 = arith.constant 0 : index
    %86 = vector.load %arg2[%c0_93, %c2_94, %c0_95, %c0_96] : memref<1x10x10x32xbf16, #tpu.memory_space<vmem>>, vector<1x8x8x32xbf16>
    %87 = vector.shape_cast %86 : vector<1x8x8x32xbf16> to vector<8x8x32xbf16>
    %88 = vector.shape_cast %87 : vector<8x8x32xbf16> to vector<64x32xbf16>
    %c6 = arith.constant 6 : index
    %c0_97 = arith.constant 0 : index
    %c0_98 = arith.constant 0 : index
    %89 = vector.load %arg3[%c6, %c0_97, %c0_98] : memref<9x32x32xbf16, #tpu.memory_space<vmem>>, vector<1x32x32xbf16>
    %90 = vector.shape_cast %89 : vector<1x32x32xbf16> to vector<32x32xbf16>
    %cst_99 = arith.constant dense<0.000000e+00> : vector<64x32xf32>
    %91 = tpu.matmul %85, %90, %cst_99 {dimension_numbers = #tpu.dot_dimension_numbers<[1], [0], [0], [1], [0, 0, 1, 1], [], []>} : vector<64x32xbf16>, vector<32x32xbf16>, vector<64x32xf32> -> vector<64x32xf32>
    %c6_100 = arith.constant 6 : index
    %c0_101 = arith.constant 0 : index
    %c0_102 = arith.constant 0 : index
    %92 = vector.load %arg4[%c6_100, %c0_101, %c0_102] : memref<9x32x32xbf16, #tpu.memory_space<vmem>>, vector<1x32x32xbf16>
    %93 = vector.shape_cast %92 : vector<1x32x32xbf16> to vector<32x32xbf16>
    %cst_103 = arith.constant dense<0.000000e+00> : vector<64x32xf32>
    %94 = tpu.matmul %88, %93, %cst_103 {dimension_numbers = #tpu.dot_dimension_numbers<[1], [0], [0], [1], [0, 0, 1, 1], [], []>} : vector<64x32xbf16>, vector<32x32xbf16>, vector<64x32xf32> -> vector<64x32xf32>
    %95 = arith.addf %91, %94 : vector<64x32xf32>
    %96 = arith.addf %82, %95 : vector<64x32xf32>
    %c0_104 = arith.constant 0 : index
    %c2_105 = arith.constant 2 : index
    %c1_106 = arith.constant 1 : index
    %c0_107 = arith.constant 0 : index
    %97 = vector.load %arg1[%c0_104, %c2_105, %c1_106, %c0_107] : memref<1x10x10x32xbf16, #tpu.memory_space<vmem>>, vector<1x8x8x32xbf16>
    %98 = vector.shape_cast %97 : vector<1x8x8x32xbf16> to vector<8x8x32xbf16>
    %99 = vector.shape_cast %98 : vector<8x8x32xbf16> to vector<64x32xbf16>
    %c0_108 = arith.constant 0 : index
    %c2_109 = arith.constant 2 : index
    %c1_110 = arith.constant 1 : index
    %c0_111 = arith.constant 0 : index
    %100 = vector.load %arg2[%c0_108, %c2_109, %c1_110, %c0_111] : memref<1x10x10x32xbf16, #tpu.memory_space<vmem>>, vector<1x8x8x32xbf16>
    %101 = vector.shape_cast %100 : vector<1x8x8x32xbf16> to vector<8x8x32xbf16>
    %102 = vector.shape_cast %101 : vector<8x8x32xbf16> to vector<64x32xbf16>
    %c7 = arith.constant 7 : index
    %c0_112 = arith.constant 0 : index
    %c0_113 = arith.constant 0 : index
    %103 = vector.load %arg3[%c7, %c0_112, %c0_113] : memref<9x32x32xbf16, #tpu.memory_space<vmem>>, vector<1x32x32xbf16>
    %104 = vector.shape_cast %103 : vector<1x32x32xbf16> to vector<32x32xbf16>
    %cst_114 = arith.constant dense<0.000000e+00> : vector<64x32xf32>
    %105 = tpu.matmul %99, %104, %cst_114 {dimension_numbers = #tpu.dot_dimension_numbers<[1], [0], [0], [1], [0, 0, 1, 1], [], []>} : vector<64x32xbf16>, vector<32x32xbf16>, vector<64x32xf32> -> vector<64x32xf32>
    %c7_115 = arith.constant 7 : index
    %c0_116 = arith.constant 0 : index
    %c0_117 = arith.constant 0 : index
    %106 = vector.load %arg4[%c7_115, %c0_116, %c0_117] : memref<9x32x32xbf16, #tpu.memory_space<vmem>>, vector<1x32x32xbf16>
    %107 = vector.shape_cast %106 : vector<1x32x32xbf16> to vector<32x32xbf16>
    %cst_118 = arith.constant dense<0.000000e+00> : vector<64x32xf32>
    %108 = tpu.matmul %102, %107, %cst_118 {dimension_numbers = #tpu.dot_dimension_numbers<[1], [0], [0], [1], [0, 0, 1, 1], [], []>} : vector<64x32xbf16>, vector<32x32xbf16>, vector<64x32xf32> -> vector<64x32xf32>
    %109 = arith.addf %105, %108 : vector<64x32xf32>
    %110 = arith.addf %96, %109 : vector<64x32xf32>
    %c0_119 = arith.constant 0 : index
    %c2_120 = arith.constant 2 : index
    %c2_121 = arith.constant 2 : index
    %c0_122 = arith.constant 0 : index
    %111 = vector.load %arg1[%c0_119, %c2_120, %c2_121, %c0_122] : memref<1x10x10x32xbf16, #tpu.memory_space<vmem>>, vector<1x8x8x32xbf16>
    %112 = vector.shape_cast %111 : vector<1x8x8x32xbf16> to vector<8x8x32xbf16>
    %113 = vector.shape_cast %112 : vector<8x8x32xbf16> to vector<64x32xbf16>
    %c0_123 = arith.constant 0 : index
    %c2_124 = arith.constant 2 : index
    %c2_125 = arith.constant 2 : index
    %c0_126 = arith.constant 0 : index
    %114 = vector.load %arg2[%c0_123, %c2_124, %c2_125, %c0_126] : memref<1x10x10x32xbf16, #tpu.memory_space<vmem>>, vector<1x8x8x32xbf16>
    %115 = vector.shape_cast %114 : vector<1x8x8x32xbf16> to vector<8x8x32xbf16>
    %116 = vector.shape_cast %115 : vector<8x8x32xbf16> to vector<64x32xbf16>
    %c8 = arith.constant 8 : index
    %c0_127 = arith.constant 0 : index
    %c0_128 = arith.constant 0 : index
    %117 = vector.load %arg3[%c8, %c0_127, %c0_128] : memref<9x32x32xbf16, #tpu.memory_space<vmem>>, vector<1x32x32xbf16>
    %118 = vector.shape_cast %117 : vector<1x32x32xbf16> to vector<32x32xbf16>
    %cst_129 = arith.constant dense<0.000000e+00> : vector<64x32xf32>
    %119 = tpu.matmul %113, %118, %cst_129 {dimension_numbers = #tpu.dot_dimension_numbers<[1], [0], [0], [1], [0, 0, 1, 1], [], []>} : vector<64x32xbf16>, vector<32x32xbf16>, vector<64x32xf32> -> vector<64x32xf32>
    %c8_130 = arith.constant 8 : index
    %c0_131 = arith.constant 0 : index
    %c0_132 = arith.constant 0 : index
    %120 = vector.load %arg4[%c8_130, %c0_131, %c0_132] : memref<9x32x32xbf16, #tpu.memory_space<vmem>>, vector<1x32x32xbf16>
    %121 = vector.shape_cast %120 : vector<1x32x32xbf16> to vector<32x32xbf16>
    %cst_133 = arith.constant dense<0.000000e+00> : vector<64x32xf32>
    %122 = tpu.matmul %116, %121, %cst_133 {dimension_numbers = #tpu.dot_dimension_numbers<[1], [0], [0], [1], [0, 0, 1, 1], [], []>} : vector<64x32xbf16>, vector<32x32xbf16>, vector<64x32xf32> -> vector<64x32xf32>
    %123 = arith.addf %119, %122 : vector<64x32xf32>
    %124 = arith.addf %110, %123 : vector<64x32xf32>
    %c0_134 = arith.constant 0 : index
    %c0_135 = arith.constant 0 : index
    %125 = vector.load %arg5[%c0_134, %c0_135] : memref<1x32xf32, #tpu.memory_space<vmem>>, vector<1x32xf32>
    %126 = vector.broadcast %125 : vector<1x32xf32> to vector<64x32xf32>
    %127 = arith.addf %124, %126 : vector<64x32xf32>
    %cst_136 = arith.constant 0.000000e+00 : f32
    %128 = vector.broadcast %cst_136 : f32 to vector<64x32xf32>
    %129 = arith.maximumf %127, %128 : vector<64x32xf32>
    %130 = arith.truncf %129 : vector<64x32xf32> to vector<64x32xbf16>
    %c0_137 = arith.constant 0 : index
    %c0_138 = arith.constant 0 : index
    %131 = vector.load %arg6[%c0_137, %c0_138] : memref<32x128xbf16, #tpu.memory_space<vmem>>, vector<32x128xbf16>
    %cst_139 = arith.constant dense<0.000000e+00> : vector<64x128xf32>
    %132 = tpu.matmul %130, %131, %cst_139 {dimension_numbers = #tpu.dot_dimension_numbers<[1], [0], [0], [1], [0, 0, 1, 1], [], []>} : vector<64x32xbf16>, vector<32x128xbf16>, vector<64x128xf32> -> vector<64x128xf32>
    %c0_140 = arith.constant 0 : index
    %c0_141 = arith.constant 0 : index
    %133 = vector.load %arg7[%c0_140, %c0_141] : memref<1x128xf32, #tpu.memory_space<vmem>>, vector<1x128xf32>
    %134 = vector.broadcast %133 : vector<1x128xf32> to vector<64x128xf32>
    %135 = arith.addf %132, %134 : vector<64x128xf32>
    %c0_142 = arith.constant 0 : index
    %c0_143 = arith.constant 0 : index
    %c0_144 = arith.constant 0 : index
    %136 = vector.load %arg8[%c0_142, %c0_143, %c0_144] : memref<1x64x128xf32, #tpu.memory_space<vmem>>, vector<1x64x128xf32>
    %137 = vector.shape_cast %136 : vector<1x64x128xf32> to vector<64x128xf32>
    %138 = vector.shape_cast %135 : vector<64x128xf32> to vector<1x64x128xf32>
    tpu.vector_store %arg8[%c0_142, %c0_143, %c0_144], %138 {strides = array<i32>} : memref<1x64x128xf32, #tpu.memory_space<vmem>>, vector<1x64x128xf32>,
    return
  }
  func.func @transform_0(%arg0: i32) -> (i32, i32, i32, i32) {
    %c0_i32 = arith.constant 0 : i32
    %c0_i32_0 = arith.constant 0 : i32
    %c0_i32_1 = arith.constant 0 : i32
    %c0_i32_2 = arith.constant 0 : i32
    return %arg0, %c0_i32, %c0_i32_0, %c0_i32_1 : i32, i32, i32, i32
  }
  func.func @transform_1(%arg0: i32) -> (i32, i32, i32, i32) {
    %c0_i32 = arith.constant 0 : i32
    %c0_i32_0 = arith.constant 0 : i32
    %c0_i32_1 = arith.constant 0 : i32
    %c0_i32_2 = arith.constant 0 : i32
    return %arg0, %c0_i32, %c0_i32_0, %c0_i32_1 : i32, i32, i32, i32
  }
  func.func @transform_2(%arg0: i32) -> (i32, i32, i32) {
    %c0_i32 = arith.constant 0 : i32
    %c0_i32_0 = arith.constant 0 : i32
    %c0_i32_1 = arith.constant 0 : i32
    %c0_i32_2 = arith.constant 0 : i32
    return %c0_i32, %c0_i32_0, %c0_i32_1 : i32, i32, i32
  }
  func.func @transform_3(%arg0: i32) -> (i32, i32, i32) {
    %c0_i32 = arith.constant 0 : i32
    %c0_i32_0 = arith.constant 0 : i32
    %c0_i32_1 = arith.constant 0 : i32
    %c0_i32_2 = arith.constant 0 : i32
    return %c0_i32, %c0_i32_0, %c0_i32_1 : i32, i32, i32
  }
  func.func @transform_4(%arg0: i32) -> (i32, i32) {
    %c0_i32 = arith.constant 0 : i32
    %c0_i32_0 = arith.constant 0 : i32
    %c0_i32_1 = arith.constant 0 : i32
    return %c0_i32, %c0_i32_0 : i32, i32
  }
  func.func @transform_5(%arg0: i32) -> (i32, i32) {
    %c0_i32 = arith.constant 0 : i32
    %c0_i32_0 = arith.constant 0 : i32
    %c0_i32_1 = arith.constant 0 : i32
    return %c0_i32, %c0_i32_0 : i32, i32
  }
  func.func @transform_6(%arg0: i32) -> (i32, i32) {
    %c0_i32 = arith.constant 0 : i32
    %c0_i32_0 = arith.constant 0 : i32
    %c0_i32_1 = arith.constant 0 : i32
    return %c0_i32, %c0_i32_0 : i32, i32
  }
  func.func @transform_7(%arg0: i32) -> (i32, i32, i32) {
    %c0_i32 = arith.constant 0 : i32
    %c0_i32_0 = arith.constant 0 : i32
    %c0_i32_1 = arith.constant 0 : i32
    return %arg0, %c0_i32, %c0_i32_0 : i32, i32, i32
  }
}

</mosaic_0001>

<bundles_post_ra>
// kernel: _lambda_.3
= control target key start
LH: loop header
LB: loop body
LE: loop exit
PB: predicated region body
PF: predicated region fallthrough
CT: control target
= control target key end

     0   :  { %9 = vsyncpa [#allocation3], 0  ;;  %s588_s0 = inlined_call_operand.hbm [shape: bf16[2,64], index: 0, kind: input, shape index: {}]   ;;  %s589_s1 = inlined_call_operand.hbm [shape: bf16[64,160], index: 1, kind: input, shape index: {}]   ;;  %s590_s2 = inlined_call_operand.hbm [shape: f32[1,160], index: 2, kind: input, shape index: {}]   ;;  %s591_s3 = inlined_call_operand.hbm [shape: bf16[160,32], index: 3, kind: input, shape index: {}]   ;;  %s592_s4 = inlined_call_operand.hbm [shape: f32[2,32], index: 4, kind: output, shape index: {}]  }
   0x1   :  { %10 = vsyncpa [#allocation6], 0 }
   0x2   :  { %11 = vsyncpa [#allocation9], 0 }
   0x3   :  { %12 = vsyncpa [#allocation4], 0  ;;  %s493_s15 = smov [#allocation5]   ;;  %s375_s19 = scalar_lea.hbm %s589_s1, 1024 }
   0x4   :  { %s28_s16 = sshll.u32 %s493_s15, 4  ;;  %p376_p0 = scmp.ne.s32.totalorder %s589_s1, %s375_s19  ;;  %s29_s16 = int_to_ptr.vmem [resolvable:$true] %s28_s16 }
   0x5   :  { %p379_p1 = scmp.lt.u32.totalorder %s375_s19, %s589_s1 }
   0x7   :  { %p381_p2 = pnand %p379_p1, %p376_p0 }
   0x9   :  { %384 = shalt.err (!%p381_p2)
}
   0xa   :  { %s385_s24 = scalar_lea.vmem %s29_s16, 1024  ;;  %p390_p4 = scmp.lt.s32.totalorder %s29_s16, %s29_s16 }
   0xb   :  { %p386_p3 = scmp.ne.s32.totalorder %s29_s16, %s385_s24  ;;  %p391_p5 = scmp.lt.s32.totalorder %s385_s24, %s385_s24 }
   0xd   :  { %p392_p6 = por %p391_p5, %p390_p4 }
   0xf   :  { %p393_p7 = pnand %p392_p6, %p386_p3 }
  0x11   :  { %396 = shalt.err (!%p393_p7)
}
  0x12   :  { %s494_s25 = smov 128   ;;  %s495_s26 = smov 8  }
  0x13   :  { %34 = dma.hbm_to_vmem [thread:$0]  %s589_s1, 1024, %s29_s16, [#allocation6], %s494_s25, %s494_s25, %s495_s26  }
  0x14   :  { %s496_s29 = smov [#allocation2]   ;;  %s497_s5 = smov [#allocation7]  }
  0x15   :  { %s19_s30 = sshll.u32 %s496_s29, 4  ;;  %s41_s6 = sshll.u32 %s497_s5, 4  ;;  %s20_s30 = int_to_ptr.vmem [resolvable:$true] %s19_s30  ;;  %s42_s6 = int_to_ptr.vmem [resolvable:$true] %s41_s6 }
  0x16   :  { %s397_s9 = scalar_lea.hbm %s588_s0, 16 }
  0x17   :  { %p398_p8 = scmp.ne.s32.totalorder %s588_s0, %s397_s9  ;;  %p401_p9 = scmp.lt.u32.totalorder %s397_s9, %s588_s0 }
  0x19   :  { %p403_p10 = pnand %p401_p9, %p398_p8 }
  0x1b   :  { %406 = shalt.err (!%p403_p10)
}
  0x1c   :  { %s407_s1 = scalar_lea.vmem %s20_s30, 16  ;;  %s411_s14 = scalar_lea.vmem %s20_s30, 32 }
  0x1d   :  { %p408_p11 = scmp.ne.s32.totalorder %s20_s30, %s407_s1  ;;  %p412_p12 = scmp.lt.s32.totalorder %s20_s30, %s20_s30 }
  0x1e   :  { %p413_p13 = scmp.lt.s32.totalorder %s411_s14, %s407_s1 }
  0x20   :  { %p414_p0 = por %p413_p13, %p412_p12 }
  0x22   :  { %p415_p1 = pnand %p414_p0, %p408_p11 }
  0x24   :  { %418 = shalt.err (!%p415_p1)
}
  0x25   :  { %22 = dma.hbm_to_vmem [thread:$0]  %s588_s0, 16, %s20_s30, [#allocation3]  }
  0x26   :  { %s419_s19 = scalar_lea.hbm %s590_s2, 32 }
  0x27   :  { %p420_p2 = scmp.ne.s32.totalorder %s590_s2, %s419_s19  ;;  %p423_p3 = scmp.lt.u32.totalorder %s419_s19, %s590_s2 }
  0x29   :  { %p425_p4 = pnand %p423_p3, %p420_p2 }
  0x2b   :  { %428 = shalt.err (!%p425_p4)
}
  0x2c   :  { %s429_s24 = scalar_lea.vmem %s42_s6, 32  ;;  %p434_p6 = scmp.lt.s32.totalorder %s42_s6, %s42_s6 }
  0x2d   :  { %p430_p5 = scmp.ne.s32.totalorder %s42_s6, %s429_s24  ;;  %p435_p7 = scmp.lt.s32.totalorder %s429_s24, %s429_s24 }
  0x2f   :  { %p436_p8 = por %p435_p7, %p434_p6 }
  0x31   :  { %p437_p9 = pnand %p436_p8, %p430_p5 }
  0x33   :  { %440 = shalt.err (!%p437_p9)
}
  0x34   :  { %44 = dma.hbm_to_vmem [thread:$0]  %s590_s2, 32, %s42_s6, [#allocation6]  }
  0x35   :  { %s498_s26 = smov [#allocation8]   ;;  %s441_s30 = scalar_lea.hbm %s591_s3, 1280 }
  0x36   :  { %s50_s27 = sshll.u32 %s498_s26, 4  ;;  %p442_p10 = scmp.ne.s32.totalorder %s591_s3, %s441_s30  ;;  %s51_s27 = int_to_ptr.vmem [resolvable:$true] %s50_s27 }
  0x37   :  { %p445_p11 = scmp.lt.u32.totalorder %s441_s30, %s591_s3 }
  0x39   :  { %p447_p12 = pnand %p445_p11, %p442_p10 }
  0x3b   :  { %450 = shalt.err (!%p447_p12)
}
  0x3c   :  { %s451_s10 = scalar_lea.vmem %s51_s27, 1280  ;;  %p456_p0 = scmp.lt.s32.totalorder %s51_s27, %s51_s27 }
  0x3d   :  { %p452_p13 = scmp.ne.s32.totalorder %s51_s27, %s451_s10  ;;  %p457_p1 = scmp.lt.s32.totalorder %s451_s10, %s451_s10 }
  0x3f   :  { %p458_p2 = por %p457_p1, %p456_p0 }
  0x41   :  { %p459_p3 = pnand %p458_p2, %p452_p13 }
  0x43   :  { %462 = shalt.err (!%p459_p3)
}
  0x44   :  { %s499_s2 = smov 64   ;;  %s500_s6 = smov 4  }
  0x45   :  { %56 = dma.hbm_to_vmem [thread:$0]  %s591_s3, 1280, %s51_s27, [#allocation9], %s499_s2, %s499_s2, %s500_s6  }
  0x46   :  { %485 = dma.done.wait [#allocation3], 16  }
  0x47   :  { %486 = vsyncadd [#allocation3], 4294967280 }
  0x48   :  { %487 = dma.done.wait [#allocation6], 1056  }
  0x49   :  { %488 = vsyncadd [#allocation6], 4294966240 }
  0x4a   :  { %489 = dma.done.wait [#allocation9], 1280  }
  0x4b   :  { %490 = vsyncadd [#allocation9], 4294966016  ;;  %v501_v0 = vmov 0   ;;  %v353_v1 = vld [vmem:[#allocation5 + $0x4] ss:$8 sps:$4 sm:$0xff]   ;;  %v367_v11 = vld [vmem:[#allocation8 + $0x10] sm:$0xff]   ;;  %v81_v20 = vlaneseq }
  0x4c   :  { %167 = vmatprep.mubr.bf16.mxu0 %v501_v0  ;;  %264 = vmatprep.subr.bf16.mxu1 %v501_v0  ;;  %v355_v2 = vld [vmem:[#allocation5] ss:$8 sps:$4 sm:$0xff]   ;;  %v356_v3 = vld [vmem:[#allocation5 + $0x14] ss:$8 sps:$4 sm:$0xff]   ;;  %v358_v4 = vld [vmem:[#allocation5 + $0x10] ss:$8 sps:$4 sm:$0xff]  }
  0x4d   :  { %135 = vmatprep.subr.bf16.mxu0 %v353_v1  ;;  %v359_v5 = vld [vmem:[#allocation5 + $0x24] ss:$8 sps:$4 sm:$0xff]   ;;  %v361_v6 = vld [vmem:[#allocation5 + $0x20] ss:$8 sps:$4 sm:$0xff]   ;;  %v362_v8 = vld [vmem:[#allocation5 + $0x34] ss:$8 sps:$4 sm:$0xff]  }
  0x4e   :  { %136 = vmatpush1.bf16.msra.mxu0 %v355_v2  ;;  %v365_v7 = vld [vmem:[#allocation8] sm:$0xff]   ;;  %v366_v9 = vld [vmem:[#allocation8 + $0x8] sm:$0xff]   ;;  %v70_v12 = vld [vmem:[#allocation2] sm:$0x1]  ;;  %vm131_vm0 = vcmask 523264   ;;  %v82_v21 = vshrl.u32 %v81_v20, 7 }
  0x4f   :  { %137 = vmatprep.subr.bf16.mxu0 %v356_v3  ;;  %265 = vmatpush1.bf16.msra.mxu1 %v365_v7  ;;  %v364_v10 = vld [vmem:[#allocation5 + $0x30] ss:$8 sps:$4 sm:$0xff]   ;;  %v369_v14 = vld [vmem:[#allocation8 + $0x20] sm:$0xff]   ;;  %v79_v23 = vld [vmem:[#allocation7] sm:$0x3]  ;;  %vm260_vm1 = vcmask 261120  }
  0x50   :  { %266 = vmatprep.subr.bf16.mxu1 %v501_v0  ;;  %v368_v13 = vld [vmem:[#allocation8 + $0x18] sm:$0xff]   ;;  %v370_v15 = vld [vmem:[#allocation8 + $0x28] sm:$0xff]   ;;  %v371_v16 = vld [vmem:[#allocation8 + $0x30] sm:$0xff]   ;;  %v83_v22 = vsub.s32 0, %v82_v21  ;;  %v87_v24 = vsub.s32 1, %v82_v21  ;;  %s502_s3 = smov [#allocation10]  }
  0x51   :  { %v372_v17 = vld [vmem:[#allocation8 + $0x38] sm:$0xff]   ;;  %v373_v18 = vld [vmem:[#allocation8 + $0x40] sm:$0xff]   ;;  %v374_v19 = vld [vmem:[#allocation8 + $0x48] sm:$0xff]   ;;  %s312_s13 = sshll.u32 %s502_s3, 4  ;;  %vm304_vm2 = vcmask 254976   ;;  %s313_s13 = int_to_ptr.vmem [resolvable:$true] %s312_s13 }
  0x52   :  { %138 = vmatpush1.bf16.msra.mxu0 %v358_v4  ;;  %v84_v25 = vrot.slane %v79_v23, %v83_v22  ;;  %v88_v26 = vrot.slane %v79_v23, %v87_v24  ;;  %s463_s1 = scalar_lea.vmem %s313_s13, 32  ;;  %p468_p5 = scmp.lt.s32.totalorder %s313_s13, %s313_s13 }
  0x53   :  { %139 = vmatprep.subr.bf16.mxu0 %v359_v5  ;;  %267 = vmatpush1.bf16.msra.mxu1 %v366_v9  ;;  %p464_p4 = scmp.ne.s32.totalorder %s313_s13, %s463_s1  ;;  %p469_p6 = scmp.lt.s32.totalorder %s463_s1, %s463_s1 }
  0x54   :  { %268 = vmatprep.subr.bf16.mxu1 %v501_v0 }
  0x55   :  { %p470_p7 = por %p469_p6, %p468_p5 }
  0x56   :  { %140 = vmatpush1.bf16.msra.mxu0 %v361_v6 }
  0x57   :  { %141 = vmatprep.subr.bf16.mxu0 %v362_v8  ;;  %269 = vmatpush1.bf16.msra.mxu1 %v367_v11  ;;  %p471_p8 = pnand %p470_p7, %p464_p4 }
  0x58   :  { %270 = vmatprep.subr.bf16.mxu1 %v501_v0 }
  0x5a   :  { %142 = vmatpush1.bf16.msra.mxu0 %v364_v10 }
  0x5b   :  { %271 = vmatpush1.bf16.msra.mxu1 %v368_v13 }
  0x5c   :  { %272 = vmatprep.subr.bf16.mxu1 %v501_v0 }
  0x5d   :  { %331 = vmatmul.mubr.msk.bf16.vlgmr.msra.gmra.mrb[0].mxu0 %vm131_vm0, %v70_v12 }
  0x5f   :  { %273 = vmatpush1.bf16.msra.mxu1 %v369_v14 }
  0x60   :  { %274 = vmatprep.subr.bf16.mxu1 %v501_v0 }
  0x63   :  { %275 = vmatpush1.bf16.msra.mxu1 %v370_v15 }
  0x64   :  { %276 = vmatprep.subr.bf16.mxu1 %v501_v0 }
  0x67   :  { %277 = vmatpush1.bf16.msra.mxu1 %v371_v16 }
  0x68   :  { %278 = vmatprep.subr.bf16.mxu1 %v501_v0 }
  0x6b   :  { %279 = vmatpush1.bf16.msra.mxu1 %v372_v17 }
  0x6c   :  { %280 = vmatprep.subr.bf16.mxu1 %v501_v0 }
  0x6f   :  { %281 = vmatpush1.bf16.msra.mxu1 %v373_v18 }
  0x70   :  { %282 = vmatprep.subr.bf16.mxu1 %v501_v0 }
  0x73   :  { %283 = vmatpush1.bf16.msra.mxu1 %v374_v19 }
 0x130   :  { %v169_v27 = vpop.f32.mrb[0].mxu0 }
 0x131   :  { %v170_v28 = vadd.f32 %v169_v27, %v84_v25  ;;  %v171_v29 = vpop.f32.mrb[1].mxu0 }
 0x132   :  { %v172_v30 = vadd.f32 %v171_v29, %v88_v26  ;;  %v173_v31 = vpop.f32.mrb[2].mxu0 }
 0x133   :  { %v176_v32 = vmax.f32 %v170_v28, 0.0  ;;  %v174_v33 = vpop.f32.mrb[3].mxu0 }
 0x134   :  { %v177_v34 = vmax.f32 %v172_v30, 0.0 }
 0x135   :  { %v178_v36 = vpack.c.bf16 %v176_v32, %v176_v32 }
 0x136   :  { %v179_v35 = vpack.c.bf16 %v177_v34, %v177_v34 }
 0x138   :  { %342 = vmatprep.mubr.msk.bf16.mxu1 %vm260_vm1, %v179_v35 }
 0x139   :  { %297 = vmatmul.mubr.bf16.vlgmr.msra.gmra.mrb[0].mxu1 %v178_v36 }
 0x20c   :  { %v298_v37 = vpop.f32.mrb[0].mxu1 }
 0x20d   :  { %v300_v38 = vpop.f32.mrb[1].mxu1  ;;  %305 = vst.msk [vmem:[#allocation10] sm:$0x3] %vm304_vm2, %v298_v37 }
 0x20e   :  { %v301_v39 = vpop.f32.mrb[2].mxu1 }
 0x20f   :  { %474 = shalt.err (!%p471_p8)
}
 0x210   :  { %s475_s16 = scalar_lea.hbm %s592_s4, 32 }
 0x211   :  { %p476_p9 = scmp.ne.s32.totalorder %s592_s4, %s475_s16  ;;  %p479_p10 = scmp.lt.u32.totalorder %s475_s16, %s592_s4 }
 0x213   :  { %p481_p11 = pnand %p479_p10, %p476_p9 }
 0x215   :  { %484 = shalt.err (!%p481_p11)
}
 0x216   :  { %315 = dma.vmem_to_hbm [thread:$0]  %s313_s13, 32, %s592_s4, [#allocation4]   ;;  %v302_v40 = vpop.f32.mrb[3].mxu1 }
 0x217   :  { %491 = dma.done.wait [#allocation4], 32  }
 0x218   :  { %492 = vsyncadd [#allocation4], 4294967264 }
 0x219   :  { %319 = vsyncpa [#allocation3], 1 }
 0x21a   :  { %320 = vsyncpa [#allocation6], 1 }
 0x21b   :  { %321 = vsyncpa [#allocation9], 1 }
 0x21c   :  { %322 = vsyncpa [#allocation4], 1 }

// kernel: _lambda_.5
= control target key start
LH: loop header
LB: loop body
LE: loop exit
PB: predicated region body
PF: predicated region fallthrough
CT: control target
= control target key end

     0   :  { %s6377_s0 = inlined_call_operand.hbm [shape: bf16[2,10,10,32], index: 0, kind: input, shape index: {}]   ;;  %s6378_s1 = inlined_call_operand.hbm [shape: bf16[2,10,10,32], index: 1, kind: input, shape index: {}]   ;;  %s6379_s2 = inlined_call_operand.hbm [shape: bf16[9,32,32], index: 2, kind: input, shape index: {}]   ;;  %s6380_s3 = inlined_call_operand.hbm [shape: bf16[9,32,32], index: 3, kind: input, shape index: {}]   ;;  %s6381_s4 = inlined_call_operand.hbm [shape: f32[1,32], index: 4, kind: input, shape index: {}]   ;;  %s6382_s5 = inlined_call_operand.hbm [shape: bf16[32,128], index: 5, kind: input, shape index: {}]   ;;  %s6383_s6 = inlined_call_operand.hbm [shape: f32[1,128], index: 6, kind: input, shape index: {}]   ;;  %s6384_s7 = inlined_call_operand.hbm [shape: f32[2,64,128], index: 7, kind: output, shape index: {}]  }
   0x1   :  { %6393 = sst [smem:[#allocation21_spill]] %s6377_s0 }
   0x2   :  { %6394 = sst [smem:[#allocation22_spill]] %s6379_s2 }
   0x3   :  { %6395 = sst [smem:[#allocation23_spill]] %s6380_s3 }
   0x4   :  { %6396 = sst [smem:[#allocation24_spill]] %s6381_s4 }
   0x5   :  { %12 = vsyncpa [#allocation3], 0 }
   0x6   :  { %14 = vsyncpa [#allocation3 + $0x1], 0 }
   0x7   :  { %15 = vsyncpa [#allocation6], 0 }
   0x8   :  { %17 = vsyncpa [#allocation6 + $0x1], 0 }
   0x9   :  { %18 = vsyncpa [#allocation9], 0 }
   0xa   :  { %19 = vsyncpa [#allocation12], 0 }
   0xb   :  { %20 = vsyncpa [#allocation4], 0 }
   0xc   :  { %22 = vsyncpa [#allocation4 + $0x1], 0  ;;  %s5261_s24 = smov 0   ;;  %s5263_s25 = smov 0  }
   0xd   :  { %s5265_s26 = smov 0   ;;  %s5267_s27 = smov 0  }
   0xe LB: > { %s5209_s28 = smov [#allocation7]   ;;  %s5282_s30 = sadd.s32 4294967295, %s5207_s27   ;;  %s5207_s27 = sphi %s5267_s27, %s6430_s27   ;;  %s5203_s26 = sphi %s5265_s26, %s6429_s26   ;;  %s5199_s25 = sphi %s5263_s25, %s6428_s25   ;;  %s5195_s24 = sphi %s5261_s24, %s6427_s24  }
   0xf   : > { %s228_s29 = sshll.u32 %s5209_s28, 4  ;;  %p3880_p0 = scmp.ge.s32.totalorder %s5207_s27, 1  ;;  %s5287_s29 = int_to_ptr.vmem [resolvable:$true] %s228_s29 }
  0x10   : > { %p6385_p1 = scmp.eq.s32.totalorder %s5282_s30, 0  ;;  %p216_p2 = scmp.lt.s32.totalorder %s5207_s27, 3 }
  0x11   : > { %s5210_s9 = smov [#allocation8]   ;;  %s5211_s12 = smov [#allocation11]  }
  0x12   : > { %p5289_p3 = pnand %p3880_p0, %p216_p2  ;;  %s241_s10 = sshll.u32 %s5210_s9, 4  ;;  %s5302_s10 = int_to_ptr.vmem [resolvable:$true] %s241_s10 }
  0x13   : > { %s265_s13 = sshll.u32 %s5211_s12, 4  ;;  %s6399_s2 = sld [smem:[#allocation22_spill]]  ;;  %s5304_s13 = int_to_ptr.vmem [resolvable:$true] %s265_s13 }
  0x14   : > { %s6397_s8 = scalar_select %p5289_p3, 1, 0 }
  0x15   : > { %p4779_p5 = pneg %p5289_p3 }
  0x17   : > { %p5298_p6 = pnand %p4779_p5, %p6385_p1 }
  0x19   : > { %s4925_s16 = scalar_lea.hbm %s6399_s2, 2304  ;;  %p5314_p8 = pneg %p5298_p6 }
  0x1a   : > { %p4926_p7 = scmp.ne.s32.totalorder %s6399_s2, %s4925_s16  ;;  %p4932_p11 = scmp.lt.u32.totalorder %s4925_s16, %s6399_s2 }
  0x1c   : > { %p4928_p9 = pnand %p5314_p8, %p4926_p7 }
  0x1e   : > { %p4929_p10 = pneg %p4928_p9 }
  0x20   : > { %p4934_p12 = pnand %p4932_p11, %p4929_p10 }
  0x22   : > { %4937 = shalt.err (!%p4934_p12)
}
  0x23   : > { %s4938_s22 = scalar_lea.vmem %s5287_s29, 2304  ;;  %p4946_p5 = scmp.lt.s32.totalorder %s5287_s29, %s5287_s29 }
  0x24   : > { %p4939_p13 = scmp.ne.s32.totalorder %s5287_s29, %s4938_s22  ;;  %p4947_p4 = scmp.lt.s32.totalorder %s4938_s22, %s4938_s22 }
  0x26   : > { %p4941_p0 = pnand %p4939_p13, %p5314_p8  ;;  %p4948_p7 = por %p4947_p4, %p4946_p5 }
  0x28   : > { %p4942_p2 = pneg %p4941_p0 }
  0x2a   : > { %p4949_p9 = pnand %p4948_p7, %p4942_p2 }
  0x2c   : > { %4952 = shalt.err (!%p4949_p9)
}
  0x2d   : > { %s6387_s23 = smov 64   ;;  %s6389_s28 = smov 4  }
  0x2e   : > { %4782 = dma.hbm_to_vmem [thread:$0]  (!%p5298_p6), %s6399_s2, 2304, %s5287_s29, [#allocation6], %s6387_s23, %s6387_s23, %s6389_s28  }
  0x2f   : > { %s6401_s3 = sld [smem:[#allocation23_spill]] }
  0x35   : > { %s4953_s16 = scalar_lea.hbm %s6401_s3, 2304 }
  0x36   : > { %p4954_p4 = scmp.ne.s32.totalorder %s6401_s3, %s4953_s16  ;;  %p4960_p12 = scmp.lt.u32.totalorder %s4953_s16, %s6401_s3 }
  0x38   : > { %p4956_p10 = pnand %p4954_p4, %p5314_p8 }
  0x3a   : > { %p4957_p11 = pneg %p4956_p10 }
  0x3c   : > { %p4962_p13 = pnand %p4960_p12, %p4957_p11 }
  0x3e   : > { %4965 = shalt.err (!%p4962_p13)
}
  0x3f   : > { %s4966_s29 = scalar_lea.vmem %s5302_s10, 2304  ;;  %p4974_p7 = scmp.lt.s32.totalorder %s5302_s10, %s5302_s10 }
  0x40   : > { %p4967_p0 = scmp.ne.s32.totalorder %s5302_s10, %s4966_s29  ;;  %p4975_p9 = scmp.lt.s32.totalorder %s4966_s29, %s4966_s29 }
  0x42   : > { %p4969_p2 = pnand %p4967_p0, %p5314_p8  ;;  %p4976_p4 = por %p4975_p9, %p4974_p7 }
  0x44   : > { %p4970_p5 = pneg %p4969_p2 }
  0x46   : > { %p4977_p10 = pnand %p4976_p4, %p4970_p5 }
  0x48   : > { %4980 = shalt.err (!%p4977_p10)
}
  0x49   : > { %4785 = dma.hbm_to_vmem [thread:$0]  (!%p5298_p6), %s6401_s3, 2304, %s5302_s10, [#allocation9], %s6387_s23, %s6387_s23, %s6389_s28  }
  0x4a   : > { %s4981_s15 = scalar_lea.hbm %s6382_s5, 256 }
  0x4b   : > { %p4982_p11 = scmp.ne.s32.totalorder %s6382_s5, %s4981_s15  ;;  %p4988_p0 = scmp.lt.u32.totalorder %s4981_s15, %s6382_s5 }
  0x4d   : > { %p4984_p12 = pnand %p4982_p11, %p5314_p8 }
  0x4f   : > { %p4985_p13 = pneg %p4984_p12 }
  0x51   : > { %p4990_p2 = pnand %p4988_p0, %p4985_p13 }
  0x53   : > { %4993 = shalt.err (!%p4990_p2)
}
  0x54   : > { %s4994_s10 = scalar_lea.vmem %s5304_s13, 256  ;;  %p5002_p4 = scmp.lt.s32.totalorder %s5304_s13, %s5304_s13 }
  0x55   : > { %p4995_p5 = scmp.ne.s32.totalorder %s5304_s13, %s4994_s10  ;;  %p5003_p10 = scmp.lt.s32.totalorder %s4994_s10, %s4994_s10 }
  0x57   : > { %p4997_p7 = pnand %p4995_p5, %p5314_p8  ;;  %p5004_p11 = por %p5003_p10, %p5002_p4 }
  0x59   : > { %p4998_p9 = pneg %p4997_p7 }
  0x5b   : > { %p5005_p12 = pnand %p5004_p11, %p4998_p9 }
  0x5d   : > { %5008 = shalt.err (!%p5005_p12)
}
  0x5e   : > { %4791 = dma.hbm_to_vmem [thread:$0]  (!%p5298_p6), %s6382_s5, 256, %s5304_s13, [#allocation12], %s6387_s23, %s6387_s23, %s6389_s28  }
  0x5f   : > { %s5214_s22 = smov [#allocation10]   ;;  %s5215_s12 = smov [#allocation13]  }
  0x60   : > { %s255_s9 = sshll.u32 %s5214_s22, 4  ;;  %s279_s14 = sshll.u32 %s5215_s12, 4  ;;  %s256_s9 = int_to_ptr.vmem [resolvable:$true] %s255_s9  ;;  %s280_s14 = int_to_ptr.vmem [resolvable:$true] %s279_s14 }
  0x61   : > { %s6402_s4 = sld [smem:[#allocation24_spill]] }
  0x67   : > { %s5009_s17 = scalar_lea.hbm %s6402_s4, 16 }
  0x68   : > { %p5010_p13 = scmp.ne.s32.totalorder %s6402_s4, %s5009_s17  ;;  %p5016_p5 = scmp.lt.u32.totalorder %s5009_s17, %s6402_s4 }
  0x6a   : > { %p5012_p0 = pnand %p5010_p13, %p5314_p8 }
  0x6c   : > { %p5013_p2 = pneg %p5012_p0 }
  0x6e   : > { %p5018_p7 = pnand %p5016_p5, %p5013_p2 }
  0x70   : > { %5021 = shalt.err (!%p5018_p7)
}
  0x71   : > { %s5022_s13 = scalar_lea.vmem %s256_s9, 16  ;;  %s5029_s29 = scalar_lea.vmem %s256_s9, 32 }
  0x72   : > { %p5023_p9 = scmp.ne.s32.totalorder %s256_s9, %s5022_s13  ;;  %p5030_p11 = scmp.lt.s32.totalorder %s256_s9, %s256_s9 }
  0x73   : > { %p5031_p12 = scmp.lt.s32.totalorder %s5029_s29, %s5022_s13 }
  0x74   : > { %p5025_p4 = pnand %p5023_p9, %p5314_p8 }
  0x75   : > { %p5032_p1 = por %p5031_p12, %p5030_p11 }
  0x76   : > { %p5026_p10 = pneg %p5025_p4 }
  0x78   : > { %p5033_p3 = pnand %p5032_p1, %p5026_p10 }
  0x7a   : > { %5036 = shalt.err (!%p5033_p3)
}
  0x7b   : > { %4788 = dma.hbm_to_vmem [thread:$0]  (!%p5298_p6), %s6402_s4, 16, %s256_s9, [#allocation9]  }
  0x7c   : > { %s5037_s17 = scalar_lea.hbm %s6383_s6, 16 }
  0x7d   : > { %p5038_p13 = scmp.ne.s32.totalorder %s6383_s6, %s5037_s17  ;;  %p5044_p3 = scmp.lt.u32.totalorder %s5037_s17, %s6383_s6 }
  0x7f   : > { %p5040_p0 = pnand %p5038_p13, %p5314_p8 }
  0x81   : > { %p5041_p1 = pneg %p5040_p0 }
  0x83   : > { %p5046_p2 = pnand %p5044_p3, %p5041_p1 }
  0x85   : > { %5049 = shalt.err (!%p5046_p2)
}
  0x86   : > { %s5050_s13 = scalar_lea.vmem %s280_s14, 16  ;;  %s5057_s9 = scalar_lea.vmem %s280_s14, 32 }
  0x87   : > { %p5051_p5 = scmp.ne.s32.totalorder %s280_s14, %s5050_s13  ;;  %p5058_p4 = scmp.lt.s32.totalorder %s280_s14, %s280_s14 }
  0x88   : > { %p5059_p10 = scmp.lt.s32.totalorder %s5057_s9, %s5050_s13 }
  0x89   : > { %p5053_p7 = pnand %p5051_p5, %p5314_p8 }
  0x8a   : > { %p5060_p11 = por %p5059_p10, %p5058_p4 }
  0x8b   : > { %p5054_p9 = pneg %p5053_p7 }
  0x8d   : > { %p5061_p12 = pnand %p5060_p11, %p5054_p9 }
  0x8f   : > { %5064 = shalt.err (!%p5061_p12)
}
  0x90   : > { %4794 = dma.hbm_to_vmem [thread:$0]  (!%p5298_p6), %s6383_s6, 16, %s280_s14, [#allocation12]  }
  0x91   : > { %s3879_s19 = sadd.s32 4294967294, %s5207_s27   ;;  %s5428_s11 = sadd.s32 1, %s5207_s27  }
  0x92   : > { %s35_s12 = sadd.s32 1, %s5203_s26  ;;  %s32_s15 = ssub.s32 %s5207_s27, %s5428_s11 }
  0x93   : > { %p42_p8 = scmp.ne.s32.totalorder %s5203_s26, %s5199_s25  ;;  %p33_p13 = scmp.eq.s32.totalorder %s32_s15, 0 }
  0x94   : > { %p43_p0 = scmp.eq.s32.totalorder %s5207_s27, 0  ;;  %p48_p1 = scmp.ne.s32.totalorder %s5199_s25, %s5195_s24 }
  0x95   : > { %p203_p3 = scmp.eq.s32.totalorder %s5282_s30, 1  ;;  %p6403_p5 = scmp.eq.s32.totalorder %s5282_s30, 0 }
  0x96   : > { %s5440_s16 = scalar_select %p33_p13, %s5203_s26, %s35_s12  }
  0x97   : > { %p44_p2 = por %p43_p0, %p42_p8  ;;  %p5444_p6 = por %p6403_p5, %p48_p1 }
  0x98   : > { %p5448_p7 = por %p203_p3, %p42_p8  ;;  %p209_p9 = scmp.eq.s32.totalorder %s3879_s19, 1 }
  0x99   : > { %p4811_p4 = scmp.lt.s32.totalorder %s5207_s27, 2  ;;  %s290_s18 = sand.u32 1, %s5203_s26  }
  0x9a   : > { %s6405_s17 = scalar_select %p5448_p7, 1, 0 }
  0x9b   : > { %p5454_p10 = por %p209_p9, %p48_p1  ;;  %s5458_s10 = smul.u32 80, %s290_s18 }
  0x9c   : > { %p5460_p11 = pnand %p4811_p4, %p44_p2  ;;  %s6391_s13 = smul.u32 1280, %s5207_s27 }
  0x9d   : > { %s6406_s20 = scalar_select %p5454_p10, 1, 0 }
  0x9e   : > { %s6408_s0 = sld [smem:[#allocation21_spill]]  ;;  %s294_s12 = scalar_lea.vmem [#allocation2], %s5458_s10 }
  0x9f   : > { %s301_s15 = sshll.u32 %s294_s12, 4  ;;  %s5476_s23 = scalar_lea.sflag [#allocation3], %s290_s18  ;;  %s5474_s15 = int_to_ptr.vmem [resolvable:$true] %s301_s15 }
  0xa0   : > { %p5067_p8 = pneg %p5460_p11 }
  0xa4   : > { %s5471_s19 = scalar_lea.hbm %s6408_s0, %s6391_s13  ;;  %s5070_s9 = scalar_lea.hbm %s6408_s0, 2560 }
  0xa5   : > { %s5065_s28 = scalar_lea.hbm %s5471_s19, 1280  ;;  %p5071_p1 = scmp.lt.u32.totalorder %s5471_s19, %s6408_s0 }
  0xa6   : > { %p5066_p12 = scmp.ne.s32.totalorder %s5471_s19, %s5065_s28  ;;  %p5072_p3 = scmp.lt.u32.totalorder %s5070_s9, %s5065_s28 }
  0xa7   : > { %p5074_p5 = scmp.lt.u32.totalorder %s5065_s28, %s5471_s19 }
  0xa8   : > { %p5068_p13 = pnand %p5067_p8, %p5066_p12  ;;  %p5073_p2 = por %p5072_p3, %p5071_p1 }
  0xaa   : > { %p5069_p0 = pneg %p5068_p13  ;;  %p5075_p9 = por %p5074_p5, %p5073_p2 }
  0xac   : > { %p5076_p4 = pnand %p5075_p9, %p5069_p0 }
  0xae   : > { %5079 = shalt.err (!%p5076_p4)
}
  0xaf   : > { %s5080_s18 = scalar_lea.vmem %s5474_s15, 1280  ;;  %s5216_s12 = smov [#allocation2]  }
  0xb0   : > { %p5081_p12 = scmp.ne.s32.totalorder %s5474_s15, %s5080_s18  ;;  %s5085_s29 = sshll.u32 %s5216_s12, 4  ;;  %s5086_s29 = int_to_ptr.vmem [resolvable:$false] %s5085_s29 }
  0xb1   : > { %s5087_s2 = scalar_lea.vmem %s5086_s29, 2560  ;;  %p5088_p7 = scmp.lt.s32.totalorder %s5474_s15, %s5086_s29 }
  0xb2   : > { %p5083_p13 = pnand %p5081_p12, %p5067_p8  ;;  %p5089_p1 = scmp.lt.s32.totalorder %s5087_s2, %s5080_s18 }
  0xb4   : > { %p5084_p10 = pneg %p5083_p13  ;;  %p5090_p3 = por %p5089_p1, %p5088_p7 }
  0xb6   : > { %p5091_p2 = pnand %p5090_p3, %p5084_p10 }
  0xb8   : > { %5094 = shalt.err (!%p5091_p2)
}
  0xb9   : > { %s6409_s28 = smov 4   ;;  %s6410_s13 = smov 64  }
  0xba   : > { %4798 = dma.hbm_to_vmem [thread:$0]  (!%p5460_p11), %s5471_s19, 1280, %s5474_s15, %s5476_s23, %s6410_s13, %s6410_s13, %s6409_s28  }
  0xbb   : > { %s6411_s9 = smul.u32 1280, %s5207_s27  ;;  %s315_s29 = scalar_lea.vmem [#allocation5], %s5458_s10 }
  0xbc   : > { %s322_s2 = sshll.u32 %s315_s29, 4  ;;  %s6412_s0 = sand.u32 1, %s5207_s27   ;;  %s5515_s2 = int_to_ptr.vmem [resolvable:$true] %s322_s2 }
  0xbd   : > { %s5512_s18 = scalar_lea.hbm %s6378_s1, %s6411_s9  ;;  %s5519_s3 = scalar_lea.sflag [#allocation6], %s6412_s0 }
  0xbe   : > { %s5095_s4 = scalar_lea.hbm %s5512_s18, 1280  ;;  %s5100_s15 = scalar_lea.hbm %s6378_s1, 2560 }
  0xbf   : > { %p5096_p7 = scmp.ne.s32.totalorder %s5512_s18, %s5095_s4  ;;  %p5101_p5 = scmp.lt.u32.totalorder %s5512_s18, %s6378_s1 }
  0xc0   : > { %p5102_p9 = scmp.lt.u32.totalorder %s5100_s15, %s5095_s4  ;;  %p5104_p12 = scmp.lt.u32.totalorder %s5095_s4, %s5512_s18 }
  0xc1   : > { %p5098_p10 = pnand %p5096_p7, %p5067_p8 }
  0xc2   : > { %p5103_p4 = por %p5102_p9, %p5101_p5 }
  0xc3   : > { %p5099_p0 = pneg %p5098_p10 }
  0xc4   : > { %p5105_p13 = por %p5104_p12, %p5103_p4 }
  0xc6   : > { %p5106_p1 = pnand %p5105_p13, %p5099_p0 }
  0xc8   : > { %5109 = shalt.err (!%p5106_p1)
}
  0xc9   : > { %s5110_s0 = scalar_lea.vmem %s5515_s2, 1280  ;;  %s5217_s10 = smov [#allocation5]  }
  0xca   : > { %p5111_p3 = scmp.ne.s32.totalorder %s5515_s2, %s5110_s0  ;;  %s5115_s12 = sshll.u32 %s5217_s10, 4  ;;  %s5116_s12 = int_to_ptr.vmem [resolvable:$false] %s5115_s12 }
  0xcb   : > { %s5117_s29 = scalar_lea.vmem %s5116_s12, 2560  ;;  %p5118_p10 = scmp.lt.s32.totalorder %s5515_s2, %s5116_s12 }
  0xcc   : > { %p5113_p2 = pnand %p5111_p3, %p5067_p8  ;;  %p5119_p5 = scmp.lt.s32.totalorder %s5117_s29, %s5110_s0 }
  0xce   : > { %p5114_p7 = pneg %p5113_p2  ;;  %p5120_p9 = por %p5119_p5, %p5118_p10 }
  0xd0   : > { %p5121_p4 = pnand %p5120_p9, %p5114_p7 }
  0xd2   : > { %5124 = shalt.err (!%p5121_p4)
}
  0xd3   : > { %4801 = dma.hbm_to_vmem [thread:$0]  (!%p5460_p11), %s5512_s18, 1280, %s5515_s2, %s5519_s3, %s6410_s13, %s6410_s13, %s6409_s28  }
  0xd4   : > { %p6413_p8 = scmp.ne.s32.totalorder %s6397_s8, 0 }
  0xd5   : > { %s5551_s4 = sand.u32 (!%p6413_p8), 1, %s5199_s25  }
  0xd6   : > { %334 = sbr.rel (%p6413_p8) target bundleno = 875 (0x36b), region = 48  ;;  %s337_s19 = scalar_lea.sflag (!%p6413_p8), [#allocation3], %s5551_s4 }
  0xd7   : > { %s4752_s23 = smul.u32 (!%p6413_p8), 80, %s5551_s4 }
  0xd9   : > { %s5555_s15 = scalar_lea.vmem (!%p6413_p8), [#allocation2], %s4752_s23 }
  0xdd   : > { %5170 = dma.done.wait (%p5444_p6), %s337_s19, 1280  }
  0xde   : > { %5172 = vsyncadd (%p5444_p6), %s337_s19, 4294966016  ;;  %s345_s3 = sand.u32 1, %s5282_s30   ;;  %s5562_s21 = scalar_lea.vmem [#allocation5], %s4752_s23 }
  0xdf   : > { %s346_s8 = scalar_lea.sflag [#allocation6], %s345_s3 }
  0xe0   : > { %5174 = dma.done.wait (%p5444_p6), %s346_s8, 1280  }
  0xe1   : > { %5176 = vsyncadd (%p5444_p6), %s346_s8, 4294966016  ;;  %p6414_p11 = scmp.eq.s32.totalorder %s5282_s30, 0 }
  0xe3   : > { %5178 = dma.done.wait (%p6414_p11), [#allocation6], 2304   ;;  %p6415_p0 = pmov %p6414_p11 }
  0xe5   : > { %5180 = vsyncadd (%p6415_p0), [#allocation6], 4294964992  ;;  %p6416_p12 = pmov %p6415_p0 }
  0xe6   : > { %p6417_p13 = pmov %p6415_p0 }
  0xe7   : > { %5182 = dma.done.wait (%p6416_p12), [#allocation9], 2320  }
  0xe8   : > { %5184 = vsyncadd (%p6417_p13), [#allocation9], 4294964976  ;;  %p6418_p1 = pmov %p6415_p0 }
  0xe9   : > { %p6419_p3 = pmov %p6415_p0 }
  0xea   : > { %5186 = dma.done.wait (%p6418_p1), [#allocation12], 272  }
  0xeb   : > { %5188 = vsyncadd (%p6419_p3), [#allocation12], 4294967024  ;;  %v4859_v0 = vld [vmem:[#allocation8] sm:$0xff]   ;;  %vm665_vm0 = vsmask.f32 3328  ;;  %v4861_v2 = vld [vmem:[#allocation8 + $0x8] sm:$0xff]  }
  0xec   : > { %v4860_v1 = vld [vmem:[#allocation8 + $0x40] sm:$0xff]   ;;  %4380 = vmatprep.subr.bf16.mxu1 %v4859_v0  ;;  %v4862_v3 = vld [vmem:[#allocation8 + $0x48] sm:$0xff]   ;;  %vm462_vm1 = vcmask 261120   ;;  %vm666_vm2 = vsmask.f32 7440  ;;  %v5594_v22 = vld [vmem:[#allocation7 + $0x40] sm:$0xff]  }
  0xed   : > { %4381 = vmatpush3.bf16.msra.mxu1 %v4859_v0  ;;  %4476 = vmatprep.subr.bf16.mxu0 %v4860_v1  ;;  %v4863_v4 = vld [vmem:[%s5562_s21] ss:$8 sps:$4 sm:$0xff]   ;;  %v4864_v5 = vld [vmem:[%s5562_s21 + $0x10] ss:$8 sps:$4 sm:$0xff]   ;;  %v5585_v7 = vld [vmem:[%s5562_s21 + $0xc] sm:$0x1] }
  0xee   : > { %4477 = vmatpush3.bf16.msra.mxu0 %v4860_v1  ;;  %4382 = vmatprep.subr.bf16.mxu1 %v4861_v2  ;;  %v4024_v6 = vld [vmem:[%s5562_s21 + $0x8] sm:$0xf]  ;;  %v4026_v8 = vld [vmem:[%s5562_s21 + $0x10] sm:$0xf]  ;;  %v5589_v9 = vld [vmem:[%s5562_s21 + $0x14] sm:$0x1] }
  0xef   : > { %4478 = vmatprep.subr.bf16.mxu0 %v4862_v3  ;;  %4384 = vmatprep.mubr.msk.bf16.mxu1 %vm462_vm1, %v4863_v4  ;;  %v1862_v10 = vshrl.u32 %v4024_v6, 16  ;;  %v1865_v11 = vshll.u32 %v4024_v6, 16  ;;  %v1871_v12 = vshll.u32 %v5585_v7, 16  ;;  %v1876_v13 = vshrl.u32 %v4026_v8, 16  ;;  %v4028_v23 = vld [vmem:[%s5562_s21 + $0x18] sm:$0xf]  ;;  %vm5606_vm3 = vmor %vm665_vm0, %vm666_vm2 }
  0xf0   : > { %v1879_v14 = vshll.u32 %v4026_v8, 16  ;;  %v1885_v15 = vshll.u32 %v5589_v9, 16  ;;  %v5598_v25 = vld [vmem:[%s5562_s21 + $0x1c] sm:$0x1]  ;;  %v4030_v26 = vld [vmem:[%s5562_s21 + $0x20] sm:$0xf] }
  0xf1   : > { %4383 = vmatpush3.bf16.msra.mxu1 %v4861_v2  ;;  %v1864_v16 = vrot.slane %v1862_v10, 4  ;;  %v1867_v17 = vrot.slane %v1865_v11, 5  ;;  %v1878_v18 = vrot.slane %v1876_v13, 4  ;;  %v1873_v19 = vrot.slane %v1871_v12, 5  ;;  %v5602_v27 = vld [vmem:[%s5562_s21 + $0x24] sm:$0x1] }
  0xf2   : > { %4479 = vmatpush3.bf16.msra.mxu0 %v4862_v3  ;;  %v1881_v20 = vrot.slane %v1879_v14, 5  ;;  %v1887_v21 = vrot.slane %v1885_v15, 5  ;;  %v1890_v30 = vshrl.u32 %v4028_v23, 16  ;;  %v1893_v31 = vshll.u32 %v4028_v23, 16  ;;  %v4869_v33 = vld [vmem:[#allocation7] sm:$0xff]   ;;  %v4870_v45 = vld [vmem:[#allocation7 + $0x8] sm:$0xff]  }
  0xf3   : > { %v1868_v24 = vor.u32 %v1867_v17, %v1864_v16  ;;  %4488 = vmatprep.subr.bf16.mxu0 %v5594_v22  ;;  %v1899_v32 = vshll.u32 %v5598_v25, 16  ;;  %v1904_v35 = vshrl.u32 %v4030_v26, 16  ;;  %v1907_v36 = vshll.u32 %v4030_v26, 16  ;;  %v4866_v41 = vld [vmem:[%s5562_s21 + $0x20] ss:$8 sps:$4 sm:$0xff]   ;;  %4392 = vmatprep.subr.bf16.mxu1 %v4869_v33  ;;  %s3895_s14 = sshll.u32 %s5551_s4, 6 }
  0xf4   : > { %4385 = vmatmul.mubr.msk.bf16.vlgmr.msra.gmra.mrb[0].mxu1 %vm462_vm1, %v4864_v5  ;;  %v1882_v29 = vor.u32 %v1881_v20, %v1878_v18  ;;  %v1913_v37 = vshll.u32 %v5602_v27, 16  ;;  %v1892_v39 = vrot.slane %v1890_v30, 4  ;;  %v1895_v40 = vrot.slane %v1893_v31, 5  ;;  %v4868_v52 = vld [vmem:[%s5562_s21 + $0x30] ss:$8 sps:$4 sm:$0xff]   ;;  %s404_s28 = scalar_lea.vmem [#allocation14], %s3895_s14 }
  0xf5   : > { %v1869_v34 = vrot.slane %v1868_v24, 4  ;;  %v1906_v43 = vrot.slane %v1904_v35, 4  ;;  %v1909_v44 = vrot.slane %v1907_v36, 5  ;;  %4393 = vmatpush3.bf16.msra.mxu1 %v4869_v33  ;;  %v1901_v48 = vrot.slane %v1899_v32, 5  ;;  %4388 = vmatprep.mubr.msk.bf16.mxu1 %vm462_vm1, %v4866_v41  ;;  %v4008_v56 = vld [vmem:[%s5555_s15 + $0x8] sm:$0xf] }
  0xf6   : > { %v1883_v38 = vrot.slane %v1882_v29, 4  ;;  %v1896_v47 = vor.u32 %v1895_v40, %v1892_v39  ;;  %v1915_v49 = vrot.slane %v1913_v37, 5  ;;  %4394 = vmatprep.subr.bf16.mxu1 %v4870_v45  ;;  %v2275_v54 = vrot.slane %v5585_v7, 5  ;;  %v5627_v58 = vld [vmem:[%s5555_s15 + $0xc] sm:$0x1]  ;;  %v5636_v1 = vld [vmem:[#allocation8 + $0x10] sm:$0xff]  }
  0xf7   : > { %v1874_v42 = vsel %vm5606_vm3, %v1869_v34, %v1873_v19  ;;  %v1910_v51 = vor.u32 %v1909_v44, %v1906_v43  ;;  %v4010_v59 = vld [vmem:[%s5555_s15 + $0x10] sm:$0xf]  ;;  %v5631_v60 = vld [vmem:[%s5555_s15 + $0x14] sm:$0x1]  ;;  %v1734_v62 = vshrl.u32 %v4008_v56, 16  ;;  %v1737_v63 = vshll.u32 %v4008_v56, 16 }
  0xf8   : > { %v1888_v46 = vsel %vm5606_vm3, %v1883_v38, %v1887_v21  ;;  %v1897_v53 = vrot.slane %v1896_v47, 4  ;;  %v1743_v0 = vshll.u32 %v5627_v58, 16  ;;  %v4867_v3 = vld [vmem:[#allocation7 + $0x48] sm:$0xff]   ;;  %v1748_v4 = vshrl.u32 %v4010_v59, 16  ;;  %v4014_v20 = vld [vmem:[%s5555_s15 + $0x20] sm:$0xf] }
  0xf9   : > { %v4040_v50 = vcombine.low %v1874_v42, %v1888_v46  ;;  %v1911_v55 = vrot.slane %v1910_v51, 4  ;;  %4395 = vmatpush3.bf16.msra.mxu1 %v4870_v45  ;;  %v1751_v5 = vshll.u32 %v4010_v59, 16  ;;  %v1757_v6 = vshll.u32 %v5631_v60, 16  ;;  %v4012_v13 = vld [vmem:[%s5555_s15 + $0x18] sm:$0xf]  ;;  %v5652_v29 = vld [vmem:[#allocation8 + $0x50] sm:$0xff]  }
  0xfa   : > { %v1902_v57 = vsel %vm5606_vm3, %v1897_v53, %v1901_v48  ;;  %v2279_v8 = vrot.slane %v5589_v9, 5  ;;  %v1736_v10 = vrot.slane %v1734_v62, 4  ;;  %v1739_v11 = vrot.slane %v1737_v63, 5  ;;  %4404 = vmatprep.subr.bf16.mxu1 %v5636_v1  ;;  %v5644_v17 = vld [vmem:[%s5555_s15 + $0x1c] sm:$0x1]  ;;  %s3736_s13 = sshll.u32 %s404_s28, 4  ;;  %s6328_s13 = int_to_ptr.vmem [resolvable:$true] %s3736_s13 }
  0xfb   : > { %4480 = vmatprep.mubr.msk.bf16.mxu0 %vm462_vm1, %v4040_v50  ;;  %v1916_v61 = vsel %vm5606_vm3, %v1911_v55, %v1915_v49  ;;  %v1745_v12 = vrot.slane %v1743_v0, 5  ;;  %v1750_v14 = vrot.slane %v1748_v4, 4  ;;  %v1753_v15 = vrot.slane %v1751_v5, 5  ;;  %v5649_v21 = vld [vmem:[%s5555_s15 + $0x24] sm:$0x1]  ;;  %v4878_v40 = vld [vmem:[#allocation8 + $0x18] sm:$0xff]  }
  0xfc   : > { %4389 = vmatmul.mubr.msk.bf16.gmra.mrb[4].mxu1 %vm462_vm1, %v4868_v52  ;;  %v4041_v2 = vcombine.low %v1902_v57, %v1916_v61  ;;  %v1759_v16 = vrot.slane %v1757_v6, 5  ;;  %v1762_v18 = vshrl.u32 %v4012_v13, 16  ;;  %v1740_v19 = vor.u32 %v1739_v11, %v1736_v10  ;;  %v4872_v39 = vld [vmem:[%s5555_s15] ss:$8 sps:$4 sm:$0xff]   ;;  %v4873_v47 = vld [vmem:[%s5555_s15 + $0x10] ss:$8 sps:$4 sm:$0xff]  }
  0xfd   : > { %v1765_v23 = vshll.u32 %v4012_v13, 16  ;;  %v1771_v24 = vshll.u32 %v5644_v17, 16  ;;  %v1754_v26 = vor.u32 %v1753_v15, %v1750_v14  ;;  %v1776_v31 = vshrl.u32 %v4014_v20, 16  ;;  %4396 = vmatprep.mubr.msk.bf16.mxu1 %vm462_vm1, %v4872_v39  ;;  %v4016_v48 = vld [vmem:[%s5555_s15 + $0x28] sm:$0xf]  ;;  %s4265_s18 = sshll.u32 %s5282_s30, 10 }
  0xfe   : > { %4481 = vmatmul.mubr.msk.bf16.vlgmr.msra.gmra.mrb[0].mxu0 %vm462_vm1, %v4041_v2  ;;  %v1764_v30 = vrot.slane %v1762_v18, 4  ;;  %v1779_v32 = vshll.u32 %v4014_v20, 16  ;;  %v2283_v33 = vrot.slane %v5598_v25, 5  ;;  %v1741_v34 = vrot.slane %v1740_v19, 4  ;;  %v5666_v49 = vld [vmem:[%s5555_s15 + $0x2c] sm:$0x1]  ;;  %s6333_s22 = scalar_lea.hbm %s6384_s7, %s4265_s18 }
  0xff   : > { %4489 = vmatpush3.bf16.msra.mxu0 %v5594_v22  ;;  %v1767_v35 = vrot.slane %v1765_v23, 5  ;;  %v1785_v22 = vshll.u32 %v5649_v21, 16  ;;  %v1755_v36 = vrot.slane %v1754_v26, 4  ;;  %v1778_v37 = vrot.slane %v1776_v31, 4  ;;  %v4018_v52 = vld [vmem:[%s5555_s15 + $0x30] sm:$0xf] }
 0x100   : > { %4490 = vmatprep.subr.bf16.mxu0 %v4867_v3  ;;  %v1781_v38 = vrot.slane %v1779_v32, 5  ;;  %v1746_v41 = vsel %vm5606_vm3, %v1741_v34, %v1745_v12  ;;  %v1773_v43 = vrot.slane %v1771_v24, 5  ;;  %v5670_v53 = vld [vmem:[%s5555_s15 + $0x34] sm:$0x1]  ;;  %v1790_v55 = vshrl.u32 %v4016_v48, 16  ;;  %s3723_s30 = scalar_lea.sflag [#allocation4], %s5551_s4 }
 0x101   : > { %v1768_v42 = vor.u32 %v1767_v35, %v1764_v30  ;;  %v1787_v44 = vrot.slane %v1785_v22, 5  ;;  %v1760_v45 = vsel %vm5606_vm3, %v1755_v36, %v1759_v16  ;;  %vm1152_vm4 = vcmask 1042432   ;;  %v4020_v11 = vld [vmem:[%s5555_s15 + $0x38] sm:$0xf]  ;;  %v5682_v12 = vld [vmem:[#allocation7 + $0x10] sm:$0xff]   ;;  %s5125_s0 = scalar_lea.vmem %s6328_s13, 1024 }
 0x102   : > { %v1782_v46 = vor.u32 %v1781_v38, %v1778_v37  ;;  %v4050_v50 = vcombine.low %v1746_v41, %v1760_v45  ;;  %vm1153_vm5 = vcmask 1046532   ;;  %v1793_v57 = vshll.u32 %v4016_v48, 16  ;;  %v5685_v16 = vld [vmem:[%s5555_s15 + $0x3c] sm:$0x1]  ;;  %v4022_v18 = vld [vmem:[%s5555_s15 + $0x40] sm:$0xf]  ;;  %p5126_p6 = scmp.ne.s32.totalorder %s6328_s13, %s5125_s0 }
 0x103   : > { %4491 = vmatpush3.bf16.msra.mxu0 %v4867_v3  ;;  %v1769_v51 = vrot.slane %v1768_v42, 4  ;;  %v1799_v59 = vshll.u32 %v5666_v49, 16  ;;  %v1804_v61 = vshrl.u32 %v4018_v52, 16  ;;  %v1792_v63 = vrot.slane %v1790_v55, 4  ;;  %v4874_v3 = vld [vmem:[#allocation8 + $0x58] sm:$0xff]   ;;  %v5694_v34 = vld [vmem:[#allocation7 + $0x50] sm:$0xff]   ;;  %vm5709_vm6 = vmor %vm1152_vm4, %vm1153_vm5 }
 0x104   : > { %4500 = vmatprep.subr.bf16.mxu0 %v5652_v29  ;;  %v1783_v56 = vrot.slane %v1782_v46, 4  ;;  %4397 = vmatmul.mubr.msk.bf16.vlgmr.msra.gmra.mrb[0].mxu1 %vm462_vm1, %v4873_v47  ;;  %v1807_v0 = vshll.u32 %v4018_v52, 16  ;;  %v1813_v2 = vshll.u32 %v5670_v53, 16  ;;  %v1795_v5 = vrot.slane %v1793_v57, 5  ;;  %v5689_v20 = vld [vmem:[%s5555_s15 + $0x44] sm:$0x1] }
 0x105   : > { %4492 = vmatprep.mubr.msk.bf16.mxu0 %vm462_vm1, %v4050_v50  ;;  %v1774_v62 = vsel %vm5606_vm3, %v1769_v51, %v1773_v43  ;;  %4405 = vmatpush3.bf16.msra.mxu1 %v5636_v1  ;;  %v1801_v6 = vrot.slane %v1799_v59, 5  ;;  %v1806_v10 = vrot.slane %v1804_v61, 4  ;;  %v1818_v1 = vshrl.u32 %v4020_v11, 16  ;;  %v4875_v43 = vld [vmem:[%s5555_s15 + $0x20] ss:$8 sps:$4 sm:$0xff]   ;;  %p6424_p2 = scmp.ne.s32.totalorder %s6405_s17, 0 }
 0x106   : > { %v1788_v4 = vsel %vm5606_vm3, %v1783_v56, %v1787_v44  ;;  %4406 = vmatprep.subr.bf16.mxu1 %v4878_v40  ;;  %v1809_v14 = vrot.slane %v1807_v0, 5  ;;  %v1815_v15 = vrot.slane %v1813_v2, 5  ;;  %v1796_v19 = vor.u32 %v1795_v5, %v1792_v63  ;;  %v4876_v45 = vld [vmem:[%s5555_s15 + $0x30] ss:$8 sps:$4 sm:$0xff]   ;;  %4400 = vmatprep.mubr.msk.bf16.mxu1 %vm462_vm1, %v4875_v43  ;;  %v4076_v52 = vld [vmem:[%s5562_s21 + $0x8] sm:$0xe] }
 0x107   : > { %v4051_v13 = vcombine.low %v1774_v62, %v1788_v4  ;;  %v1821_v23 = vshll.u32 %v4020_v11, 16  ;;  %v1827_v24 = vshll.u32 %v5685_v16, 16  ;;  %v1832_v30 = vshrl.u32 %v4022_v18, 16  ;;  %v4077_v56 = vld [vmem:[%s5562_s21 + $0x10] sm:$0xe]  ;;  %p5127_p7 = pnand %p5126_p6, %p6424_p2  ;;  %s5218_s10 = smov [#allocation14]  }
 0x108   : > { %v1810_v26 = vor.u32 %v1809_v14, %v1806_v10  ;;  %v1835_v31 = vshll.u32 %v4022_v18, 16  ;;  %v1841_v32 = vshll.u32 %v5689_v20, 16  ;;  %v1797_v35 = vrot.slane %v1796_v19, 4  ;;  %v4078_v62 = vld [vmem:[%s5562_s21 + $0x18] sm:$0xe]  ;;  %s5129_s12 = sshll.u32 %s5218_s10, 4  ;;  %s5130_s12 = int_to_ptr.vmem [resolvable:$false] %s5129_s12 }
 0x109   : > { %4407 = vmatpush3.bf16.msra.mxu1 %v4878_v40  ;;  %v1820_v22 = vrot.slane %v1818_v1, 4  ;;  %v1823_v36 = vrot.slane %v1821_v23, 5  ;;  %v1829_v37 = vrot.slane %v1827_v24, 5  ;;  %v1834_v39 = vrot.slane %v1832_v30, 4  ;;  %v780_v5 = vld [vmem:[%s5562_s21] sm:$0xf]  ;;  %p5128_p10 = pneg %p5127_p7  ;;  %p5132_p5 = scmp.lt.s32.totalorder %s6328_s13, %s5130_s12 }
 0x10a   : > { %4493 = vmatmul.mubr.msk.bf16.vlgmr.msra.gmra.mrb[0].mxu0 %vm462_vm1, %v4051_v13  ;;  %4416 = vmatprep.subr.bf16.mxu1 %v5682_v12  ;;  %v1811_v38 = vrot.slane %v1810_v26, 4  ;;  %v1837_v41 = vrot.slane %v1835_v31, 5  ;;  %v1843_v42 = vrot.slane %v1841_v32, 5  ;;  %v1802_v40 = vsel %vm5606_vm3, %v1797_v35, %v1801_v6  ;;  %v5735_v13 = vld [vmem:[%s5562_s21 + $0x4] sm:$0x1]  ;;  %s5131_s29 = scalar_lea.vmem %s5130_s12, 2048 }
 0x10b   : > { %4501 = vmatpush3.bf16.msra.mxu0 %v5652_v29  ;;  %v1824_v44 = vor.u32 %v1823_v36, %v1820_v22  ;;  %v2287_v47 = vrot.slane %v5602_v27, 5  ;;  %v4084_v57 = vrot.slane %v4076_v52, 9  ;;  %v2227_v27 = vrot.slane %v5644_v17, 5  ;;  %v782_v14 = vld [vmem:[%s5562_s21 + $0x8] sm:$0xf]  ;;  %p5133_p9 = scmp.lt.s32.totalorder %s5131_s29, %s5125_s0 }
 0x10c   : > { %4502 = vmatprep.subr.bf16.mxu0 %v4874_v3  ;;  %v1816_v29 = vsel %vm5606_vm3, %v1811_v38, %v1815_v15  ;;  %v1838_v46 = vor.u32 %v1837_v41, %v1834_v39  ;;  %4401 = vmatmul.mubr.msk.bf16.gmra.mrb[4].mxu1 %vm462_vm1, %v4876_v45  ;;  %v4085_v61 = vrot.slane %v4077_v56, 9  ;;  %v2231_v63 = vrot.slane %v5649_v21, 5  ;;  %v5743_v18 = vld [vmem:[%s5562_s21 + $0xc] sm:$0x1]  ;;  %v5751_v25 = vld [vmem:[%s5562_s21 + $0x14] sm:$0x1] }
 0x10d   : > { %v4052_v48 = vcombine.low %v1802_v40, %v1816_v29  ;;  %v1825_v50 = vrot.slane %v1824_v44, 4  ;;  %v2276_v2 = vsel %vm5709_vm6, %v4084_v57, %v2275_v54  ;;  %v4086_v4 = vrot.slane %v4078_v62, 9  ;;  %v786_v35 = vld [vmem:[%s5562_s21 + $0x18] sm:$0xf]  ;;  %v4033_v44 = vld [vmem:[%s5562_s21 + $0x2c] sm:$0x1]  ;;  %p5134_p4 = por %p5133_p9, %p5132_p5 }
 0x10e   : > { %v1839_v55 = vrot.slane %v1838_v46, 4  ;;  %v2280_v10 = vsel %vm5709_vm6, %v4085_v61, %v2279_v8  ;;  %v797_v15 = vshrl.u32 %v780_v5, 16  ;;  %v800_v19 = vshll.u32 %v780_v5, 16  ;;  %v784_v8 = vld [vmem:[%s5562_s21 + $0x10] sm:$0xf] }
 0x10f   : > { %4503 = vmatpush3.bf16.msra.mxu0 %v4874_v3  ;;  %4496 = vmatprep.mubr.msk.bf16.mxu0 %vm462_vm1, %v4052_v48  ;;  %v1830_v59 = vsel %vm5606_vm3, %v1825_v50, %v1829_v37  ;;  %v4079_v3 = vld [vmem:[%s5562_s21 + $0x20] sm:$0xe]  ;;  %v4092_v7 = vcombine.low %v2276_v2, %v2280_v10  ;;  %v2284_v54 = vsel %vm5709_vm6, %v4086_v4, %v2283_v33  ;;  %v806_v9 = vshll.u32 %v5735_v13, 16  ;;  %v5757_v37 = vld [vmem:[%s5562_s21 + $0x1c] sm:$0x1]  ;;  %p5135_p8 = pnand %p5134_p4, %p5128_p10 }
 0x110   : > { %4512 = vmatprep.subr.bf16.mxu0 %v5694_v34  ;;  %v1844_v0 = vsel %vm5606_vm3, %v1839_v55, %v1843_v42  ;;  %v4087_v11 = vrot.slane %v4079_v3, 9  ;;  %v799_v23 = vrot.slane %v797_v15, 4  ;;  %v811_v24 = vshrl.u32 %v782_v14, 16  ;;  %v4035_v48 = vld [vmem:[%s5562_s21 + $0x34] sm:$0x1]  ;;  %v4880_v3 = vld [vmem:[#allocation7 + $0x58] sm:$0xff]  }
 0x111   : > { %v4053_v6 = vcombine.low %v1830_v59, %v1844_v0  ;;  %v814_v26 = vshll.u32 %v782_v14, 16  ;;  %v802_v30 = vrot.slane %v800_v19, 5  ;;  %v808_v31 = vrot.slane %v806_v9, 5  ;;  %v4080_v57 = vld [vmem:[%s5562_s21 + $0x28] sm:$0xe] }
 0x112   : > { %v2288_v1 = vsel %vm5709_vm6, %v4087_v11, %v2287_v47  ;;  %v820_v32 = vshll.u32 %v5743_v18, 16  ;;  %v813_v22 = vrot.slane %v811_v24, 4  ;;  %v825_v38 = vshrl.u32 %v784_v8, 16  ;;  %v4081_v0 = vld [vmem:[%s5562_s21 + $0x30] sm:$0xe] }
 0x113   : > { %4497 = vmatmul.mubr.msk.bf16.gmra.mrb[4].mxu0 %vm462_vm1, %v4053_v6  ;;  %v4093_v33 = vcombine.low %v2284_v54, %v2288_v1  ;;  %v816_v36 = vrot.slane %v814_v26, 5  ;;  %v828_v39 = vshll.u32 %v784_v8, 16  ;;  %v803_v41 = vor.u32 %v802_v30, %v799_v23  ;;  %v5771_v54 = vld [vmem:[%s5562_s21 + $0x3c] sm:$0x1]  ;;  %v5777_v8 = vld [vmem:[%s5562_s21 + $0x44] sm:$0x1] }
 0x114   : > { %4504 = vmatprep.mubr.msk.bf16.mxu0 %vm462_vm1, %v4092_v7  ;;  %v822_v42 = vrot.slane %v820_v32, 5  ;;  %v834_v43 = vshll.u32 %v5751_v25, 16  ;;  %v839_v40 = vshrl.u32 %v786_v35, 16  ;;  %v827_v29 = vrot.slane %v825_v38, 4  ;;  %v4082_v1 = vld [vmem:[%s5562_s21 + $0x38] sm:$0xe] }
 0x115   : > { %v817_v45 = vor.u32 %v816_v36, %v813_v22  ;;  %v830_v46 = vrot.slane %v828_v39, 5  ;;  %v842_v47 = vshll.u32 %v786_v35, 16  ;;  %v804_v50 = vrot.slane %v803_v41, 4  ;;  %v5781_v24 = vld [vmem:[#allocation8 + $0x60] sm:$0xff]   ;;  %v4882_v39 = vld [vmem:[#allocation7 + $0x18] sm:$0xff]  }
 0x116   : > { %v836_v52 = vrot.slane %v834_v43, 5  ;;  %v841_v55 = vrot.slane %v839_v40, 4  ;;  %v848_v56 = vshll.u32 %v5757_v37, 16  ;;  %v4088_v2 = vrot.slane %v4080_v57, 9  ;;  %v4083_v30 = vld [vmem:[%s5562_s21 + $0x40] sm:$0xe] }
 0x117   : > { %v818_v59 = vrot.slane %v817_v45, 4  ;;  %v831_v61 = vor.u32 %v830_v46, %v827_v29  ;;  %v844_v62 = vrot.slane %v842_v47, 5  ;;  %v809_v4 = vsel %vm5606_vm3, %v804_v50, %v808_v31  ;;  %v788_v31 = vld [vmem:[%s5562_s21 + $0x20] sm:$0xf]  ;;  %v5792_v38 = vld [vmem:[%s5562_s21 + $0x24] sm:$0x1] }
 0x118   : > { %v850_v5 = vrot.slane %v848_v56, 5  ;;  %v2291_v6 = vrot.slane %v4033_v44, 5  ;;  %v4089_v10 = vrot.slane %v4081_v0, 9  ;;  %v2295_v7 = vrot.slane %v4035_v48, 5  ;;  %v790_v40 = vld [vmem:[%s5562_s21 + $0x28] sm:$0xf] }
 0x119   : > { %v823_v11 = vsel %vm5606_vm3, %v818_v59, %v822_v42  ;;  %v832_v14 = vrot.slane %v831_v61, 4  ;;  %v845_v15 = vor.u32 %v844_v62, %v841_v55  ;;  %v2299_v23 = vrot.slane %v5771_v54, 5  ;;  %v5800_v44 = vld [vmem:[%s5562_s21 + $0x2c] sm:$0x1]  ;;  %v792_v50 = vld [vmem:[%s5562_s21 + $0x30] sm:$0xf] }
 0x11a   : > { %v3916_v19 = vcombine.low %v809_v4, %v823_v11  ;;  %v2292_v9 = vsel %vm5709_vm6, %v4088_v2, %v2291_v6  ;;  %v2219_v32 = vrot.slane %v5627_v58, 5  ;;  %v4090_v22 = vrot.slane %v4082_v1, 9  ;;  %v794_v61 = vld [vmem:[%s5562_s21 + $0x38] sm:$0xf]  ;;  %v5818_v4 = vld [vmem:[%s5562_s21 + $0x3c] sm:$0x1] }
 0x11b   : > { %4505 = vmatmul.mubr.msk.bf16.vlgmr.msra.gmra.mrb[0].mxu0 %vm462_vm1, %v4093_v33  ;;  %v837_v26 = vsel %vm5606_vm3, %v832_v14, %v836_v52  ;;  %v846_v33 = vrot.slane %v845_v15, 4  ;;  %v4091_v36 = vrot.slane %v4083_v30, 9  ;;  %v2223_v41 = vrot.slane %v5631_v60, 5  ;;  %v5808_v52 = vld [vmem:[%s5562_s21 + $0x34] sm:$0x1] }
 0x11c   : > { %4513 = vmatpush3.bf16.msra.mxu0 %v5694_v34  ;;  %v2296_v34 = vsel %vm5709_vm6, %v4089_v10, %v2295_v7  ;;  %4408 = vmatprep.mubr.msk.bf16.mxu1 %vm462_vm1, %v3916_v19  ;;  %v2303_v43 = vrot.slane %v5777_v8, 5  ;;  %v2235_v45 = vrot.slane %v5666_v49, 5  ;;  %v2300_v46 = vsel %vm5709_vm6, %v4090_v22, %v2299_v23  ;;  %v4252_v51 = vld [vmem:[#allocation10] ss:$0 sm:$0xff] }
 0x11d   : > { %4514 = vmatprep.subr.bf16.mxu0 %v4880_v3  ;;  %v4094_v35 = vcombine.low %v2292_v9, %v2296_v34  ;;  %v851_v42 = vsel %vm5606_vm3, %v846_v33, %v850_v5  ;;  %v853_v47 = vshrl.u32 %v788_v31, 16  ;;  %v856_v48 = vshll.u32 %v788_v31, 16  ;;  %v5823_v9 = vld [vmem:[#allocation8 + $0x20] sm:$0xff]  }
 0x11e   : > { %v3917_v29 = vcombine.low %v837_v26, %v851_v42  ;;  %v2304_v55 = vsel %vm5709_vm6, %v4091_v36, %v2303_v43  ;;  %v862_v56 = vshll.u32 %v5792_v38, 16  ;;  %v867_v57 = vshrl.u32 %v790_v40, 16  ;;  %v4060_v42 = vld [vmem:[%s5555_s15 + $0x8] sm:$0xe] }
 0x11f   : > { %4508 = vmatprep.mubr.msk.bf16.mxu0 %vm462_vm1, %v4094_v35  ;;  %v870_v59 = vshll.u32 %v790_v40, 16  ;;  %v4095_v62 = vcombine.low %v2300_v46, %v2304_v55  ;;  %v855_v0 = vrot.slane %v853_v47, 4  ;;  %v858_v2 = vrot.slane %v856_v48, 5  ;;  %v4061_v47 = vld [vmem:[%s5555_s15 + $0x10] sm:$0xe] }
 0x120   : > { %4515 = vmatpush3.bf16.msra.mxu0 %v4880_v3  ;;  %4409 = vmatmul.mubr.msk.bf16.vlgmr.msra.gmra.mrb[0].mxu1 %vm462_vm1, %v3917_v29  ;;  %v876_v3 = vshll.u32 %v5800_v44, 16  ;;  %v864_v5 = vrot.slane %v862_v56, 5  ;;  %v869_v6 = vrot.slane %v867_v57, 4  ;;  %v881_v11 = vshrl.u32 %v792_v50, 16  ;;  %v4062_v56 = vld [vmem:[%s5555_s15 + $0x18] sm:$0xe] }
 0x121   : > { %4524 = vmatprep.subr.bf16.mxu0 %v5781_v24  ;;  %v872_v10 = vrot.slane %v870_v59, 5  ;;  %4417 = vmatpush3.bf16.msra.mxu1 %v5682_v12  ;;  %v859_v14 = vor.u32 %v858_v2, %v855_v0  ;;  %v884_v7 = vshll.u32 %v792_v50, 16  ;;  %v890_v19 = vshll.u32 %v5808_v52, 16  ;;  %v4063_v0 = vld [vmem:[%s5555_s15 + $0x20] sm:$0xe] }
 0x122   : > { %v878_v15 = vrot.slane %v876_v3, 5  ;;  %4418 = vmatprep.subr.bf16.mxu1 %v4882_v39  ;;  %v883_v23 = vrot.slane %v881_v11, 4  ;;  %v895_v26 = vshrl.u32 %v794_v61, 16  ;;  %v898_v33 = vshll.u32 %v794_v61, 16  ;;  %v649_v3 = vld [vmem:[%s5555_s15] sm:$0xf] }
 0x123   : > { %4509 = vmatmul.mubr.msk.bf16.gmra.mrb[4].mxu0 %vm462_vm1, %v4095_v62  ;;  %v873_v1 = vor.u32 %v872_v10, %v869_v6  ;;  %v860_v34 = vrot.slane %v859_v14, 4  ;;  %v886_v30 = vrot.slane %v884_v7, 5  ;;  %v892_v31 = vrot.slane %v890_v19, 5  ;;  %v5847_v11 = vld [vmem:[%s5555_s15 + $0x4] sm:$0x1]  ;;  %v4884_v7 = vld [vmem:[#allocation8 + $0x68] sm:$0xff]  }
 0x124   : > { %v904_v12 = vshll.u32 %v5818_v4, 16  ;;  %v897_v22 = vrot.slane %v895_v26, 4  ;;  %v900_v36 = vrot.slane %v898_v33, 5  ;;  %v2239_v43 = vrot.slane %v5670_v53, 5  ;;  %v651_v14 = vld [vmem:[%s5555_s15 + $0x8] sm:$0xf] }
 0x125   : > { %v874_v35 = vrot.slane %v873_v1, 4  ;;  %4419 = vmatpush3.bf16.msra.mxu1 %v4882_v39  ;;  %v865_v40 = vsel %vm5606_vm3, %v860_v34, %v864_v5  ;;  %v887_v29 = vor.u32 %v886_v30, %v883_v23  ;;  %v4068_v48 = vrot.slane %v4060_v42, 9  ;;  %v653_v26 = vld [vmem:[%s5555_s15 + $0x10] sm:$0xf]  ;;  %v4064_v42 = vld [vmem:[%s5555_s15 + $0x28] sm:$0xe] }
 0x126   : > { %v906_v46 = vrot.slane %v904_v12, 5  ;;  %4428 = vmatprep.subr.bf16.mxu1 %v5823_v9  ;;  %v901_v39 = vor.u32 %v900_v36, %v897_v22  ;;  %v4069_v55 = vrot.slane %v4061_v47, 9  ;;  %v2243_v57 = vrot.slane %v5685_v16, 5  ;;  %v655_v12 = vld [vmem:[%s5555_s15 + $0x18] sm:$0xf] }
 0x127   : > { %v879_v50 = vsel %vm5606_vm3, %v874_v35, %v878_v15  ;;  %v888_v61 = vrot.slane %v887_v29, 4  ;;  %v2220_v62 = vsel %vm5709_vm6, %v4068_v48, %v2219_v32  ;;  %v4070_v2 = vrot.slane %v4062_v56, 9  ;;  %v5858_v15 = vld [vmem:[%s5555_s15 + $0xc] sm:$0x1]  ;;  %v5874_v35 = vld [vmem:[%s5555_s15 + $0x1c] sm:$0x1] }
 0x128   : > { %v3918_v59 = vcombine.low %v865_v40, %v879_v50  ;;  %v902_v5 = vrot.slane %v901_v39, 4  ;;  %v2224_v6 = vsel %vm5709_vm6, %v4069_v55, %v2223_v41  ;;  %v4071_v10 = vrot.slane %v4063_v0, 9  ;;  %v4065_v40 = vld [vmem:[%s5555_s15 + $0x30] sm:$0xe] }
 0x129   : > { %v893_v58 = vsel %vm5606_vm3, %v888_v61, %v892_v31  ;;  %v4102_v32 = vcombine.low %v2220_v62, %v2224_v6  ;;  %v2228_v60 = vsel %vm5709_vm6, %v4070_v2, %v2227_v27  ;;  %v669_v41 = vshrl.u32 %v649_v3, 16  ;;  %v5869_v27 = vld [vmem:[%s5555_s15 + $0x14] sm:$0x1] }
 0x12a   : > { %4412 = vmatprep.mubr.msk.bf16.mxu1 %vm462_vm1, %v3918_v59  ;;  %v907_v19 = vsel %vm5606_vm3, %v902_v5, %v906_v46  ;;  %v2232_v1 = vsel %vm5709_vm6, %v4071_v10, %v2231_v63  ;;  %v672_v23 = vshll.u32 %v649_v3, 16  ;;  %v678_v17 = vshll.u32 %v5847_v11, 16  ;;  %v5883_v59 = vld [vmem:[#allocation7 + $0x60] sm:$0xff]   ;;  %v4066_v3 = vld [vmem:[%s5555_s15 + $0x38] sm:$0xe] }
 0x12b   : > { %v3919_v33 = vcombine.low %v893_v58, %v907_v19  ;;  %4516 = vmatprep.mubr.msk.bf16.mxu0 %vm462_vm1, %v4102_v32  ;;  %v4103_v34 = vcombine.low %v2228_v60, %v2232_v1  ;;  %v671_v30 = vrot.slane %v669_v41, 4  ;;  %v683_v31 = vshrl.u32 %v651_v14, 16  ;;  %v4067_v41 = vld [vmem:[%s5555_s15 + $0x40] sm:$0xe] }
 0x12c   : > { %v674_v21 = vrot.slane %v672_v23, 5  ;;  %v680_v22 = vrot.slane %v678_v17, 5  ;;  %v686_v63 = vshll.u32 %v651_v14, 16  ;;  %v692_v36 = vshll.u32 %v5858_v15, 16 }
 0x12d   : > { %4413 = vmatmul.mubr.msk.bf16.gmra.mrb[4].mxu1 %vm462_vm1, %v3919_v33  ;;  %4517 = vmatmul.mubr.msk.bf16.vlgmr.msra.gmra.mrb[0].mxu0 %vm462_vm1, %v4103_v34  ;;  %v685_v29 = vrot.slane %v683_v31, 4  ;;  %v697_v46 = vshrl.u32 %v653_v26, 16  ;;  %v700_v47 = vshll.u32 %v653_v26, 16  ;;  %v706_v48 = vshll.u32 %v5869_v27, 16  ;;  %v657_v26 = vld [vmem:[%s5555_s15 + $0x20] sm:$0xf] }
 0x12e   : > { %4525 = vmatpush3.bf16.msra.mxu0 %v5781_v24  ;;  %v675_v50 = vor.u32 %v674_v21, %v671_v30  ;;  %v688_v39 = vrot.slane %v686_v63, 5  ;;  %v694_v55 = vrot.slane %v692_v36, 5  ;;  %v711_v56 = vshrl.u32 %v655_v12, 16  ;;  %v659_v21 = vld [vmem:[%s5555_s15 + $0x28] sm:$0xf] }
 0x12f   : > { %v699_v61 = vrot.slane %v697_v46, 4  ;;  %v702_v62 = vrot.slane %v700_v47, 5  ;;  %v708_v0 = vrot.slane %v706_v48, 5  ;;  %v714_v2 = vshll.u32 %v655_v12, 16  ;;  %4526 = vmatprep.subr.bf16.mxu0 %v4884_v7  ;;  %v5900_v12 = vld [vmem:[%s5555_s15 + $0x24] sm:$0x1] }
 0x130   : > { %v676_v5 = vrot.slane %v675_v50, 4  ;;  %v689_v6 = vor.u32 %v688_v39, %v685_v29  ;;  %v713_v10 = vrot.slane %v711_v56, 4  ;;  %v720_v14 = vshll.u32 %v5874_v35, 16  ;;  %v5918_v29 = vld [vmem:[%s5555_s15 + $0x34] sm:$0x1]  ;;  %v4886_v39 = vld [vmem:[#allocation8 + $0x28] sm:$0xff]  }
 0x131   : > { %v703_v24 = vor.u32 %v702_v62, %v699_v61  ;;  %v716_v58 = vrot.slane %v714_v2, 5  ;;  %v4072_v32 = vrot.slane %v4064_v42, 9  ;;  %v4073_v60 = vrot.slane %v4065_v40, 9  ;;  %v661_v40 = vld [vmem:[%s5555_s15 + $0x30] sm:$0xf] }
 0x132   : > { %v681_v19 = vsel %vm5606_vm3, %v676_v5, %v680_v22  ;;  %v690_v1 = vrot.slane %v689_v6, 4  ;;  %v722_v23 = vrot.slane %v720_v14, 5  ;;  %v4074_v17 = vrot.slane %v4066_v3, 9  ;;  %4527 = vmatpush3.bf16.msra.mxu0 %v4884_v7  ;;  %v663_v48 = vld [vmem:[%s5555_s15 + $0x38] sm:$0xf] }
 0x133   : > { %v704_v33 = vrot.slane %v703_v24, 4  ;;  %v717_v34 = vor.u32 %v716_v58, %v713_v10  ;;  %v2236_v30 = vsel %vm5709_vm6, %v4072_v32, %v2235_v45  ;;  %v2240_v31 = vsel %vm5709_vm6, %v4073_v60, %v2239_v43  ;;  %4536 = vmatprep.subr.bf16.mxu0 %v5883_v59  ;;  %v5911_v45 = vld [vmem:[%s5555_s15 + $0x2c] sm:$0x1]  ;;  %v5924_v50 = vld [vmem:[%s5555_s15 + $0x3c] sm:$0x1] }
 0x134   : > { %v695_v7 = vsel %vm5606_vm3, %v690_v1, %v694_v55  ;;  %v4104_v22 = vcombine.low %v2236_v30, %v2240_v31  ;;  %v2244_v49 = vsel %vm5709_vm6, %v4074_v17, %v2243_v57  ;;  %v4075_v53 = vrot.slane %v4067_v41, 9  ;;  %v4887_v41 = vld [vmem:[%s5562_s21 + $0x10] ss:$8 sps:$4 sm:$0xff]  }
 0x135   : > { %v3926_v43 = vcombine.low %v681_v19, %v695_v7  ;;  %v709_v63 = vsel %vm5606_vm3, %v704_v33, %v708_v0  ;;  %v718_v36 = vrot.slane %v717_v34, 4  ;;  %v2247_v42 = vrot.slane %v5689_v20, 5 }
 0x136   : > { %4520 = vmatprep.mubr.msk.bf16.mxu0 %vm462_vm1, %v4104_v22  ;;  %v725_v16 = vshrl.u32 %v657_v26, 16  ;;  %v728_v46 = vshll.u32 %v657_v26, 16  ;;  %v734_v47 = vshll.u32 %v5900_v12, 16  ;;  %v739_v57 = vshrl.u32 %v659_v21, 16  ;;  %v5938_v26 = vld [vmem:[#allocation7 + $0x20] sm:$0xff]  }
 0x137   : > { %4420 = vmatprep.mubr.msk.bf16.mxu1 %vm462_vm1, %v3926_v43  ;;  %v723_v55 = vsel %vm5606_vm3, %v718_v36, %v722_v23  ;;  %v2248_v20 = vsel %vm5709_vm6, %v4075_v53, %v2247_v42  ;;  %v742_v56 = vshll.u32 %v659_v21, 16  ;;  %v748_v61 = vshll.u32 %v5911_v45, 16  ;;  %v4889_v43 = vld [vmem:[%s5562_s21 + $0x20] ss:$8 sps:$4 sm:$0xff]  }
 0x138   : > { %v3927_v62 = vcombine.low %v709_v63, %v723_v55  ;;  %v4105_v0 = vcombine.low %v2244_v49, %v2248_v20  ;;  %v727_v2 = vrot.slane %v725_v16, 4  ;;  %v730_v3 = vrot.slane %v728_v46, 5  ;;  %v1187_v63 = vld [vmem:[%s5562_s21] sm:$0xe] }
 0x139   : > { %v736_v5 = vrot.slane %v734_v47, 5  ;;  %v741_v6 = vrot.slane %v739_v57, 4  ;;  %v744_v10 = vrot.slane %v742_v56, 5  ;;  %v750_v14 = vrot.slane %v748_v61, 5  ;;  %v1189_v47 = vld [vmem:[%s5562_s21 + $0x10] sm:$0xe] }
 0x13a   : > { %4421 = vmatmul.mubr.msk.bf16.vlgmr.msra.gmra.mrb[0].mxu1 %vm462_vm1, %v3927_v62  ;;  %4521 = vmatmul.mubr.msk.bf16.gmra.mrb[4].mxu0 %vm462_vm1, %v4105_v0  ;;  %v731_v24 = vor.u32 %v730_v3, %v727_v2  ;;  %v753_v58 = vshrl.u32 %v661_v40, 16  ;;  %v756_v32 = vshll.u32 %v661_v40, 16  ;;  %v762_v60 = vshll.u32 %v5918_v29, 16  ;;  %v1188_v40 = vld [vmem:[%s5562_s21 + $0x8] sm:$0xe] }
 0x13b   : > { %v745_v19 = vor.u32 %v744_v10, %v741_v6  ;;  %v767_v1 = vshrl.u32 %v663_v48, 16  ;;  %v770_v23 = vshll.u32 %v663_v48, 16  ;;  %v776_v17 = vshll.u32 %v5924_v50, 16  ;;  %4429 = vmatpush3.bf16.msra.mxu1 %v5823_v9  ;;  %4528 = vmatprep.mubr.msk.bf16.mxu0 %vm462_vm1, %v4887_v41  ;;  %v1190_v56 = vld [vmem:[%s5562_s21 + $0x18] sm:$0xe]  ;;  %v5964_v10 = vld [vmem:[#allocation8 + $0x70] sm:$0xff]  }
 0x13c   : > { %v732_v33 = vrot.slane %v731_v24, 4  ;;  %v755_v34 = vrot.slane %v753_v58, 4  ;;  %v758_v30 = vrot.slane %v756_v32, 5  ;;  %v764_v31 = vrot.slane %v762_v60, 5  ;;  %4430 = vmatprep.subr.bf16.mxu1 %v4886_v39  ;;  %v4891_v61 = vld [vmem:[#allocation7 + $0x68] sm:$0xff]  }
 0x13d   : > { %v746_v21 = vrot.slane %v745_v19, 4  ;;  %v769_v7 = vrot.slane %v767_v1, 4  ;;  %v772_v22 = vrot.slane %v770_v23, 5  ;;  %v778_v49 = vrot.slane %v776_v17, 5  ;;  %v4890_v6 = vld [vmem:[%s5562_s21 + $0x30] ss:$8 sps:$4 sm:$0xff]  }
 0x13e   : > { %v737_v53 = vsel %vm5606_vm3, %v732_v33, %v736_v5  ;;  %v759_v9 = vor.u32 %v758_v30, %v755_v34  ;;  %v3944_v16 = vrot.slane %v1187_v63, 9  ;;  %v1213_v46 = vrot.slane %v5735_v13, 5  ;;  %v4892_v58 = vld [vmem:[%s5562_s21 + $0x40] ss:$8 sps:$4 sm:$0xff]   ;;  %v1193_v34 = vld [vmem:[%s5562_s21 + $0x30] sm:$0xe] }
 0x13f   : > { %v751_v36 = vsel %vm5606_vm3, %v746_v21, %v750_v14  ;;  %v773_v42 = vor.u32 %v772_v22, %v769_v7  ;;  %4431 = vmatpush3.bf16.msra.mxu1 %v4886_v39  ;;  %v3945_v55 = vrot.slane %v1188_v40, 9  ;;  %v1217_v20 = vrot.slane %v5743_v18, 5  ;;  %v1191_v32 = vld [vmem:[%s5562_s21 + $0x20] sm:$0xe]  ;;  %v4895_v7 = vld [vmem:[%s5555_s15 + $0x10] ss:$8 sps:$4 sm:$0xff]  }
 0x140   : > { %v3928_v57 = vcombine.low %v737_v53, %v751_v36  ;;  %v760_v48 = vrot.slane %v759_v9, 4  ;;  %4440 = vmatprep.subr.bf16.mxu1 %v5938_v26  ;;  %v1214_v0 = vsel %vm5709_vm6, %v3944_v16, %v1213_v46  ;;  %v3946_v39 = vrot.slane %v1189_v47, 9  ;;  %v1129_v9 = vld [vmem:[%s5555_s15 + $0x8] sm:$0xe]  ;;  %v1130_v46 = vld [vmem:[%s5555_s15 + $0x10] sm:$0xe] }
 0x141   : > { %v774_v62 = vrot.slane %v773_v42, 4  ;;  %v1221_v2 = vrot.slane %v5751_v25, 5  ;;  %v1218_v18 = vsel %vm5709_vm6, %v3945_v55, %v1217_v20  ;;  %v3947_v3 = vrot.slane %v1190_v56, 9  ;;  %v4897_v40 = vld [vmem:[%s5555_s15 + $0x20] ss:$8 sps:$4 sm:$0xff]  }
 0x142   : > { %4424 = vmatprep.mubr.msk.bf16.mxu1 %vm462_vm1, %v3928_v57  ;;  %v765_v13 = vsel %vm5606_vm3, %v760_v48, %v764_v31  ;;  %4529 = vmatmul.mubr.msk.bf16.vlgmr.msra.gmra.mrb[0].mxu0 %vm462_vm1, %v4889_v43  ;;  %v1225_v5 = vrot.slane %v5757_v37, 5  ;;  %v3952_v14 = vcombine.low %v1214_v0, %v1218_v18  ;;  %v1955_v60 = vshll.u32 %v5771_v54, 16  ;;  %v1192_v37 = vld [vmem:[%s5562_s21 + $0x28] sm:$0xe]  ;;  %v1194_v54 = vld [vmem:[%s5562_s21 + $0x38] sm:$0xe] }
 0x143   : > { %v779_v25 = vsel %vm5606_vm3, %v774_v62, %v778_v49  ;;  %4537 = vmatpush3.bf16.msra.mxu0 %v5883_v59  ;;  %4532 = vmatprep.mubr.msk.bf16.mxu0 %vm462_vm1, %v4890_v6  ;;  %v3948_v41 = vrot.slane %v1191_v32, 9  ;;  %v1229_v19 = vrot.slane %v5792_v38, 5  ;;  %v1233_v1 = vrot.slane %v5800_v44, 5  ;;  %v1131_v48 = vld [vmem:[%s5555_s15 + $0x18] sm:$0xe]  ;;  %v6015_v20 = vld [vmem:[#allocation8 + $0x30] sm:$0xff]  }
 0x144   : > { %v3929_v24 = vcombine.low %v765_v13, %v779_v25  ;;  %4538 = vmatprep.subr.bf16.mxu0 %v4891_v61  ;;  %v1969_v23 = vshll.u32 %v5777_v8, 16  ;;  %v1222_v59 = vsel %vm5709_vm6, %v3946_v39, %v1221_v2  ;;  %v1226_v17 = vsel %vm5709_vm6, %v3947_v3, %v1225_v5  ;;  %v4898_v62 = vld [vmem:[%s5555_s15 + $0x30] ss:$8 sps:$4 sm:$0xff]   ;;  %v1133_v13 = vld [vmem:[%s5555_s15 + $0x28] sm:$0xe] }
 0x145   : > { %v3949_v33 = vrot.slane %v1192_v37, 9  ;;  %v3950_v38 = vrot.slane %v1193_v34, 9  ;;  %v1237_v8 = vrot.slane %v5808_v52, 5  ;;  %v3951_v44 = vrot.slane %v1194_v54, 9  ;;  %v4894_v52 = vld [vmem:[#allocation7 + $0x28] sm:$0xff]   ;;  %v6028_v6 = vld [vmem:[#allocation7 + $0x70] sm:$0xff]  }
 0x146   : > { %4425 = vmatmul.mubr.msk.bf16.gmra.mrb[4].mxu1 %vm462_vm1, %v3929_v24  ;;  %v1241_v30 = vrot.slane %v5818_v4, 5  ;;  %v1230_v31 = vsel %vm5709_vm6, %v3948_v41, %v1229_v19  ;;  %v3953_v22 = vcombine.low %v1222_v59, %v1226_v17  ;;  %v1128_v4 = vld [vmem:[%s5555_s15] sm:$0xe]  ;;  %v5996_v53 = vrot.slane %v1955_v60, 5  ;;  %v1134_v5 = vld [vmem:[%s5555_s15 + $0x30] sm:$0xe] }
 0x147   : > { %4432 = vmatprep.mubr.msk.bf16.mxu1 %vm462_vm1, %v3952_v14  ;;  %4539 = vmatpush3.bf16.msra.mxu0 %v4891_v61  ;;  %v1234_v21 = vsel %vm5709_vm6, %v3949_v33, %v1233_v1  ;;  %v3936_v43 = vrot.slane %v1128_v4, 9  ;;  %v1157_v63 = vrot.slane %v5847_v11, 5  ;;  %v1161_v36 = vrot.slane %v5858_v15, 5  ;;  %v4899_v11 = vld [vmem:[#allocation8 + $0x78] sm:$0xff]   ;;  %v4164_v60 = vld [vmem:[%s5562_s21 + $0x10] sm:$0xf] }
 0x148   : > { %4548 = vmatprep.subr.bf16.mxu0 %v5964_v10  ;;  %v3954_v49 = vcombine.low %v1230_v31, %v1234_v21  ;;  %v6001_v42 = vrot.slane %v1969_v23, 5  ;;  %v3937_v16 = vrot.slane %v1129_v9, 9  ;;  %v1238_v47 = vsel %vm5709_vm6, %v3950_v38, %v1237_v8  ;;  %v1135_v14 = vld [vmem:[%s5555_s15 + $0x38] sm:$0xe]  ;;  %v6049_v41 = vld [vmem:[%s5562_s21 + $0x1c] sm:$0x1] }
 0x149   : > { %v1242_v57 = vsel %vm5709_vm6, %v3951_v44, %v1241_v30  ;;  %v1165_v15 = vrot.slane %v5869_v27, 5  ;;  %v1169_v55 = vrot.slane %v5874_v35, 5  ;;  %v1158_v56 = vsel %vm5709_vm6, %v3936_v43, %v1157_v63  ;;  %v4166_v37 = vld [vmem:[%s5562_s21 + $0x18] sm:$0xf]  ;;  %v4170_v43 = vld [vmem:[%s5562_s21 + $0x28] sm:$0xf] }
 0x14a   : > { %4533 = vmatmul.mubr.msk.bf16.gmra.mrb[4].mxu0 %vm462_vm1, %v4892_v58  ;;  %v1162_v61 = vsel %vm5709_vm6, %v3937_v16, %v1161_v36  ;;  %v3955_v0 = vcombine.low %v1238_v47, %v1242_v57  ;;  %v3938_v39 = vrot.slane %v1130_v46, 9  ;;  %v3939_v2 = vrot.slane %v1131_v48, 9  ;;  %v6069_v63 = vld [vmem:[%s5562_s21 + $0x2c] sm:$0x1] }
 0x14b   : > { %4540 = vmatprep.mubr.msk.bf16.mxu0 %vm462_vm1, %v4895_v7  ;;  %v1173_v35 = vrot.slane %v5900_v12, 5  ;;  %v3941_v18 = vrot.slane %v1133_v13, 9  ;;  %v1177_v3 = vrot.slane %v5911_v45, 5  ;;  %v3962_v25 = vcombine.low %v1158_v56, %v1162_v61  ;;  %v4900_v12 = vld [vmem:[%s5555_s15 + $0x40] ss:$8 sps:$4 sm:$0xff]  }
 0x14c   : > { %v3942_v24 = vrot.slane %v1134_v5, 9  ;;  %v1181_v58 = vrot.slane %v5918_v29, 5  ;;  %v1166_v45 = vsel %vm5709_vm6, %v3938_v39, %v1165_v15  ;;  %v1170_v32 = vsel %vm5709_vm6, %v3939_v2, %v1169_v55  ;;  %v4902_v36 = vld [vmem:[#allocation8 + $0x38] sm:$0xff]   ;;  %v4172_v5 = vld [vmem:[%s5562_s21 + $0x30] sm:$0xf] }
 0x14d   : > { %v2924_v19 = vshrl.u32 %v4164_v60, 16  ;;  %v2927_v1 = vshll.u32 %v4164_v60, 16  ;;  %v1178_v59 = vsel %vm5709_vm6, %v3941_v18, %v1177_v3  ;;  %v2938_v17 = vshrl.u32 %v4166_v37, 16 }
 0x14e   : > { %4433 = vmatmul.mubr.msk.bf16.vlgmr.msra.gmra.mrb[0].mxu1 %vm462_vm1, %v3953_v22  ;;  %v2941_v33 = vshll.u32 %v4166_v37, 16  ;;  %v2947_v34 = vshll.u32 %v6049_v41, 16  ;;  %v3943_v54 = vrot.slane %v1135_v14, 9  ;;  %v1185_v38 = vrot.slane %v5924_v50, 5  ;;  %v4168_v22 = vld [vmem:[%s5562_s21 + $0x20] sm:$0xf] }
 0x14f   : > { %4436 = vmatprep.mubr.msk.bf16.mxu1 %vm462_vm1, %v3954_v49  ;;  %4441 = vmatpush3.bf16.msra.mxu1 %v5938_v26  ;;  %v1132_v26 = vld [vmem:[%s5555_s15 + $0x20] sm:$0xe]  ;;  %v2926_v8 = vrot.slane %v2924_v19, 4  ;;  %v2929_v44 = vrot.slane %v2927_v1, 5  ;;  %v2940_v31 = vrot.slane %v2938_v17, 4  ;;  %v3963_v49 = vcombine.low %v1166_v45, %v1170_v32 }
 0x150   : > { %4442 = vmatprep.subr.bf16.mxu1 %v4894_v52  ;;  %v3940_v27 = vrot.slane %v1132_v26, 9  ;;  %v2943_v21 = vrot.slane %v2941_v33, 5  ;;  %v2949_v7 = vrot.slane %v2947_v34, 5  ;;  %v6062_v4 = vsel %vm5709_vm6, %v3942_v24, %v1181_v58  ;;  %v6065_v50 = vld [vmem:[%s5562_s21 + $0x24] sm:$0x1] }
 0x151   : > { %v2930_v9 = vor.u32 %v2929_v44, %v2926_v8  ;;  %v2952_v16 = vshrl.u32 %v4168_v22, 16  ;;  %v2955_v46 = vshll.u32 %v4168_v22, 16  ;;  %v2961_v47 = vshll.u32 %v6065_v50, 16  ;;  %v6078_v26 = vld [vmem:[#allocation7 + $0x30] sm:$0xff]   ;;  %v6092_v45 = vld [vmem:[%s5562_s21 + $0x3c] sm:$0x1] }
 0x152   : > { %4541 = vmatmul.mubr.msk.bf16.vlgmr.msra.gmra.mrb[0].mxu0 %vm462_vm1, %v4897_v40  ;;  %v1174_v29 = vsel %vm5709_vm6, %v3940_v27, %v1173_v35  ;;  %v2944_v40 = vor.u32 %v2943_v21, %v2940_v31  ;;  %v2966_v48 = vshrl.u32 %v4170_v43, 16  ;;  %v2975_v15 = vshll.u32 %v6069_v63, 16  ;;  %v6088_v58 = vld [vmem:[%s5562_s21 + $0x34] sm:$0x1]  ;;  %v4906_v21 = vld [vmem:[#allocation7 + $0x78] sm:$0xff]  }
 0x153   : > { %4443 = vmatpush3.bf16.msra.mxu1 %v4894_v52  ;;  %4549 = vmatpush3.bf16.msra.mxu0 %v5964_v10  ;;  %v6042_v10 = vld [vmem:[%s5562_s21 + $0x14] sm:$0x1]  ;;  %v3964_v52 = vcombine.low %v1174_v29, %v1178_v59  ;;  %v2931_v57 = vrot.slane %v2930_v9, 4  ;;  %v1186_v55 = vsel %vm5709_vm6, %v3943_v54, %v1185_v38  ;;  %v2954_v61 = vrot.slane %v2952_v16, 4  ;;  %v4176_v38 = vld [vmem:[%s5562_s21 + $0x40] sm:$0xf] }
 0x154   : > { %4544 = vmatprep.mubr.msk.bf16.mxu0 %vm462_vm1, %v4898_v62  ;;  %4550 = vmatprep.subr.bf16.mxu0 %v4899_v11  ;;  %v2933_v23 = vshll.u32 %v6042_v10, 16  ;;  %v2945_v56 = vrot.slane %v2944_v40, 4  ;;  %v2957_v62 = vrot.slane %v2955_v46, 5  ;;  %v2968_v39 = vrot.slane %v2966_v48, 4 }
 0x155   : > { %4452 = vmatprep.subr.bf16.mxu1 %v6015_v20  ;;  %v3337_v13 = vrot.slane %v6042_v10, 5  ;;  %v2963_v18 = vrot.slane %v2961_v47, 5  ;;  %v2977_v3 = vrot.slane %v2975_v15, 5  ;;  %v2980_v60 = vshrl.u32 %v4172_v5, 16  ;;  %v6116_v15 = vld [vmem:[#allocation8 + $0x80] sm:$0xff]  }
 0x156   : > { %4437 = vmatmul.mubr.msk.bf16.gmra.mrb[4].mxu1 %vm462_vm1, %v3955_v0  ;;  %v2935_v30 = vrot.slane %v2933_v23, 5  ;;  %v2950_v27 = vsel %vm5606_vm3, %v2945_v56, %v2949_v7  ;;  %v2958_v35 = vor.u32 %v2957_v62, %v2954_v61  ;;  %v2983_v37 = vshll.u32 %v4172_v5, 16  ;;  %v6104_v7 = vld [vmem:[%s5562_s21 + $0x44] sm:$0x1] }
 0x157   : > { %4444 = vmatprep.mubr.msk.bf16.mxu1 %vm462_vm1, %v3962_v25  ;;  %4551 = vmatpush3.bf16.msra.mxu0 %v4899_v11  ;;  %v2969_v11 = vshll.u32 %v4170_v43, 16  ;;  %v3965_v25 = vcombine.low %v6062_v4, %v1186_v55  ;;  %v2989_v29 = vshll.u32 %v6088_v58, 16  ;;  %v3003_v59 = vshll.u32 %v6092_v45, 16  ;;  %v6109_v4 = vld [vmem:[%s5562_s21 + $0x4c] sm:$0x1] }
 0x158   : > { %4560 = vmatprep.subr.bf16.mxu0 %v6028_v6  ;;  %v2936_v0 = vsel %vm5606_vm3, %v2931_v57, %v2935_v30  ;;  %v2959_v32 = vrot.slane %v2958_v35, 4  ;;  %v2982_v33 = vrot.slane %v2980_v60, 4  ;;  %v2985_v34 = vrot.slane %v2983_v37, 5  ;;  %v4905_v55 = vld [vmem:[%s5562_s21 + $0x18] ss:$8 sps:$4 sm:$0xff]  }
 0x159   : > { %v2971_v2 = vrot.slane %v2969_v11, 5  ;;  %v4180_v14 = vcombine.low %v2936_v0, %v2950_v27  ;;  %v2991_v54 = vrot.slane %v2989_v29, 5  ;;  %v3005_v31 = vrot.slane %v3003_v59, 5  ;;  %v4907_v27 = vld [vmem:[%s5562_s21 + $0x28] ss:$8 sps:$4 sm:$0xff]  }
 0x15a   : > { %4545 = vmatmul.mubr.msk.bf16.gmra.mrb[4].mxu0 %vm462_vm1, %v4900_v12  ;;  %v4174_v12 = vld [vmem:[%s5562_s21 + $0x38] sm:$0xf]  ;;  %v2964_v17 = vsel %vm5606_vm3, %v2959_v32, %v2963_v18  ;;  %v3008_v9 = vshrl.u32 %v4176_v38, 16  ;;  %v3011_v43 = vshll.u32 %v4176_v38, 16  ;;  %v3017_v40 = vshll.u32 %v6104_v7, 16 }
 0x15b   : > { %v2972_v24 = vor.u32 %v2971_v2, %v2968_v39  ;;  %4552 = vmatprep.mubr.msk.bf16.mxu0 %vm462_vm1, %v4180_v14  ;;  %v2994_v1 = vshrl.u32 %v4174_v12, 16  ;;  %v2997_v23 = vshll.u32 %v4174_v12, 16  ;;  %v3031_v11 = vshll.u32 %v6109_v4, 16  ;;  %v6129_v60 = vld [vmem:[%s5555_s15 + $0x14] sm:$0x1] }
 0x15c   : > { %v3010_v57 = vrot.slane %v3008_v9, 4  ;;  %v3013_v48 = vrot.slane %v3011_v43, 5  ;;  %v3019_v61 = vrot.slane %v3017_v40, 5  ;;  %v3341_v5 = vrot.slane %v6049_v41, 5  ;;  %v6152_v40 = vld [vmem:[%s5555_s15 + $0x24] sm:$0x1] }
 0x15d   : > { %v2973_v19 = vrot.slane %v2972_v24, 4  ;;  %v2996_v44 = vrot.slane %v2994_v1, 4  ;;  %v2999_v30 = vrot.slane %v2997_v23, 5  ;;  %v4921_v24 = vld [vmem:[%s5562_s21 + $0x2c] sm:$0x1]  ;;  %v3345_v37 = vrot.slane %v6065_v50, 5 }
 0x15e   : > { %4445 = vmatmul.mubr.msk.bf16.vlgmr.msra.gmra.mrb[0].mxu1 %vm462_vm1, %v3963_v49  ;;  %v2986_v49 = vor.u32 %v2985_v34, %v2982_v33  ;;  %v3014_v2 = vor.u32 %v3013_v48, %v3010_v57  ;;  %v1927_v12 = vshll.u32 %v4921_v24, 16  ;;  %v6137_v1 = vld [vmem:[%s5555_s15 + $0x1c] sm:$0x1]  ;;  %v2805_v33 = vshll.u32 %v6129_v60, 16 }
 0x15f   : > { %4448 = vmatprep.mubr.msk.bf16.mxu1 %vm462_vm1, %v3964_v52  ;;  %4453 = vmatpush3.bf16.msra.mxu1 %v6015_v20  ;;  %v4904_v20 = vld [vmem:[%s5562_s21 + $0x8] ss:$8 sps:$4 sm:$0xff]   ;;  %v2978_v8 = vsel %vm5606_vm3, %v2973_v19, %v2977_v3  ;;  %v4150_v19 = vld [vmem:[%s5555_s15 + $0x18] sm:$0xf]  ;;  %v3349_v9 = vrot.slane %v6069_v63, 5  ;;  %v2833_v48 = vshll.u32 %v6152_v40, 16 }
 0x160   : > { %4454 = vmatprep.subr.bf16.mxu1 %v4902_v36  ;;  %v4181_v22 = vcombine.low %v2964_v17, %v2978_v8  ;;  %v4178_v52 = vld [vmem:[%s5562_s21 + $0x48] sm:$0xf]  ;;  %v2987_v47 = vrot.slane %v2986_v49, 4  ;;  %v3015_v14 = vrot.slane %v3014_v2, 4  ;;  %v2810_v34 = vshrl.u32 %v4150_v19, 16 }
 0x161   : > { %v3022_v16 = vshrl.u32 %v4178_v52, 16  ;;  %v3025_v46 = vshll.u32 %v4178_v52, 16  ;;  %v4910_v3 = vld [vmem:[#allocation7 + $0x38] sm:$0xff]   ;;  %v4152_v52 = vld [vmem:[%s5555_s15 + $0x20] sm:$0xf] }
 0x162   : > { %4553 = vmatmul.mubr.msk.bf16.vlgmr.msra.gmra.mrb[0].mxu0 %vm462_vm1, %v4181_v22  ;;  %v2992_v39 = vsel %vm5606_vm3, %v2987_v47, %v2991_v54  ;;  %v3020_v29 = vsel %vm5606_vm3, %v3015_v14, %v3019_v61  ;;  %v2813_v54 = vshll.u32 %v4150_v19, 16  ;;  %v2812_v22 = vrot.slane %v2810_v34, 4  ;;  %v6156_v47 = vld [vmem:[%s5555_s15 + $0x2c] sm:$0x1] }
 0x163   : > { %4455 = vmatpush3.bf16.msra.mxu1 %v4902_v36  ;;  %v3000_v36 = vor.u32 %v2999_v30, %v2996_v44  ;;  %4561 = vmatpush3.bf16.msra.mxu0 %v6028_v6  ;;  %v3024_v62 = vrot.slane %v3022_v16, 4  ;;  %v3027_v0 = vrot.slane %v3025_v46, 5  ;;  %v3033_v6 = vrot.slane %v3031_v11, 5 }
 0x164   : > { %4464 = vmatprep.subr.bf16.mxu1 %v6078_v26  ;;  %4562 = vmatprep.subr.bf16.mxu0 %v4906_v21  ;;  %v2819_v30 = vshll.u32 %v6137_v1, 16  ;;  %v2815_v49 = vrot.slane %v2813_v54, 5  ;;  %v2824_v16 = vshrl.u32 %v4152_v52, 16  ;;  %v2827_v57 = vshll.u32 %v4152_v52, 16  ;;  %v4913_v54 = vld [vmem:[%s5555_s15 + $0x18] ss:$8 sps:$4 sm:$0xff]  }
 0x165   : > { %v3001_v56 = vrot.slane %v3000_v36, 4  ;;  %v3028_v18 = vor.u32 %v3027_v0, %v3024_v62  ;;  %v2847_v62 = vshll.u32 %v6156_v47, 16 }
 0x166   : > { %4449 = vmatmul.mubr.msk.bf16.gmra.mrb[4].mxu1 %vm462_vm1, %v3965_v25  ;;  %v2821_v36 = vrot.slane %v2819_v30, 5  ;;  %v2816_v46 = vor.u32 %v2815_v49, %v2812_v22 }
 0x167   : > { %4456 = vmatprep.mubr.msk.bf16.mxu1 %vm462_vm1, %v4904_v20  ;;  %v3006_v35 = vsel %vm5606_vm3, %v3001_v56, %v3005_v31  ;;  %v3029_v32 = vrot.slane %v3028_v18, 4  ;;  %4563 = vmatpush3.bf16.msra.mxu0 %v4906_v21  ;;  %v4148_v20 = vld [vmem:[%s5555_s15 + $0x10] sm:$0xf]  ;;  %v4908_v31 = vld [vmem:[%s5562_s21 + $0x38] ss:$8 sps:$4 sm:$0xff]   ;;  %v2807_v21 = vrot.slane %v2805_v33, 5 }
 0x168   : > { %v4182_v25 = vcombine.low %v2992_v39, %v3006_v35  ;;  %v2796_v23 = vshrl.u32 %v4148_v20, 16  ;;  %v2799_v59 = vshll.u32 %v4148_v20, 16  ;;  %4572 = vmatprep.subr.bf16.mxu0 %v6116_v15  ;;  %v2826_v56 = vrot.slane %v2824_v16, 4  ;;  %v6182_v33 = vld [vmem:[%s5555_s15 + $0x3c] sm:$0x1] }
 0x169   : > { %v3034_v17 = vsel %vm5606_vm3, %v3029_v32, %v3033_v6  ;;  %v2817_v0 = vrot.slane %v2816_v46, 4  ;;  %v2829_v39 = vrot.slane %v2827_v57, 5  ;;  %v6163_v35 = vrot.slane %v1927_v12, 5 }
 0x16a   : > { %4556 = vmatprep.mubr.msk.bf16.mxu0 %vm462_vm1, %v4182_v25  ;;  %v4183_v38 = vcombine.low %v3020_v29, %v3034_v17  ;;  %v2798_v8 = vrot.slane %v2796_v23, 4  ;;  %v2801_v44 = vrot.slane %v2799_v59, 5  ;;  %v6169_v25 = vld [vmem:[%s5562_s21 + $0x34] sm:$0x1]  ;;  %v2835_v12 = vrot.slane %v2833_v48, 5 }
 0x16b   : > { %v1941_v14 = vshll.u32 %v6169_v25, 16  ;;  %v2822_v24 = vsel %vm5606_vm3, %v2817_v0, %v2821_v36  ;;  %v2830_v32 = vor.u32 %v2829_v39, %v2826_v56  ;;  %v2849_v20 = vrot.slane %v2847_v62, 5  ;;  %v4156_v29 = vld [vmem:[%s5555_s15 + $0x30] sm:$0xf]  ;;  %v6178_v59 = vld [vmem:[%s5555_s15 + $0x34] sm:$0x1] }
 0x16c   : > { %4557 = vmatmul.mubr.msk.bf16.gmra.mrb[4].mxu0 %vm462_vm1, %v4183_v38  ;;  %v2802_v43 = vor.u32 %v2801_v44, %v2798_v8  ;;  %v4158_v17 = vld [vmem:[%s5555_s15 + $0x38] sm:$0xf]  ;;  %v2852_v38 = vshrl.u32 %v4156_v29, 16  ;;  %v2855_v8 = vshll.u32 %v4156_v29, 16  ;;  %v2861_v44 = vshll.u32 %v6178_v59, 16 }
 0x16d   : > { %v2831_v34 = vrot.slane %v2830_v32, 4  ;;  %v2875_v22 = vshll.u32 %v6182_v33, 16  ;;  %v4162_v62 = vld [vmem:[%s5555_s15 + $0x48] sm:$0xf]  ;;  %v6198_v0 = vld [vmem:[%s5555_s15 + $0x4c] sm:$0x1] }
 0x16e   : > { %4457 = vmatmul.mubr.msk.bf16.vlgmr.msra.gmra.mrb[0].mxu1 %vm462_vm1, %v4905_v55  ;;  %v2803_v55 = vrot.slane %v2802_v43, 4  ;;  %v2854_v52 = vrot.slane %v2852_v38, 4  ;;  %v2857_v43 = vrot.slane %v2855_v8, 5  ;;  %v2863_v36 = vrot.slane %v2861_v44, 5  ;;  %v4915_v8 = vld [vmem:[%s5555_s15 + $0x28] ss:$8 sps:$4 sm:$0xff]  }
 0x16f   : > { %4460 = vmatprep.mubr.msk.bf16.mxu1 %vm462_vm1, %v4907_v27  ;;  %4465 = vmatpush3.bf16.msra.mxu1 %v6078_v26  ;;  %v4154_v26 = vld [vmem:[%s5555_s15 + $0x28] sm:$0xf]  ;;  %v6160_v27 = vld [vmem:[#allocation8 + $0x40] sm:$0xff]   ;;  %v2836_v49 = vsel %vm5606_vm3, %v2831_v34, %v2835_v12  ;;  %v2877_v48 = vrot.slane %v2875_v22, 5  ;;  %v2903_v29 = vshll.u32 %v6198_v0, 16 }
 0x170   : > { %4466 = vmatprep.subr.bf16.mxu1 %v4910_v3  ;;  %v2838_v11 = vshrl.u32 %v4154_v26, 16  ;;  %v2841_v61 = vshll.u32 %v4154_v26, 16  ;;  %v2808_v18 = vsel %vm5606_vm3, %v2803_v55, %v2807_v21  ;;  %v2869_v21 = vshll.u32 %v4158_v17, 16  ;;  %v4160_v26 = vld [vmem:[%s5555_s15 + $0x40] sm:$0xf] }
 0x171   : > { %v4190_v19 = vcombine.low %v2808_v18, %v2822_v24  ;;  %v6194_v55 = vld [vmem:[%s5555_s15 + $0x44] sm:$0x1]  ;;  %v2880_v39 = vshrl.u32 %v4160_v26, 16  ;;  %v2897_v24 = vshll.u32 %v4162_v62, 16  ;;  %v4218_v25 = vld [vmem:[%s5562_s21 + $0x20] sm:$0xe] }
 0x172   : > { %v2840_v2 = vrot.slane %v2838_v11, 4  ;;  %v2843_v6 = vrot.slane %v2841_v61, 5  ;;  %v2871_v57 = vrot.slane %v2869_v21, 5  ;;  %v4914_v11 = vld [vmem:[#allocation8 + $0x88] sm:$0xff]   ;;  %v2858_v61 = vor.u32 %v2857_v43, %v2854_v52 }
 0x173   : > { %4467 = vmatpush3.bf16.msra.mxu1 %v4910_v3  ;;  %v4912_v3 = vld [vmem:[%s5555_s15 + $0x8] ss:$8 sps:$4 sm:$0xff]   ;;  %4564 = vmatprep.mubr.msk.bf16.mxu0 %vm462_vm1, %v4190_v19  ;;  %v2882_v12 = vrot.slane %v2880_v39, 4  ;;  %v2899_v38 = vrot.slane %v2897_v24, 5  ;;  %v4217_v52 = vld [vmem:[%s5562_s21 + $0x18] sm:$0xe] }
 0x174   : > { %4608 = vmatprep.subr.bf16.mxu1 %v6160_v27  ;;  %v2844_v23 = vor.u32 %v2843_v6, %v2840_v2  ;;  %v2883_v2 = vshll.u32 %v4160_v26, 16  ;;  %v2889_v6 = vshll.u32 %v6194_v55, 16  ;;  %v2859_v32 = vrot.slane %v2858_v61, 4  ;;  %v6204_v19 = vld [vmem:[#allocation7 + $0x80] sm:$0xff]   ;;  %v4032_v61 = vld [vmem:[%s5562_s21 + $0x28] sm:$0xf] }
 0x175   : > { %v4038_v24 = vld [vmem:[%s5562_s21 + $0x40] sm:$0xf] }
 0x176   : > { %4461 = vmatmul.mubr.msk.bf16.gmra.mrb[4].mxu1 %vm462_vm1, %v4908_v31  ;;  %v2845_v30 = vrot.slane %v2844_v23, 4  ;;  %v2866_v31 = vshrl.u32 %v4158_v17, 16  ;;  %v2891_v17 = vrot.slane %v2889_v6, 5  ;;  %v1921_v6 = vshll.u32 %v4032_v61, 16 }
 0x177   : > { %4468 = vmatprep.mubr.msk.bf16.mxu1 %vm462_vm1, %v4912_v3  ;;  %v2894_v3 = vshrl.u32 %v4162_v62, 16  ;;  %v1960_v63 = vshrl.u32 %v4038_v24, 16 }
 0x178   : > { %v2850_v16 = vsel %vm5606_vm3, %v2845_v30, %v2849_v20  ;;  %v2868_v46 = vrot.slane %v2866_v31, 4  ;;  %v2885_v20 = vrot.slane %v2883_v2, 5  ;;  %v2905_v30 = vrot.slane %v2903_v29, 5  ;;  %v4924_v31 = vld [vmem:[#allocation8 + $0x48] sm:$0xff]   ;;  %v4034_v2 = vld [vmem:[%s5562_s21 + $0x30] sm:$0xf] }
 0x179   : > { %v4191_v56 = vcombine.low %v2836_v49, %v2850_v16  ;;  %v2896_v34 = vrot.slane %v2894_v3, 4  ;;  %v4216_v49 = vld [vmem:[%s5562_s21 + $0x10] sm:$0xe]  ;;  %v4225_v16 = vrot.slane %v4217_v52, 9  ;;  %v1932_v3 = vshrl.u32 %v4034_v2, 16 }
 0x17a   : > { %v2872_v18 = vor.u32 %v2871_v57, %v2868_v46  ;;  %v2886_v44 = vor.u32 %v2885_v20, %v2882_v12  ;;  %v4224_v26 = vrot.slane %v4216_v49, 9  ;;  %v1935_v29 = vshll.u32 %v4034_v2, 16  ;;  %v4201_v2 = vld [vmem:[%s5555_s15 + $0x18] sm:$0xe] }
 0x17b   : > { %4565 = vmatmul.mubr.msk.bf16.vlgmr.msra.gmra.mrb[0].mxu0 %vm462_vm1, %v4191_v56  ;;  %v2900_v22 = vor.u32 %v2899_v38, %v2896_v34  ;;  %v4226_v56 = vrot.slane %v4218_v25, 9  ;;  %v1923_v34 = vrot.slane %v1921_v6, 5  ;;  %v1934_v38 = vrot.slane %v1932_v3, 4 }
 0x17c   : > { %4573 = vmatpush3.bf16.msra.mxu0 %v6116_v15  ;;  %v2873_v23 = vrot.slane %v2872_v18, 4  ;;  %v6213_v15 = vrot.slane %v1941_v14, 5  ;;  %v3353_v14 = vrot.slane %v6088_v58, 5  ;;  %v4219_v58 = vld [vmem:[%s5562_s21 + $0x28] sm:$0xe]  ;;  %v1962_v49 = vrot.slane %v1960_v63, 4 }
 0x17d   : > { %4574 = vmatprep.subr.bf16.mxu0 %v4914_v11  ;;  %v2901_v46 = vrot.slane %v2900_v22, 4  ;;  %v4227_v10 = vrot.slane %v4219_v58, 9  ;;  %v4036_v18 = vld [vmem:[%s5562_s21 + $0x38] sm:$0xf]  ;;  %v4222_v22 = vld [vmem:[%s5562_s21 + $0x40] sm:$0xe] }
 0x17e   : > { %4469 = vmatmul.mubr.msk.bf16.vlgmr.msra.gmra.mrb[0].mxu1 %vm462_vm1, %v4913_v54  ;;  %v2864_v54 = vsel %vm5606_vm3, %v2859_v32, %v2863_v36  ;;  %v2878_v21 = vsel %vm5606_vm3, %v2873_v23, %v2877_v48  ;;  %v2887_v36 = vrot.slane %v2886_v44, 4  ;;  %v3338_v48 = vsel %vm5709_vm6, %v4224_v26, %v3337_v13  ;;  %v4220_v32 = vld [vmem:[%s5562_s21 + $0x30] sm:$0xe] }
 0x17f   : > { %4610 = vmatpush3.bf16.msra.mxu1 %v6160_v27  ;;  %4472 = vmatprep.mubr.msk.bf16.mxu1 %vm462_vm1, %v4915_v8  ;;  %v4916_v27 = vld [vmem:[%s5555_s15 + $0x38] ss:$8 sps:$4 sm:$0xff]   ;;  %v4192_v43 = vcombine.low %v2864_v54, %v2878_v21  ;;  %v2906_v62 = vsel %vm5606_vm3, %v2901_v46, %v2905_v30  ;;  %v1918_v13 = vshrl.u32 %v4032_v61, 16  ;;  %v3350_v12 = vsel %vm5709_vm6, %v4227_v10, %v3349_v9 }
 0x180   : > { %4609 = vmatprep.subr.bf16.mxu1 %v4924_v31  ;;  %4575 = vmatpush3.bf16.msra.mxu0 %v4914_v11  ;;  %v2892_v57 = vsel %vm5606_vm3, %v2887_v36, %v2891_v17  ;;  %v3342_v11 = vsel %vm5709_vm6, %v4225_v16, %v3341_v5  ;;  %v3346_v5 = vsel %vm5709_vm6, %v4226_v56, %v3345_v37  ;;  %v1946_v23 = vshrl.u32 %v4036_v18, 16  ;;  %v4221_v17 = vld [vmem:[%s5562_s21 + $0x38] sm:$0xe]  ;;  %v4223_v36 = vld [vmem:[%s5562_s21 + $0x48] sm:$0xe] }
 0x181   : > { %4568 = vmatprep.mubr.msk.bf16.mxu0 %vm462_vm1, %v4192_v43  ;;  %4584 = vmatprep.subr.bf16.mxu0 %v6204_v19  ;;  %v4232_v39 = vcombine.low %v3338_v48, %v3342_v11  ;;  %v4193_v41 = vcombine.low %v2892_v57, %v2906_v62  ;;  %v1920_v20 = vrot.slane %v1918_v13, 4  ;;  %v4233_v50 = vcombine.low %v3346_v5, %v3350_v12  ;;  %v4200_v56 = vld [vmem:[%s5555_s15 + $0x10] sm:$0xe]  ;;  %v4205_v12 = vld [vmem:[%s5555_s15 + $0x38] sm:$0xe] }
 0x182   : > { %v1949_v37 = vshll.u32 %v4036_v18, 16  ;;  %v1937_v8 = vrot.slane %v1935_v29, 5  ;;  %v1948_v54 = vrot.slane %v1946_v23, 4  ;;  %v1963_v44 = vshll.u32 %v4038_v24, 16 }
 0x183   : > { %4611 = vmatpush3.bf16.msra.mxu1 %v4924_v31  ;;  %4569 = vmatmul.mubr.msk.bf16.gmra.mrb[4].mxu0 %vm462_vm1, %v4193_v41  ;;  %v1924_v30 = vor.u32 %v1923_v34, %v1920_v20  ;;  %v4228_v31 = vrot.slane %v4220_v32, 9  ;;  %v4229_v21 = vrot.slane %v4221_v17, 9  ;;  %v3357_v43 = vrot.slane %v6092_v45, 5  ;;  %v4202_v41 = vld [vmem:[%s5555_s15 + $0x20] sm:$0xe] }
 0x184   : > { %4576 = vmatprep.mubr.msk.bf16.mxu0 %vm462_vm1, %v4232_v39  ;;  %v1951_v9 = vrot.slane %v1949_v37, 5  ;;  %v1965_v52 = vrot.slane %v1963_v44, 5  ;;  %v4230_v25 = vrot.slane %v4222_v22, 9  ;;  %v3361_v58 = vrot.slane %v6104_v7, 5  ;;  %v4918_v39 = vld [vmem:[#allocation7 + $0x88] sm:$0xff]  }
 0x185   : > { %v1925_v26 = vrot.slane %v1924_v30, 4  ;;  %v3354_v46 = vsel %vm5709_vm6, %v4228_v31, %v3353_v14  ;;  %v3358_v11 = vsel %vm5709_vm6, %v4229_v21, %v3357_v43  ;;  %v4231_v10 = vrot.slane %v4223_v36, 9  ;;  %v4207_v44 = vld [vmem:[%s5555_s15 + $0x48] sm:$0xe] }
 0x186   : > { %4473 = vmatmul.mubr.msk.bf16.gmra.mrb[4].mxu1 %vm462_vm1, %v4916_v27  ;;  %v1938_v27 = vor.u32 %v1937_v8, %v1934_v38  ;;  %v1952_v16 = vor.u32 %v1951_v9, %v1948_v54  ;;  %v1966_v48 = vor.u32 %v1965_v52, %v1962_v49  ;;  %v4234_v62 = vcombine.low %v3354_v46, %v3358_v11  ;;  %v4919_v43 = vld [vmem:[#allocation11] sm:$0xff]  }
 0x187   : > { %v1930_v45 = vsel %vm5606_vm3, %v1925_v26, %v6163_v35  ;;  %v3362_v18 = vsel %vm5709_vm6, %v4230_v25, %v3361_v58  ;;  %v3365_v7 = vrot.slane %v6109_v4, 5  ;;  %v4208_v6 = vrot.slane %v4200_v56, 9  ;;  %4596 = vmatprep.subr.bf16.mxu1 %v4919_v43 }
 0x188   : > { %v1939_v57 = vrot.slane %v1938_v27, 4  ;;  %v1953_v61 = vrot.slane %v1952_v16, 4  ;;  %v1967_v13 = vrot.slane %v1966_v48, 4  ;;  %v4209_v24 = vrot.slane %v4201_v2, 9 }
 0x189   : > { %v3366_v3 = vsel %vm5709_vm6, %v4231_v10, %v3365_v7  ;;  %v3285_v32 = vrot.slane %v6137_v1, 5  ;;  %v4210_v29 = vrot.slane %v4202_v41, 9  ;;  %v3289_v23 = vrot.slane %v6152_v40, 5  ;;  %v4206_v40 = vld [vmem:[%s5555_s15 + $0x40] sm:$0xe] }
 0x18a   : > { %v1944_v14 = vsel %vm5606_vm3, %v1939_v57, %v6213_v15  ;;  %v1958_v5 = vsel %vm5606_vm3, %v1953_v61, %v5996_v53  ;;  %v3281_v15 = vrot.slane %v6129_v60, 5  ;;  %v1972_v4 = vsel %vm5606_vm3, %v1967_v13, %v6001_v42  ;;  %v4204_v42 = vld [vmem:[%s5555_s15 + $0x30] sm:$0xe] }
 0x18b   : > { %4577 = vmatmul.mubr.msk.bf16.vlgmr.msra.gmra.mrb[0].mxu0 %vm462_vm1, %v4233_v50  ;;  %v4042_v35 = vcombine.low %v1930_v45, %v1944_v14  ;;  %v4043_v53 = vcombine.low %v1958_v5, %v1972_v4  ;;  %v3286_v28 = vsel %vm5709_vm6, %v4209_v24, %v3285_v32  ;;  %v4235_v20 = vcombine.low %v3362_v18, %v3366_v3 }
 0x18c   : > { %4585 = vmatpush3.bf16.msra.mxu0 %v6204_v19  ;;  %4580 = vmatprep.mubr.msk.bf16.mxu0 %vm462_vm1, %v4234_v62  ;;  %v3282_v60 = vsel %vm5709_vm6, %v4208_v6, %v3281_v15  ;;  %v4203_v19 = vld [vmem:[%s5555_s15 + $0x28] sm:$0xe]  ;;  %v3293_v50 = vrot.slane %v6156_v47, 5  ;;  %v4212_v34 = vrot.slane %v4204_v42, 9  ;;  %v3297_v38 = vrot.slane %v6178_v59, 5 }
 0x18d   : > { %4484 = vmatprep.mubr.msk.bf16.mxu1 %vm462_vm1, %v4042_v35  ;;  %4586 = vmatprep.subr.bf16.mxu0 %v4918_v39  ;;  %v4242_v1 = vcombine.low %v3282_v60, %v3286_v28  ;;  %v4211_v17 = vrot.slane %v4203_v19, 9  ;;  %v4213_v37 = vrot.slane %v4205_v12, 9  ;;  %v3301_v8 = vrot.slane %v6182_v33, 5 }
 0x18e   : > { %v3290_v54 = vsel %vm5709_vm6, %v4210_v29, %v3289_v23  ;;  %v3298_v47 = vsel %vm5709_vm6, %v4212_v34, %v3297_v38  ;;  %v4214_v33 = vrot.slane %v4206_v40, 9  ;;  %v3305_v31 = vrot.slane %v6194_v55, 5  ;;  %v4920_v55 = vld [vmem:[#allocation11 + $0x8] sm:$0xff]  }
 0x18f   : > { %v3294_v63 = vsel %vm5709_vm6, %v4211_v17, %v3293_v50  ;;  %v3302_v59 = vsel %vm5709_vm6, %v4213_v37, %v3301_v8  ;;  %v4215_v21 = vrot.slane %v4207_v44, 9  ;;  %v3309_v22 = vrot.slane %v6198_v0, 5  ;;  %v4253_v37 = vld [vmem:[#allocation13] ss:$0 sm:$0xff] }
 0x190   : > { %4587 = vmatpush3.bf16.msra.mxu0 %v4918_v39  ;;  %v4243_v30 = vcombine.low %v3290_v54, %v3294_v63  ;;  %v4244_v9 = vcombine.low %v3298_v47, %v3302_v59  ;;  %v3306_v27 = vsel %vm5709_vm6, %v4214_v33, %v3305_v31 }
 0x191   : > { %v3310_v49 = vsel %vm5709_vm6, %v4215_v21, %v3309_v22 }
 0x192   : > { %4485 = vmatmul.mubr.msk.bf16.vlgmr.msra.gmra.mrb[4].mxu1 %vm462_vm1, %v4043_v53  ;;  %v4245_v52 = vcombine.low %v3306_v27, %v3310_v49 }
 0x193   : > { %4581 = vmatmul.mubr.msk.bf16.gmra.mrb[4].mxu0 %vm462_vm1, %v4235_v20  ;;  %4597 = vmatpush3.bf16.msra.mxu1 %v4919_v43 }
 0x194   : > { %4588 = vmatprep.mubr.msk.bf16.mxu0 %vm462_vm1, %v4242_v1  ;;  %4598 = vmatprep.subr.bf16.mxu1 %v4920_v55 }
 0x197   : > { %4599 = vmatpush3.bf16.msra.mxu1 %v4920_v55 }
 0x19b   : > { %4589 = vmatmul.mubr.msk.bf16.vlgmr.msra.gmra.mrb[0].mxu0 %vm462_vm1, %v4243_v30 }
 0x19c   : > { %4592 = vmatprep.mubr.msk.bf16.mxu0 %vm462_vm1, %v4244_v9 }
 0x1a3   : > { %4593 = vmatmul.mubr.msk.bf16.gmra.mrb[4].mxu0 %vm462_vm1, %v4245_v52 }
 0x251   : > { %v4470_v0 = vpop.f32.mrb[0].mxu1 }
 0x252   : > { %v1678_v36 = vpop.f32.mrb[1].mxu1 }
 0x253   : > { %v4471_v26 = vpop.f32.mrb[2].mxu1 }
 0x254   : > { %v1681_v16 = vpop.f32.mrb[3].mxu1 }
 0x265   : > { %v4486_v46 = vpop.f32.mrb[4].mxu1 }
 0x266   : > { %v2069_v25 = vpop.f32.mrb[5].mxu1 }
 0x267   : > { %v4487_v57 = vpop.f32.mrb[6].mxu1 }
 0x268   : > { %v2072_v48 = vpop.f32.mrb[7].mxu1 }
 0x26e   : > { %v4590_v11 = vpop.f32.mrb[0].mxu0 }
 0x26f   : > { %v4612_v58 = vadd.f32 %v4590_v11, %v4470_v0  ;;  %v3548_v56 = vpop.f32.mrb[1].mxu0 }
 0x270   : > { %v4613_v45 = vadd.f32 %v3548_v56, %v1678_v36  ;;  %v4591_v61 = vpop.f32.mrb[2].mxu0 }
 0x271   : > { %v3596_v62 = vadd.f32 %v4612_v58, %v4252_v51  ;;  %v4614_v39 = vadd.f32 %v4591_v61, %v4471_v26  ;;  %v3551_v10 = vpop.f32.mrb[3].mxu0 }
 0x272   : > { %v3594_v2 = vadd.f32 %v4613_v45, %v4252_v51  ;;  %v4615_v14 = vadd.f32 %v3551_v10, %v1681_v16 }
 0x273   : > { %v3597_v13 = vadd.f32 %v4614_v39, %v4252_v51  ;;  %v3604_v7 = vmax.f32 %v3596_v62, 0.0 }
 0x274   : > { %v3595_v18 = vadd.f32 %v4615_v14, %v4252_v51  ;;  %v3602_v35 = vmax.f32 %v3594_v2, 0.0 }
 0x275   : > { %v3605_v41 = vmax.f32 %v3597_v13, 0.0 }
 0x276   : > { %v3603_v5 = vmax.f32 %v3595_v18, 0.0  ;;  %v4594_v6 = vpop.f32.mrb[4].mxu0 }
 0x277   : > { %v3611_v15 = vpack.c.bf16 %v3605_v41, %v3604_v7  ;;  %v4616_v4 = vadd.f32 %v4594_v6, %v4486_v46  ;;  %v3564_v3 = vpop.f32.mrb[5].mxu0 }
 0x278   : > { %v3610_v24 = vpack.c.bf16 %v3603_v5, %v3602_v35  ;;  %v4617_v32 = vadd.f32 %v3564_v3, %v2069_v25  ;;  %v4595_v53 = vpop.f32.mrb[6].mxu0 }
 0x279   : > { %v3600_v60 = vadd.f32 %v4616_v4, %v4252_v51  ;;  %v4618_v19 = vadd.f32 %v4595_v53, %v4487_v57  ;;  %v3567_v28 = vpop.f32.mrb[7].mxu0 }
 0x27a   : > { %v3598_v42 = vadd.f32 %v4617_v32, %v4252_v51  ;;  %v4619_v12 = vadd.f32 %v3567_v28, %v2072_v48  ;;  %4600 = vmatprep.mubr.msk.bf16.mxu1 %vm462_vm1, %v3610_v24 }
 0x27b   : > { %v3601_v20 = vadd.f32 %v4618_v19, %v4252_v51  ;;  %4601 = vmatmul.mubr.msk.bf16.vlgmr.msra.gmra.mrb[8].mxu1 %vm462_vm1, %v3611_v15  ;;  %v3608_v1 = vmax.f32 %v3600_v60, 0.0 }
 0x27c   : > { %v3599_v29 = vadd.f32 %v4619_v12, %v4252_v51  ;;  %v3606_v17 = vmax.f32 %v3598_v42, 0.0 }
 0x27d   : > { %v3609_v23 = vmax.f32 %v3601_v20, 0.0 }
 0x27e   : > { %v3607_v50 = vmax.f32 %v3599_v29, 0.0 }
 0x27f   : > { %v3613_v34 = vpack.c.bf16 %v3609_v23, %v3608_v1 }
 0x280   : > { %v3612_v38 = vpack.c.bf16 %v3607_v50, %v3606_v17 }
 0x282   : > { %4604 = vmatprep.mubr.msk.bf16.mxu1 %vm462_vm1, %v3612_v38 }
 0x283   : > { %4605 = vmatmul.mubr.msk.bf16.gmra.mrb[12].mxu1 %vm462_vm1, %v3613_v34 }
 0x34e   : > { %v4602_v8 = vpop.f32.mrb[8].mxu1 }
 0x34f   : > { %v3692_v54 = vadd.f32 %v4602_v8, %v4253_v37  ;;  %v3683_v63 = vpop.f32.mrb[9].mxu1 }
 0x350   : > { %v3684_v40 = vadd.f32 %v4253_v37, %v3683_v63  ;;  %v4603_v47 = vpop.f32.mrb[10].mxu1 }
 0x351   : > { %3716 = vst [vmem:[%s404_s28 + $0x10] sm:$0xff] %v3692_v54  ;;  %v3695_v59 = vadd.f32 %v4603_v47, %v4253_v37  ;;  %v3686_v44 = vpop.f32.mrb[11].mxu1 }
 0x352   : > { %3714 = vst [vmem:[%s404_s28] sm:$0xff] %v3684_v40  ;;  %v3687_v30 = vadd.f32 %v4253_v37, %v3686_v44 }
 0x353   : > { %3717 = vst [vmem:[%s404_s28 + $0x18] sm:$0xff] %v3695_v59 }
 0x354   : > { %3715 = vst [vmem:[%s404_s28 + $0x8] sm:$0xff] %v3687_v30 }
 0x356   : > { %v4606_v33 = vpop.f32.mrb[12].mxu1 }
 0x357   : > { %v3708_v9 = vadd.f32 %v4606_v33, %v4253_v37  ;;  %v3699_v31 = vpop.f32.mrb[13].mxu1 }
 0x358   : > { %v3700_v21 = vadd.f32 %v4253_v37, %v3699_v31  ;;  %v4607_v22 = vpop.f32.mrb[14].mxu1 }
 0x359   : > { %3720 = vst [vmem:[%s404_s28 + $0x30] sm:$0xff] %v3708_v9  ;;  %v3711_v27 = vadd.f32 %v4607_v22, %v4253_v37  ;;  %v3702_v49 = vpop.f32.mrb[15].mxu1 }
 0x35a   : > { %3718 = vst [vmem:[%s404_s28 + $0x20] sm:$0xff] %v3700_v21  ;;  %v3703_v52 = vadd.f32 %v4253_v37, %v3702_v49 }
 0x35b   : > { %3721 = vst [vmem:[%s404_s28 + $0x38] sm:$0xff] %v3711_v27 }
 0x35c   : > { %3719 = vst [vmem:[%s404_s28 + $0x28] sm:$0xff] %v3703_v52 }
 0x35d   : > { %5138 = shalt.err (!%p5135_p8)
}
 0x35e   : > { %s5139_s23 = scalar_lea.hbm %s6333_s22, 1024  ;;  %s5143_s3 = scalar_lea.hbm %s6384_s7, 2048 }
 0x35f   : > { %p5140_p11 = scmp.ne.s32.totalorder %s6333_s22, %s5139_s23  ;;  %p5144_p13 = scmp.lt.u32.totalorder %s6333_s22, %s6384_s7 }
 0x360   : > { %p5145_p1 = scmp.lt.u32.totalorder %s5143_s3, %s5139_s23  ;;  %p5147_p6 = scmp.lt.u32.totalorder %s5139_s23, %s6333_s22 }
 0x361   : > { %p5141_p0 = pnand %p5140_p11, %p6424_p2 }
 0x362   : > { %p5146_p3 = por %p5145_p1, %p5144_p13 }
 0x363   : > { %p5142_p12 = pneg %p5141_p0 }
 0x364   : > { %p5148_p7 = por %p5147_p6, %p5146_p3 }
 0x366   : > { %p5149_p10 = pnand %p5148_p7, %p5142_p12 }
 0x368   : > { %5152 = shalt.err (!%p5149_p10)
}
 0x369   : > { %s5219_s14 = smov 128   ;;  %s5220_s28 = smov 8  }
 0x36a   : > { %4777 = dma.vmem_to_hbm [thread:$0]  (%p6424_p2), %s6328_s13, 1024, %s6333_s22, %s3723_s30, %s5219_s14, %s5219_s14, %s5220_s28  }
 0x36b PF: > { %s3751_s18 = sand.u32 1, %s5195_s24   ;;  %p6425_p5 = scmp.ne.s32.totalorder %s6406_s20, 0 }
 0x36c   : > { %p6426_p9 = scmp.ge.s32.totalorder %s5207_s27, 2  ;;  %s3752_s2 = scalar_lea.sflag [#allocation4], %s3751_s18 }
 0x36e   : > { %p4803_p4 = pnand %p6426_p9, %p6425_p5 }
 0x370   : > { %5190 = dma.done.wait (!%p4803_p4), %s3752_s2, 1024  }
 0x371   : > { %5192 = vsyncadd (!%p4803_p4), %s3752_s2, 4294966272  ;;  %p25_p8 = scmp.ge.s32.totalorder %s5428_s11, 4   ;;  %s6427_s24 = smov %s5199_s25 }
 0x372   : > { %s6428_s25 = smov %s5203_s26  ;;  %s6429_s26 = smov %s5440_s16 }
 0x373   : > { %s6430_s27 = smov %s5428_s11  ;;  %27 = sbr.rel (!%p25_p8) target bundleno = 14 (0xe), region = 146 }
 0x37a   :  { %3757 = vsyncpa [#allocation3], 1 }
 0x37b   :  { %3759 = vsyncpa [#allocation3 + $0x1], 1 }
 0x37c   :  { %3760 = vsyncpa [#allocation6], 1 }
 0x37d   :  { %3762 = vsyncpa [#allocation6 + $0x1], 1 }
 0x37e   :  { %3763 = vsyncpa [#allocation9], 1 }
 0x37f   :  { %3764 = vsyncpa [#allocation12], 1 }
 0x380   :  { %3765 = vsyncpa [#allocation4], 1 }
 0x381   :  { %3767 = vsyncpa [#allocation4 + $0x1], 1 }

// kernel: _lambda_.4
= control target key start
LH: loop header
LB: loop body
LE: loop exit
PB: predicated region body
PF: predicated region fallthrough
CT: control target
= control target key end

     0   :  { %s14947_s0 = inlined_call_operand.hbm [shape: bf16[2,44,44,64], index: 0, kind: input, shape index: {}]   ;;  %s14948_s1 = inlined_call_operand.hbm [shape: f32[2,1,32], index: 1, kind: input, shape index: {}]   ;;  %s14949_s2 = inlined_call_operand.hbm [shape: bf16[64,160], index: 2, kind: input, shape index: {}]   ;;  %s14950_s3 = inlined_call_operand.hbm [shape: f32[1,160], index: 3, kind: input, shape index: {}]   ;;  %s14951_s4 = inlined_call_operand.hbm [shape: bf16[160,32], index: 4, kind: input, shape index: {}]   ;;  %s14952_s5 = inlined_call_operand.hbm [shape: f32[1,32], index: 5, kind: input, shape index: {}]   ;;  %s14953_s6 = inlined_call_operand.hbm [shape: bf16[4,9,64,128], index: 6, kind: input, shape index: {}]   ;;  %s14954_s7 = inlined_call_operand.hbm [shape: f32[4,1,128], index: 7, kind: input, shape index: {}]   ;;  %s14955_s8 = inlined_call_operand.hbm [shape: bf16[4,128,32], index: 8, kind: input, shape index: {}]   ;;  %s14956_s9 = inlined_call_operand.hbm [shape: bf16[2,64,32], index: 9, kind: output, shape index: {}]  }
   0x1   :  { %14995 = sst [smem:[#allocation42_spill]] %s14947_s0 }
   0x2   :  { %14996 = sst [smem:[#allocation43_spill]] %s14948_s1 }
   0x3   :  { %14997 = sst [smem:[#allocation44_spill]] %s14949_s2 }
   0x4   :  { %14998 = sst [smem:[#allocation45_spill]] %s14950_s3 }
   0x5   :  { %14999 = sst [smem:[#allocation46_spill]] %s14953_s6 }
   0x6   :  { %15000 = sst [smem:[#allocation47_spill]] %s14956_s9 }
   0x7   :  { %14 = vsyncpa [#allocation4], 0 }
   0x8   :  { %16 = vsyncpa [#allocation4 + $0x1], 0 }
   0x9   :  { %17 = vsyncpa [#allocation7], 0 }
   0xa   :  { %19 = vsyncpa [#allocation7 + $0x1], 0 }
   0xb   :  { %20 = vsyncpa [#allocation10], 0 }
   0xc   :  { %21 = vsyncpa [#allocation13], 0 }
   0xd   :  { %22 = vsyncpa [#allocation5], 0 }
   0xe   :  { %24 = vsyncpa [#allocation5 + $0x1], 0  ;;  %s12719_s30 = smov 0   ;;  %s12721_s10 = smov 0  }
   0xf   :  { %s12723_s11 = smov 0   ;;  %s12725_s12 = smov 0  }
  0x10   :  { %s12727_s13 = smov 0   ;;  %s12729_s14 = smov 0  }
  0x11   :  { %s12731_s15 = smov 0   ;;  %s12733_s16 = smov 0  }
  0x12   :  { %s12735_s17 = smov 0   ;;  %s12737_s18 = smov 0  }
  0x13   :  { %s12739_s19 = smov 0  }
  0x14 LB: > { %15001 = sst [smem:[#allocation27_spill]] %s12622_s12  ;;  %s12773_s20 = sadd.s32 4294967295, %s12650_s19   ;;  %s12650_s19 = sphi %s12739_s19, %s30_s19   ;;  %s12646_s18 = sphi %s12737_s18, %s15095_s18   ;;  %s12642_s17 = sphi %s12735_s17, %s15100_s17   ;;  %s12638_s16 = sphi %s12733_s16, %s15093_s16   ;;  %s12634_s15 = sphi %s12731_s15, %s15099_s15   ;;  %s12630_s14 = sphi %s12729_s14, %s15092_s14   ;;  %s12626_s13 = sphi %s12727_s13, %s15091_s13   ;;  %s12622_s12 = sphi %s12725_s12, %s15090_s12   ;;  %s12618_s11 = sphi %s12723_s11, %s15098_s11   ;;  %s12614_s10 = sphi %s12721_s10, %s15097_s10   ;;  %s12610_s30 = sphi %s12719_s30, %s15096_s30  }
  0x15   : > { %15002 = sst [smem:[#allocation28_spill]] %s12626_s13  ;;  %p198_p0 = scmp.ne.s32.totalorder %s12614_s10, %s12610_s30 }
  0x16   : > { %15003 = sst [smem:[#allocation29_spill]] %s12630_s14  ;;  %p14958_p1 = scmp.eq.s32.totalorder %s12773_s20, 0 }
  0x17   : > { %15004 = sst [smem:[#allocation30_spill]] %s12634_s15  ;;  %p9103_p3 = scmp.ge.s32.totalorder %s12650_s19, 1 }
  0x18   : > { %15005 = sst [smem:[#allocation31_spill]] %s12638_s16  ;;  %p287_p4 = scmp.lt.s32.totalorder %s12650_s19, 9 }
  0x19   : > { %15006 = sst [smem:[#allocation32_spill]] %s12646_s18  ;;  %p12782_p5 = por %p198_p0, %p14958_p1 }
  0x1a   : > { %15007 = sst [smem:[#allocation33_spill]] %s12773_s20  ;;  %p12786_p6 = pnand %p9103_p3, %p287_p4 }
  0x1b   : > { %s15008_s21 = scalar_select %p12782_p5, 1, 0 }
  0x1c   : > { %s15010_s22 = scalar_select %p12786_p6, 1, 0 }
  0x1d   : > { %15009 = sst [smem:[#allocation34_spill]] %s15008_s21  ;;  %s12652_s23 = smov [#allocation8]  }
  0x1e   : > { %15011 = sst [smem:[#allocation35_spill]] %s15010_s22  ;;  %s299_s24 = sshll.u32 %s12652_s23, 4  ;;  %s300_s24 = int_to_ptr.vmem [resolvable:$true] %s299_s24 }
  0x1f   : > { %p11860_p7 = pneg %p12786_p6  ;;  %s15013_s2 = sld [smem:[#allocation44_spill]] }
  0x21   : > { %p12794_p8 = pnand %p11860_p7, %p14958_p1 }
  0x23   : > { %s15012_s25 = scalar_select %p12794_p8, 1, 0 }
  0x24   : > { %p12806_p10 = pneg %p12794_p8 }
  0x25   : > { %s12238_s28 = scalar_lea.hbm %s15013_s2, 1024 }
  0x26   : > { %p12239_p9 = scmp.ne.s32.totalorder %s15013_s2, %s12238_s28  ;;  %p12245_p13 = scmp.lt.u32.totalorder %s12238_s28, %s15013_s2 }
  0x27   : > { %s15014_s23 = scalar_select %p12806_p10, 1, 0 }
  0x28   : > { %p12241_p11 = pnand %p12806_p10, %p12239_p9 }
  0x2a   : > { %p12242_p12 = pneg %p12241_p11 }
  0x2c   : > { %p12247_p0 = pnand %p12245_p13, %p12242_p12 }
  0x2e   : > { %12250 = shalt.err (!%p12247_p0)
}
  0x2f   : > { %s12251_s26 = scalar_lea.vmem %s300_s24, 1024  ;;  %p12259_p1 = scmp.lt.s32.totalorder %s300_s24, %s300_s24 }
  0x30   : > { %p12252_p3 = scmp.ne.s32.totalorder %s300_s24, %s12251_s26  ;;  %p12260_p2 = scmp.lt.s32.totalorder %s12251_s26, %s12251_s26 }
  0x32   : > { %p12254_p4 = pnand %p12252_p3, %p12806_p10  ;;  %p12261_p5 = por %p12260_p2, %p12259_p1 }
  0x34   : > { %p12255_p7 = pneg %p12254_p4 }
  0x36   : > { %p12262_p6 = pnand %p12261_p5, %p12255_p7 }
  0x38   : > { %12265 = shalt.err (!%p12262_p6)
}
  0x39   : > { %s12653_s27 = smov 128   ;;  %s12654_s9 = smov 8  }
  0x3a   : > { %11863 = dma.hbm_to_vmem [thread:$0]  (!%p12794_p8), %s15013_s2, 1024, %s300_s24, [#allocation7], %s12653_s27, %s12653_s27, %s12654_s9  }
  0x3b   : > { %s9102_s29 = sadd.s32 4294967294, %s12650_s19   ;;  %s39_s30 = sadd.s32 1, %s12642_s17 }
  0x3c   : > { %p40_p1 = scmp.ge.s32.totalorder %s39_s30, 4  ;;  %s42_s26 = sadd.s32 1, %s12646_s18 }
  0x3d   : > { %s49_s15 = sadd.s32 1, %s12630_s14  ;;  %p56_p2 = scmp.ne.s32.totalorder %s12630_s14, %s12626_s13 }
  0x3e   : > { %s15102_s30 = smov (%p40_p1, %s39_s30), 0  ;;  %s15104_s26 = smov (!%p40_p1, %s42_s26), %s12646_s18 }
  0x3f   : > { %15015 = sst [smem:[#allocation36_spill]] %s15102_s30  ;;  %p14975_p5 = scmp.eq.s32.totalorder %s12650_s19, 0 }
  0x40   : > { %p62_p6 = scmp.ne.s32.totalorder %s12626_s13, %s12622_s12  ;;  %p44_p9 = scmp.ge.s32.totalorder %s15104_s26, 2 }
  0x41   : > { %p15016_p11 = scmp.eq.s32.totalorder %s12773_s20, 7  ;;  %p58_p13 = por %p14975_p5, %p56_p2 }
  0x42   : > { %p15019_p0 = scmp.eq.s32.totalorder %s12773_s20, 0  ;;  %s15106_s26 = smov (%p44_p9, %s15104_s26), 0 }
  0x43   : > { %p12836_p12 = por %p15016_p11, %p56_p2  ;;  %15022 = sst [smem:[#allocation39_spill]] %s15106_s26 }
  0x44   : > { %p12844_p3 = por %p15019_p0, %p62_p6  ;;  %p280_p4 = scmp.eq.s32.totalorder %s9102_s29, 7 }
  0x45   : > { %s15017_s24 = scalar_select %p12836_p12, 1, 0 }
  0x46   : > { %s15020_s27 = scalar_select %p12844_p3, 1, 0 }
  0x47   : > { %15018 = sst [smem:[#allocation37_spill]] %s15017_s24  ;;  %s46_s9 = ssub.s32 %s12646_s18, %s15106_s26 }
  0x48   : > { %15021 = sst [smem:[#allocation38_spill]] %s15020_s27  ;;  %p47_p7 = scmp.eq.s32.totalorder %s46_s9, 0 }
  0x49   : > { %p12852_p1 = por %p280_p4, %p62_p6  ;;  %p14974_p11 = scmp.lt.s32.totalorder %s12650_s19, 8 }
  0x4a   : > { %s12859_s2 = scalar_select %p47_p7, %s12630_s14, %s49_s15  }
  0x4b   : > { %s15023_s16 = scalar_select %p12852_p1, 1, 0 }
  0x4c   : > { %15025 = sst [smem:[#allocation41_spill]] %s12859_s2  ;;  %s14969_s12 = sand.u32 1, %s12630_s14  }
  0x4d   : > { %15024 = sst [smem:[#allocation40_spill]] %s15023_s16  ;;  %s11826_s24 = smul.u32 1056, %s14969_s12 }
  0x4e   : > { %p12866_p2 = pnand %p14974_p11, %p58_p13  ;;  %s11827_s29 = smul.u32 16896, %s12646_s18 }
  0x4f   : > { %s15027_s0 = sld [smem:[#allocation42_spill]]  ;;  %s352_s15 = scalar_lea.vmem [#allocation3], %s11826_s24 }
  0x50   : > { %s359_s28 = sshll.u32 %s352_s15, 4  ;;  %s12655_s12 = smov [#allocation9]   ;;  %s12876_s28 = int_to_ptr.vmem [resolvable:$true] %s359_s28 }
  0x51   : > { %s12878_s2 = sshll.u32 %s12655_s12, 4  ;;  %s15028_s16 = sand.u32 1, %s12650_s19   ;;  %s314_s2 = int_to_ptr.vmem [resolvable:$true] %s12878_s2 }
  0x52   : > { %s12882_s13 = scalar_lea.sflag [#allocation4], %s15028_s16  ;;  %p14981_p9 = pneg %p12866_p2 }
  0x55   : > { %s12874_s27 = scalar_lea.hbm %s15027_s0, %s11827_s29  ;;  %s12271_s24 = scalar_lea.hbm %s15027_s0, 33792 }
  0x56   : > { %s12266_s20 = scalar_lea.hbm %s12874_s27, 16896  ;;  %p12272_p4 = scmp.lt.u32.totalorder %s12874_s27, %s15027_s0 }
  0x57   : > { %p12267_p6 = scmp.ne.s32.totalorder %s12874_s27, %s12266_s20  ;;  %p12273_p7 = scmp.lt.u32.totalorder %s12271_s24, %s12266_s20 }
  0x58   : > { %p12275_p5 = scmp.lt.u32.totalorder %s12266_s20, %s12874_s27 }
  0x59   : > { %p12269_p13 = pnand %p14981_p9, %p12267_p6  ;;  %p12274_p11 = por %p12273_p7, %p12272_p4 }
  0x5b   : > { %p12270_p0 = pneg %p12269_p13  ;;  %p12276_p1 = por %p12275_p5, %p12274_p11 }
  0x5d   : > { %p12277_p12 = pnand %p12276_p1, %p12270_p0 }
  0x5f   : > { %12280 = shalt.err (!%p12277_p12)
}
  0x60   : > { %s12281_s12 = scalar_lea.vmem %s12876_s28, 16896  ;;  %s12656_s16 = smov [#allocation3]  }
  0x61   : > { %p12282_p6 = scmp.ne.s32.totalorder %s12876_s28, %s12281_s12  ;;  %s12286_s26 = sshll.u32 %s12656_s16, 4  ;;  %s12287_s26 = int_to_ptr.vmem [resolvable:$false] %s12286_s26 }
  0x62   : > { %s12288_s29 = scalar_lea.vmem %s12287_s26, 33792  ;;  %p12289_p8 = scmp.lt.s32.totalorder %s12876_s28, %s12287_s26 }
  0x63   : > { %p12284_p13 = pnand %p12282_p6, %p14981_p9  ;;  %p12290_p4 = scmp.lt.s32.totalorder %s12288_s29, %s12281_s12 }
  0x65   : > { %p12285_p3 = pneg %p12284_p13  ;;  %p12291_p7 = por %p12290_p4, %p12289_p8 }
  0x67   : > { %p12292_p5 = pnand %p12291_p7, %p12285_p3 }
  0x69   : > { %12295 = shalt.err (!%p12292_p5)
}
  0x6a   : > { %s14982_s20 = smov 64   ;;  %s14986_s24 = smov 4  }
  0x6b   : > { %11876 = dma.hbm_to_vmem [thread:$0]  (!%p12866_p2), %s12874_s27, 16896, %s12876_s28, %s12882_s13, %s14982_s20, %s14982_s20, %s14986_s24  }
  0x6c   : > { %s15029_s3 = sld [smem:[#allocation45_spill]] }
  0x72   : > { %s12296_s12 = scalar_lea.hbm %s15029_s3, 32 }
  0x73   : > { %p12297_p8 = scmp.ne.s32.totalorder %s15029_s3, %s12296_s12  ;;  %p12303_p1 = scmp.lt.u32.totalorder %s12296_s12, %s15029_s3 }
  0x75   : > { %p12299_p12 = pnand %p12297_p8, %p12806_p10 }
  0x77   : > { %p12300_p3 = pneg %p12299_p12 }
  0x79   : > { %p12305_p11 = pnand %p12303_p1, %p12300_p3 }
  0x7b   : > { %12308 = shalt.err (!%p12305_p11)
}
  0x7c   : > { %s12309_s22 = scalar_lea.vmem %s314_s2, 32  ;;  %p12317_p4 = scmp.lt.s32.totalorder %s314_s2, %s314_s2 }
  0x7d   : > { %p12310_p0 = scmp.ne.s32.totalorder %s314_s2, %s12309_s22  ;;  %p12318_p7 = scmp.lt.s32.totalorder %s12309_s22, %s12309_s22 }
  0x7f   : > { %p12312_p6 = pnand %p12310_p0, %p12806_p10  ;;  %p12319_p5 = por %p12318_p7, %p12317_p4 }
  0x81   : > { %p12313_p13 = pneg %p12312_p6 }
  0x83   : > { %p12320_p9 = pnand %p12319_p5, %p12313_p13 }
  0x85   : > { %12323 = shalt.err (!%p12320_p9)
}
  0x86   : > { %p15030_p8 = scmp.ne.s32.totalorder %s15012_s25, 0  ;;  %s9110_s0 = sshll.u32 %s12646_s18, 4 }
  0x87   : > { %s15031_s1 = sld [smem:[#allocation43_spill]]  ;;  %s15032_s22 = sand.u32 1, %s12630_s14  }
  0x88   : > { %11866 = dma.hbm_to_vmem [thread:$0]  (!%p15030_p8), %s15029_s3, 32, %s314_s2, [#allocation10]  }
  0x89   : > { %s372_s16 = scalar_lea.vmem [#allocation6], %s15032_s22  ;;  %s15033_s29 = sand.u32 1, %s12650_s19  }
  0x8a   : > { %s379_s26 = sshll.u32 %s372_s16, 4  ;;  %s12942_s27 = scalar_lea.sflag [#allocation7], %s15033_s29  ;;  %s380_s26 = int_to_ptr.vmem [resolvable:$true] %s379_s26 }
  0x8b   : > { %p15034_p12 = pneg %p12866_p2 }
  0x8d   : > { %s12936_s12 = scalar_lea.hbm %s15031_s1, %s9110_s0  ;;  %s12329_s9 = scalar_lea.hbm %s15031_s1, 32 }
  0x8e   : > { %s12324_s28 = scalar_lea.hbm %s12936_s12, 16  ;;  %p12330_p11 = scmp.lt.u32.totalorder %s12936_s12, %s15031_s1 }
  0x8f   : > { %p12325_p9 = scmp.ne.s32.totalorder %s12936_s12, %s12324_s28  ;;  %p12331_p0 = scmp.lt.u32.totalorder %s12329_s9, %s12324_s28 }
  0x90   : > { %p12333_p13 = scmp.lt.u32.totalorder %s12324_s28, %s12936_s12 }
  0x91   : > { %p12327_p3 = pnand %p12325_p9, %p15034_p12  ;;  %p12332_p6 = por %p12331_p0, %p12330_p11 }
  0x93   : > { %p12328_p1 = pneg %p12327_p3  ;;  %p12334_p4 = por %p12333_p13, %p12332_p6 }
  0x95   : > { %p12335_p7 = pnand %p12334_p4, %p12328_p1 }
  0x97   : > { %12338 = shalt.err (!%p12335_p7)
}
  0x98   : > { %s12339_s22 = scalar_lea.vmem %s380_s26, 16  ;;  %p15035_p9 = pmov %p15034_p12 }
  0x99   : > { %p12340_p5 = scmp.ne.s32.totalorder %s380_s26, %s12339_s22  ;;  %s12659_s16 = smov [#allocation6]  }
  0x9a   : > { %s12344_s29 = sshll.u32 %s12659_s16, 4  ;;  %s12345_s29 = int_to_ptr.vmem [resolvable:$false] %s12344_s29 }
  0x9b   : > { %p12342_p12 = pnand %p12340_p5, %p15035_p9  ;;  %s12346_s2 = scalar_lea.vmem %s12345_s29, 32 }
  0x9c   : > { %p12347_p8 = scmp.lt.s32.totalorder %s380_s26, %s12345_s29  ;;  %p12348_p10 = scmp.lt.s32.totalorder %s12346_s2, %s12339_s22 }
  0x9d   : > { %p12343_p3 = pneg %p12342_p12 }
  0x9e   : > { %p12349_p0 = por %p12348_p10, %p12347_p8 }
  0xa0   : > { %p12350_p11 = pnand %p12349_p0, %p12343_p3 }
  0xa2   : > { %12353 = shalt.err (!%p12350_p11)
}
  0xa3   : > { %11879 = dma.hbm_to_vmem [thread:$0]  (!%p12866_p2), %s12936_s12, 16, %s380_s26, %s12942_s27  }
  0xa4   : > { %s182_s20 = ssub.s32 %s12642_s17, %s15102_s30  ;;  %s185_s28 = sadd.s32 1, %s12618_s11 }
  0xa5   : > { %p183_p1 = scmp.eq.s32.totalorder %s182_s20, 0  ;;  %p192_p10 = scmp.ne.s32.totalorder %s12618_s11, %s12614_s10 }
  0xa6   : > { %s12970_s0 = sand.u32 1, %s12618_s11   ;;  %p15036_p8 = scmp.eq.s32.totalorder %s12650_s19, 0 }
  0xa7   : > { %s12973_s21 = scalar_select %p183_p1, %s12618_s11, %s185_s28  }
  0xa8   : > { %p194_p6 = por %p192_p10, %p15036_p8  ;;  %s11828_s9 = smul.u32 288, %s12970_s0 }
  0xa9   : > { %s11829_s15 = smul.u32 4608, %s12642_s17  ;;  %p15037_p13 = scmp.lt.s32.totalorder %s12650_s19, 8 }
  0xaa   : > { %s15039_s6 = sld [smem:[#allocation46_spill]]  ;;  %s390_s29 = scalar_lea.vmem [#allocation14], %s11828_s9 }
  0xab   : > { %p12981_p4 = pnand %p15037_p13, %p194_p6  ;;  %s397_s2 = sshll.u32 %s390_s29, 4  ;;  %s12990_s2 = int_to_ptr.vmem [resolvable:$true] %s397_s2 }
  0xad   : > { %s15038_s22 = scalar_select %p12981_p4, 1, 0 }
  0xae   : > { %p12996_p7 = pneg %p12981_p4 }
  0xb0   : > { %s12988_s26 = scalar_lea.hbm %s15039_s6, %s11829_s15  ;;  %s12359_s12 = scalar_lea.hbm %s15039_s6, 18432 }
  0xb1   : > { %s12354_s20 = scalar_lea.hbm %s12988_s26, 4608  ;;  %p12360_p12 = scmp.lt.u32.totalorder %s12988_s26, %s15039_s6 }
  0xb2   : > { %p12355_p2 = scmp.ne.s32.totalorder %s12988_s26, %s12354_s20  ;;  %p12361_p3 = scmp.lt.u32.totalorder %s12359_s12, %s12354_s20 }
  0xb3   : > { %s15040_s28 = scalar_select %p12996_p7, 1, 0 }
  0xb4   : > { %p12357_p5 = pnand %p12996_p7, %p12355_p2  ;;  %p12362_p0 = por %p12361_p3, %p12360_p12 }
  0xb5   : > { %p12363_p11 = scmp.lt.u32.totalorder %s12354_s20, %s12988_s26 }
  0xb6   : > { %p12358_p9 = pneg %p12357_p5 }
  0xb7   : > { %p12364_p1 = por %p12363_p11, %p12362_p0 }
  0xb9   : > { %p12365_p10 = pnand %p12364_p1, %p12358_p9 }
  0xbb   : > { %12368 = shalt.err (!%p12365_p10)
}
  0xbc   : > { %s12369_s29 = scalar_lea.vmem %s12990_s2, 4608  ;;  %s12660_s15 = smov [#allocation14]  }
  0xbd   : > { %p12370_p8 = scmp.ne.s32.totalorder %s12990_s2, %s12369_s29  ;;  %s12374_s16 = sshll.u32 %s12660_s15, 4  ;;  %s12375_s16 = int_to_ptr.vmem [resolvable:$false] %s12374_s16 }
  0xbe   : > { %s12376_s24 = scalar_lea.vmem %s12375_s16, 9216  ;;  %p12377_p2 = scmp.lt.s32.totalorder %s12990_s2, %s12375_s16 }
  0xbf   : > { %p12372_p6 = pnand %p12370_p8, %p12996_p7  ;;  %p12378_p5 = scmp.lt.s32.totalorder %s12376_s24, %s12369_s29 }
  0xc1   : > { %p12373_p13 = pneg %p12372_p6  ;;  %p12379_p12 = por %p12378_p5, %p12377_p2 }
  0xc3   : > { %p12380_p3 = pnand %p12379_p12, %p12373_p13 }
  0xc5   : > { %12383 = shalt.err (!%p12380_p3)
}
  0xc6   : > { %s15041_s20 = smov 4   ;;  %s15042_s12 = smov 64  }
  0xc7   : > { %11882 = dma.hbm_to_vmem [thread:$0]  (!%p12981_p4), %s12988_s26, 4608, %s12990_s2, %s12882_s13, %s15042_s12, %s15042_s12, %s15041_s20  }
  0xc8   : > { %s12661_s9 = smov [#allocation11]   ;;  %s12662_s15 = smov [#allocation12]  }
  0xc9   : > { %s323_s1 = sshll.u32 %s12661_s9, 4  ;;  %s337_s3 = sshll.u32 %s12662_s15, 4  ;;  %s324_s1 = int_to_ptr.vmem [resolvable:$true] %s323_s1  ;;  %s338_s3 = int_to_ptr.vmem [resolvable:$true] %s337_s3 }
  0xca   : > { %s12384_s24 = scalar_lea.hbm %s14951_s4, 1280  ;;  %p15043_p0 = scmp.ne.s32.totalorder %s15014_s23, 0 }
  0xcb   : > { %p12385_p9 = scmp.ne.s32.totalorder %s14951_s4, %s12384_s24  ;;  %p12391_p10 = scmp.lt.u32.totalorder %s12384_s24, %s14951_s4 }
  0xcd   : > { %p12387_p11 = pnand %p12385_p9, %p15043_p0 }
  0xcf   : > { %p12388_p1 = pneg %p12387_p11 }
  0xd1   : > { %p12393_p8 = pnand %p12391_p10, %p12388_p1 }
  0xd3   : > { %12396 = shalt.err (!%p12393_p8)
}
  0xd4   : > { %s12397_s26 = scalar_lea.vmem %s324_s1, 1280  ;;  %p12405_p5 = scmp.lt.s32.totalorder %s324_s1, %s324_s1 }
  0xd5   : > { %p12398_p6 = scmp.ne.s32.totalorder %s324_s1, %s12397_s26  ;;  %p12406_p12 = scmp.lt.s32.totalorder %s12397_s26, %s12397_s26 }
  0xd7   : > { %p12400_p13 = pnand %p12398_p6, %p15043_p0  ;;  %p12407_p3 = por %p12406_p12, %p12405_p5 }
  0xd9   : > { %p12401_p2 = pneg %p12400_p13 }
  0xdb   : > { %p12408_p4 = pnand %p12407_p3, %p12401_p2 }
  0xdd   : > { %12411 = shalt.err (!%p12408_p4)
}
  0xde   : > { %p15044_p9 = scmp.ne.s32.totalorder %s15012_s25, 0  ;;  %s12412_s2 = scalar_lea.hbm %s14952_s5, 16 }
  0xdf   : > { %p12413_p11 = scmp.ne.s32.totalorder %s14952_s5, %s12412_s2  ;;  %p12419_p10 = scmp.lt.u32.totalorder %s12412_s2, %s14952_s5 }
  0xe0   : > { %11869 = dma.hbm_to_vmem [thread:$0]  (!%p15044_p9), %s14951_s4, 1280, %s324_s1, [#allocation10], %s15042_s12, %s15042_s12, %s15041_s20  }
  0xe1   : > { %p12415_p4 = pnand %p12413_p11, %p15043_p0 }
  0xe3   : > { %p12416_p1 = pneg %p12415_p4 }
  0xe5   : > { %p12421_p8 = pnand %p12419_p10, %p12416_p1 }
  0xe7   : > { %12424 = shalt.err (!%p12421_p8)
}
  0xe8   : > { %s12425_s24 = scalar_lea.vmem %s338_s3, 16  ;;  %s12432_s1 = scalar_lea.vmem %s338_s3, 32 }
  0xe9   : > { %p12426_p6 = scmp.ne.s32.totalorder %s338_s3, %s12425_s24  ;;  %p12433_p5 = scmp.lt.s32.totalorder %s338_s3, %s338_s3 }
  0xea   : > { %p12434_p12 = scmp.lt.s32.totalorder %s12432_s1, %s12425_s24 }
  0xeb   : > { %p12428_p13 = pnand %p12426_p6, %p15043_p0 }
  0xec   : > { %p12435_p3 = por %p12434_p12, %p12433_p5 }
  0xed   : > { %p12429_p2 = pneg %p12428_p13 }
  0xef   : > { %p12436_p7 = pnand %p12435_p3, %p12429_p2 }
  0xf1   : > { %12439 = shalt.err (!%p12436_p7)
}
  0xf2   : > { %11872 = dma.hbm_to_vmem [thread:$0]  (!%p15044_p9), %s14952_s5, 16, %s338_s3, [#allocation13]  }
  0xf3   : > { %s9112_s14 = sshll.u32 %s12642_s17, 4  ;;  %s410_s18 = scalar_lea.vmem [#allocation15], %s12970_s0 }
  0xf4   : > { %s417_s23 = sshll.u32 %s410_s18, 4  ;;  %s415_s9 = scalar_lea.hbm %s14954_s7, %s9112_s14  ;;  %s418_s23 = int_to_ptr.vmem [resolvable:$true] %s417_s23 }
  0xf5   : > { %s12440_s15 = scalar_lea.hbm %s415_s9, 16  ;;  %p15045_p7 = scmp.ne.s32.totalorder %s15040_s28, 0 }
  0xf6   : > { %p12441_p0 = scmp.ne.s32.totalorder %s415_s9, %s12440_s15  ;;  %s12445_s29 = scalar_lea.hbm %s14954_s7, 64 }
  0xf7   : > { %p12446_p9 = scmp.lt.u32.totalorder %s415_s9, %s14954_s7  ;;  %p12447_p1 = scmp.lt.u32.totalorder %s12445_s29, %s12440_s15 }
  0xf8   : > { %p12443_p11 = pnand %p12441_p0, %p15045_p7  ;;  %p12449_p8 = scmp.lt.u32.totalorder %s12440_s15, %s415_s9 }
  0xf9   : > { %p12448_p10 = por %p12447_p1, %p12446_p9 }
  0xfa   : > { %p12444_p4 = pneg %p12443_p11 }
  0xfb   : > { %p12450_p6 = por %p12449_p8, %p12448_p10 }
  0xfd   : > { %p12451_p13 = pnand %p12450_p6, %p12444_p4 }
  0xff   : > { %12454 = shalt.err (!%p12451_p13)
}
 0x100   : > { %s12455_s3 = scalar_lea.vmem %s418_s23, 16  ;;  %s12663_s26 = smov [#allocation15]  }
 0x101   : > { %p12456_p2 = scmp.ne.s32.totalorder %s418_s23, %s12455_s3  ;;  %s12460_s6 = sshll.u32 %s12663_s26, 4  ;;  %s12461_s6 = int_to_ptr.vmem [resolvable:$false] %s12460_s6 }
 0x102   : > { %s12462_s14 = scalar_lea.vmem %s12461_s6, 32  ;;  %p12463_p3 = scmp.lt.s32.totalorder %s418_s23, %s12461_s6 }
 0x103   : > { %p12458_p5 = pnand %p12456_p2, %p15045_p7  ;;  %p12464_p0 = scmp.lt.s32.totalorder %s12462_s14, %s12455_s3 }
 0x105   : > { %p12459_p12 = pneg %p12458_p5  ;;  %p12465_p11 = por %p12464_p0, %p12463_p3 }
 0x107   : > { %p12466_p1 = pnand %p12465_p11, %p12459_p12 }
 0x109   : > { %12469 = shalt.err (!%p12466_p1)
}
 0x10a   : > { %p15046_p9 = scmp.ne.s32.totalorder %s15038_s22, 0  ;;  %s9113_s18 = sshll.u32 %s12970_s0, 6 }
 0x10b   : > { %s10552_s30 = sshll.u32 %s12642_s17, 10  ;;  %s428_s16 = scalar_lea.vmem [#allocation16], %s9113_s18 }
 0x10c   : > { %11885 = dma.hbm_to_vmem [thread:$0]  (!%p15046_p9), %s415_s9, 16, %s418_s23, %s12942_s27  }
 0x10d   : > { %s13085_s25 = scalar_lea.hbm %s14955_s8, %s10552_s30  ;;  %s435_s29 = sshll.u32 %s428_s16, 4  ;;  %s13087_s29 = int_to_ptr.vmem [resolvable:$true] %s435_s29 }
 0x10e   : > { %s12470_s24 = scalar_lea.hbm %s13085_s25, 1024  ;;  %s12475_s23 = scalar_lea.hbm %s14955_s8, 4096 }
 0x10f   : > { %p12471_p4 = scmp.ne.s32.totalorder %s13085_s25, %s12470_s24  ;;  %p12476_p6 = scmp.lt.u32.totalorder %s13085_s25, %s14955_s8 }
 0x110   : > { %p12477_p13 = scmp.lt.u32.totalorder %s12475_s23, %s12470_s24  ;;  %p12479_p5 = scmp.lt.u32.totalorder %s12470_s24, %s13085_s25 }
 0x111   : > { %p12473_p10 = pnand %p12471_p4, %p15045_p7 }
 0x112   : > { %p12478_p2 = por %p12477_p13, %p12476_p6 }
 0x113   : > { %p12474_p8 = pneg %p12473_p10 }
 0x114   : > { %p12480_p12 = por %p12479_p5, %p12478_p2 }
 0x116   : > { %p12481_p3 = pnand %p12480_p12, %p12474_p8 }
 0x118   : > { %12484 = shalt.err (!%p12481_p3)
}
 0x119   : > { %s12485_s3 = scalar_lea.vmem %s13087_s29, 1024  ;;  %s12664_s26 = smov [#allocation16]  }
 0x11a   : > { %p12486_p0 = scmp.ne.s32.totalorder %s13087_s29, %s12485_s3  ;;  %s12490_s6 = sshll.u32 %s12664_s26, 4  ;;  %s12491_s6 = int_to_ptr.vmem [resolvable:$false] %s12490_s6 }
 0x11b   : > { %s12492_s14 = scalar_lea.vmem %s12491_s6, 2048  ;;  %p12493_p4 = scmp.lt.s32.totalorder %s13087_s29, %s12491_s6 }
 0x11c   : > { %p12488_p11 = pnand %p12486_p0, %p15045_p7  ;;  %p12494_p10 = scmp.lt.s32.totalorder %s12492_s14, %s12485_s3 }
 0x11e   : > { %p12489_p1 = pneg %p12488_p11  ;;  %p12495_p6 = por %p12494_p10, %p12493_p4 }
 0x120   : > { %p12496_p13 = pnand %p12495_p6, %p12489_p1 }
 0x122   : > { %12499 = shalt.err (!%p12496_p13)
}
 0x123   : > { %11888 = dma.hbm_to_vmem [thread:$0]  (!%p15046_p9), %s13085_s25, 1024, %s13087_s29, %s12882_s13, %s15042_s12, %s15042_s12, %s15041_s20  }
 0x124   : > { %s15047_s28 = sld [smem:[#allocation35_spill]] }
 0x12a   : > { %p15048_p7 = scmp.ne.s32.totalorder %s15047_s28, 0 }
 0x12b   : > { %s15049_s18 = sld [smem:[#allocation33_spill]] (!%p15048_p7)  ;;  %s15050_s30 = sld [smem:[#allocation28_spill]] (!%p15048_p7) }
 0x12c   : > { %447 = sbr.rel (%p15048_p7) target bundleno = 2766 (0xace), region = 56  ;;  %s15051_s2 = sld [smem:[#allocation38_spill]] (!%p15048_p7) }
 0x131   : > { %s449_s15 = sand.u32 (!%p15048_p7), 1, %s15049_s18   ;;  %s13118_s16 = sand.u32 (!%p15048_p7), 1, %s15050_s30  }
 0x132   : > { %s11830_s24 = smul.u32 (!%p15048_p7), 1056, %s13118_s16  ;;  %s450_s27 = scalar_lea.sflag (!%p15048_p7), [#allocation4], %s449_s15 }
 0x133   : > { %p15052_p8 = scmp.ne.s32.totalorder %s15051_s2, 0 }
 0x134   : > { %s13121_s22 = scalar_lea.vmem [#allocation3], %s11830_s24 }
 0x135   : > { %12573 = dma.done.wait (%p15052_p8), %s450_s27, 16896  }
 0x136   : > { %12575 = vsyncadd (%p15052_p8), %s450_s27, 4294950400  ;;  %s459_s13 = scalar_lea.sflag [#allocation7], %s449_s15  ;;  %s461_s20 = scalar_lea.vmem [#allocation6], %s13118_s16 }
 0x137   : > { %12577 = dma.done.wait (%p15052_p8), %s459_s13, 16  }
 0x138   : > { %12579 = vsyncadd (%p15052_p8), %s459_s13, 4294967280  ;;  %p15053_p9 = scmp.eq.s32.totalorder %s15049_s18, 0 }
 0x13a   : > { %12581 = dma.done.wait (%p15053_p9), [#allocation7], 1024   ;;  %p15054_p2 = pmov %p15053_p9 }
 0x13c   : > { %12583 = vsyncadd (%p15054_p2), [#allocation7], 4294966272  ;;  %p15055_p5 = pmov %p15054_p2 }
 0x13d   : > { %p15056_p12 = pmov %p15054_p2 }
 0x13e   : > { %12585 = dma.done.wait (%p15055_p5), [#allocation10], 1312  }
 0x13f   : > { %12587 = vsyncadd (%p15056_p12), [#allocation10], 4294965984  ;;  %p15057_p3 = pmov %p15054_p2 }
 0x140   : > { %p15058_p0 = pmov %p15054_p2 }
 0x141   : > { %12589 = dma.done.wait (%p15057_p3), [#allocation13], 16  }
 0x142   : > { %12591 = vsyncadd (%p15058_p0), [#allocation13], 4294967280  ;;  %s15059_s12 = sld [smem:[#allocation34_spill]]  ;;  %s484_s25 = sand.u32 1, %s12614_s10  }
 0x143   : > { %s11831_s29 = smul.u32 288, %s484_s25 }
 0x145   : > { %s13145_s0 = scalar_lea.vmem [#allocation14], %s11831_s29 }
 0x148   : > { %p15060_p11 = scmp.ne.s32.totalorder %s15059_s12, 0 }
 0x14a   : > { %12593 = dma.done.wait (%p15060_p11), %s450_s27, 4608  }
 0x14b   : > { %12595 = vsyncadd (%p15060_p11), %s450_s27, 4294962688  ;;  %s13151_s23 = scalar_lea.vmem [#allocation15], %s484_s25 }
 0x14c   : > { %12597 = dma.done.wait (%p15060_p11), %s459_s13, 16  }
 0x14d   : > { %12599 = vsyncadd (%p15060_p11), %s459_s13, 4294967280  ;;  %s9121_s9 = sshll.u32 %s484_s25, 6 }
 0x14e   : > { %s13157_s1 = scalar_lea.vmem [#allocation16], %s9121_s9 }
 0x14f   : > { %12601 = dma.done.wait (%p15060_p11), %s450_s27, 1024  }
 0x150   : > { %12603 = vsyncadd (%p15060_p11), %s450_s27, 4294966272  ;;  %s9122_s3 = sshll.u32 %s13118_s16, 5  ;;  %s15061_s6 = sld [smem:[#allocation30_spill]] }
 0x151   : > { %s13164_s26 = scalar_lea.vmem [#allocation17], %s9122_s3 }
 0x156   : > { %p9123_p1 = scmp.ne.s32.totalorder %s15061_s6, 0 }
 0x157   : > { %v12002_v0 = vld [vmem:[#allocation8 + $0x4] ss:$8 sps:$4 sm:$0xff] (!%p9123_p1)   ;;  %v12004_v1 = vld [vmem:[#allocation8] ss:$8 sps:$4 sm:$0xff] (!%p9123_p1)   ;;  %v12665_v2 = vmov (!%p9123_p1), 0   ;;  %vm594_vm0 = vcmask (!%p9123_p1), 1042432  }
 0x158   : > { %560 = sbr.rel (%p9123_p1) target bundleno = 1064 (0x428), region = 96  ;;  %746 = vmatprep.mubr.bf16.mxu1 (!%p9123_p1), %v12665_v2  ;;  %714 = vmatprep.subr.bf16.mxu1 (!%p9123_p1), %v12002_v0  ;;  %v12005_v3 = vld [vmem:[#allocation8 + $0x14] ss:$8 sps:$4 sm:$0xff] (!%p9123_p1)   ;;  %v12007_v4 = vld [vmem:[#allocation8 + $0x10] ss:$8 sps:$4 sm:$0xff] (!%p9123_p1)   ;;  %vm595_vm1 = vcmask (!%p9123_p1), 1046532  }
 0x159   : > { %715 = vmatpush1.bf16.msra.mxu1 (!%p9123_p1), %v12004_v1  ;;  %v12008_v5 = vld [vmem:[#allocation8 + $0x24] ss:$8 sps:$4 sm:$0xff] (!%p9123_p1)   ;;  %v12010_v6 = vld [vmem:[#allocation8 + $0x20] ss:$8 sps:$4 sm:$0xff] (!%p9123_p1)   ;;  %v9124_v7 = vld [vmem:[%s13121_s22 + $0x1b8] sm:$0xe] (!%p9123_p1) }
 0x15a   : > { %716 = vmatprep.subr.bf16.mxu1 (!%p9123_p1), %v12005_v3  ;;  %v9125_v8 = vld [vmem:[%s13121_s22 + $0x1bc] sm:$0x1] (!%p9123_p1)  ;;  %v12011_v9 = vld [vmem:[#allocation8 + $0x34] ss:$8 sps:$4 sm:$0xff] (!%p9123_p1)   ;;  %v9126_v10 = vld [vmem:[%s13121_s22 + $0x1d0] sm:$0xe] (!%p9123_p1) }
 0x15b   : > { %v9127_v11 = vld [vmem:[%s13121_s22 + $0x1d4] sm:$0x1] (!%p9123_p1)  ;;  %v9140_v12 = vrot.slane (!%p9123_p1), %v9124_v7, 9  ;;  %v599_v13 = vrot.slane (!%p9123_p1), %v9125_v8, 5  ;;  %v9141_v14 = vrot.slane (!%p9123_p1), %v9126_v10, 9  ;;  %vm13176_vm2 = vmor (!%p9123_p1), %vm594_vm0, %vm595_vm1  ;;  %v12014_v25 = vld [vmem:[%s13145_s0] sm:$0xff] (!%p9123_p1)  }
 0x15c   : > { %v603_v15 = vrot.slane (!%p9123_p1), %v9127_v11, 5  ;;  %v9128_v16 = vld [vmem:[%s13121_s22 + $0x1e8] sm:$0xe] (!%p9123_p1)  ;;  %v9129_v17 = vld [vmem:[%s13121_s22 + $0x1ec] sm:$0x1] (!%p9123_p1)  ;;  %v12015_v29 = vld [vmem:[%s13145_s0 + $0x8] sm:$0xff] (!%p9123_p1)   ;;  %10914 = vmatprep.subr.bf16.mxu0 (!%p9123_p1), %v12014_v25 }
 0x15d   : > { %717 = vmatpush1.bf16.msra.mxu1 (!%p9123_p1), %v12007_v4  ;;  %v9130_v19 = vld [vmem:[%s13121_s22 + $0x200] sm:$0xe] (!%p9123_p1)  ;;  %v9131_v20 = vld [vmem:[%s13121_s22 + $0x204] sm:$0x1] (!%p9123_p1)  ;;  %v12013_v21 = vld [vmem:[#allocation8 + $0x30] ss:$8 sps:$4 sm:$0xff] (!%p9123_p1)   ;;  %v600_v26 = vsel (!%p9123_p1), %vm13176_vm2, %v9140_v12, %v599_v13  ;;  %10915 = vmatpush3.bf16.msra.mxu0 (!%p9123_p1), %v12014_v25 }
 0x15e   : > { %718 = vmatprep.subr.bf16.mxu1 (!%p9123_p1), %v12008_v5  ;;  %v9142_v22 = vrot.slane (!%p9123_p1), %v9128_v16, 9  ;;  %v607_v23 = vrot.slane (!%p9123_p1), %v9129_v17, 5  ;;  %v9143_v24 = vrot.slane (!%p9123_p1), %v9130_v19, 9  ;;  %v604_v27 = vsel (!%p9123_p1), %vm13176_vm2, %v9141_v14, %v603_v15  ;;  %v9132_v30 = vld [vmem:[%s13121_s22 + $0x218] sm:$0xe] (!%p9123_p1)  ;;  %10916 = vmatprep.subr.bf16.mxu0 (!%p9123_p1), %v12015_v29  ;;  %v12016_v39 = vld [vmem:[%s13145_s0 + $0x10] sm:$0xff] (!%p9123_p1)  }
 0x15f   : > { %v611_v28 = vrot.slane %v9131_v20, 5  ;;  %v9133_v31 = vld [vmem:[%s13121_s22 + $0x21c] sm:$0x1]  ;;  %v9134_v32 = vld [vmem:[%s13121_s22 + $0x230] sm:$0xe]  ;;  %v9144_v34 = vrot.slane %v9132_v30, 9  ;;  %v9148_v38 = vcombine.low %v600_v26, %v604_v27 }
 0x160   : > { %v9135_v33 = vld [vmem:[%s13121_s22 + $0x234] sm:$0x1]  ;;  %v615_v35 = vrot.slane %v9133_v31, 5  ;;  %v9145_v36 = vrot.slane %v9134_v32, 9  ;;  %vm701_vm3 = vcmask 523264   ;;  %v608_v40 = vsel %vm13176_vm2, %v9142_v22, %v607_v23  ;;  %v13233_v8 = vld [vmem:[%s13145_s0 + $0x40] sm:$0xff]  }
 0x161   : > { %719 = vmatpush1.bf16.msra.mxu1 %v12010_v6  ;;  %v619_v37 = vrot.slane %v9135_v33, 5  ;;  %v612_v41 = vsel %vm13176_vm2, %v9143_v24, %v611_v28  ;;  %v9136_v42 = vld [vmem:[%s13121_s22 + $0x248] sm:$0xe]  ;;  %v9137_v43 = vld [vmem:[%s13121_s22 + $0x24c] sm:$0x1]  ;;  %v12017_v46 = vld [vmem:[%s13145_s0 + $0x18] sm:$0xff]   ;;  %10917 = vmatpush3.bf16.msra.mxu0 %v12015_v29 }
 0x162   : > { %720 = vmatprep.subr.bf16.mxu1 %v12011_v9  ;;  %vm1016_vm4 = vsmask.f32 3328  ;;  %v13201_v44 = vsel %vm13176_vm2, %v9144_v34, %v615_v35  ;;  %v9138_v47 = vld [vmem:[%s13121_s22 + $0x260] sm:$0xe]  ;;  %v9139_v48 = vld [vmem:[%s13121_s22 + $0x264] sm:$0x1]  ;;  %v9149_v53 = vcombine.low %v608_v40, %v612_v41  ;;  %10918 = vmatprep.subr.bf16.mxu0 %v12016_v39 }
 0x163   : > { %v13205_v45 = vsel %vm13176_vm2, %v9145_v36, %v619_v37  ;;  %v9146_v49 = vrot.slane %v9136_v42, 9  ;;  %v623_v50 = vrot.slane %v9137_v43, 5  ;;  %v9180_v51 = vld [vmem:[%s13121_s22 + $0x1a0] sm:$0xf]  ;;  %v13213_v52 = vld [vmem:[%s13121_s22 + $0x1a4] sm:$0x1] }
 0x164   : > { %v9182_v54 = vld [vmem:[%s13121_s22 + $0x1b8] sm:$0xf]  ;;  %v13218_v55 = vld [vmem:[%s13121_s22 + $0x1bc] sm:$0x1]  ;;  %vm1017_vm5 = vsmask.f32 7440  ;;  %v9150_v56 = vcombine.low %v13201_v44, %v13205_v45 }
 0x165   : > { %721 = vmatpush1.bf16.msra.mxu1 %v12013_v21  ;;  %v1020_v57 = vshrl.u32 %v9180_v51, 16  ;;  %v1023_v58 = vshll.u32 %v9180_v51, 16  ;;  %v1029_v59 = vshll.u32 %v13213_v52, 16  ;;  %v9184_v60 = vld [vmem:[%s13121_s22 + $0x1d0] sm:$0xf]  ;;  %v9147_v61 = vrot.slane %v9138_v47, 9  ;;  %10919 = vmatpush3.bf16.msra.mxu0 %v12016_v39  ;;  %vm13238_vm6 = vmor %vm1016_vm4, %vm1017_vm5 }
 0x166   : > { %911 = vmatprep.subr.bf16.mxu1 %v12665_v2  ;;  %v1034_v62 = vshrl.u32 %v9182_v54, 16  ;;  %v1037_v63 = vshll.u32 %v9182_v54, 16  ;;  %v1043_v0 = vshll.u32 %v13218_v55, 16  ;;  %v9185_v1 = vld [vmem:[%s13121_s22 + $0x1d4] sm:$0x1]  ;;  %v13229_v3 = vsel %vm13176_vm2, %v9146_v49, %v623_v50  ;;  %10920 = vmatprep.subr.bf16.mxu0 %v12017_v46  ;;  %v12065_v18 = vld [vmem:[%s13157_s1 + $0x28] sm:$0xff]  }
 0x167   : > { %v627_v4 = vrot.slane %v9139_v48, 5  ;;  %v1022_v5 = vrot.slane %v1020_v57, 4  ;;  %v1025_v6 = vrot.slane %v1023_v58, 5  ;;  %v9186_v7 = vld [vmem:[%s13121_s22 + $0x1e8] sm:$0xf]  ;;  %v1031_v9 = vrot.slane %v1029_v59, 5 }
 0x168   : > { %9160 = vmatmul.mubr.msk.bf16.vlgmr.msra.gmra.mrb[0].mxu1 %vm701_vm3, %v9148_v38  ;;  %v1036_v10 = vrot.slane %v1034_v62, 4  ;;  %v1039_v11 = vrot.slane %v1037_v63, 5  ;;  %v1045_v12 = vrot.slane %v1043_v0, 5  ;;  %v9187_v13 = vld [vmem:[%s13121_s22 + $0x1ec] sm:$0x1]  ;;  %v1048_v15 = vshrl.u32 %v9184_v60, 16 }
 0x169   : > { %756 = vmatprep.mubr.bf16.mxu1 %v12665_v2  ;;  %v1026_v14 = vor.u32 %v1025_v6, %v1022_v5  ;;  %v1051_v16 = vshll.u32 %v9184_v60, 16  ;;  %v1057_v17 = vshll.u32 %v9185_v1, 16  ;;  %v1062_v21 = vshrl.u32 %v9186_v7, 16  ;;  %10921 = vmatpush3.bf16.msra.mxu0 %v12017_v46  ;;  %v9188_v36 = vld [vmem:[%s13121_s22 + $0x200] sm:$0xf] }
 0x16a   : > { %v1040_v20 = vor.u32 %v1039_v11, %v1036_v10  ;;  %v1065_v22 = vshll.u32 %v9186_v7, 16  ;;  %v1071_v23 = vshll.u32 %v9187_v13, 16  ;;  %v13244_v24 = vsel %vm13176_vm2, %v9147_v61, %v627_v4  ;;  %10930 = vmatprep.subr.bf16.mxu0 %v13233_v8  ;;  %v9189_v37 = vld [vmem:[%s13121_s22 + $0x204] sm:$0x1]  ;;  %v9190_v40 = vld [vmem:[%s13121_s22 + $0x218] sm:$0xf] }
 0x16b   : > { %v1027_v25 = vrot.slane %v1026_v14, 4  ;;  %v1050_v26 = vrot.slane %v1048_v15, 4  ;;  %v1053_v27 = vrot.slane %v1051_v16, 5  ;;  %v1165_v29 = vrot.slane %v13213_v52, 5  ;;  %v9191_v41 = vld [vmem:[%s13121_s22 + $0x21c] sm:$0x1] }
 0x16c   : > { %v1041_v28 = vrot.slane %v1040_v20, 4  ;;  %v1064_v30 = vrot.slane %v1062_v21, 4  ;;  %v1067_v31 = vrot.slane %v1065_v22, 5  ;;  %v1059_v34 = vrot.slane %v1057_v17, 5  ;;  %v9192_v50 = vld [vmem:[%s13121_s22 + $0x230] sm:$0xf] }
 0x16d   : > { %v1032_v32 = vsel %vm13238_vm6, %v1027_v25, %v1031_v9  ;;  %v1054_v33 = vor.u32 %v1053_v27, %v1050_v26  ;;  %v1073_v35 = vrot.slane %v1071_v23, 5  ;;  %v1076_v42 = vshrl.u32 %v9188_v36, 16  ;;  %v9193_v58 = vld [vmem:[%s13121_s22 + $0x234] sm:$0x1]  ;;  %v9194_v63 = vld [vmem:[%s13121_s22 + $0x248] sm:$0xf] }
 0x16e   : > { %v1046_v38 = vsel %vm13238_vm6, %v1041_v28, %v1045_v12  ;;  %v1068_v39 = vor.u32 %v1067_v31, %v1064_v30  ;;  %v1079_v43 = vshll.u32 %v9188_v36, 16  ;;  %v1085_v48 = vshll.u32 %v9189_v37, 16  ;;  %v9195_v5 = vld [vmem:[%s13121_s22 + $0x24c] sm:$0x1]  ;;  %v12019_v9 = vld [vmem:[%s13145_s0 + $0x48] sm:$0xff]  }
 0x16f   : > { %v9232_v46 = vcombine.low %v1032_v32, %v1046_v38  ;;  %v1055_v47 = vrot.slane %v1054_v33, 4  ;;  %v1090_v49 = vshrl.u32 %v9190_v40, 16  ;;  %v1093_v57 = vshll.u32 %v9190_v40, 16  ;;  %v12020_v25 = vld [vmem:[%s13145_s0 + $0x50] sm:$0xff]   ;;  %v9196_v26 = vld [vmem:[%s13121_s22 + $0x1a0] sm:$0xe] }
 0x170   : > { %9161 = vmatmul.mubr.msk.bf16.gmra.mrb[4].mxu1 %vm701_vm3, %v9149_v53  ;;  %v1069_v51 = vrot.slane %v1068_v39, 4  ;;  %v1078_v53 = vrot.slane %v1076_v42, 4  ;;  %v1081_v54 = vrot.slane %v1079_v43, 5  ;;  %v1087_v60 = vrot.slane %v1085_v48, 5  ;;  %v9197_v32 = vld [vmem:[%s13121_s22 + $0x1b8] sm:$0xe] }
 0x171   : > { %766 = vmatprep.mubr.bf16.mxu1 %v12665_v2  ;;  %10922 = vmatprep.mubr.msk.bf16.mxu0 %vm701_vm3, %v9232_v46  ;;  %v1060_v59 = vsel %vm13238_vm6, %v1055_v47, %v1059_v34  ;;  %v1092_v61 = vrot.slane %v1090_v49, 4  ;;  %v1099_v62 = vshll.u32 %v9191_v41, 16  ;;  %v1095_v4 = vrot.slane %v1093_v57, 5  ;;  %v9244_v33 = vld [vmem:[%s13121_s22 + $0x1a4] sm:$0x3]  ;;  %v12021_v47 = vld [vmem:[%s13145_s0 + $0x58] sm:$0xff]  }
 0x172   : > { %v1074_v0 = vsel %vm13238_vm6, %v1069_v51, %v1073_v35  ;;  %v1082_v1 = vor.u32 %v1081_v54, %v1078_v53  ;;  %v1104_v6 = vshrl.u32 %v9192_v50, 16  ;;  %v1107_v11 = vshll.u32 %v9192_v50, 16  ;;  %v9245_v38 = vld [vmem:[%s13121_s22 + $0x1bc] sm:$0x3]  ;;  %v9198_v42 = vld [vmem:[%s13121_s22 + $0x1d0] sm:$0xe] }
 0x173   : > { %v9233_v7 = vcombine.low %v1060_v59, %v1074_v0  ;;  %v1101_v10 = vrot.slane %v1099_v62, 5  ;;  %v1113_v12 = vshll.u32 %v9193_v58, 16  ;;  %v1096_v14 = vor.u32 %v1095_v4, %v1092_v61  ;;  %v9199_v50 = vld [vmem:[%s13121_s22 + $0x1e8] sm:$0xe]  ;;  %v9246_v51 = vld [vmem:[%s13121_s22 + $0x1d4] sm:$0x3] }
 0x174   : > { %v1083_v13 = vrot.slane %v1082_v1, 4  ;;  %v1106_v15 = vrot.slane %v1104_v6, 4  ;;  %v1118_v16 = vshrl.u32 %v9194_v63, 16  ;;  %v1169_v17 = vrot.slane %v13218_v55, 5 }
 0x175   : > { %10923 = vmatmul.mubr.msk.bf16.vlgmr.msra.gmra.mrb[0].mxu0 %vm701_vm3, %v9233_v7  ;;  %v1109_v20 = vrot.slane %v1107_v11, 5  ;;  %v1121_v21 = vshll.u32 %v9194_v63, 16  ;;  %v1127_v22 = vshll.u32 %v9195_v5, 16  ;;  %v1097_v45 = vrot.slane %v1096_v14, 4  ;;  %v13304_v11 = vld [vmem:[%s13145_s0 + $0x60] sm:$0xff]  }
 0x176   : > { %10931 = vmatpush3.bf16.msra.mxu0 %v13233_v8  ;;  %v1088_v44 = vsel %vm13238_vm6, %v1083_v13, %v1087_v60  ;;  %v1120_v23 = vrot.slane %v1118_v16, 4  ;;  %v9151_v27 = vcombine.low %v13229_v3, %v13244_v24  ;;  %vm1438_vm7 = vsmask.f32 2304 }
 0x177   : > { %10932 = vmatprep.subr.bf16.mxu0 %v12019_v9  ;;  %v1110_v28 = vor.u32 %v1109_v20, %v1106_v15  ;;  %v1123_v30 = vrot.slane %v1121_v21, 5  ;;  %v1129_v31 = vrot.slane %v1127_v22, 5  ;;  %v1102_v8 = vsel %vm13238_vm6, %v1097_v45, %v1101_v10  ;;  %v9200_v45 = vld [vmem:[%s13121_s22 + $0x200] sm:$0xe] }
 0x178   : > { %9162 = vmatmul.mubr.msk.bf16.gmra.mrb[8].mxu1 %vm701_vm3, %v9150_v56  ;;  %v1115_v56 = vrot.slane %v1113_v12, 5  ;;  %vm1439_vm8 = vsmask.f32 6416  ;;  %v1442_v34 = vshrl.u32 %v9196_v26, 16  ;;  %v9234_v35 = vcombine.low %v1088_v44, %v1102_v8  ;;  %v9247_v12 = vld [vmem:[%s13121_s22 + $0x1ec] sm:$0x3] }
 0x179   : > { %776 = vmatprep.mubr.bf16.mxu1 %v12665_v2  ;;  %v1111_v36 = vrot.slane %v1110_v28, 4  ;;  %v1124_v37 = vor.u32 %v1123_v30, %v1120_v23  ;;  %v1445_v3 = vshll.u32 %v9196_v26, 16  ;;  %v1451_v39 = vshrl.u32 %v9244_v33, 16  ;;  %vm13299_vm9 = vmor %vm1438_vm7, %vm1439_vm8 }
 0x17a   : > { %10933 = vmatpush3.bf16.msra.mxu0 %v12019_v9  ;;  %v1444_v24 = vrot.slane %v1442_v34, 5  ;;  %v1454_v40 = vshll.u32 %v9244_v33, 16  ;;  %v1460_v41 = vshrl.u32 %v9197_v32, 16  ;;  %10926 = vmatprep.mubr.msk.bf16.mxu0 %vm701_vm3, %v9234_v35  ;;  %v1463_v49 = vshll.u32 %v9197_v32, 16  ;;  %v9201_v32 = vld [vmem:[%s13121_s22 + $0x218] sm:$0xe] }
 0x17b   : > { %v1116_v43 = vsel %vm13238_vm6, %v1111_v36, %v1115_v56  ;;  %v1125_v46 = vrot.slane %v1124_v37, 4  ;;  %10934 = vmatprep.subr.bf16.mxu0 %v12020_v25  ;;  %v1447_v48 = vrot.slane %v1445_v3, 6  ;;  %v1453_v53 = vrot.slane %v1451_v39, 5  ;;  %v9248_v33 = vld [vmem:[%s13121_s22 + $0x204] sm:$0x3] }
 0x17c   : > { %v1456_v54 = vrot.slane %v1454_v40, 6  ;;  %v1462_v57 = vrot.slane %v1460_v41, 5  ;;  %v1469_v58 = vshrl.u32 %v9245_v38, 16  ;;  %v1465_v61 = vrot.slane %v1463_v49, 6  ;;  %v9249_v36 = vld [vmem:[%s13121_s22 + $0x21c] sm:$0x3] }
 0x17d   : > { %v1130_v59 = vsel %vm13238_vm6, %v1125_v46, %v1129_v31  ;;  %v1448_v60 = vor.u32 %v1447_v48, %v1444_v24  ;;  %v1472_v62 = vshll.u32 %v9245_v38, 16  ;;  %v1478_v5 = vshrl.u32 %v9198_v42, 16 }
 0x17e   : > { %v9235_v63 = vcombine.low %v1116_v43, %v1130_v59  ;;  %10935 = vmatpush3.bf16.msra.mxu0 %v12020_v25  ;;  %v1457_v1 = vor.u32 %v1456_v54, %v1453_v53  ;;  %v1471_v4 = vrot.slane %v1469_v58, 5  ;;  %v1466_v7 = vor.u32 %v1465_v61, %v1462_v57 }
 0x17f   : > { %10936 = vmatprep.subr.bf16.mxu0 %v12021_v47  ;;  %v1449_v6 = vrot.slane %v1448_v60, 4  ;;  %v1474_v9 = vrot.slane %v1472_v62, 6  ;;  %v1481_v10 = vshll.u32 %v9198_v42, 16  ;;  %v1480_v13 = vrot.slane %v1478_v5, 5  ;;  %v9250_v62 = vld [vmem:[%s13121_s22 + $0x234] sm:$0x3] }
 0x180   : > { %9163 = vmatmul.mubr.msk.bf16.gmra.mrb[12].mxu1 %vm701_vm3, %v9151_v27  ;;  %10927 = vmatmul.mubr.msk.bf16.gmra.mrb[4].mxu0 %vm701_vm3, %v9235_v63  ;;  %v1487_v14 = vshrl.u32 %v9246_v51, 16  ;;  %v1490_v15 = vshll.u32 %v9246_v51, 16  ;;  %v1496_v16 = vshrl.u32 %v9199_v50, 16  ;;  %v1467_v21 = vrot.slane %v1466_v7, 4  ;;  %v9203_v5 = vld [vmem:[%s13121_s22 + $0x248] sm:$0xe] }
 0x181   : > { %v1458_v20 = vsel %vm13299_vm9, %v1449_v6, %v1457_v1  ;;  %v1475_v22 = vor.u32 %v1474_v9, %v1471_v4  ;;  %v1483_v44 = vrot.slane %v1481_v10, 6  ;;  %v1499_v26 = vshll.u32 %v9199_v50, 16  ;;  %v9202_v50 = vld [vmem:[%s13121_s22 + $0x230] sm:$0xe]  ;;  %v12023_v9 = vld [vmem:[%s13145_s0 + $0x68] sm:$0xff]  }
 0x182   : > { %10937 = vmatpush3.bf16.msra.mxu0 %v12021_v47  ;;  %v1489_v56 = vrot.slane %v1487_v14, 5  ;;  %v1492_v23 = vrot.slane %v1490_v15, 6  ;;  %v1498_v25 = vrot.slane %v1496_v16, 5  ;;  %v1505_v30 = vshrl.u32 %v9247_v12, 16  ;;  %v9251_v14 = vld [vmem:[%s13121_s22 + $0x24c] sm:$0x3] }
 0x183   : > { %v1476_v27 = vsel %vm13299_vm9, %v1467_v21, %v1475_v22  ;;  %v1484_v28 = vor.u32 %v1483_v44, %v1480_v13  ;;  %v1508_v31 = vshll.u32 %v9247_v12, 16  ;;  %10946 = vmatprep.subr.bf16.mxu0 %v13304_v11  ;;  %v1501_v35 = vrot.slane %v1499_v26, 6  ;;  %v9272_v22 = vld [vmem:[%s13121_s22 + $0x1b8] sm:$0xf] }
 0x184   : > { %v9260_v8 = vcombine.low %v1458_v20, %v1476_v27  ;;  %v1493_v34 = vor.u32 %v1492_v23, %v1489_v56  ;;  %v1514_v37 = vshrl.u32 %v9200_v45, 16  ;;  %v1507_v3 = vrot.slane %v1505_v30, 5 }
 0x185   : > { %v1485_v38 = vrot.slane %v1484_v28, 4  ;;  %v1510_v24 = vrot.slane %v1508_v31, 6  ;;  %v1517_v39 = vshll.u32 %v9200_v45, 16  ;;  %v1502_v40 = vor.u32 %v1501_v35, %v1498_v25  ;;  %v12024_v25 = vld [vmem:[%s13145_s0 + $0x70] sm:$0xff]  }
 0x186   : > { %10938 = vmatprep.mubr.msk.bf16.mxu0 %vm701_vm3, %v9260_v8  ;;  %v1516_v41 = vrot.slane %v1514_v37, 5  ;;  %v1523_v42 = vshrl.u32 %v9248_v33, 16  ;;  %v1526_v43 = vshll.u32 %v9248_v33, 16  ;;  %v1532_v49 = vshrl.u32 %v9201_v32, 16  ;;  %v13336_v37 = vld [vmem:[%s13121_s22 + $0x1bc] sm:$0x1] }
 0x187   : > { %v1494_v46 = vsel %vm13299_vm9, %v1485_v38, %v1493_v34  ;;  %v1511_v47 = vor.u32 %v1510_v24, %v1507_v3  ;;  %v1519_v48 = vrot.slane %v1517_v39, 6  ;;  %v1503_v51 = vrot.slane %v1502_v40, 4 }
 0x188   : > { %v1525_v53 = vrot.slane %v1523_v42, 5  ;;  %v1528_v54 = vrot.slane %v1526_v43, 6  ;;  %v1535_v57 = vshll.u32 %v9201_v32, 16  ;;  %v1534_v59 = vrot.slane %v1532_v49, 5  ;;  %v9276_v42 = vld [vmem:[%s13121_s22 + $0x1e8] sm:$0xf] }
 0x189   : > { %v1520_v58 = vor.u32 %v1519_v48, %v1516_v41  ;;  %v1541_v60 = vshrl.u32 %v9249_v36, 16  ;;  %v1544_v61 = vshll.u32 %v9249_v36, 16  ;;  %v1512_v63 = vsel %vm13299_vm9, %v1503_v51, %v1511_v47  ;;  %v13340_v41 = vld [vmem:[%s13121_s22 + $0x1d4] sm:$0x1]  ;;  %v13344_v49 = vld [vmem:[%s13121_s22 + $0x1ec] sm:$0x1] }
 0x18a   : > { %v1529_v1 = vor.u32 %v1528_v54, %v1525_v53  ;;  %v1537_v4 = vrot.slane %v1535_v57, 6  ;;  %v1550_v6 = vshrl.u32 %v9202_v50, 16  ;;  %v9261_v7 = vcombine.low %v1494_v46, %v1512_v63  ;;  %v12025_v51 = vld [vmem:[%s13145_s0 + $0x78] sm:$0xff]   ;;  %v13354_v63 = vld [vmem:[%s13121_s22 + $0x204] sm:$0x1] }
 0x18b   : > { %v1521_v10 = vrot.slane %v1520_v58, 4  ;;  %v1543_v12 = vrot.slane %v1541_v60, 5  ;;  %v1546_v13 = vrot.slane %v1544_v61, 6  ;;  %v1553_v20 = vshll.u32 %v9202_v50, 16  ;;  %v9278_v58 = vld [vmem:[%s13121_s22 + $0x200] sm:$0xf] }
 0x18c   : > { %v1538_v15 = vor.u32 %v1537_v4, %v1534_v59  ;;  %v1552_v16 = vrot.slane %v1550_v6, 5  ;;  %v1559_v21 = vshrl.u32 %v9250_v62, 16  ;;  %10939 = vmatmul.mubr.msk.bf16.vlgmr.msra.gmra.mrb[0].mxu0 %vm701_vm3, %v9261_v7  ;;  %v1562_v56 = vshll.u32 %v9250_v62, 16  ;;  %v13357_v7 = vld [vmem:[%s13145_s0 + $0x80] sm:$0xff]  }
 0x18d   : > { %v1530_v44 = vsel %vm13299_vm9, %v1521_v10, %v1529_v1  ;;  %v1547_v45 = vor.u32 %v1546_v13, %v1543_v12  ;;  %v1568_v23 = vshrl.u32 %v9203_v5, 16  ;;  %10947 = vmatpush3.bf16.msra.mxu0 %v13304_v11  ;;  %v1555_v27 = vrot.slane %v1553_v20, 6  ;;  %v9274_v11 = vld [vmem:[%s13121_s22 + $0x1d0] sm:$0xf] }
 0x18e   : > { %v1539_v26 = vrot.slane %v1538_v15, 4  ;;  %v1561_v28 = vrot.slane %v1559_v21, 5  ;;  %v1571_v30 = vshll.u32 %v9203_v5, 16  ;;  %10948 = vmatprep.subr.bf16.mxu0 %v12023_v9  ;;  %v1564_v31 = vrot.slane %v1562_v56, 6 }
 0x18f   : > { %v1570_v32 = vrot.slane %v1568_v23, 5  ;;  %v1577_v33 = vshrl.u32 %v9251_v14, 16  ;;  %v1580_v8 = vshll.u32 %v9251_v14, 16  ;;  %v1556_v35 = vor.u32 %v1555_v27, %v1552_v16  ;;  %v13364_v23 = vld [vmem:[%s13121_s22 + $0x21c] sm:$0x1] }
 0x190   : > { %v1548_v34 = vsel %vm13299_vm9, %v1539_v26, %v1547_v45  ;;  %v1573_v36 = vrot.slane %v1571_v30, 6  ;;  %v1732_v38 = vshrl.u32 %v9272_v22, 16  ;;  %v1565_v24 = vor.u32 %v1564_v31, %v1561_v28  ;;  %v9282_v28 = vld [vmem:[%s13121_s22 + $0x230] sm:$0xf] }
 0x191   : > { %v9262_v3 = vcombine.low %v1530_v44, %v1548_v34  ;;  %v1579_v39 = vrot.slane %v1577_v33, 5  ;;  %v1582_v40 = vrot.slane %v1580_v8, 6  ;;  %10949 = vmatpush3.bf16.msra.mxu0 %v12023_v9  ;;  %v1557_v43 = vrot.slane %v1556_v35, 4  ;;  %v9280_v9 = vld [vmem:[%s13121_s22 + $0x218] sm:$0xf] }
 0x192   : > { %v1574_v46 = vor.u32 %v1573_v36, %v1570_v32  ;;  %v1734_v47 = vrot.slane %v1732_v38, 4  ;;  %v1735_v48 = vshll.u32 %v9272_v22, 16  ;;  %10950 = vmatprep.subr.bf16.mxu0 %v12024_v25  ;;  %v1741_v53 = vshll.u32 %v13336_v37, 16  ;;  %v13372_v34 = vld [vmem:[%s13121_s22 + $0x234] sm:$0x1] }
 0x193   : > { %10942 = vmatprep.mubr.msk.bf16.mxu0 %vm701_vm3, %v9262_v3  ;;  %v1583_v50 = vor.u32 %v1582_v40, %v1579_v39  ;;  %v1746_v54 = vshrl.u32 %v9274_v11, 16  ;;  %v1749_v57 = vshll.u32 %v9274_v11, 16  ;;  %v1566_v59 = vsel %vm13299_vm9, %v1557_v43, %v1565_v24  ;;  %v9284_v35 = vld [vmem:[%s13121_s22 + $0x248] sm:$0xf]  ;;  %v13379_v24 = vld [vmem:[%s13121_s22 + $0x24c] sm:$0x1] }
 0x194   : > { %v1575_v60 = vrot.slane %v1574_v46, 4  ;;  %v1737_v61 = vrot.slane %v1735_v48, 5  ;;  %v1755_v62 = vshll.u32 %v13340_v41, 16  ;;  %v1743_v1 = vrot.slane %v1741_v53, 5  ;;  %v9286_v46 = vld [vmem:[%s13121_s22 + $0x260] sm:$0xf] }
 0x195   : > { %v1748_v4 = vrot.slane %v1746_v54, 4  ;;  %v1751_v5 = vrot.slane %v1749_v57, 5  ;;  %v1760_v6 = vshrl.u32 %v9276_v42, 16  ;;  %10951 = vmatpush3.bf16.msra.mxu0 %v12024_v25  ;;  %v1763_v14 = vshll.u32 %v9276_v42, 16 }
 0x196   : > { %v1584_v10 = vsel %vm13299_vm9, %v1575_v60, %v1583_v50  ;;  %v1738_v12 = vor.u32 %v1737_v61, %v1734_v47  ;;  %v1757_v13 = vrot.slane %v1755_v62, 5  ;;  %10952 = vmatprep.subr.bf16.mxu0 %v12025_v51  ;;  %v1769_v21 = vshll.u32 %v13344_v49, 16 }
 0x197   : > { %v9263_v15 = vcombine.low %v1566_v59, %v1584_v10  ;;  %v1752_v16 = vor.u32 %v1751_v5, %v1748_v4  ;;  %v1762_v20 = vrot.slane %v1760_v6, 4  ;;  %v1765_v44 = vrot.slane %v1763_v14, 5  ;;  %v13391_v4 = vld [vmem:[%s13121_s22 + $0x1b8] sm:$0xe]  ;;  %v12027_v6 = vld [vmem:[%s13145_s0 + $0x88] sm:$0xff]  }
 0x198   : > { %v1739_v22 = vrot.slane %v1738_v12, 4  ;;  %v1774_v45 = vshrl.u32 %v9278_v58, 16  ;;  %v1777_v56 = vshll.u32 %v9278_v58, 16  ;;  %v1771_v26 = vrot.slane %v1769_v21, 5  ;;  %v13388_v58 = vld [vmem:[%s13121_s22 + $0x264] sm:$0x1] }
 0x199   : > { %10943 = vmatmul.mubr.msk.bf16.gmra.mrb[4].mxu0 %vm701_vm3, %v9263_v15  ;;  %v1753_v25 = vrot.slane %v1752_v16, 4  ;;  %v1783_v27 = vshll.u32 %v13354_v63, 16  ;;  %v1788_v30 = vshrl.u32 %v9280_v9, 16  ;;  %v1766_v32 = vor.u32 %v1765_v44, %v1762_v20  ;;  %v13401_v21 = vld [vmem:[%s13121_s22 + $0x1e8] sm:$0xe] }
 0x19a   : > { %10953 = vmatpush3.bf16.msra.mxu0 %v12025_v51  ;;  %v1744_v31 = vsel %vm13238_vm6, %v1739_v22, %v1743_v1  ;;  %v1776_v33 = vrot.slane %v1774_v45, 4  ;;  %v1779_v8 = vrot.slane %v1777_v56, 5  ;;  %v1791_v3 = vshll.u32 %v9280_v9, 16 }
 0x19b   : > { %v1758_v36 = vsel %vm13238_vm6, %v1753_v25, %v1757_v13  ;;  %v1785_v11 = vrot.slane %v1783_v27, 5  ;;  %10962 = vmatprep.subr.bf16.mxu0 %v13357_v7  ;;  %v1790_v38 = vrot.slane %v1788_v30, 4  ;;  %v1767_v40 = vrot.slane %v1766_v32, 4  ;;  %v13398_v13 = vld [vmem:[%s13121_s22 + $0x1d0] sm:$0xe] }
 0x19c   : > { %v9296_v39 = vcombine.low %v1744_v31, %v1758_v36  ;;  %v1780_v42 = vor.u32 %v1779_v8, %v1776_v33  ;;  %v1797_v43 = vshll.u32 %v13364_v23, 16  ;;  %v1793_v47 = vrot.slane %v1791_v3, 5  ;;  %v13405_v25 = vld [vmem:[%s13121_s22 + $0x200] sm:$0xe]  ;;  %v12028_v36 = vld [vmem:[%s13145_s0 + $0x90] sm:$0xff]  }
 0x19d   : > { %v1802_v48 = vshrl.u32 %v9282_v28, 16  ;;  %v1805_v50 = vshll.u32 %v9282_v28, 16  ;;  %v1811_v51 = vshll.u32 %v13372_v34, 16  ;;  %v1772_v53 = vsel %vm13238_vm6, %v1767_v40, %v1771_v26  ;;  %v13420_v3 = vld [vmem:[%s13121_s22 + $0x218] sm:$0xe] }
 0x19e   : > { %10954 = vmatprep.mubr.msk.bf16.mxu0 %vm701_vm3, %v9296_v39  ;;  %v1781_v54 = vrot.slane %v1780_v42, 4  ;;  %v1799_v57 = vrot.slane %v1797_v43, 5  ;;  %v1816_v59 = vshrl.u32 %v9284_v35, 16  ;;  %v1794_v60 = vor.u32 %v1793_v47, %v1790_v38  ;;  %v13425_v43 = vld [vmem:[%s13121_s22 + $0x230] sm:$0xe] }
 0x19f   : > { %v1804_v61 = vrot.slane %v1802_v48, 4  ;;  %v1807_v62 = vrot.slane %v1805_v50, 5  ;;  %v1813_v1 = vrot.slane %v1811_v51, 5  ;;  %v1819_v10 = vshll.u32 %v9284_v35, 16  ;;  %v12029_v47 = vld [vmem:[%s13145_s0 + $0x98] sm:$0xff]  }
 0x1a0   : > { %v1786_v5 = vsel %vm13238_vm6, %v1781_v54, %v1785_v11  ;;  %v1818_v9 = vrot.slane %v1816_v59, 4  ;;  %v1825_v12 = vshll.u32 %v13379_v24, 16  ;;  %v1795_v15 = vrot.slane %v1794_v60, 4 }
 0x1a1   : > { %v9297_v14 = vcombine.low %v1772_v53, %v1786_v5  ;;  %v1808_v16 = vor.u32 %v1807_v62, %v1804_v61  ;;  %v1830_v20 = vshrl.u32 %v9286_v46, 16  ;;  %v1821_v22 = vrot.slane %v1819_v10, 5  ;;  %v13437_v53 = vld [vmem:[%s13121_s22 + $0x260] sm:$0xe]  ;;  %v9344_v10 = vld [vmem:[%s13121_s22 + $0x1bc] sm:$0x3] }
 0x1a2   : > { %v1827_v44 = vrot.slane %v1825_v12, 5  ;;  %v1833_v45 = vshll.u32 %v9286_v46, 16  ;;  %v1839_v56 = vshll.u32 %v13388_v58, 16  ;;  %v1800_v26 = vsel %vm13238_vm6, %v1795_v15, %v1799_v57  ;;  %v13428_v46 = vld [vmem:[%s13121_s22 + $0x248] sm:$0xe] }
 0x1a3   : > { %10955 = vmatmul.mubr.msk.bf16.vlgmr.msra.gmra.mrb[0].mxu0 %vm701_vm3, %v9297_v14  ;;  %v1809_v27 = vrot.slane %v1808_v16, 4  ;;  %v1832_v28 = vrot.slane %v1830_v20, 4  ;;  %v9316_v30 = vrot.slane %v13391_v4, 9  ;;  %v1822_v31 = vor.u32 %v1821_v22, %v1818_v9  ;;  %v9345_v16 = vld [vmem:[%s13121_s22 + $0x1d4] sm:$0x3]  ;;  %v12030_v20 = vld [vmem:[%s13145_s0 + $0xa0] sm:$0xff]  }
 0x1a4   : > { %10963 = vmatpush3.bf16.msra.mxu0 %v13357_v7  ;;  %v1835_v32 = vrot.slane %v1833_v45, 5  ;;  %v1841_v33 = vrot.slane %v1839_v56, 5  ;;  %v1999_v8 = vrot.slane %v13336_v37, 5  ;;  %v9317_v11 = vrot.slane %v13398_v13, 9 }
 0x1a5   : > { %10964 = vmatprep.subr.bf16.mxu0 %v12027_v6  ;;  %v1814_v35 = vsel %vm13238_vm6, %v1809_v27, %v1813_v1  ;;  %v2003_v38 = vrot.slane %v13340_v41, 5  ;;  %v9318_v7 = vrot.slane %v13401_v21, 9  ;;  %v1823_v40 = vrot.slane %v1822_v31, 4  ;;  %v12046_v31 = vld [vmem:[#allocation11] sm:$0xff]  }
 0x1a6   : > { %v9298_v39 = vcombine.low %v1800_v26, %v1814_v35  ;;  %v1836_v42 = vor.u32 %v1835_v32, %v1832_v28  ;;  %v2000_v37 = vsel %vm13176_vm2, %v9316_v30, %v1999_v8  ;;  %v2007_v41 = vrot.slane %v13344_v49, 5  ;;  %912 = vmatpush1.bf16.msra.mxu1 %v12046_v31 }
 0x1a7   : > { %v2004_v48 = vsel %vm13176_vm2, %v9317_v11, %v2003_v38  ;;  %v9319_v50 = vrot.slane %v13405_v25, 9  ;;  %v2011_v51 = vrot.slane %v13354_v63, 5  ;;  %v1828_v54 = vsel %vm13238_vm6, %v1823_v40, %v1827_v44  ;;  %v12047_v40 = vld [vmem:[#allocation11 + $0x8] sm:$0xff]   ;;  %913 = vmatprep.subr.bf16.mxu1 %v12665_v2 }
 0x1a8   : > { %10965 = vmatpush3.bf16.msra.mxu0 %v12027_v6  ;;  %10958 = vmatprep.mubr.msk.bf16.mxu0 %vm701_vm3, %v9298_v39  ;;  %v1837_v57 = vrot.slane %v1836_v42, 4  ;;  %v9332_v59 = vcombine.low %v2000_v37, %v2004_v48  ;;  %v9320_v60 = vrot.slane %v13420_v3, 9  ;;  %v13445_v49 = vsel %vm13176_vm2, %v9318_v7, %v2007_v41 }
 0x1a9   : > { %10966 = vmatprep.subr.bf16.mxu0 %v12028_v36  ;;  %v13449_v63 = vsel %vm13176_vm2, %v9319_v50, %v2011_v51  ;;  %v2015_v61 = vrot.slane %v13364_v23, 5  ;;  %v9321_v62 = vrot.slane %v13425_v43, 9  ;;  %v2019_v6 = vrot.slane %v13372_v34, 5 }
 0x1aa   : > { %v1842_v1 = vsel %vm13238_vm6, %v1837_v57, %v1841_v33  ;;  %v9333_v5 = vcombine.low %v13445_v49, %v13449_v63  ;;  %v9322_v9 = vrot.slane %v13428_v46, 9  ;;  %v2023_v23 = vrot.slane %v13379_v24, 5  ;;  %914 = vmatpush1.bf16.msra.mxu1 %v12047_v40 }
 0x1ab   : > { %v9299_v12 = vcombine.low %v1828_v54, %v1842_v1  ;;  %v13462_v14 = vsel %vm13176_vm2, %v9320_v60, %v2015_v61  ;;  %v9323_v15 = vrot.slane %v13437_v53, 9  ;;  %v2020_v22 = vsel %vm13176_vm2, %v9321_v62, %v2019_v6  ;;  %v12031_v54 = vld [vmem:[%s13145_s0 + $0xa8] sm:$0xff]   ;;  %v12048_v6 = vld [vmem:[#allocation11 + $0x10] sm:$0xff]   ;;  %915 = vmatprep.subr.bf16.mxu1 %v12665_v2 }
 0x1ac   : > { %10967 = vmatpush3.bf16.msra.mxu0 %v12028_v36  ;;  %v2027_v34 = vrot.slane %v13388_v58, 5  ;;  %v2168_v44 = vshrl.u32 %v13391_v4, 16  ;;  %v2171_v45 = vshll.u32 %v13391_v4, 16  ;;  %v9334_v24 = vcombine.low %v13462_v14, %v2020_v22  ;;  %v9346_v36 = vld [vmem:[%s13121_s22 + $0x1ec] sm:$0x3] }
 0x1ad   : > { %10959 = vmatmul.mubr.msk.bf16.gmra.mrb[4].mxu0 %vm701_vm3, %v9299_v12  ;;  %10968 = vmatprep.subr.bf16.mxu0 %v12029_v47  ;;  %v13477_v56 = vsel %vm13176_vm2, %v9322_v9, %v2023_v23  ;;  %v2177_v26 = vshrl.u32 %v9344_v10, 16  ;;  %v2180_v27 = vshll.u32 %v9344_v10, 16  ;;  %v2186_v30 = vshrl.u32 %v13398_v13, 16  ;;  %v12032_v9 = vld [vmem:[%s13145_s0 + $0xb0] sm:$0xff]  }
 0x1ae   : > { %10970 = vmatprep.mubr.msk.bf16.mxu0 %vm701_vm3, %v9332_v59  ;;  %v13482_v58 = vsel %vm13176_vm2, %v9323_v15, %v2027_v34  ;;  %v2170_v28 = vrot.slane %v2168_v44, 5  ;;  %v2173_v4 = vrot.slane %v2171_v45, 6  ;;  %v2189_v35 = vshll.u32 %v13398_v13, 16  ;;  %v9347_v59 = vld [vmem:[%s13121_s22 + $0x204] sm:$0x3]  ;;  %916 = vmatpush1.bf16.msra.mxu1 %v12048_v6 }
 0x1af   : > { %v9335_v32 = vcombine.low %v13477_v56, %v13482_v58  ;;  %v2179_v33 = vrot.slane %v2177_v26, 5  ;;  %v2182_v8 = vrot.slane %v2180_v27, 6  ;;  %v2188_v38 = vrot.slane %v2186_v30, 5  ;;  %v9348_v15 = vld [vmem:[%s13121_s22 + $0x21c] sm:$0x3]  ;;  %917 = vmatprep.subr.bf16.mxu1 %v12665_v2 }
 0x1b0   : > { %10969 = vmatpush3.bf16.msra.mxu0 %v12029_v47  ;;  %v2174_v11 = vor.u32 %v2173_v4, %v2170_v28  ;;  %v2195_v7 = vshrl.u32 %v9345_v16, 16  ;;  %v2198_v39 = vshll.u32 %v9345_v16, 16  ;;  %v2191_v37 = vrot.slane %v2189_v35, 6  ;;  %v9349_v44 = vld [vmem:[%s13121_s22 + $0x234] sm:$0x3] }
 0x1b1   : > { %10978 = vmatprep.subr.bf16.mxu0 %v12030_v20  ;;  %v2183_v42 = vor.u32 %v2182_v8, %v2179_v33  ;;  %v2204_v48 = vshrl.u32 %v13401_v21, 16  ;;  %v2207_v41 = vshll.u32 %v13401_v21, 16  ;;  %v2213_v51 = vshrl.u32 %v9346_v36, 16  ;;  %v9372_v6 = vld [vmem:[%s13121_s22 + $0x1d0] sm:$0xf] }
 0x1b2   : > { %v2175_v13 = vrot.slane %v2174_v11, 4  ;;  %v2197_v50 = vrot.slane %v2195_v7, 5  ;;  %v2200_v47 = vrot.slane %v2198_v39, 6  ;;  %v2192_v57 = vor.u32 %v2191_v37, %v2188_v38 }
 0x1b3   : > { %v2206_v60 = vrot.slane %v2204_v48, 5  ;;  %v2209_v49 = vrot.slane %v2207_v41, 6  ;;  %v2216_v63 = vshll.u32 %v9346_v36, 16  ;;  %v2215_v21 = vrot.slane %v2213_v51, 5  ;;  %v12033_v36 = vld [vmem:[%s13145_s0 + $0xb8] sm:$0xff]   ;;  %v12050_v51 = vld [vmem:[#allocation11 + $0x20] sm:$0xff]  }
 0x1b4   : > { %v13496_v61 = vsel %vm13299_vm9, %v2175_v13, %v2183_v42  ;;  %v2201_v62 = vor.u32 %v2200_v47, %v2197_v50  ;;  %v2222_v1 = vshrl.u32 %v13405_v25, 16  ;;  %v2193_v10 = vrot.slane %v2192_v57, 4  ;;  %v9350_v41 = vld [vmem:[%s13121_s22 + $0x24c] sm:$0x3] }
 0x1b5   : > { %10971 = vmatmul.mubr.msk.bf16.vlgmr.msra.gmra.mrb[0].mxu0 %vm701_vm3, %v9333_v5  ;;  %v2210_v12 = vor.u32 %v2209_v49, %v2206_v60  ;;  %v2218_v14 = vrot.slane %v2216_v63, 6  ;;  %v2225_v23 = vshll.u32 %v13405_v25, 16  ;;  %v2231_v22 = vshrl.u32 %v9347_v59, 16  ;;  %v12034_v49 = vld [vmem:[%s13145_s0 + $0xc0] sm:$0xff]  }
 0x1b6   : > { %10979 = vmatpush3.bf16.msra.mxu0 %v12030_v20  ;;  %10974 = vmatprep.mubr.msk.bf16.mxu0 %vm701_vm3, %v9334_v24  ;;  %v2224_v16 = vrot.slane %v2222_v1, 5  ;;  %v2234_v34 = vshll.u32 %v9347_v59, 16  ;;  %v2240_v45 = vshrl.u32 %v13420_v3, 16  ;;  %v2202_v5 = vsel %vm13299_vm9, %v2193_v10, %v2201_v62  ;;  %v12049_v24 = vld [vmem:[#allocation11 + $0x18] sm:$0xff]  }
 0x1b7   : > { %10980 = vmatprep.subr.bf16.mxu0 %v12031_v54  ;;  %v2211_v26 = vrot.slane %v2210_v12, 4  ;;  %v2219_v27 = vor.u32 %v2218_v14, %v2215_v21  ;;  %v2227_v25 = vrot.slane %v2225_v23, 6  ;;  %v9360_v28 = vcombine.low %v13496_v61, %v2202_v5  ;;  %918 = vmatpush1.bf16.msra.mxu1 %v12049_v24  ;;  %v12051_v23 = vld [vmem:[#allocation11 + $0x28] sm:$0xff]  }
 0x1b8   : > { %v2233_v4 = vrot.slane %v2231_v22, 5  ;;  %v2236_v20 = vrot.slane %v2234_v34, 6  ;;  %v2242_v30 = vrot.slane %v2240_v45, 5  ;;  %v2243_v8 = vshll.u32 %v13420_v3, 16  ;;  %919 = vmatprep.subr.bf16.mxu1 %v12665_v2 }
 0x1b9   : > { %v13512_v31 = vsel %vm13299_vm9, %v2211_v26, %v2219_v27  ;;  %v2228_v33 = vor.u32 %v2227_v25, %v2224_v16  ;;  %v2249_v35 = vshrl.u32 %v9348_v15, 16  ;;  %v2252_v38 = vshll.u32 %v9348_v15, 16  ;;  %v13543_v27 = vld [vmem:[%s13121_s22 + $0x1d4] sm:$0x1] }
 0x1ba   : > { %10981 = vmatpush3.bf16.msra.mxu0 %v12031_v54  ;;  %v2237_v11 = vor.u32 %v2236_v20, %v2233_v4  ;;  %v2258_v7 = vshrl.u32 %v13425_v43, 16  ;;  %v2261_v39 = vshll.u32 %v13425_v43, 16  ;;  %v2245_v42 = vrot.slane %v2243_v8, 6  ;;  %v9374_v20 = vld [vmem:[%s13121_s22 + $0x1e8] sm:$0xf] }
 0x1bb   : > { %10982 = vmatprep.subr.bf16.mxu0 %v12032_v9  ;;  %v2229_v40 = vrot.slane %v2228_v33, 4  ;;  %v2251_v37 = vrot.slane %v2249_v35, 5  ;;  %v2267_v48 = vshrl.u32 %v9349_v44, 16  ;;  %v2254_v13 = vrot.slane %v2252_v38, 6  ;;  %920 = vmatpush1.bf16.msra.mxu1 %v12050_v51  ;;  %v9376_v35 = vld [vmem:[%s13121_s22 + $0x200] sm:$0xf] }
 0x1bc   : > { %v2260_v3 = vrot.slane %v2258_v7, 5  ;;  %v2263_v50 = vrot.slane %v2261_v39, 6  ;;  %v2270_v47 = vshll.u32 %v9349_v44, 16  ;;  %v2246_v54 = vor.u32 %v2245_v42, %v2242_v30  ;;  %921 = vmatprep.subr.bf16.mxu1 %v12665_v2  ;;  %v13547_v30 = vld [vmem:[%s13121_s22 + $0x1ec] sm:$0x1] }
 0x1bd   : > { %10975 = vmatmul.mubr.msk.bf16.gmra.mrb[4].mxu0 %vm701_vm3, %v9335_v32  ;;  %v2238_v43 = vsel %vm13299_vm9, %v2229_v40, %v2237_v11  ;;  %v2269_v57 = vrot.slane %v2267_v48, 5  ;;  %v2276_v59 = vshrl.u32 %v13428_v46, 16  ;;  %v2255_v63 = vor.u32 %v2254_v13, %v2251_v37  ;;  %v9351_v32 = vld [vmem:[%s13121_s22 + $0x264] sm:$0x3]  ;;  %v12052_v11 = vld [vmem:[#allocation11 + $0x30] sm:$0xff]   ;;  %v12036_v40 = vld [vmem:[%s13145_s0 + $0xd0] sm:$0xff]  }
 0x1be   : > { %10983 = vmatpush3.bf16.msra.mxu0 %v12032_v9  ;;  %10986 = vmatprep.mubr.msk.bf16.mxu0 %vm701_vm3, %v9360_v28  ;;  %v9361_v60 = vcombine.low %v13512_v31, %v2238_v43  ;;  %v2264_v56 = vor.u32 %v2263_v50, %v2260_v3  ;;  %v2272_v58 = vrot.slane %v2270_v47, 6  ;;  %v2247_v61 = vrot.slane %v2246_v54, 4 }
 0x1bf   : > { %10984 = vmatprep.subr.bf16.mxu0 %v12033_v36  ;;  %v2278_v62 = vrot.slane %v2276_v59, 5  ;;  %v2279_v21 = vshll.u32 %v13428_v46, 16  ;;  %v2285_v1 = vshrl.u32 %v9350_v41, 16  ;;  %v2288_v9 = vshll.u32 %v9350_v41, 16  ;;  %v12035_v46 = vld [vmem:[%s13145_s0 + $0xc8] sm:$0xff]   ;;  %922 = vmatpush1.bf16.msra.mxu1 %v12051_v23 }
 0x1c0   : > { %v2265_v10 = vrot.slane %v2264_v56, 4  ;;  %v2273_v12 = vor.u32 %v2272_v58, %v2269_v57  ;;  %v2294_v14 = vshrl.u32 %v13437_v53, 16  ;;  %v2256_v15 = vsel %vm13299_vm9, %v2247_v61, %v2255_v63  ;;  %923 = vmatprep.subr.bf16.mxu1 %v12665_v2  ;;  %v12037_v56 = vld [vmem:[%s13145_s0 + $0xd8] sm:$0xff]   ;;  %v13566_v58 = vld [vmem:[%s13121_s22 + $0x21c] sm:$0x1] }
 0x1c1   : > { %v2281_v16 = vrot.slane %v2279_v21, 6  ;;  %v2287_v22 = vrot.slane %v2285_v1, 5  ;;  %v2297_v34 = vshll.u32 %v13437_v53, 16  ;;  %v2290_v45 = vrot.slane %v2288_v9, 6  ;;  %v13572_v9 = vld [vmem:[%s13121_s22 + $0x234] sm:$0x1] }
 0x1c2   : > { %10985 = vmatpush3.bf16.msra.mxu0 %v12033_v36  ;;  %v2274_v44 = vsel %vm13299_vm9, %v2265_v10, %v2273_v12  ;;  %v2296_v5 = vrot.slane %v2294_v14, 5  ;;  %v2303_v26 = vshrl.u32 %v9351_v32, 16  ;;  %v2306_v53 = vshll.u32 %v9351_v32, 16  ;;  %v13551_v36 = vld [vmem:[%s13121_s22 + $0x204] sm:$0x1] }
 0x1c3   : > { %10994 = vmatprep.subr.bf16.mxu0 %v12034_v49  ;;  %v9362_v25 = vcombine.low %v2256_v15, %v2274_v44  ;;  %v2282_v28 = vor.u32 %v2281_v16, %v2278_v62  ;;  %v2299_v4 = vrot.slane %v2297_v34, 6  ;;  %v2291_v24 = vor.u32 %v2290_v45, %v2287_v22  ;;  %924 = vmatpush1.bf16.msra.mxu1 %v12052_v11  ;;  %v9380_v12 = vld [vmem:[%s13121_s22 + $0x230] sm:$0xf]  ;;  %v9382_v22 = vld [vmem:[%s13121_s22 + $0x248] sm:$0xf] }
 0x1c4   : > { %v2305_v31 = vrot.slane %v2303_v26, 5  ;;  %v2459_v33 = vshrl.u32 %v9372_v6, 16  ;;  %v2462_v8 = vshll.u32 %v9372_v6, 16  ;;  %v2308_v39 = vrot.slane %v2306_v53, 6  ;;  %925 = vmatprep.subr.bf16.mxu1 %v12665_v2  ;;  %v9384_v26 = vld [vmem:[%s13121_s22 + $0x260] sm:$0xf] }
 0x1c5   : > { %10987 = vmatmul.mubr.msk.bf16.vlgmr.msra.gmra.mrb[0].mxu0 %vm701_vm3, %v9361_v60  ;;  %v2283_v38 = vrot.slane %v2282_v28, 4  ;;  %v2300_v7 = vor.u32 %v2299_v4, %v2296_v5  ;;  %v2468_v42 = vshll.u32 %v13543_v27, 16  ;;  %v2473_v41 = vshrl.u32 %v9374_v20, 16  ;;  %v9378_v60 = vld [vmem:[%s13121_s22 + $0x218] sm:$0xf] }
 0x1c6   : > { %10995 = vmatpush3.bf16.msra.mxu0 %v12034_v49  ;;  %10990 = vmatprep.mubr.msk.bf16.mxu0 %vm701_vm3, %v9362_v25  ;;  %v2461_v37 = vrot.slane %v2459_v33, 4  ;;  %v2464_v48 = vrot.slane %v2462_v8, 5  ;;  %v2476_v13 = vshll.u32 %v9374_v20, 16  ;;  %v2309_v47 = vor.u32 %v2308_v39, %v2305_v31  ;;  %v12053_v49 = vld [vmem:[#allocation11 + $0x38] sm:$0xff]   ;;  %v13581_v5 = vld [vmem:[%s13121_s22 + $0x24c] sm:$0x1] }
 0x1c7   : > { %10996 = vmatprep.subr.bf16.mxu0 %v12035_v46  ;;  %v2292_v3 = vsel %vm13299_vm9, %v2283_v38, %v2291_v24  ;;  %v2301_v50 = vrot.slane %v2300_v7, 4  ;;  %v2470_v51 = vrot.slane %v2468_v42, 5  ;;  %v2475_v54 = vrot.slane %v2473_v41, 4  ;;  %926 = vmatpush1.bf16.msra.mxu1 %v12053_v49  ;;  %v12054_v25 = vld [vmem:[#allocation11 + $0x40] sm:$0xff]   ;;  %v12038_v38 = vld [vmem:[%s13145_s0 + $0xe0] sm:$0xff]  }
 0x1c8   : > { %v2465_v43 = vor.u32 %v2464_v48, %v2461_v37  ;;  %v2478_v57 = vrot.slane %v2476_v13, 5  ;;  %v2482_v59 = vshll.u32 %v13547_v30, 16  ;;  %v2487_v32 = vshrl.u32 %v9376_v35, 16  ;;  %927 = vmatprep.subr.bf16.mxu1 %v12665_v2  ;;  %v12055_v13 = vld [vmem:[#allocation11 + $0x48] sm:$0xff]   ;;  %v13604_v49 = vld [vmem:[%s13121_s22 + $0x27c] sm:$0x1] }
 0x1c9   : > { %v2310_v63 = vsel %vm13299_vm9, %v2301_v50, %v2309_v47  ;;  %v2490_v61 = vshll.u32 %v9376_v35, 16  ;;  %v2496_v62 = vshll.u32 %v13551_v36, 16  ;;  %v2501_v16 = vshrl.u32 %v9378_v60, 16 }
 0x1ca   : > { %10997 = vmatpush3.bf16.msra.mxu0 %v12035_v46  ;;  %v9363_v21 = vcombine.low %v2292_v3, %v2310_v63  ;;  %v2466_v1 = vrot.slane %v2465_v43, 4  ;;  %v2479_v6 = vor.u32 %v2478_v57, %v2475_v54  ;;  %v2484_v10 = vrot.slane %v2482_v59, 5  ;;  %v13601_v54 = vld [vmem:[%s13145_s0 + $0x20] sm:$0xff]  }
 0x1cb   : > { %10998 = vmatprep.subr.bf16.mxu0 %v12036_v40  ;;  %v2489_v14 = vrot.slane %v2487_v32, 4  ;;  %v2492_v23 = vrot.slane %v2490_v61, 5  ;;  %v13574_v15 = vrot.slane %v2496_v62, 5  ;;  %v2504_v44 = vshll.u32 %v9378_v60, 16  ;;  %928 = vmatpush1.bf16.msra.mxu1 %v12054_v25  ;;  %v12039_v32 = vld [vmem:[%s13145_s0 + $0xe8] sm:$0xff]  }
 0x1cc   : > { %v2471_v34 = vsel %vm13238_vm6, %v2466_v1, %v2470_v51  ;;  %v2480_v46 = vrot.slane %v2479_v6, 4  ;;  %v2510_v45 = vshll.u32 %v13566_v58, 16  ;;  %v2503_v4 = vrot.slane %v2501_v16, 4  ;;  %v9386_v51 = vld [vmem:[%s13121_s22 + $0x278] sm:$0xf]  ;;  %929 = vmatprep.subr.bf16.mxu1 %v12665_v2 }
 0x1cd   : > { %10991 = vmatmul.mubr.msk.bf16.gmra.mrb[4].mxu0 %vm701_vm3, %v9363_v21  ;;  %v2493_v28 = vor.u32 %v2492_v23, %v2489_v14  ;;  %v2515_v53 = vshrl.u32 %v9380_v12, 16  ;;  %v2518_v20 = vshll.u32 %v9380_v12, 16  ;;  %v2506_v31 = vrot.slane %v2504_v44, 5  ;;  %v13609_v2 = vld [vmem:[%s13121_s22 + $0x1d0] sm:$0xe] }
 0x1ce   : > { %10999 = vmatpush3.bf16.msra.mxu0 %v12036_v40  ;;  %v2485_v24 = vsel %vm13238_vm6, %v2480_v46, %v2484_v10  ;;  %v2512_v33 = vrot.slane %v2510_v45, 5  ;;  %v2524_v8 = vshll.u32 %v13572_v9, 16  ;;  %v2529_v48 = vshrl.u32 %v9382_v22, 16  ;;  %v13591_v40 = vld [vmem:[%s13121_s22 + $0x264] sm:$0x1] }
 0x1cf   : > { %11000 = vmatprep.subr.bf16.mxu0 %v12037_v56  ;;  %v9396_v35 = vcombine.low %v2471_v34, %v2485_v24  ;;  %v2494_v11 = vrot.slane %v2493_v28, 4  ;;  %v2517_v7 = vrot.slane %v2515_v53, 4  ;;  %v2520_v39 = vrot.slane %v2518_v20, 5  ;;  %v13614_v14 = vld [vmem:[%s13121_s22 + $0x1e8] sm:$0xe]  ;;  %930 = vmatpush1.bf16.msra.mxu1 %v12055_v13 }
 0x1d0   : > { %v2507_v42 = vor.u32 %v2506_v31, %v2503_v4  ;;  %v2526_v37 = vrot.slane %v2524_v8, 5  ;;  %v2532_v41 = vshll.u32 %v9382_v22, 16  ;;  %v2538_v47 = vshll.u32 %v13581_v5, 16  ;;  %v13617_v23 = vld [vmem:[%s13121_s22 + $0x200] sm:$0xe]  ;;  %10898 = vmatprep.subr.bf16.mxu1 %v13601_v54 }
 0x1d1   : > { %11002 = vmatprep.mubr.msk.bf16.mxu0 %vm701_vm3, %v9396_v35  ;;  %v2499_v3 = vsel %vm13238_vm6, %v2494_v11, %v13574_v15  ;;  %v2521_v50 = vor.u32 %v2520_v39, %v2517_v7  ;;  %v2543_v43 = vshrl.u32 %v9384_v26, 16  ;;  %v2531_v59 = vrot.slane %v2529_v48, 4  ;;  %v13622_v46 = vld [vmem:[%s13121_s22 + $0x218] sm:$0xe]  ;;  %v13627_v28 = vld [vmem:[%s13121_s22 + $0x230] sm:$0xe] }
 0x1d2   : > { %11001 = vmatpush3.bf16.msra.mxu0 %v12037_v56  ;;  %v2508_v57 = vrot.slane %v2507_v42, 4  ;;  %v2534_v60 = vrot.slane %v2532_v41, 5  ;;  %v2546_v63 = vshll.u32 %v9384_v26, 16  ;;  %v2540_v62 = vrot.slane %v2538_v47, 5  ;;  %v13634_v31 = vld [vmem:[%s13121_s22 + $0x248] sm:$0xe] }
 0x1d3   : > { %11010 = vmatprep.subr.bf16.mxu0 %v12038_v38  ;;  %v2522_v61 = vrot.slane %v2521_v50, 4  ;;  %v2545_v21 = vrot.slane %v2543_v43, 4  ;;  %v2552_v1 = vshll.u32 %v13591_v40, 16  ;;  %v2557_v12 = vshrl.u32 %v9386_v51, 16  ;;  %v13640_v7 = vld [vmem:[%s13121_s22 + $0x260] sm:$0xe] }
 0x1d4   : > { %v2513_v56 = vsel %vm13238_vm6, %v2508_v57, %v2512_v33  ;;  %v2535_v6 = vor.u32 %v2534_v60, %v2531_v59  ;;  %v2548_v10 = vrot.slane %v2546_v63, 5  ;;  %v2560_v34 = vshll.u32 %v9386_v51, 16  ;;  %v9444_v57 = vld [vmem:[%s13121_s22 + $0x1d4] sm:$0x3] }
 0x1d5   : > { %v9397_v15 = vcombine.low %v2499_v3, %v2513_v56  ;;  %v2527_v16 = vsel %vm13238_vm6, %v2522_v61, %v2526_v37  ;;  %v2554_v22 = vrot.slane %v2552_v1, 5  ;;  %v2559_v26 = vrot.slane %v2557_v12, 4  ;;  %v13653_v3 = vld [vmem:[%s13121_s22 + $0x278] sm:$0xe]  ;;  %v12041_v59 = vld [vmem:[%s13145_s0 + $0xf8] sm:$0xff]  }
 0x1d6   : > { %v2536_v44 = vrot.slane %v2535_v6, 4  ;;  %v2549_v45 = vor.u32 %v2548_v10, %v2545_v21  ;;  %v2566_v25 = vshll.u32 %v13604_v49, 16  ;;  %v2562_v4 = vrot.slane %v2560_v34, 5 }
 0x1d7   : > { %11003 = vmatmul.mubr.msk.bf16.vlgmr.msra.gmra.mrb[0].mxu0 %vm701_vm3, %v9397_v15  ;;  %v9416_v53 = vrot.slane %v13609_v2, 9  ;;  %v2726_v20 = vrot.slane %v13543_v27, 5  ;;  %v9417_v24 = vrot.slane %v13614_v14, 9  ;;  %v2730_v11 = vrot.slane %v13547_v30, 5  ;;  %v12040_v27 = vld [vmem:[%s13145_s0 + $0xf0] sm:$0xff]  }
 0x1d8   : > { %11011 = vmatpush3.bf16.msra.mxu0 %v12038_v38  ;;  %v2541_v33 = vsel %vm13238_vm6, %v2536_v44, %v2540_v62  ;;  %v2550_v8 = vrot.slane %v2549_v45, 4  ;;  %v2568_v35 = vrot.slane %v2566_v25, 5  ;;  %v2563_v42 = vor.u32 %v2562_v4, %v2559_v26  ;;  %v9445_v62 = vld [vmem:[%s13121_s22 + $0x1ec] sm:$0x3]  ;;  %v9446_v44 = vld [vmem:[%s13121_s22 + $0x204] sm:$0x3] }
 0x1d9   : > { %11012 = vmatprep.subr.bf16.mxu0 %v12039_v32  ;;  %v9398_v39 = vcombine.low %v2527_v16, %v2541_v33  ;;  %v2727_v37 = vsel %vm13176_vm2, %v9416_v53, %v2726_v20  ;;  %v9418_v38 = vrot.slane %v13617_v23, 9  ;;  %v2731_v41 = vsel %vm13176_vm2, %v9417_v24, %v2730_v11  ;;  %v12042_v4 = vld [vmem:[%s13145_s0 + $0x100] sm:$0xff]  }
 0x1da   : > { %v2555_v48 = vsel %vm13238_vm6, %v2550_v8, %v2554_v22  ;;  %v2734_v30 = vrot.slane %v13551_v36, 5  ;;  %v9419_v13 = vrot.slane %v13622_v46, 9  ;;  %v2564_v50 = vrot.slane %v2563_v42, 4 }
 0x1db   : > { %11006 = vmatprep.mubr.msk.bf16.mxu0 %vm701_vm3, %v9398_v39  ;;  %v9432_v47 = vcombine.low %v2727_v37, %v2731_v41  ;;  %v2738_v51 = vrot.slane %v13566_v58, 5  ;;  %v9420_v43 = vrot.slane %v13627_v28, 9  ;;  %v2742_v36 = vrot.slane %v13572_v9, 5  ;;  %v12043_v39 = vld [vmem:[%s13145_s0 + $0x108] sm:$0xff]   ;;  %v9447_v37 = vld [vmem:[%s13121_s22 + $0x21c] sm:$0x3] }
 0x1dc   : > { %11013 = vmatpush3.bf16.msra.mxu0 %v12039_v32  ;;  %v2735_v60 = vsel %vm13176_vm2, %v9418_v38, %v2734_v30  ;;  %v9421_v63 = vrot.slane %v13634_v31, 9  ;;  %v2746_v61 = vrot.slane %v13581_v5, 5  ;;  %v2569_v21 = vsel %vm13238_vm6, %v2564_v50, %v2568_v35 }
 0x1dd   : > { %11014 = vmatprep.subr.bf16.mxu0 %v12040_v27  ;;  %v2739_v58 = vsel %vm13176_vm2, %v9419_v13, %v2738_v51  ;;  %v9422_v32 = vrot.slane %v13640_v7, 9  ;;  %v2750_v1 = vrot.slane %v13591_v40, 5  ;;  %v9399_v56 = vcombine.low %v2555_v48, %v2569_v21 }
 0x1de   : > { %v9433_v6 = vcombine.low %v2735_v60, %v2739_v58  ;;  %v2743_v9 = vsel %vm13176_vm2, %v9420_v43, %v2742_v36  ;;  %v2747_v5 = vsel %vm13176_vm2, %v9421_v63, %v2746_v61  ;;  %v9423_v12 = vrot.slane %v13653_v3, 9  ;;  %v9448_v61 = vld [vmem:[%s13121_s22 + $0x234] sm:$0x3] }
 0x1df   : > { %v9434_v10 = vcombine.low %v2743_v9, %v2747_v5  ;;  %v13678_v19 = vsel %vm13176_vm2, %v9422_v32, %v2750_v1  ;;  %v2754_v15 = vrot.slane %v13604_v49, 5  ;;  %11007 = vmatmul.mubr.msk.bf16.gmra.mrb[4].mxu0 %vm701_vm3, %v9399_v56  ;;  %v2895_v40 = vshrl.u32 %v13609_v2, 16  ;;  %v9449_v9 = vld [vmem:[%s13121_s22 + $0x24c] sm:$0x3] }
 0x1e0   : > { %v2898_v16 = vshll.u32 %v13609_v2, 16  ;;  %v2904_v22 = vshrl.u32 %v9444_v57, 16  ;;  %v2907_v34 = vshll.u32 %v9444_v57, 16  ;;  %11015 = vmatpush3.bf16.msra.mxu0 %v12040_v27  ;;  %11018 = vmatprep.mubr.msk.bf16.mxu0 %vm701_vm3, %v9432_v47  ;;  %v2913_v26 = vshrl.u32 %v13614_v14, 16  ;;  %v12044_v5 = vld [vmem:[%s13145_s0 + $0x110] sm:$0xff]  }
 0x1e1   : > { %v13689_v45 = vsel %vm13176_vm2, %v9423_v12, %v2754_v15  ;;  %v2916_v49 = vshll.u32 %v13614_v14, 16  ;;  %v2922_v25 = vshrl.u32 %v9445_v62, 16  ;;  %11016 = vmatprep.subr.bf16.mxu0 %v12041_v59  ;;  %v2897_v53 = vrot.slane %v2895_v40, 5 }
 0x1e2   : > { %v9435_v2 = vcombine.low %v13678_v19, %v13689_v45  ;;  %v2900_v20 = vrot.slane %v2898_v16, 6  ;;  %v2906_v24 = vrot.slane %v2904_v22, 5  ;;  %v2909_v33 = vrot.slane %v2907_v34, 6 }
 0x1e3   : > { %v2915_v8 = vrot.slane %v2913_v26, 5  ;;  %v2918_v35 = vrot.slane %v2916_v49, 6  ;;  %v2924_v11 = vrot.slane %v2922_v25, 5  ;;  %v2925_v27 = vshll.u32 %v9445_v62, 16  ;;  %v12045_v25 = vld [vmem:[%s13145_s0 + $0x118] sm:$0xff]  }
 0x1e4   : > { %v2901_v42 = vor.u32 %v2900_v20, %v2897_v53  ;;  %v2931_v38 = vshrl.u32 %v13617_v23, 16  ;;  %v2934_v14 = vshll.u32 %v13617_v23, 16  ;;  %11017 = vmatpush3.bf16.msra.mxu0 %v12041_v59  ;;  %v2910_v48 = vor.u32 %v2909_v33, %v2906_v24  ;;  %v9450_v33 = vld [vmem:[%s13121_s22 + $0x264] sm:$0x3] }
 0x1e5   : > { %v2919_v41 = vor.u32 %v2918_v35, %v2915_v8  ;;  %v2940_v30 = vshrl.u32 %v9446_v44, 16  ;;  %v2943_v13 = vshll.u32 %v9446_v44, 16  ;;  %11026 = vmatprep.subr.bf16.mxu0 %v12042_v4  ;;  %v2927_v47 = vrot.slane %v2925_v27, 6 }
 0x1e6   : > { %v2902_v50 = vrot.slane %v2901_v42, 4  ;;  %v2933_v51 = vrot.slane %v2931_v38, 5  ;;  %v2936_v43 = vrot.slane %v2934_v14, 6  ;;  %v2949_v63 = vshrl.u32 %v13622_v46, 16 }
 0x1e7   : > { %v2920_v57 = vrot.slane %v2919_v41, 4  ;;  %v2942_v60 = vrot.slane %v2940_v30, 5  ;;  %v2945_v36 = vrot.slane %v2943_v13, 6  ;;  %11019 = vmatmul.mubr.msk.bf16.vlgmr.msra.gmra.mrb[0].mxu0 %vm701_vm3, %v9433_v6  ;;  %v2928_v59 = vor.u32 %v2927_v47, %v2924_v11  ;;  %v9451_v41 = vld [vmem:[%s13121_s22 + $0x27c] sm:$0x3] }
 0x1e8   : > { %v2911_v23 = vsel %vm13299_vm9, %v2902_v50, %v2910_v48  ;;  %v2937_v62 = vor.u32 %v2936_v43, %v2933_v51  ;;  %v2952_v21 = vshll.u32 %v13622_v46, 16  ;;  %11027 = vmatpush3.bf16.msra.mxu0 %v12042_v4  ;;  %11022 = vmatprep.mubr.msk.bf16.mxu0 %vm701_vm3, %v9434_v10  ;;  %v2951_v32 = vrot.slane %v2949_v63, 5 }
 0x1e9   : > { %v2946_v58 = vor.u32 %v2945_v36, %v2942_v60  ;;  %v2958_v1 = vshrl.u32 %v9447_v37, 16  ;;  %v2961_v56 = vshll.u32 %v9447_v37, 16  ;;  %11028 = vmatprep.subr.bf16.mxu0 %v12043_v39  ;;  %v2929_v6 = vsel %vm13299_vm9, %v2920_v57, %v2928_v59 }
 0x1ea   : > { %v2938_v12 = vrot.slane %v2937_v62, 4  ;;  %v2954_v15 = vrot.slane %v2952_v21, 6  ;;  %v2967_v40 = vshrl.u32 %v13627_v28, 16  ;;  %v9460_v46 = vcombine.low %v2911_v23, %v2929_v6 }
 0x1eb   : > { %v2960_v16 = vrot.slane %v2958_v1, 5  ;;  %v2963_v22 = vrot.slane %v2961_v56, 6  ;;  %v2970_v10 = vshll.u32 %v13627_v28, 16  ;;  %v2976_v49 = vshrl.u32 %v9448_v61, 16 }
 0x1ec   : > { %v2947_v34 = vsel %vm13299_vm9, %v2938_v12, %v2946_v58  ;;  %v2955_v44 = vor.u32 %v2954_v15, %v2951_v32  ;;  %v2969_v26 = vrot.slane %v2967_v40, 5  ;;  %11029 = vmatpush3.bf16.msra.mxu0 %v12043_v39  ;;  %v2979_v20 = vshll.u32 %v9448_v61, 16 }
 0x1ed   : > { %v2964_v4 = vor.u32 %v2963_v22, %v2960_v16  ;;  %v2972_v53 = vrot.slane %v2970_v10, 6  ;;  %v2985_v24 = vshrl.u32 %v13634_v31, 16  ;;  %11030 = vmatprep.subr.bf16.mxu0 %v12044_v5  ;;  %v2978_v35 = vrot.slane %v2976_v49, 5 }
 0x1ee   : > { %v2956_v8 = vrot.slane %v2955_v44, 4  ;;  %v2988_v28 = vshll.u32 %v13634_v31, 16  ;;  %v2994_v11 = vshrl.u32 %v9449_v9, 16  ;;  %v2981_v27 = vrot.slane %v2979_v20, 6 }
 0x1ef   : > { %v2973_v42 = vor.u32 %v2972_v53, %v2969_v26  ;;  %v2987_v37 = vrot.slane %v2985_v24, 5  ;;  %v2997_v38 = vshll.u32 %v9449_v9, 16  ;;  %11023 = vmatmul.mubr.msk.bf16.gmra.mrb[4].mxu0 %vm701_vm3, %v9435_v2  ;;  %v3003_v30 = vshrl.u32 %v13640_v7, 16  ;;  %v12071_v26 = vld [vmem:[%s13121_s22 + $0x1b8] sm:$0xe] }
 0x1f0   : > { %v2965_v39 = vsel %vm13299_vm9, %v2956_v8, %v2964_v4  ;;  %v2990_v14 = vrot.slane %v2988_v28, 6  ;;  %v2996_v48 = vrot.slane %v2994_v11, 5  ;;  %11031 = vmatpush3.bf16.msra.mxu0 %v12044_v5  ;;  %11034 = vmatprep.mubr.msk.bf16.mxu0 %vm701_vm3, %v9460_v46  ;;  %v2982_v50 = vor.u32 %v2981_v27, %v2978_v35  ;;  %v12073_v35 = vld [vmem:[%s13121_s22 + $0x1e8] sm:$0xe] }
 0x1f1   : > { %v9461_v31 = vcombine.low %v2947_v34, %v2965_v39  ;;  %v2974_v13 = vrot.slane %v2973_v42, 4  ;;  %v2999_v47 = vrot.slane %v2997_v38, 6  ;;  %11032 = vmatprep.subr.bf16.mxu0 %v12045_v25  ;;  %v3005_v19 = vrot.slane %v3003_v30, 5  ;;  %v12070_v34 = vld [vmem:[%s13121_s22 + $0x1a0] sm:$0xe] }
 0x1f2   : > { %v2991_v51 = vor.u32 %v2990_v14, %v2987_v37  ;;  %v3006_v45 = vshll.u32 %v13640_v7, 16  ;;  %v3012_v2 = vshrl.u32 %v9450_v33, 16  ;;  %v3015_v60 = vshll.u32 %v9450_v33, 16  ;;  %v12068_v7 = vld [vmem:[%s13121_s22 + $0x1d4] sm:$0x1] }
 0x1f3   : > { %v2983_v43 = vsel %vm13299_vm9, %v2974_v13, %v2982_v50  ;;  %v3000_v57 = vor.u32 %v2999_v47, %v2996_v48  ;;  %v3021_v36 = vshrl.u32 %v13653_v3, 16  ;;  %v3024_v59 = vshll.u32 %v13653_v3, 16  ;;  %v12069_v3 = vld [vmem:[%s13121_s22 + $0x1ec] sm:$0x1]  ;;  %v637_v38 = vld [vmem:[#allocation9] sm:$0x3] }
 0x1f4   : > { %v2992_v63 = vrot.slane %v2991_v51, 4  ;;  %v3008_v61 = vrot.slane %v3006_v45, 6  ;;  %v3014_v23 = vrot.slane %v3012_v2, 5  ;;  %11033 = vmatpush3.bf16.msra.mxu0 %v12045_v25  ;;  %v3017_v62 = vrot.slane %v3015_v60, 6  ;;  %v12072_v25 = vld [vmem:[%s13121_s22 + $0x1d0] sm:$0xe] }
 0x1f5   : > { %v3023_v21 = vrot.slane %v3021_v36, 5  ;;  %v3030_v58 = vshrl.u32 %v9451_v41, 16  ;;  %v3033_v32 = vshll.u32 %v9451_v41, 16  ;;  %v1173_v1 = vrot.slane %v12068_v7, 5 }
 0x1f6   : > { %v3001_v56 = vsel %vm13299_vm9, %v2992_v63, %v3000_v57  ;;  %v3009_v9 = vor.u32 %v3008_v61, %v3005_v19  ;;  %v3026_v5 = vrot.slane %v3024_v59, 6  ;;  %v3018_v12 = vor.u32 %v3017_v62, %v3014_v23  ;;  %v12057_v23 = vld [vmem:[%s13145_s0 + $0x28] sm:$0xff]  }
 0x1f7   : > { %v9462_v6 = vcombine.low %v2983_v43, %v3001_v56  ;;  %v3032_v15 = vrot.slane %v3030_v58, 5  ;;  %v3035_v40 = vrot.slane %v3033_v32, 6  ;;  %v1177_v46 = vrot.slane %v12069_v3, 5  ;;  %11035 = vmatmul.mubr.msk.bf16.vlgmr.msra.gmra.mrb[0].mxu0 %vm701_vm3, %v9461_v31  ;;  %v12058_v56 = vld [vmem:[%s13145_s0 + $0x30] sm:$0xff]  }
 0x1f8   : > { %v3010_v16 = vrot.slane %v3009_v9, 4  ;;  %v3027_v22 = vor.u32 %v3026_v5, %v3023_v21  ;;  %v9204_v44 = vrot.slane %v12070_v34, 9  ;;  %v9205_v49 = vrot.slane %v12071_v26, 9 }
 0x1f9   : > { %11038 = vmatprep.mubr.msk.bf16.mxu0 %vm701_vm3, %v9462_v6  ;;  %v3036_v10 = vor.u32 %v3035_v40, %v3032_v15  ;;  %v9206_v4 = vrot.slane %v12072_v25, 9  ;;  %v9207_v28 = vrot.slane %v12073_v35, 9  ;;  %v639_v42 = vlaneseq }
 0x1fa   : > { %v3019_v53 = vsel %vm13299_vm9, %v3010_v16, %v3018_v12  ;;  %v3028_v20 = vrot.slane %v3027_v22, 4  ;;  %v13748_v24 = vsel %vm13176_vm2, %v9204_v44, %v1165_v29  ;;  %v13754_v33 = vsel %vm13176_vm2, %v9205_v49, %v1169_v17 }
 0x1fb   : > { %v13758_v8 = vsel %vm13176_vm2, %v9206_v4, %v1173_v1  ;;  %v9220_v52 = vcombine.low %v13748_v24, %v13754_v33  ;;  %v13767_v55 = vsel %vm13176_vm2, %v9207_v28, %v1177_v46  ;;  %v640_v27 = vshrl.u32 %v639_v42, 7  ;;  %v12059_v46 = vld [vmem:[%s13145_s0 + $0x38] sm:$0xff]  }
 0x1fc   : > { %v3037_v11 = vsel %vm13299_vm9, %v3028_v20, %v3036_v10  ;;  %v9221_v17 = vcombine.low %v13758_v8, %v13767_v55  ;;  %vm898_vm10 = vcmask 261120   ;;  %v12061_v8 = vld [vmem:[%s13157_s1 + $0x8] sm:$0xff]   ;;  %v12062_v55 = vld [vmem:[%s13157_s1 + $0x10] sm:$0xff]  }
 0x1fd   : > { %v9463_v29 = vcombine.low %v3019_v53, %v3037_v11  ;;  %v641_v37 = vsub.s32 0, %v640_v27  ;;  %v645_v39 = vsub.s32 1, %v640_v27 }
 0x1ff   : > { %11039 = vmatmul.mubr.msk.bf16.gmra.mrb[4].mxu0 %vm701_vm3, %v9463_v29  ;;  %v13772_v0 = vrot.slane %v637_v38, %v641_v37  ;;  %v13774_v14 = vrot.slane %v637_v38, %v645_v39 }
 0x23b   : > { %v748_v48 = vpop.f32.mrb[0].mxu1 }
 0x23c   : > { %v749_v41 = vadd.f32 %v748_v48, %v13772_v0  ;;  %v750_v30 = vpop.f32.mrb[1].mxu1 }
 0x23d   : > { %v751_v31 = vadd.f32 %v750_v30, %v13774_v14  ;;  %v752_v13 = vpop.f32.mrb[2].mxu1 }
 0x23e   : > { %v753_v50 = vadd.f32 %v752_v13, %v13772_v0  ;;  %v754_v47 = vpop.f32.mrb[3].mxu1  ;;  %v787_v19 = vmax.f32 %v749_v41, 0.0  ;;  %v12074_v13 = vld [vmem:[%s13121_s22 + $0x200] sm:$0xe] }
 0x23f   : > { %v755_v51 = vadd.f32 %v754_v47, %v13774_v14  ;;  %v788_v2 = vmax.f32 %v751_v31, 0.0  ;;  %v12075_v47 = vld [vmem:[%s13121_s22 + $0x204] sm:$0x1] }
 0x240   : > { %v789_v45 = vmax.f32 %v753_v50, 0.0  ;;  %v9208_v50 = vrot.slane %v12074_v13, 9 }
 0x241   : > { %v790_v43 = vmax.f32 %v755_v51, 0.0  ;;  %v1181_v51 = vrot.slane %v12075_v47, 5 }
 0x242   : > { %v803_v57 = vpack.c.bf16 %v789_v45, %v787_v19  ;;  %v12076_v19 = vld [vmem:[%s13121_s22 + $0x218] sm:$0xe]  ;;  %v12077_v45 = vld [vmem:[%s13121_s22 + $0x21c] sm:$0x1] }
 0x243   : > { %v804_v60 = vpack.c.bf16 %v790_v43, %v788_v2  ;;  %v758_v36 = vpop.f32.mrb[4].mxu1  ;;  %v1185_v2 = vrot.slane %v12077_v45, 5 }
 0x244   : > { %v759_v63 = vadd.f32 %v758_v36, %v13772_v0  ;;  %v760_v61 = vpop.f32.mrb[5].mxu1 }
 0x245   : > { %v761_v59 = vadd.f32 %v760_v61, %v13774_v14  ;;  %v762_v62 = vpop.f32.mrb[6].mxu1  ;;  %9175 = vmatprep.mubr.msk.bf16.mxu1 %vm898_vm10, %v804_v60 }
 0x246   : > { %v763_v21 = vadd.f32 %v762_v62, %v13772_v0  ;;  %v764_v58 = vpop.f32.mrb[7].mxu1  ;;  %944 = vmatmul.mubr.bf16.vlgmr.msra.gmra.mrb[16].mxu1 %v803_v57  ;;  %v791_v7 = vmax.f32 %v759_v63, 0.0  ;;  %v12078_v57 = vld [vmem:[%s13121_s22 + $0x230] sm:$0xe]  ;;  %v12079_v63 = vld [vmem:[%s13121_s22 + $0x234] sm:$0x1] }
 0x247   : > { %v765_v32 = vadd.f32 %v764_v58, %v13774_v14  ;;  %10899 = vmatpush3.bf16.msra.mxu1 %v13601_v54  ;;  %v792_v9 = vmax.f32 %v761_v59, 0.0  ;;  %v9210_v60 = vrot.slane %v12078_v57, 9  ;;  %v1189_v61 = vrot.slane %v12079_v63, 5  ;;  %v12081_v62 = vld [vmem:[%s13121_s22 + $0x24c] sm:$0x1]  ;;  %v12060_v58 = vld [vmem:[%s13157_s1] sm:$0xff]  }
 0x248   : > { %v793_v1 = vmax.f32 %v763_v21, 0.0  ;;  %10900 = vmatprep.subr.bf16.mxu1 %v12057_v23  ;;  %v1193_v24 = vrot.slane %v12081_v62, 5 }
 0x249   : > { %v794_v5 = vmax.f32 %v765_v32, 0.0  ;;  %v1190_v33 = vsel %vm13176_vm2, %v9210_v60, %v1189_v61  ;;  %v12064_v32 = vld [vmem:[%s13157_s1 + $0x20] sm:$0xff]  }
 0x24a   : > { %v805_v6 = vpack.c.bf16 %v793_v1, %v791_v7  ;;  %v12066_v7 = vld [vmem:[%s13157_s1 + $0x30] sm:$0xff]   ;;  %v12067_v1 = vld [vmem:[%s13157_s1 + $0x38] sm:$0xff]  }
 0x24b   : > { %v806_v12 = vpack.c.bf16 %v794_v5, %v792_v9  ;;  %v768_v15 = vpop.f32.mrb[8].mxu1  ;;  %10901 = vmatpush3.bf16.msra.mxu1 %v12057_v23  ;;  %v12080_v23 = vld [vmem:[%s13121_s22 + $0x248] sm:$0xe] }
 0x24c   : > { %v769_v40 = vadd.f32 %v768_v15, %v13772_v0  ;;  %v770_v3 = vpop.f32.mrb[9].mxu1  ;;  %10902 = vmatprep.subr.bf16.mxu1 %v12058_v56  ;;  %v9211_v59 = vrot.slane %v12080_v23, 9 }
 0x24d   : > { %v771_v16 = vadd.f32 %v770_v3, %v13774_v14  ;;  %v772_v22 = vpop.f32.mrb[10].mxu1  ;;  %9176 = vmatprep.mubr.msk.bf16.mxu1 %vm898_vm10, %v806_v12 }
 0x24e   : > { %v773_v54 = vadd.f32 %v772_v22, %v13772_v0  ;;  %v774_v10 = vpop.f32.mrb[11].mxu1  ;;  %952 = vmatmul.mubr.bf16.gmra.mrb[20].mxu1 %v805_v6  ;;  %v795_v44 = vmax.f32 %v769_v40, 0.0  ;;  %v9179_v22 = vld [vmem:[%s461_s20] ss:$0 sm:$0xff] }
 0x24f   : > { %v775_v34 = vadd.f32 %v774_v10, %v13774_v14  ;;  %10903 = vmatpush3.bf16.msra.mxu1 %v12058_v56  ;;  %v796_v49 = vmax.f32 %v771_v16, 0.0 }
 0x250   : > { %v797_v26 = vmax.f32 %v773_v54, 0.0  ;;  %10904 = vmatprep.subr.bf16.mxu1 %v12059_v46 }
 0x251   : > { %v798_v25 = vmax.f32 %v775_v34, 0.0 }
 0x252   : > { %v807_v4 = vpack.c.bf16 %v797_v26, %v795_v44 }
 0x253   : > { %v808_v53 = vpack.c.bf16 %v798_v25, %v796_v49  ;;  %v778_v20 = vpop.f32.mrb[12].mxu1  ;;  %10905 = vmatpush3.bf16.msra.mxu1 %v12059_v46  ;;  %v9164_v46 = vld [vmem:[#allocation12] ss:$0 sm:$0xff] }
 0x254   : > { %v779_v35 = vadd.f32 %v778_v20, %v13772_v0  ;;  %v780_v28 = vpop.f32.mrb[13].mxu1  ;;  %11042 = vmatprep.subr.bf16.mxu1 %v12060_v58 }
 0x255   : > { %v781_v11 = vadd.f32 %v780_v28, %v13774_v14  ;;  %v782_v29 = vpop.f32.mrb[14].mxu1  ;;  %9177 = vmatprep.mubr.msk.bf16.mxu1 %vm898_vm10, %v808_v53 }
 0x256   : > { %v783_v42 = vadd.f32 %v782_v29, %v13772_v0  ;;  %v784_v27 = vpop.f32.mrb[15].mxu1  ;;  %960 = vmatmul.mubr.bf16.gmra.mrb[24].mxu1 %v807_v4  ;;  %v799_v38 = vmax.f32 %v779_v35, 0.0  ;;  %v9209_v0 = vrot.slane %v12076_v19, 9 }
 0x257   : > { %v785_v37 = vadd.f32 %v784_v27, %v13774_v14  ;;  %v800_v48 = vmax.f32 %v781_v11, 0.0  ;;  %v1182_v14 = vsel %vm13176_vm2, %v9208_v50, %v1181_v51 }
 0x258   : > { %v801_v39 = vmax.f32 %v783_v42, 0.0  ;;  %v1186_v43 = vsel %vm13176_vm2, %v9209_v0, %v1185_v2 }
 0x259   : > { %v802_v41 = vmax.f32 %v785_v37, 0.0  ;;  %v9222_v36 = vcombine.low %v1182_v14, %v1186_v43  ;;  %v9472_v43 = vld [vmem:[%s13151_s23] ss:$0 sm:$0xff] }
 0x25a   : > { %v809_v30 = vpack.c.bf16 %v801_v39, %v799_v38 }
 0x25b   : > { %v810_v31 = vpack.c.bf16 %v802_v41, %v800_v48 }
 0x25d   : > { %9178 = vmatprep.mubr.msk.bf16.mxu1 %vm898_vm10, %v810_v31 }
 0x25e   : > { %968 = vmatmul.mubr.bf16.gmra.mrb[28].mxu1 %v809_v30 }
 0x25f   : > { %10906 = vmatprep.mubr.msk.bf16.mxu1 %vm701_vm3, %v9220_v52  ;;  %v1194_v52 = vsel %vm13176_vm2, %v9211_v59, %v1193_v24 }
 0x260   : > { %v9223_v21 = vcombine.low %v1190_v33, %v1194_v52 }
 0x266   : > { %10907 = vmatmul.mubr.msk.bf16.vlgmr.msra.gmra.mrb[32].mxu1 %vm701_vm3, %v9221_v17  ;;  %v12063_v17 = vld [vmem:[%s13157_s1 + $0x18] sm:$0xff]  }
 0x267   : > { %10910 = vmatprep.mubr.msk.bf16.mxu1 %vm701_vm3, %v9222_v36  ;;  %11043 = vmatpush3.bf16.msra.mxu1 %v12060_v58 }
 0x268   : > { %11044 = vmatprep.subr.bf16.mxu1 %v12061_v8 }
 0x26b   : > { %11045 = vmatpush3.bf16.msra.mxu1 %v12061_v8 }
 0x26c   : > { %11046 = vmatprep.subr.bf16.mxu1 %v12062_v55 }
 0x26e   : > { %10911 = vmatmul.mubr.msk.bf16.gmra.mrb[36].mxu1 %vm701_vm3, %v9223_v21 }
 0x26f   : > { %11047 = vmatpush3.bf16.msra.mxu1 %v12062_v55 }
 0x270   : > { %11048 = vmatprep.subr.bf16.mxu1 %v12063_v17 }
 0x273   : > { %11049 = vmatpush3.bf16.msra.mxu1 %v12063_v17 }
 0x274   : > { %11050 = vmatprep.subr.bf16.mxu1 %v12064_v32 }
 0x277   : > { %11051 = vmatpush3.bf16.msra.mxu1 %v12064_v32 }
 0x278   : > { %11052 = vmatprep.subr.bf16.mxu1 %v12065_v18 }
 0x27b   : > { %11053 = vmatpush3.bf16.msra.mxu1 %v12065_v18 }
 0x27c   : > { %11054 = vmatprep.subr.bf16.mxu1 %v12066_v7 }
 0x27f   : > { %11055 = vmatpush3.bf16.msra.mxu1 %v12066_v7 }
 0x280   : > { %11056 = vmatprep.subr.bf16.mxu1 %v12067_v1 }
 0x283   : > { %11057 = vmatpush3.bf16.msra.mxu1 %v12067_v1 }
 0x2ca   : > { %v11036_v56 = vpop.f32.mrb[0].mxu0 }
 0x2cb   : > { %v3129_v9 = vpop.f32.mrb[1].mxu0 }
 0x2cc   : > { %v11037_v5 = vpop.f32.mrb[2].mxu0 }
 0x2cd   : > { %v3132_v6 = vpop.f32.mrb[3].mxu0 }
 0x2d2   : > { %v13834_v12 = vpop.f32.mrb[4].mxu0 }
 0x2d3   : > { %v13836_v15 = vpop.f32.mrb[5].mxu0 }
 0x2d4   : > { %v13838_v40 = vpop.f32.mrb[6].mxu0 }
 0x2d5   : > { %v13840_v3 = vpop.f32.mrb[7].mxu0 }
 0x319   : > { %v945_v16 = vpop.f32.mrb[16].mxu1 }
 0x31a   : > { %v946_v54 = vadd.f32 %v9164_v46, %v945_v16  ;;  %v947_v10 = vpop.f32.mrb[17].mxu1 }
 0x31b   : > { %v948_v34 = vpop.f32.mrb[18].mxu1 }
 0x31c   : > { %v983_v44 = vadd.f32 %v9179_v22, %v946_v54  ;;  %v949_v26 = vadd.f32 %v9164_v46, %v948_v34  ;;  %v950_v49 = vpop.f32.mrb[19].mxu1 }
 0x31e   : > { %991 = vst.msk [vmem:[#allocation2] sm:$0xff] %vm898_vm10, %v983_v44  ;;  %v984_v25 = vadd.f32 %v9179_v22, %v949_v26 }
 0x320   : > { %992 = vst.msk [vmem:[#allocation2 + $0x8] sm:$0xff] %vm898_vm10, %v984_v25 }
 0x321   : > { %v953_v4 = vpop.f32.mrb[20].mxu1 }
 0x322   : > { %v954_v53 = vadd.f32 %v9164_v46, %v953_v4  ;;  %v955_v20 = vpop.f32.mrb[21].mxu1 }
 0x323   : > { %v956_v35 = vpop.f32.mrb[22].mxu1 }
 0x324   : > { %v985_v28 = vadd.f32 %v9179_v22, %v954_v53  ;;  %v957_v11 = vadd.f32 %v9164_v46, %v956_v35  ;;  %v958_v29 = vpop.f32.mrb[23].mxu1 }
 0x326   : > { %993 = vst.msk [vmem:[#allocation2 + $0x10] sm:$0xff] %vm898_vm10, %v985_v28  ;;  %v986_v42 = vadd.f32 %v9179_v22, %v957_v11 }
 0x327   : > { %v3196_v29 = vld [vmem:[#allocation2 + $0x8] sm:$0xff] }
 0x328   : > { %994 = vst.msk [vmem:[#allocation2 + $0x18] sm:$0xff] %vm898_vm10, %v986_v42 }
 0x329   : > { %v961_v27 = vpop.f32.mrb[24].mxu1 }
 0x32a   : > { %v962_v37 = vadd.f32 %v9164_v46, %v961_v27  ;;  %v963_v38 = vpop.f32.mrb[25].mxu1 }
 0x32b   : > { %v964_v39 = vpop.f32.mrb[26].mxu1 }
 0x32c   : > { %v987_v48 = vadd.f32 %v9179_v22, %v962_v37  ;;  %v965_v41 = vadd.f32 %v9164_v46, %v964_v39  ;;  %v966_v30 = vpop.f32.mrb[27].mxu1 }
 0x32e   : > { %995 = vst.msk [vmem:[#allocation2 + $0x20] sm:$0xff] %vm898_vm10, %v987_v48  ;;  %v988_v31 = vadd.f32 %v9179_v22, %v965_v41 }
 0x32f   : > { %v3198_v28 = vld [vmem:[#allocation2 + $0x18] sm:$0xff] }
 0x330   : > { %996 = vst.msk [vmem:[#allocation2 + $0x28] sm:$0xff] %vm898_vm10, %v988_v31 }
 0x331   : > { %v969_v13 = vpop.f32.mrb[28].mxu1 }
 0x332   : > { %v970_v50 = vadd.f32 %v9164_v46, %v969_v13  ;;  %v971_v47 = vpop.f32.mrb[29].mxu1 }
 0x333   : > { %v972_v51 = vpop.f32.mrb[30].mxu1 }
 0x334   : > { %v989_v19 = vadd.f32 %v9179_v22, %v970_v50  ;;  %v973_v0 = vadd.f32 %v9164_v46, %v972_v51  ;;  %v974_v45 = vpop.f32.mrb[31].mxu1 }
 0x335   : > { %v3199_v48 = vld [vmem:[#allocation2 + $0x20] sm:$0xff] }
 0x336   : > { %997 = vst.msk [vmem:[#allocation2 + $0x30] sm:$0xff] %vm898_vm10, %v989_v19  ;;  %v990_v2 = vadd.f32 %v9179_v22, %v973_v0 }
 0x337   : > { %v3200_v47 = vld [vmem:[#allocation2 + $0x28] sm:$0xff] }
 0x338   : > { %998 = vst.msk [vmem:[#allocation2 + $0x38] sm:$0xff] %vm898_vm10, %v990_v2 }
 0x339   : > { %v10908_v14 = vpop.f32.mrb[32].mxu1 }
 0x33a   : > { %v11570_v57 = vadd.f32 %v11036_v56, %v10908_v14  ;;  %v1286_v60 = vpop.f32.mrb[33].mxu1 }
 0x33b   : > { %v11571_v36 = vadd.f32 %v3129_v9, %v1286_v60  ;;  %v10909_v63 = vpop.f32.mrb[34].mxu1 }
 0x33c   : > { %v3177_v61 = vadd.f32 %v11570_v57, %v9472_v43  ;;  %v11572_v23 = vadd.f32 %v11037_v5, %v10909_v63  ;;  %v1289_v59 = vpop.f32.mrb[35].mxu1 }
 0x33d   : > { %v3175_v62 = vadd.f32 %v11571_v36, %v9472_v43  ;;  %v11573_v24 = vadd.f32 %v3132_v6, %v1289_v59  ;;  %v3201_v37 = vld [vmem:[#allocation2 + $0x30] sm:$0xff] }
 0x33e   : > { %v3178_v33 = vadd.f32 %v11572_v23, %v9472_v43  ;;  %v3185_v21 = vmax.f32 %v3177_v61, 0.0 }
 0x33f   : > { %v3176_v52 = vadd.f32 %v11573_v24, %v9472_v43  ;;  %v3183_v8 = vmax.f32 %v3175_v62, 0.0  ;;  %v3202_v31 = vld [vmem:[#allocation2 + $0x38] sm:$0xff] }
 0x340   : > { %v3186_v58 = vmax.f32 %v3178_v33, 0.0 }
 0x341   : > { %v3184_v55 = vmax.f32 %v3176_v52, 0.0  ;;  %v10912_v17 = vpop.f32.mrb[36].mxu1 }
 0x342   : > { %v3192_v32 = vpack.c.bf16 %v3186_v58, %v3185_v21  ;;  %v11574_v18 = vadd.f32 %v13834_v12, %v10912_v17  ;;  %v1302_v7 = vpop.f32.mrb[37].mxu1 }
 0x343   : > { %v11575_v1 = vadd.f32 %v13836_v15, %v1302_v7  ;;  %v10913_v56 = vpop.f32.mrb[38].mxu1  ;;  %v3191_v9 = vpack.c.bf16 %v3184_v55, %v3183_v8  ;;  %v3197_v15 = vld [vmem:[#allocation2 + $0x10] sm:$0xff] }
 0x344   : > { %v3181_v46 = vadd.f32 %v11574_v18, %v9472_v43  ;;  %v11576_v5 = vadd.f32 %v13838_v40, %v10913_v56  ;;  %v1305_v16 = vpop.f32.mrb[39].mxu1  ;;  %v3195_v40 = vld [vmem:[#allocation2] sm:$0xff] }
 0x345   : > { %v3179_v6 = vadd.f32 %v11575_v1, %v9472_v43  ;;  %v11577_v22 = vadd.f32 %v13840_v3, %v1305_v16  ;;  %11058 = vmatprep.mubr.bf16.mxu1 %v3191_v9 }
 0x346   : > { %v3182_v54 = vadd.f32 %v11576_v5, %v9472_v43  ;;  %11059 = vmatmul.mubr.bf16.vlgmr.msra.gmra.mrb[40].mxu1 %v3192_v32  ;;  %v3189_v34 = vmax.f32 %v3181_v46, 0.0 }
 0x347   : > { %v3180_v10 = vadd.f32 %v11577_v22, %v9472_v43  ;;  %v3187_v26 = vmax.f32 %v3179_v6, 0.0 }
 0x348   : > { %v3190_v44 = vmax.f32 %v3182_v54, 0.0 }
 0x349   : > { %v3188_v12 = vmax.f32 %v3180_v10, 0.0 }
 0x34a   : > { %v3194_v49 = vpack.c.bf16 %v3190_v44, %v3189_v34 }
 0x34b   : > { %v3193_v25 = vpack.c.bf16 %v3188_v12, %v3187_v26 }
 0x34d   : > { %11062 = vmatprep.mubr.bf16.mxu1 %v3193_v25 }
 0x34e   : > { %11063 = vmatmul.mubr.bf16.gmra.mrb[44].mxu1 %v3194_v49 }
 0x419   : > { %v11060_v4 = vpop.f32.mrb[40].mxu1 }
 0x41a   : > { %v3334_v53 = vadd.f32 %v11060_v4, %v3197_v15  ;;  %v3301_v20 = vpop.f32.mrb[41].mxu1 }
 0x41b   : > { %v3332_v35 = vadd.f32 %v3301_v20, %v3195_v40  ;;  %v11061_v3 = vpop.f32.mrb[42].mxu1 }
 0x41c   : > { %3342 = vst.msk [vmem:[#allocation2 + $0x10] sm:$0xff] %vm898_vm10, %v3334_v53  ;;  %v3335_v11 = vadd.f32 %v11061_v3, %v3198_v28  ;;  %v3304_v42 = vpop.f32.mrb[43].mxu1 }
 0x41d   : > { %3340 = vst.msk [vmem:[#allocation2] sm:$0xff] %vm898_vm10, %v3332_v35  ;;  %v3333_v27 = vadd.f32 %v3304_v42, %v3196_v29 }
 0x41e   : > { %3343 = vst.msk [vmem:[#allocation2 + $0x18] sm:$0xff] %vm898_vm10, %v3335_v11 }
 0x41f   : > { %3341 = vst.msk [vmem:[#allocation2 + $0x8] sm:$0xff] %vm898_vm10, %v3333_v27 }
 0x421   : > { %v11064_v38 = vpop.f32.mrb[44].mxu1 }
 0x422   : > { %v3338_v39 = vadd.f32 %v11064_v38, %v3201_v37  ;;  %v3317_v41 = vpop.f32.mrb[45].mxu1 }
 0x423   : > { %v3336_v30 = vadd.f32 %v3317_v41, %v3199_v48  ;;  %v11065_v13 = vpop.f32.mrb[46].mxu1 }
 0x424   : > { %3346 = vst.msk [vmem:[#allocation2 + $0x30] sm:$0xff] %vm898_vm10, %v3338_v39  ;;  %v3339_v50 = vadd.f32 %v11065_v13, %v3202_v31  ;;  %v3320_v51 = vpop.f32.mrb[47].mxu1 }
 0x425   : > { %3344 = vst.msk [vmem:[#allocation2 + $0x20] sm:$0xff] %vm898_vm10, %v3336_v30  ;;  %v3337_v19 = vadd.f32 %v3320_v51, %v3200_v47 }
 0x426   : > { %3347 = vst.msk [vmem:[#allocation2 + $0x38] sm:$0xff] %vm898_vm10, %v3339_v50 }
 0x427   : > { %3345 = vst.msk [vmem:[#allocation2 + $0x28] sm:$0xff] %vm898_vm10, %v3337_v19 }
 0x428 PF: > { %s15068_s14 = sld [smem:[#allocation30_spill]] }
 0x42e   : > { %p9481_p4 = scmp.ne.s32.totalorder %s15068_s14, 1 }
 0x42f   : > { %v12082_v0 = vld [vmem:[%s13145_s0 + $0x60] sm:$0xff] (!%p9481_p4)   ;;  %v12083_v45 = vld [vmem:[%s13145_s0 + $0x68] sm:$0xff] (!%p9481_p4)   ;;  %vm3385_vm11 = vcmask (!%p9481_p4), 1041408   ;;  %vm3386_vm12 = vcmask (!%p9481_p4), 1045508   ;;  %v12084_v2 = vld [vmem:[%s13145_s0 + $0x70] sm:$0xff] (!%p9481_p4)   ;;  %vm3540_vm14 = vcmask (!%p9481_p4), 523264  }
 0x430   : > { %3351 = sbr.rel (%p9481_p4) target bundleno = 1618 (0x652), region = 100  ;;  %11114 = vmatprep.subr.bf16.mxu0 (!%p9481_p4), %v12082_v0  ;;  %v12086_v14 = vld [vmem:[%s13145_s0 + $0x20] sm:$0xff] (!%p9481_p4)   ;;  %vm13870_vm13 = vmor (!%p9481_p4), %vm3385_vm11, %vm3386_vm12  ;;  %v12085_v36 = vld [vmem:[%s13145_s0 + $0x78] sm:$0xff] (!%p9481_p4)   ;;  %vm3460_vm15 = vcmask (!%p9481_p4), 1042432   ;;  %vm3461_vm0 = vcmask (!%p9481_p4), 1046532   ;;  %vm5119_vm2 = vcmask (!%p9481_p4), 261120  }
 0x431   : > { %11115 = vmatpush3.bf16.msra.mxu0 (!%p9481_p4), %v12082_v0  ;;  %v9590_v57 = vld [vmem:[%s13121_s22 + $0x1b4] sm:$0xc] (!%p9481_p4)  ;;  %v9591_v60 = vld [vmem:[%s13121_s22 + $0x1b8] sm:$0x3] (!%p9481_p4)  ;;  %11066 = vmatprep.subr.bf16.mxu1 (!%p9481_p4), %v12086_v14  ;;  %v9592_v63 = vld [vmem:[%s13121_s22 + $0x1cc] sm:$0xc] (!%p9481_p4) }
 0x432   : > { %11116 = vmatprep.subr.bf16.mxu0 (!%p9481_p4), %v12083_v45  ;;  %v9593_v61 = vld [vmem:[%s13121_s22 + $0x1d0] sm:$0x3] (!%p9481_p4)  ;;  %v9606_v23 = vrot.slane (!%p9481_p4), %v9590_v57, 10  ;;  %v3912_v59 = vrot.slane (!%p9481_p4), %v9591_v60, 6  ;;  %11067 = vmatpush3.bf16.msra.mxu1 (!%p9481_p4), %v12086_v14  ;;  %v9607_v62 = vrot.slane (!%p9481_p4), %v9592_v63, 10  ;;  %v12088_v46 = vld [vmem:[%s13145_s0 + $0x28] sm:$0xff] (!%p9481_p4)   ;;  %vm13911_vm1 = vmor (!%p9481_p4), %vm3460_vm15, %vm3461_vm0 }
 0x433   : > { %v3916_v24 = vrot.slane (!%p9481_p4), %v9593_v61, 6  ;;  %v9594_v33 = vld [vmem:[%s13121_s22 + $0x1e4] sm:$0xc] (!%p9481_p4)  ;;  %v9595_v52 = vld [vmem:[%s13121_s22 + $0x1e8] sm:$0x3] (!%p9481_p4)  ;;  %v12087_v5 = vld [vmem:[%s13145_s0 + $0x80] sm:$0xff] (!%p9481_p4)   ;;  %11068 = vmatprep.subr.bf16.mxu1 (!%p9481_p4), %v12088_v46 }
 0x434   : > { %v3913_v21 = vsel (!%p9481_p4), %vm13870_vm13, %v9606_v23, %v3912_v59  ;;  %v9596_v58 = vld [vmem:[%s13121_s22 + $0x1fc] sm:$0xc] (!%p9481_p4)  ;;  %v9597_v8 = vld [vmem:[%s13121_s22 + $0x200] sm:$0x3] (!%p9481_p4)  ;;  %v9608_v55 = vrot.slane (!%p9481_p4), %v9594_v33, 10  ;;  %v3920_v17 = vrot.slane (!%p9481_p4), %v9595_v52, 6 }
 0x435   : > { %11117 = vmatpush3.bf16.msra.mxu0 (!%p9481_p4), %v12083_v45  ;;  %v3917_v32 = vsel (!%p9481_p4), %vm13870_vm13, %v9607_v62, %v3916_v24  ;;  %v9609_v18 = vrot.slane (!%p9481_p4), %v9596_v58, 10  ;;  %v3924_v7 = vrot.slane (!%p9481_p4), %v9597_v8, 6  ;;  %v12090_v16 = vld [vmem:[%s13145_s0 + $0x30] sm:$0xff] (!%p9481_p4)   ;;  %v9598_v6 = vld [vmem:[%s13121_s22 + $0x214] sm:$0xc] (!%p9481_p4)  ;;  %v12089_v10 = vld [vmem:[%s13145_s0 + $0x88] sm:$0xff] (!%p9481_p4)  }
 0x436   : > { %11118 = vmatprep.subr.bf16.mxu0 (!%p9481_p4), %v12084_v2  ;;  %v9622_v1 = vcombine.low (!%p9481_p4), %v3913_v21, %v3917_v32  ;;  %v3921_v56 = vsel (!%p9481_p4), %vm13870_vm13, %v9608_v55, %v3920_v17  ;;  %v9599_v22 = vld [vmem:[%s13121_s22 + $0x218] sm:$0x3] (!%p9481_p4)  ;;  %11069 = vmatpush3.bf16.msra.mxu1 (!%p9481_p4), %v12088_v46  ;;  %v9600_v34 = vld [vmem:[%s13121_s22 + $0x22c] sm:$0xc] (!%p9481_p4)  ;;  %v9601_v44 = vld [vmem:[%s13121_s22 + $0x230] sm:$0x3] (!%p9481_p4) }
 0x437   : > { %v3925_v9 = vsel %vm13870_vm13, %v9609_v18, %v3924_v7  ;;  %v9610_v26 = vrot.slane %v9598_v6, 10  ;;  %v3928_v12 = vrot.slane %v9599_v22, 6  ;;  %11070 = vmatprep.subr.bf16.mxu1 %v12090_v16  ;;  %v9611_v49 = vrot.slane %v9600_v34, 10  ;;  %v9602_v15 = vld [vmem:[%s13121_s22 + $0x244] sm:$0xc]  ;;  %v12092_v39 = vld [vmem:[%s13145_s0 + $0x38] sm:$0xff]  }
 0x438   : > { %11122 = vmatprep.mubr.msk.bf16.mxu0 %vm3540_vm14, %v9622_v1  ;;  %v9623_v54 = vcombine.low %v3921_v56, %v3925_v9  ;;  %v3932_v25 = vrot.slane %v9601_v44, 6  ;;  %v9603_v4 = vld [vmem:[%s13121_s22 + $0x248] sm:$0x3]  ;;  %v9604_v40 = vld [vmem:[%s13121_s22 + $0x25c] sm:$0xc]  ;;  %v9612_v35 = vrot.slane %v9602_v15, 10 }
 0x439   : > { %11119 = vmatpush3.bf16.msra.mxu0 %v12084_v2  ;;  %v3929_v53 = vsel %vm13870_vm13, %v9610_v26, %v3928_v12  ;;  %v9605_v20 = vld [vmem:[%s13121_s22 + $0x260] sm:$0x3]  ;;  %v3936_v28 = vrot.slane %v9603_v4, 6  ;;  %v9613_v11 = vrot.slane %v9604_v40, 10  ;;  %v12091_v48 = vld [vmem:[%s13145_s0 + $0x90] sm:$0xff]   ;;  %v12093_v19 = vld [vmem:[%s13145_s0 + $0x98] sm:$0xff]  }
 0x43a   : > { %11120 = vmatprep.subr.bf16.mxu0 %v12085_v36  ;;  %v3933_v3 = vsel %vm13870_vm13, %v9611_v49, %v3932_v25  ;;  %v3940_v29 = vrot.slane %v9605_v20, 6  ;;  %11071 = vmatpush3.bf16.msra.mxu1 %v12090_v16  ;;  %v9506_v41 = vld [vmem:[%s13121_s22 + $0x128] sm:$0xe]  ;;  %v9507_v30 = vld [vmem:[%s13121_s22 + $0x12c] sm:$0x1]  ;;  %v12094_v52 = vld [vmem:[%s13145_s0] sm:$0xff]  }
 0x43b   : > { %v9624_v42 = vcombine.low %v3929_v53, %v3933_v3  ;;  %v3937_v37 = vsel %vm13870_vm13, %v9612_v35, %v3936_v28  ;;  %11072 = vmatprep.subr.bf16.mxu1 %v12092_v39  ;;  %v9508_v31 = vld [vmem:[%s13121_s22 + $0x140] sm:$0xe]  ;;  %v9509_v13 = vld [vmem:[%s13121_s22 + $0x144] sm:$0x1]  ;;  %v9522_v50 = vrot.slane %v9506_v41, 9  ;;  %v3465_v47 = vrot.slane %v9507_v30, 5 }
 0x43c   : > { %v3941_v38 = vsel %vm13870_vm13, %v9613_v11, %v3940_v29  ;;  %v9523_v0 = vrot.slane %v9508_v31, 9  ;;  %v3469_v45 = vrot.slane %v9509_v13, 5  ;;  %v9510_v2 = vld [vmem:[%s13121_s22 + $0x158] sm:$0xe]  ;;  %v9511_v14 = vld [vmem:[%s13121_s22 + $0x15c] sm:$0x1] }
 0x43d   : > { %11121 = vmatpush3.bf16.msra.mxu0 %v12085_v36  ;;  %v9625_v51 = vcombine.low %v3937_v37, %v3941_v38  ;;  %v3466_v57 = vsel %vm13911_vm1, %v9522_v50, %v3465_v47  ;;  %v9512_v60 = vld [vmem:[%s13121_s22 + $0x170] sm:$0xe]  ;;  %v9513_v36 = vld [vmem:[%s13121_s22 + $0x174] sm:$0x1]  ;;  %v9524_v63 = vrot.slane %v9510_v2, 9  ;;  %v3473_v61 = vrot.slane %v9511_v14, 5 }
 0x43e   : > { %11130 = vmatprep.subr.bf16.mxu0 %v12087_v5  ;;  %11073 = vmatpush3.bf16.msra.mxu1 %v12092_v39  ;;  %v3470_v23 = vsel %vm13911_vm1, %v9523_v0, %v3469_v45  ;;  %v9525_v59 = vrot.slane %v9512_v60, 9  ;;  %v3477_v62 = vrot.slane %v9513_v36, 5  ;;  %v9634_v21 = vld [vmem:[%s13121_s22 + $0x1b8] sm:$0xe]  ;;  %v9635_v58 = vld [vmem:[%s13121_s22 + $0x1bc] sm:$0x1] }
 0x43f   : > { %v9538_v24 = vcombine.low %v3466_v57, %v3470_v23  ;;  %v3474_v33 = vsel %vm13911_vm1, %v9524_v63, %v3473_v61  ;;  %v9636_v55 = vld [vmem:[%s13121_s22 + $0x1d0] sm:$0xe]  ;;  %v9637_v17 = vld [vmem:[%s13121_s22 + $0x1d4] sm:$0x1]  ;;  %v9650_v32 = vrot.slane %v9634_v21, 9  ;;  %v4106_v18 = vrot.slane %v9635_v58, 5  ;;  %11082 = vmatprep.subr.bf16.mxu1 %v12094_v52 }
 0x440   : > { %11123 = vmatmul.mubr.msk.bf16.vlgmr.msra.gmra.mrb[0].mxu0 %vm3540_vm14, %v9623_v54  ;;  %v3478_v8 = vsel %vm13911_vm1, %v9525_v59, %v3477_v62  ;;  %v9651_v1 = vrot.slane %v9636_v55, 9  ;;  %v4110_v56 = vrot.slane %v9637_v17, 5  ;;  %v9638_v9 = vld [vmem:[%s13121_s22 + $0x1e8] sm:$0xe]  ;;  %v9639_v46 = vld [vmem:[%s13121_s22 + $0x1ec] sm:$0x1] }
 0x441   : > { %11131 = vmatpush3.bf16.msra.mxu0 %v12087_v5  ;;  %11126 = vmatprep.mubr.msk.bf16.mxu0 %vm3540_vm14, %v9624_v42  ;;  %v9539_v7 = vcombine.low %v3474_v33, %v3478_v8  ;;  %v4107_v5 = vsel %vm13911_vm1, %v9650_v32, %v4106_v18  ;;  %v9640_v16 = vld [vmem:[%s13121_s22 + $0x200] sm:$0xe]  ;;  %v9641_v6 = vld [vmem:[%s13121_s22 + $0x204] sm:$0x1]  ;;  %v9652_v22 = vrot.slane %v9638_v9, 9  ;;  %v4114_v54 = vrot.slane %v9639_v46, 5 }
 0x442   : > { %11132 = vmatprep.subr.bf16.mxu0 %v12089_v10  ;;  %11074 = vmatprep.mubr.msk.bf16.mxu1 %vm3540_vm14, %v9538_v24  ;;  %v9653_v34 = vrot.slane %v9640_v16, 9  ;;  %v4118_v44 = vrot.slane %v9641_v6, 5  ;;  %v12095_v49 = vld [vmem:[%s13145_s0 + $0xa0] sm:$0xff]   ;;  %v12096_v15 = vld [vmem:[%s13145_s0 + $0x8] sm:$0xff]   ;;  %v9514_v40 = vld [vmem:[%s13121_s22 + $0x188] sm:$0xe] }
 0x443   : > { %11075 = vmatmul.mubr.msk.bf16.vlgmr.msra.gmra.mrb[0].mxu1 %vm3540_vm14, %v9539_v7  ;;  %v4115_v12 = vsel %vm13911_vm1, %v9652_v22, %v4114_v54  ;;  %v12097_v53 = vld [vmem:[%s13145_s0 + $0xa8] sm:$0xff]   ;;  %v9515_v20 = vld [vmem:[%s13121_s22 + $0x18c] sm:$0x1]  ;;  %v9526_v3 = vrot.slane %v9514_v40, 9  ;;  %v9518_v37 = vld [vmem:[%s13121_s22 + $0x1b8] sm:$0xe] }
 0x444   : > { %11083 = vmatpush3.bf16.msra.mxu1 %v12094_v52  ;;  %v4119_v25 = vsel %vm13911_vm1, %v9653_v34, %v4118_v44  ;;  %v9516_v35 = vld [vmem:[%s13121_s22 + $0x1a0] sm:$0xe]  ;;  %v9517_v28 = vld [vmem:[%s13121_s22 + $0x1a4] sm:$0x1]  ;;  %v3481_v11 = vrot.slane %v9515_v20, 5  ;;  %v9528_v30 = vrot.slane %v9518_v37, 9 }
 0x445   : > { %11133 = vmatpush3.bf16.msra.mxu0 %v12089_v10  ;;  %v4111_v10 = vsel %vm13911_vm1, %v9651_v1, %v4110_v56  ;;  %v9667_v4 = vcombine.low %v4115_v12, %v4119_v25  ;;  %11084 = vmatprep.subr.bf16.mxu1 %v12096_v15  ;;  %v9527_v29 = vrot.slane %v9516_v35, 9  ;;  %v3485_v42 = vrot.slane %v9517_v28, 5  ;;  %v9519_v38 = vld [vmem:[%s13121_s22 + $0x1bc] sm:$0x1]  ;;  %v9521_v41 = vld [vmem:[%s13121_s22 + $0x1d4] sm:$0x1] }
 0x446   : > { %11134 = vmatprep.subr.bf16.mxu0 %v12091_v48  ;;  %v9666_v26 = vcombine.low %v4107_v5, %v4111_v10  ;;  %v3482_v39 = vsel %vm13911_vm1, %v9526_v3, %v3481_v11  ;;  %v3489_v31 = vrot.slane %v9519_v38, 5  ;;  %v3493_v47 = vrot.slane %v9521_v41, 5  ;;  %v12098_v0 = vld [vmem:[%s13145_s0 + $0x10] sm:$0xff]   ;;  %v9642_v45 = vld [vmem:[%s13121_s22 + $0x218] sm:$0xe]  ;;  %v12100_v9 = vld [vmem:[%s13145_s0 + $0x18] sm:$0xff]  }
 0x447   : > { %v3486_v13 = vsel %vm13911_vm1, %v9527_v29, %v3485_v42  ;;  %v9643_v2 = vld [vmem:[%s13121_s22 + $0x21c] sm:$0x1]  ;;  %v9644_v57 = vld [vmem:[%s13121_s22 + $0x230] sm:$0xe]  ;;  %v9645_v60 = vld [vmem:[%s13121_s22 + $0x234] sm:$0x1] }
 0x448   : > { %11127 = vmatmul.mubr.msk.bf16.gmra.mrb[4].mxu0 %vm3540_vm14, %v9625_v51  ;;  %11085 = vmatpush3.bf16.msra.mxu1 %v12096_v15  ;;  %v9540_v51 = vcombine.low %v3482_v39, %v3486_v13  ;;  %v9654_v36 = vrot.slane %v9642_v45, 9  ;;  %v4122_v63 = vrot.slane %v9643_v2, 5  ;;  %v9655_v23 = vrot.slane %v9644_v57, 9  ;;  %v9646_v62 = vld [vmem:[%s13121_s22 + $0x248] sm:$0xe]  ;;  %v12101_v5 = vld [vmem:[%s13145_s0 + $0xb8] sm:$0xff]  }
 0x449   : > { %11135 = vmatpush3.bf16.msra.mxu0 %v12091_v48  ;;  %11138 = vmatprep.mubr.msk.bf16.mxu0 %vm3540_vm14, %v9666_v26  ;;  %v9520_v48 = vld [vmem:[%s13121_s22 + $0x1d0] sm:$0xe]  ;;  %v4126_v59 = vrot.slane %v9645_v60, 5  ;;  %v9647_v24 = vld [vmem:[%s13121_s22 + $0x24c] sm:$0x1]  ;;  %v9656_v58 = vrot.slane %v9646_v62, 9 }
 0x44a   : > { %11136 = vmatprep.subr.bf16.mxu0 %v12093_v19  ;;  %v9529_v50 = vrot.slane %v9520_v48, 9  ;;  %11078 = vmatprep.mubr.msk.bf16.mxu1 %vm3540_vm14, %v9540_v51  ;;  %v4123_v33 = vsel %vm13911_vm1, %v9654_v36, %v4122_v63  ;;  %v9648_v52 = vld [vmem:[%s13121_s22 + $0x260] sm:$0xe]  ;;  %v9649_v21 = vld [vmem:[%s13121_s22 + $0x264] sm:$0x1]  ;;  %v4130_v8 = vrot.slane %v9647_v24, 5 }
 0x44b   : > { %11086 = vmatprep.subr.bf16.mxu1 %v12098_v0  ;;  %v4127_v55 = vsel %vm13911_vm1, %v9655_v23, %v4126_v59  ;;  %v9657_v17 = vrot.slane %v9648_v52, 9  ;;  %v4134_v32 = vrot.slane %v9649_v21, 5  ;;  %v12099_v1 = vld [vmem:[%s13145_s0 + $0xb0] sm:$0xff]   ;;  %v9484_v22 = vld [vmem:[%s13121_s22 + $0x13c] sm:$0xc]  ;;  %v12102_v29 = vld [vmem:[%s13145_s0 + $0x40] sm:$0xff]  }
 0x44c   : > { %v3494_v14 = vsel %vm13911_vm1, %v9529_v50, %v3493_v47  ;;  %11087 = vmatpush3.bf16.msra.mxu1 %v12098_v0  ;;  %v9668_v18 = vcombine.low %v4123_v33, %v4127_v55  ;;  %v4131_v7 = vsel %vm13911_vm1, %v9656_v58, %v4130_v8  ;;  %v9482_v16 = vld [vmem:[%s13121_s22 + $0x124] sm:$0xc]  ;;  %v9483_v6 = vld [vmem:[%s13121_s22 + $0x128] sm:$0x3]  ;;  %v9485_v54 = vld [vmem:[%s13121_s22 + $0x140] sm:$0x3] }
 0x44d   : > { %11137 = vmatpush3.bf16.msra.mxu0 %v12093_v19  ;;  %v3490_v19 = vsel %vm13911_vm1, %v9528_v30, %v3489_v31  ;;  %v4135_v56 = vsel %vm13911_vm1, %v9657_v17, %v4134_v32  ;;  %11088 = vmatprep.subr.bf16.mxu1 %v12100_v9  ;;  %v9498_v10 = vrot.slane %v9482_v16, 10  ;;  %v3390_v34 = vrot.slane %v9483_v6, 6  ;;  %v9486_v12 = vld [vmem:[%s13121_s22 + $0x154] sm:$0xc]  ;;  %v9488_v15 = vld [vmem:[%s13121_s22 + $0x16c] sm:$0xc] }
 0x44e   : > { %11146 = vmatprep.subr.bf16.mxu0 %v12095_v49  ;;  %v9541_v61 = vcombine.low %v3490_v19, %v3494_v14  ;;  %v9669_v46 = vcombine.low %v4131_v7, %v4135_v56  ;;  %v9499_v44 = vrot.slane %v9484_v22, 10  ;;  %v3394_v26 = vrot.slane %v9485_v54, 6  ;;  %v12103_v37 = vld [vmem:[%s13121_s22 + $0x1bc] ss:$24 sps:$4 sm:$0xff]   ;;  %v12104_v39 = vld [vmem:[%s13121_s22 + $0x1ec] ss:$24 sps:$4 sm:$0xff]  }
 0x44f   : > { %v3391_v25 = vsel %vm13870_vm13, %v9498_v10, %v3390_v34  ;;  %v9501_v35 = vrot.slane %v9488_v15, 10  ;;  %v12105_v48 = vld [vmem:[%s13145_s0 + $0xc0] sm:$0xff]   ;;  %v12106_v41 = vld [vmem:[%s13145_s0 + $0x48] sm:$0xff]   ;;  %v9490_v31 = vld [vmem:[%s13121_s22 + $0x184] sm:$0xc] }
 0x450   : > { %11139 = vmatmul.mubr.msk.bf16.vlgmr.msra.gmra.mrb[0].mxu0 %vm3540_vm14, %v9667_v4  ;;  %11079 = vmatmul.mubr.msk.bf16.gmra.mrb[4].mxu1 %vm3540_vm14, %v9541_v61  ;;  %v9489_v4 = vld [vmem:[%s13121_s22 + $0x170] sm:$0x3]  ;;  %v3395_v20 = vsel %vm13870_vm13, %v9499_v44, %v3394_v26  ;;  %v12107_v30 = vld [vmem:[%s13145_s0 + $0xc8] sm:$0xff]   ;;  %v9491_v13 = vld [vmem:[%s13121_s22 + $0x188] sm:$0x3]  ;;  %v9502_v51 = vrot.slane %v9490_v31, 10 }
 0x451   : > { %11147 = vmatpush3.bf16.msra.mxu0 %v12095_v49  ;;  %11142 = vmatprep.mubr.msk.bf16.mxu0 %vm3540_vm14, %v9668_v18  ;;  %v9487_v49 = vld [vmem:[%s13121_s22 + $0x158] sm:$0x3]  ;;  %v3402_v28 = vrot.slane %v9489_v4, 6  ;;  %v9550_v3 = vcombine.low %v3391_v25, %v3395_v20  ;;  %v9492_v50 = vld [vmem:[%s13121_s22 + $0x19c] sm:$0xc]  ;;  %v3406_v19 = vrot.slane %v9491_v13, 6 }
 0x452   : > { %11148 = vmatprep.subr.bf16.mxu0 %v12097_v53  ;;  %11089 = vmatpush3.bf16.msra.mxu1 %v12100_v9  ;;  %v3398_v40 = vrot.slane %v9487_v49, 6  ;;  %v9493_v47 = vld [vmem:[%s13121_s22 + $0x1a0] sm:$0x3]  ;;  %v9503_v0 = vrot.slane %v9492_v50, 10  ;;  %v9494_v2 = vld [vmem:[%s13121_s22 + $0x1b4] sm:$0xc] }
 0x453   : > { %v3403_v42 = vsel %vm13870_vm13, %v9501_v35, %v3402_v28  ;;  %11090 = vmatprep.mubr.msk.bf16.mxu1 %vm3540_vm14, %v9550_v3  ;;  %11098 = vmatprep.subr.bf16.mxu1 %v12102_v29  ;;  %v3410_v45 = vrot.slane %v9493_v47, 6  ;;  %v9495_v14 = vld [vmem:[%s13121_s22 + $0x1b8] sm:$0x3]  ;;  %v3407_v57 = vsel %vm13870_vm13, %v9502_v51, %v3406_v19  ;;  %v9496_v60 = vld [vmem:[%s13121_s22 + $0x1cc] sm:$0xc]  ;;  %v9504_v63 = vrot.slane %v9494_v2, 10 }
 0x454   : > { %v9497_v36 = vld [vmem:[%s13121_s22 + $0x1d0] sm:$0x3]  ;;  %v3414_v61 = vrot.slane %v9495_v14, 6  ;;  %v9505_v59 = vrot.slane %v9496_v60, 10  ;;  %v12108_v52 = vld [vmem:[%s13145_s0 + $0x50] sm:$0xff]   ;;  %v12116_v35 = vld [vmem:[%s13145_s0 + $0xe0] sm:$0xff]  }
 0x455   : > { %11149 = vmatpush3.bf16.msra.mxu0 %v12097_v53  ;;  %v9500_v53 = vrot.slane %v9486_v12, 10  ;;  %v3411_v23 = vsel %vm13870_vm13, %v9503_v0, %v3410_v45  ;;  %v3418_v62 = vrot.slane %v9497_v36, 6  ;;  %v12109_v58 = vld [vmem:[%s13121_s22 + $0x21c] ss:$24 sps:$4 sm:$0xff]   ;;  %v12110_v55 = vld [vmem:[%s13121_s22 + $0x24c] ss:$24 sps:$4 sm:$0xff]  }
 0x456   : > { %11150 = vmatprep.subr.bf16.mxu0 %v12099_v1  ;;  %v9552_v24 = vcombine.low %v3407_v57, %v3411_v23  ;;  %v3415_v33 = vsel %vm13870_vm13, %v9504_v63, %v3414_v61  ;;  %v12111_v17 = vld [vmem:[%s13145_s0 + $0xd0] sm:$0xff]   ;;  %v12112_v32 = vld [vmem:[%s13145_s0 + $0x58] sm:$0xff]   ;;  %v9710_v10 = vld [vmem:[%s13121_s22 + $0x274] sm:$0xc] }
 0x457   : > { %v3399_v11 = vsel %vm13870_vm13, %v9500_v53, %v3398_v40  ;;  %v3419_v21 = vsel %vm13870_vm13, %v9505_v59, %v3418_v62  ;;  %v12113_v18 = vld [vmem:[%s13145_s0 + $0xd8] sm:$0xff]   ;;  %v9706_v56 = vld [vmem:[%s13121_s22 + $0x244] sm:$0xc]  ;;  %v9707_v9 = vld [vmem:[%s13121_s22 + $0x248] sm:$0x3]  ;;  %v9724_v49 = vrot.slane %v9710_v10, 10 }
 0x458   : > { %11143 = vmatmul.mubr.msk.bf16.gmra.mrb[4].mxu0 %vm3540_vm14, %v9669_v46  ;;  %v9551_v38 = vcombine.low %v3399_v11, %v3403_v42  ;;  %v9553_v8 = vcombine.low %v3415_v33, %v3419_v21  ;;  %v12114_v7 = vld [vmem:[%s13121_s22 + $0x12c] ss:$24 sps:$4 sm:$0xff]   ;;  %v9708_v46 = vld [vmem:[%s13121_s22 + $0x25c] sm:$0xc]  ;;  %v9722_v16 = vrot.slane %v9706_v56, 10  ;;  %v4447_v6 = vrot.slane %v9707_v9, 6 }
 0x459   : > { %11151 = vmatpush3.bf16.msra.mxu0 %v12099_v1  ;;  %11154 = vmatprep.mubr.msk.bf16.mxu0 %vm3540_vm14, %v12103_v37  ;;  %v12115_v1 = vld [vmem:[%s13121_s22 + $0x15c] ss:$24 sps:$4 sm:$0xff]   ;;  %v9723_v22 = vrot.slane %v9708_v46, 10  ;;  %v9711_v34 = vld [vmem:[%s13121_s22 + $0x278] sm:$0x3]  ;;  %v12120_v61 = vld [vmem:[%s13145_s0 + $0xf0] sm:$0xff]  }
 0x45a   : > { %11152 = vmatprep.subr.bf16.mxu0 %v12101_v5  ;;  %11091 = vmatmul.mubr.msk.bf16.vlgmr.msra.gmra.mrb[0].mxu1 %vm3540_vm14, %v9551_v38  ;;  %v4448_v44 = vsel %vm13870_vm13, %v9722_v16, %v4447_v6  ;;  %v9712_v26 = vld [vmem:[%s13121_s22 + $0x28c] sm:$0xc]  ;;  %v9713_v12 = vld [vmem:[%s13121_s22 + $0x290] sm:$0x3]  ;;  %v4455_v25 = vrot.slane %v9711_v34, 6  ;;  %v12117_v3 = vld [vmem:[%s13145_s0 + $0xe8] sm:$0xff]  }
 0x45b   : > { %11099 = vmatpush3.bf16.msra.mxu1 %v12102_v29  ;;  %11094 = vmatprep.mubr.msk.bf16.mxu1 %vm3540_vm14, %v9552_v24  ;;  %v9725_v4 = vrot.slane %v9712_v26, 10  ;;  %v4459_v53 = vrot.slane %v9713_v12, 6  ;;  %v12118_v29 = vld [vmem:[%s13121_s22 + $0x18c] ss:$24 sps:$4 sm:$0xff]   ;;  %v12119_v42 = vld [vmem:[%s13121_s22 + $0x1bc] ss:$24 sps:$4 sm:$0xff]  }
 0x45c   : > { %11100 = vmatprep.subr.bf16.mxu1 %v12106_v41  ;;  %v4456_v20 = vsel %vm13870_vm13, %v9724_v49, %v4455_v25  ;;  %v9714_v37 = vld [vmem:[%s13121_s22 + $0x2a4] sm:$0xc]  ;;  %v9715_v38 = vld [vmem:[%s13121_s22 + $0x2a8] sm:$0x3]  ;;  %v9718_v50 = vld [vmem:[%s13121_s22 + $0x2d4] sm:$0xc] }
 0x45d   : > { %11153 = vmatpush3.bf16.msra.mxu0 %v12101_v5  ;;  %v9709_v5 = vld [vmem:[%s13121_s22 + $0x260] sm:$0x3]  ;;  %v4460_v28 = vsel %vm13870_vm13, %v9725_v4, %v4459_v53  ;;  %v9719_v47 = vld [vmem:[%s13121_s22 + $0x2d8] sm:$0x3]  ;;  %v9720_v19 = vld [vmem:[%s13121_s22 + $0x2ec] sm:$0xc] }
 0x45e   : > { %11162 = vmatprep.subr.bf16.mxu0 %v12105_v48  ;;  %v4451_v54 = vrot.slane %v9709_v5, 6  ;;  %v9739_v11 = vcombine.low %v4456_v20, %v4460_v28  ;;  %v9721_v0 = vld [vmem:[%s13121_s22 + $0x2f0] sm:$0x3]  ;;  %v9728_v45 = vrot.slane %v9718_v50, 10  ;;  %v4471_v2 = vrot.slane %v9719_v47, 6  ;;  %v12123_v12 = vld [vmem:[%s13145_s0 + $0x108] sm:$0xff]  }
 0x45f   : > { %11101 = vmatpush3.bf16.msra.mxu1 %v12106_v41  ;;  %v9726_v41 = vrot.slane %v9714_v37, 10  ;;  %v9729_v57 = vrot.slane %v9720_v19, 10  ;;  %v4475_v60 = vrot.slane %v9721_v0, 6  ;;  %v12121_v59 = vld [vmem:[%s13145_s0 + $0xf8] sm:$0xff]   ;;  %v9750_v62 = vld [vmem:[%s13121_s22 + $0x248] sm:$0xe] }
 0x460   : > { %11155 = vmatmul.mubr.msk.bf16.vlgmr.msra.gmra.mrb[0].mxu0 %vm3540_vm14, %v12104_v39  ;;  %11102 = vmatprep.subr.bf16.mxu1 %v12108_v52  ;;  %v4452_v15 = vsel %vm13870_vm13, %v9723_v22, %v4451_v54  ;;  %v9716_v39 = vld [vmem:[%s13121_s22 + $0x2bc] sm:$0xc]  ;;  %v4472_v63 = vsel %vm13870_vm13, %v9728_v45, %v4471_v2  ;;  %v9751_v24 = vld [vmem:[%s13121_s22 + $0x24c] sm:$0x1]  ;;  %v9753_v21 = vld [vmem:[%s13121_s22 + $0x264] sm:$0x1] }
 0x461   : > { %11163 = vmatpush3.bf16.msra.mxu0 %v12105_v48  ;;  %11158 = vmatprep.mubr.msk.bf16.mxu0 %vm3540_vm14, %v12109_v58  ;;  %v9738_v40 = vcombine.low %v4448_v44, %v4452_v15  ;;  %v9717_v48 = vld [vmem:[%s13121_s22 + $0x2c0] sm:$0x3]  ;;  %v9727_v31 = vrot.slane %v9716_v39, 10  ;;  %v4476_v23 = vsel %vm13870_vm13, %v9729_v57, %v4475_v60  ;;  %v9766_v58 = vrot.slane %v9750_v62, 9  ;;  %v12122_v54 = vld [vmem:[%s13145_s0 + $0x100] sm:$0xff]   ;;  %v12125_v50 = vld [vmem:[%s13145_s0 + $0x118] sm:$0xff]  }
 0x462   : > { %11164 = vmatprep.subr.bf16.mxu0 %v12107_v30  ;;  %11095 = vmatmul.mubr.msk.bf16.gmra.mrb[4].mxu1 %vm3540_vm14, %v9553_v8  ;;  %v4467_v13 = vrot.slane %v9717_v48, 6  ;;  %v9741_v33 = vcombine.low %v4472_v63, %v4476_v23  ;;  %v4641_v8 = vrot.slane %v9751_v24, 5  ;;  %v9758_v34 = vld [vmem:[%s13121_s22 + $0x2a8] sm:$0xe]  ;;  %v9759_v44 = vld [vmem:[%s13121_s22 + $0x2ac] sm:$0x1] }
 0x463   : > { %11103 = vmatpush3.bf16.msra.mxu1 %v12108_v52  ;;  %11106 = vmatprep.mubr.msk.bf16.mxu1 %vm3540_vm14, %v12114_v7  ;;  %v9752_v52 = vld [vmem:[%s13121_s22 + $0x260] sm:$0xe]  ;;  %v9756_v7 = vld [vmem:[%s13121_s22 + $0x290] sm:$0xe]  ;;  %v9761_v25 = vld [vmem:[%s13121_s22 + $0x2c4] sm:$0x1] }
 0x464   : > { %11104 = vmatprep.subr.bf16.mxu1 %v12112_v32  ;;  %v4468_v14 = vsel %vm13870_vm13, %v9727_v31, %v4467_v13  ;;  %v4642_v43 = vsel %vm13911_vm1, %v9766_v58, %v4641_v8  ;;  %v9769_v5 = vrot.slane %v9756_v7, 9  ;;  %v9760_v49 = vld [vmem:[%s13121_s22 + $0x2c0] sm:$0xe]  ;;  %v9770_v15 = vrot.slane %v9758_v34, 9  ;;  %v9762_v20 = vld [vmem:[%s13121_s22 + $0x2d8] sm:$0xe] }
 0x465   : > { %11165 = vmatpush3.bf16.msra.mxu0 %v12107_v30  ;;  %v4463_v30 = vrot.slane %v9715_v38, 6  ;;  %v4657_v4 = vrot.slane %v9759_v44, 5  ;;  %v9771_v53 = vrot.slane %v9760_v49, 9  ;;  %v12124_v31 = vld [vmem:[%s13145_s0 + $0x110] sm:$0xff]   ;;  %v12127_v27 = vld [vmem:[%s13121_s22 + $0x27c] ss:$24 sps:$4 sm:$0xff]  }
 0x466   : > { %11166 = vmatprep.subr.bf16.mxu0 %v12111_v17  ;;  %v12126_v47 = vld [vmem:[%s13121_s22 + $0x24c] ss:$24 sps:$4 sm:$0xff]   ;;  %v12129_v19 = vld [vmem:[%s13121_s22 + $0x2dc] ss:$24 sps:$4 sm:$0xff]   ;;  %v9822_v8 = vld [vmem:[%s13151_s23] ss:$0 sm:$0xff] }
 0x467   : > { %11105 = vmatpush3.bf16.msra.mxu1 %v12112_v32  ;;  %v4464_v51 = vsel %vm13870_vm13, %v9726_v41, %v4463_v30  ;;  %v9754_v32 = vld [vmem:[%s13121_s22 + $0x278] sm:$0xe]  ;;  %v4658_v28 = vsel %vm13911_vm1, %v9770_v15, %v4657_v4  ;;  %v12131_v45 = vld [vmem:[%s13157_s1 + $0x8] sm:$0xff]   ;;  %v12132_v2 = vld [vmem:[%s13157_s1 + $0x10] sm:$0xff]  }
 0x468   : > { %11159 = vmatmul.mubr.msk.bf16.gmra.mrb[4].mxu0 %vm3540_vm14, %v12110_v55  ;;  %v9740_v36 = vcombine.low %v4464_v51, %v4468_v14  ;;  %v9767_v55 = vrot.slane %v9752_v52, 9  ;;  %v9768_v56 = vrot.slane %v9754_v32, 9  ;;  %v12128_v51 = vld [vmem:[%s13121_s22 + $0x2ac] ss:$24 sps:$4 sm:$0xff]   ;;  %v12130_v0 = vld [vmem:[%s13157_s1] sm:$0xff]   ;;  %v12133_v14 = vld [vmem:[%s13157_s1 + $0x18] sm:$0xff]  }
 0x469   : > { %11167 = vmatpush3.bf16.msra.mxu0 %v12111_v17  ;;  %11170 = vmatprep.mubr.msk.bf16.mxu0 %vm3540_vm14, %v9738_v40  ;;  %v4645_v17 = vrot.slane %v9753_v21, 5  ;;  %v4661_v40 = vrot.slane %v9761_v25, 5  ;;  %v12134_v57 = vld [vmem:[%s13157_s1 + $0x20] sm:$0xff]   ;;  %v12135_v60 = vld [vmem:[%s13157_s1 + $0x28] sm:$0xff]   ;;  %v12137_v63 = vld [vmem:[%s13157_s1 + $0x38] sm:$0xff]  }
 0x46a   : > { %11168 = vmatprep.subr.bf16.mxu0 %v12113_v18  ;;  %11107 = vmatmul.mubr.msk.bf16.vlgmr.msra.gmra.mrb[0].mxu1 %vm3540_vm14, %v12115_v1  ;;  %v9757_v1 = vld [vmem:[%s13121_s22 + $0x294] sm:$0x1] }
 0x46b   : > { %11110 = vmatprep.mubr.msk.bf16.mxu1 %vm3540_vm14, %v12118_v29  ;;  %v4646_v46 = vsel %vm13911_vm1, %v9767_v55, %v4645_v17  ;;  %v4653_v16 = vrot.slane %v9757_v1, 5  ;;  %v9772_v29 = vrot.slane %v9762_v20, 9  ;;  %v4662_v37 = vsel %vm13911_vm1, %v9771_v53, %v4661_v40  ;;  %11210 = vmatprep.subr.bf16.mxu1 %v12130_v0 }
 0x46c   : > { %v9782_v6 = vcombine.low %v4642_v43, %v4646_v46  ;;  %v9784_v48 = vcombine.low %v4658_v28, %v4662_v37  ;;  %11211 = vmatpush3.bf16.msra.mxu1 %v12130_v0 }
 0x46d   : > { %11169 = vmatpush3.bf16.msra.mxu0 %v12113_v18  ;;  %v9755_v18 = vld [vmem:[%s13121_s22 + $0x27c] sm:$0x1]  ;;  %v4654_v10 = vsel %vm13911_vm1, %v9769_v5, %v4653_v16  ;;  %11212 = vmatprep.subr.bf16.mxu1 %v12131_v45 }
 0x46e   : > { %11178 = vmatprep.subr.bf16.mxu0 %v12116_v35  ;;  %v4649_v9 = vrot.slane %v9755_v18, 5 }
 0x470   : > { %11171 = vmatmul.mubr.msk.bf16.vlgmr.msra.gmra.mrb[0].mxu0 %vm3540_vm14, %v9739_v11  ;;  %v4650_v22 = vsel %vm13911_vm1, %v9768_v56, %v4649_v9  ;;  %v9765_v11 = vld [vmem:[%s13121_s22 + $0x2f4] sm:$0x1]  ;;  %11213 = vmatpush3.bf16.msra.mxu1 %v12131_v45 }
 0x471   : > { %11179 = vmatpush3.bf16.msra.mxu0 %v12116_v35  ;;  %11174 = vmatprep.mubr.msk.bf16.mxu0 %vm3540_vm14, %v9740_v36  ;;  %v9783_v26 = vcombine.low %v4650_v22, %v4654_v10  ;;  %v9763_v35 = vld [vmem:[%s13121_s22 + $0x2dc] sm:$0x1]  ;;  %v4669_v39 = vrot.slane %v9765_v11, 5  ;;  %v12136_v36 = vld [vmem:[%s13157_s1 + $0x30] sm:$0xff]   ;;  %v4980_v45 = vld [vmem:[#allocation2 + $0x30] sm:$0xff] }
 0x472   : > { %11180 = vmatprep.subr.bf16.mxu0 %v12117_v3  ;;  %11111 = vmatmul.mubr.msk.bf16.gmra.mrb[4].mxu1 %vm3540_vm14, %v12119_v42  ;;  %v4665_v42 = vrot.slane %v9763_v35, 5 }
 0x473   : > { %11214 = vmatprep.subr.bf16.mxu1 %v12132_v2 }
 0x474   : > { %v4666_v41 = vsel %vm13911_vm1, %v9772_v29, %v4665_v42  ;;  %11215 = vmatpush3.bf16.msra.mxu1 %v12132_v2  ;;  %v4978_v2 = vld [vmem:[#allocation2 + $0x20] sm:$0xff] }
 0x475   : > { %11181 = vmatpush3.bf16.msra.mxu0 %v12117_v3  ;;  %v9764_v3 = vld [vmem:[%s13121_s22 + $0x2f0] sm:$0xe]  ;;  %11216 = vmatprep.subr.bf16.mxu1 %v12133_v14 }
 0x476   : > { %11182 = vmatprep.subr.bf16.mxu0 %v12120_v61  ;;  %v9773_v38 = vrot.slane %v9764_v3, 9 }
 0x478   : > { %11175 = vmatmul.mubr.msk.bf16.gmra.mrb[4].mxu0 %vm3540_vm14, %v9741_v33  ;;  %v4670_v30 = vsel %vm13911_vm1, %v9773_v38, %v4669_v39  ;;  %11217 = vmatpush3.bf16.msra.mxu1 %v12133_v14  ;;  %v4976_v39 = vld [vmem:[#allocation2 + $0x10] sm:$0xff] }
 0x479   : > { %11183 = vmatpush3.bf16.msra.mxu0 %v12120_v61  ;;  %11186 = vmatprep.mubr.msk.bf16.mxu0 %vm3540_vm14, %v9782_v6  ;;  %v9785_v13 = vcombine.low %v4666_v41, %v4670_v30  ;;  %v4977_v30 = vld [vmem:[#allocation2 + $0x18] sm:$0xff] }
 0x47a   : > { %11184 = vmatprep.subr.bf16.mxu0 %v12121_v59  ;;  %11218 = vmatprep.subr.bf16.mxu1 %v12134_v57 }
 0x47c   : > { %11219 = vmatpush3.bf16.msra.mxu1 %v12134_v57  ;;  %v4981_v57 = vld [vmem:[#allocation2 + $0x38] sm:$0xff] }
 0x47d   : > { %11185 = vmatpush3.bf16.msra.mxu0 %v12121_v59  ;;  %11220 = vmatprep.subr.bf16.mxu1 %v12135_v60 }
 0x47e   : > { %11194 = vmatprep.subr.bf16.mxu0 %v12122_v54 }
 0x480   : > { %11187 = vmatmul.mubr.msk.bf16.vlgmr.msra.gmra.mrb[0].mxu0 %vm3540_vm14, %v9783_v26  ;;  %11221 = vmatpush3.bf16.msra.mxu1 %v12135_v60 }
 0x481   : > { %11195 = vmatpush3.bf16.msra.mxu0 %v12122_v54  ;;  %11190 = vmatprep.mubr.msk.bf16.mxu0 %vm3540_vm14, %v9784_v48  ;;  %v4974_v48 = vld [vmem:[#allocation2] sm:$0xff] }
 0x482   : > { %11196 = vmatprep.subr.bf16.mxu0 %v12123_v12  ;;  %11222 = vmatprep.subr.bf16.mxu1 %v12136_v36 }
 0x484   : > { %11223 = vmatpush3.bf16.msra.mxu1 %v12136_v36 }
 0x485   : > { %11197 = vmatpush3.bf16.msra.mxu0 %v12123_v12  ;;  %11224 = vmatprep.subr.bf16.mxu1 %v12137_v63 }
 0x486   : > { %11198 = vmatprep.subr.bf16.mxu0 %v12124_v31 }
 0x488   : > { %11191 = vmatmul.mubr.msk.bf16.gmra.mrb[4].mxu0 %vm3540_vm14, %v9785_v13  ;;  %11225 = vmatpush3.bf16.msra.mxu1 %v12137_v63  ;;  %v4979_v63 = vld [vmem:[#allocation2 + $0x28] sm:$0xff] }
 0x489   : > { %11199 = vmatpush3.bf16.msra.mxu0 %v12124_v31  ;;  %11202 = vmatprep.mubr.msk.bf16.mxu0 %vm3540_vm14, %v12126_v47 }
 0x48a   : > { %11200 = vmatprep.subr.bf16.mxu0 %v12125_v50 }
 0x48d   : > { %11201 = vmatpush3.bf16.msra.mxu0 %v12125_v50  ;;  %v4975_v50 = vld [vmem:[#allocation2 + $0x8] sm:$0xff] }
 0x490   : > { %11203 = vmatmul.mubr.msk.bf16.vlgmr.msra.gmra.mrb[0].mxu0 %vm3540_vm14, %v12127_v27 }
 0x491   : > { %11206 = vmatprep.mubr.msk.bf16.mxu0 %vm3540_vm14, %v12128_v51 }
 0x498   : > { %11207 = vmatmul.mubr.msk.bf16.gmra.mrb[4].mxu0 %vm3540_vm14, %v12129_v19 }
 0x53d   : > { %v11108_v61 = vpop.f32.mrb[0].mxu1 }
 0x53e   : > { %v3838_v23 = vpop.f32.mrb[1].mxu1 }
 0x53f   : > { %v11109_v59 = vpop.f32.mrb[2].mxu1 }
 0x540   : > { %v3841_v62 = vpop.f32.mrb[3].mxu1 }
 0x545   : > { %v11112_v24 = vpop.f32.mrb[4].mxu1 }
 0x546   : > { %v3854_v33 = vpop.f32.mrb[5].mxu1 }
 0x547   : > { %v11113_v52 = vpop.f32.mrb[6].mxu1 }
 0x548   : > { %v3857_v21 = vpop.f32.mrb[7].mxu1 }
 0x563   : > { %v11204_v58 = vpop.f32.mrb[0].mxu0 }
 0x564   : > { %v11634_v55 = vadd.f32 %v11204_v58, %v11108_v61  ;;  %v4908_v17 = vpop.f32.mrb[1].mxu0 }
 0x565   : > { %v11635_v32 = vadd.f32 %v4908_v17, %v3838_v23  ;;  %v11205_v18 = vpop.f32.mrb[2].mxu0 }
 0x566   : > { %v4956_v43 = vadd.f32 %v11634_v55, %v9822_v8  ;;  %v11636_v7 = vadd.f32 %v11205_v18, %v11109_v59  ;;  %v4911_v1 = vpop.f32.mrb[3].mxu0 }
 0x567   : > { %v4954_v56 = vadd.f32 %v11635_v32, %v9822_v8  ;;  %v11637_v9 = vadd.f32 %v4911_v1, %v3841_v62 }
 0x568   : > { %v4957_v46 = vadd.f32 %v11636_v7, %v9822_v8  ;;  %v4964_v16 = vmax.f32 %v4956_v43, 0.0 }
 0x569   : > { %v4955_v5 = vadd.f32 %v11637_v9, %v9822_v8  ;;  %v4962_v22 = vmax.f32 %v4954_v56, 0.0 }
 0x56a   : > { %v4965_v6 = vmax.f32 %v4957_v46, 0.0 }
 0x56b   : > { %v4963_v54 = vmax.f32 %v4955_v5, 0.0  ;;  %v11208_v10 = vpop.f32.mrb[4].mxu0 }
 0x56c   : > { %v4971_v34 = vpack.c.bf16 %v4965_v6, %v4964_v16  ;;  %v11638_v44 = vadd.f32 %v11208_v10, %v11112_v24  ;;  %v4924_v26 = vpop.f32.mrb[5].mxu0 }
 0x56d   : > { %v11639_v12 = vadd.f32 %v4924_v26, %v3854_v33  ;;  %v11209_v49 = vpop.f32.mrb[6].mxu0  ;;  %v4970_v25 = vpack.c.bf16 %v4963_v54, %v4962_v22 }
 0x56e   : > { %v4960_v15 = vadd.f32 %v11638_v44, %v9822_v8  ;;  %v11640_v4 = vadd.f32 %v11209_v49, %v11113_v52  ;;  %v4927_v53 = vpop.f32.mrb[7].mxu0 }
 0x56f   : > { %v4958_v40 = vadd.f32 %v11639_v12, %v9822_v8  ;;  %v11641_v20 = vadd.f32 %v4927_v53, %v3857_v21  ;;  %11226 = vmatprep.mubr.bf16.mxu1 %v4970_v25 }
 0x570   : > { %v4961_v35 = vadd.f32 %v11640_v4, %v9822_v8  ;;  %11227 = vmatmul.mubr.bf16.vlgmr.msra.gmra.mrb[8].mxu1 %v4971_v34  ;;  %v4968_v3 = vmax.f32 %v4960_v15, 0.0 }
 0x571   : > { %v4959_v28 = vadd.f32 %v11641_v20, %v9822_v8  ;;  %v4966_v29 = vmax.f32 %v4958_v40, 0.0 }
 0x572   : > { %v4969_v11 = vmax.f32 %v4961_v35, 0.0 }
 0x573   : > { %v4967_v42 = vmax.f32 %v4959_v28, 0.0 }
 0x574   : > { %v4973_v37 = vpack.c.bf16 %v4969_v11, %v4968_v3 }
 0x575   : > { %v4972_v38 = vpack.c.bf16 %v4967_v42, %v4966_v29 }
 0x577   : > { %11230 = vmatprep.mubr.bf16.mxu1 %v4972_v38 }
 0x578   : > { %11231 = vmatmul.mubr.bf16.gmra.mrb[12].mxu1 %v4973_v37 }
 0x643   : > { %v11228_v41 = vpop.f32.mrb[8].mxu1 }
 0x644   : > { %v5113_v31 = vadd.f32 %v11228_v41, %v4976_v39  ;;  %v5080_v13 = vpop.f32.mrb[9].mxu1 }
 0x645   : > { %v5111_v47 = vadd.f32 %v5080_v13, %v4974_v48  ;;  %v11229_v27 = vpop.f32.mrb[10].mxu1 }
 0x646   : > { %5122 = vst.msk [vmem:[#allocation2 + $0x10] sm:$0xff] %vm5119_vm2, %v5113_v31  ;;  %v5114_v51 = vadd.f32 %v11229_v27, %v4977_v30  ;;  %v5083_v19 = vpop.f32.mrb[11].mxu1 }
 0x647   : > { %5120 = vst.msk [vmem:[#allocation2] sm:$0xff] %vm5119_vm2, %v5111_v47  ;;  %v5112_v0 = vadd.f32 %v5083_v19, %v4975_v50 }
 0x648   : > { %5123 = vst.msk [vmem:[#allocation2 + $0x18] sm:$0xff] %vm5119_vm2, %v5114_v51 }
 0x649   : > { %5121 = vst.msk [vmem:[#allocation2 + $0x8] sm:$0xff] %vm5119_vm2, %v5112_v0 }
 0x64b   : > { %v11232_v14 = vpop.f32.mrb[12].mxu1 }
 0x64c   : > { %v5117_v60 = vadd.f32 %v11232_v14, %v4980_v45  ;;  %v5096_v36 = vpop.f32.mrb[13].mxu1 }
 0x64d   : > { %v5115_v61 = vadd.f32 %v5096_v36, %v4978_v2  ;;  %v11233_v23 = vpop.f32.mrb[14].mxu1 }
 0x64e   : > { %5126 = vst.msk [vmem:[#allocation2 + $0x30] sm:$0xff] %vm5119_vm2, %v5117_v60  ;;  %v5118_v59 = vadd.f32 %v11233_v23, %v4981_v57  ;;  %v5099_v62 = vpop.f32.mrb[15].mxu1 }
 0x64f   : > { %5124 = vst.msk [vmem:[#allocation2 + $0x20] sm:$0xff] %vm5119_vm2, %v5115_v61  ;;  %v5116_v24 = vadd.f32 %v5099_v62, %v4979_v63 }
 0x650   : > { %5127 = vst.msk [vmem:[#allocation2 + $0x38] sm:$0xff] %vm5119_vm2, %v5118_v59 }
 0x651   : > { %5125 = vst.msk [vmem:[#allocation2 + $0x28] sm:$0xff] %vm5119_vm2, %v5116_v24 }
 0x652 PF: > { %s15073_s28 = sld [smem:[#allocation30_spill]] }
 0x658   : > { %p9831_p10 = scmp.ne.s32.totalorder %s15073_s28, 2 }
 0x659   : > { %v12138_v33 = vld [vmem:[%s13145_s0 + $0x60] sm:$0xff] (!%p9831_p10)   ;;  %v12139_v52 = vld [vmem:[%s13145_s0 + $0x68] sm:$0xff] (!%p9831_p10)   ;;  %vm5165_vm3 = vcmask (!%p9831_p10), 1040384   ;;  %vm5166_vm4 = vcmask (!%p9831_p10), 1044484   ;;  %v12140_v21 = vld [vmem:[%s13145_s0 + $0x70] sm:$0xff] (!%p9831_p10)   ;;  %vm5320_vm6 = vcmask (!%p9831_p10), 523264  }
 0x65a   : > { %5131 = sbr.rel (%p9831_p10) target bundleno = 2172 (0x87c), region = 104  ;;  %11282 = vmatprep.subr.bf16.mxu0 (!%p9831_p10), %v12138_v33  ;;  %v12142_v58 = vld [vmem:[%s13145_s0 + $0x20] sm:$0xff] (!%p9831_p10)   ;;  %vm14174_vm5 = vmor (!%p9831_p10), %vm5165_vm3, %vm5166_vm4  ;;  %v9956_v55 = vld [vmem:[%s13121_s22 + $0x1b0] sm:$0x8] (!%p9831_p10)  ;;  %vm5240_vm7 = vcmask (!%p9831_p10), 1042432   ;;  %vm5241_vm8 = vcmask (!%p9831_p10), 1046532  }
 0x65b   : > { %11283 = vmatpush3.bf16.msra.mxu0 (!%p9831_p10), %v12138_v33  ;;  %v9957_v17 = vld [vmem:[%s13121_s22 + $0x1b4] sm:$0x7] (!%p9831_p10)  ;;  %11234 = vmatprep.subr.bf16.mxu1 (!%p9831_p10), %v12142_v58  ;;  %v9958_v18 = vld [vmem:[%s13121_s22 + $0x1c8] sm:$0x8] (!%p9831_p10)  ;;  %v9959_v43 = vld [vmem:[%s13121_s22 + $0x1cc] sm:$0x7] (!%p9831_p10) }
 0x65c   : > { %11284 = vmatprep.subr.bf16.mxu0 (!%p9831_p10), %v12139_v52  ;;  %v12141_v32 = vld [vmem:[%s13145_s0 + $0x78] sm:$0xff] (!%p9831_p10)   ;;  %v9972_v7 = vrot.slane (!%p9831_p10), %v9956_v55, 11  ;;  %v5740_v1 = vrot.slane (!%p9831_p10), %v9957_v17, 7  ;;  %11235 = vmatpush3.bf16.msra.mxu1 (!%p9831_p10), %v12142_v58  ;;  %v9973_v56 = vrot.slane (!%p9831_p10), %v9958_v18, 11  ;;  %v5744_v9 = vrot.slane (!%p9831_p10), %v9959_v43, 7  ;;  %v12144_v15 = vld [vmem:[%s13145_s0 + $0x28] sm:$0xff] (!%p9831_p10)   ;;  %vm14215_vm9 = vmor (!%p9831_p10), %vm5240_vm7, %vm5241_vm8 }
 0x65d   : > { %v9960_v46 = vld [vmem:[%s13121_s22 + $0x1e0] sm:$0x8] (!%p9831_p10)  ;;  %v9961_v5 = vld [vmem:[%s13121_s22 + $0x1e4] sm:$0x7] (!%p9831_p10)  ;;  %v9962_v6 = vld [vmem:[%s13121_s22 + $0x1f8] sm:$0x8] (!%p9831_p10)  ;;  %11236 = vmatprep.subr.bf16.mxu1 (!%p9831_p10), %v12144_v15 }
 0x65e   : > { %v5741_v16 = vsel (!%p9831_p10), %vm14174_vm5, %v9972_v7, %v5740_v1  ;;  %v9963_v22 = vld [vmem:[%s13121_s22 + $0x1fc] sm:$0x7] (!%p9831_p10)  ;;  %v9974_v54 = vrot.slane (!%p9831_p10), %v9960_v46, 11  ;;  %v5748_v10 = vrot.slane (!%p9831_p10), %v9961_v5, 7  ;;  %v5745_v34 = vsel (!%p9831_p10), %vm14174_vm5, %v9973_v56, %v5744_v9  ;;  %v12146_v53 = vld [vmem:[%s13145_s0 + $0x30] sm:$0xff] (!%p9831_p10)   ;;  %v12148_v14 = vld [vmem:[%s13145_s0 + $0x38] sm:$0xff] (!%p9831_p10)  }
 0x65f   : > { %11285 = vmatpush3.bf16.msra.mxu0 (!%p9831_p10), %v12139_v52  ;;  %v9975_v44 = vrot.slane (!%p9831_p10), %v9962_v6, 11  ;;  %v5752_v26 = vrot.slane (!%p9831_p10), %v9963_v22, 7  ;;  %v9988_v12 = vcombine.low (!%p9831_p10), %v5741_v16, %v5745_v34  ;;  %v12143_v4 = vld [vmem:[%s13145_s0 + $0x80] sm:$0xff] (!%p9831_p10)   ;;  %v9964_v40 = vld [vmem:[%s13121_s22 + $0x210] sm:$0x8] (!%p9831_p10)  ;;  %v12145_v28 = vld [vmem:[%s13145_s0 + $0x88] sm:$0xff] (!%p9831_p10)  }
 0x660   : > { %11286 = vmatprep.subr.bf16.mxu0 (!%p9831_p10), %v12140_v21  ;;  %v5749_v49 = vsel (!%p9831_p10), %vm14174_vm5, %v9974_v54, %v5748_v10  ;;  %v9965_v20 = vld [vmem:[%s13121_s22 + $0x214] sm:$0x7] (!%p9831_p10)  ;;  %11237 = vmatpush3.bf16.msra.mxu1 (!%p9831_p10), %v12144_v15  ;;  %v9966_v3 = vld [vmem:[%s13121_s22 + $0x228] sm:$0x8] (!%p9831_p10)  ;;  %v9967_v11 = vld [vmem:[%s13121_s22 + $0x22c] sm:$0x7] (!%p9831_p10) }
 0x661   : > { %v5753_v25 = vsel %vm14174_vm5, %v9975_v44, %v5752_v26  ;;  %11290 = vmatprep.mubr.msk.bf16.mxu0 %vm5320_vm6, %v9988_v12  ;;  %v9976_v29 = vrot.slane %v9964_v40, 11  ;;  %v5756_v42 = vrot.slane %v9965_v20, 7  ;;  %11238 = vmatprep.subr.bf16.mxu1 %v12146_v53  ;;  %v9977_v37 = vrot.slane %v9966_v3, 11  ;;  %v9968_v39 = vld [vmem:[%s13121_s22 + $0x240] sm:$0x8]  ;;  %v12147_v57 = vld [vmem:[%s13145_s0 + $0x90] sm:$0xff]  }
 0x662   : > { %v9989_v35 = vcombine.low %v5749_v49, %v5753_v25  ;;  %v5760_v38 = vrot.slane %v9967_v11, 7  ;;  %v9969_v48 = vld [vmem:[%s13121_s22 + $0x244] sm:$0x7]  ;;  %v9970_v30 = vld [vmem:[%s13121_s22 + $0x258] sm:$0x8]  ;;  %v9978_v13 = vrot.slane %v9968_v39, 11 }
 0x663   : > { %11287 = vmatpush3.bf16.msra.mxu0 %v12140_v21  ;;  %v5757_v41 = vsel %vm14174_vm5, %v9976_v29, %v5756_v42  ;;  %v9971_v31 = vld [vmem:[%s13121_s22 + $0x25c] sm:$0x7]  ;;  %v5764_v50 = vrot.slane %v9969_v48, 7  ;;  %v9979_v27 = vrot.slane %v9970_v30, 11  ;;  %v9856_v60 = vld [vmem:[%s13121_s22 + $0x98] sm:$0xe] }
 0x664   : > { %11288 = vmatprep.subr.bf16.mxu0 %v12141_v32  ;;  %v5761_v47 = vsel %vm14174_vm5, %v9977_v37, %v5760_v38  ;;  %v5768_v51 = vrot.slane %v9971_v31, 7  ;;  %11239 = vmatpush3.bf16.msra.mxu1 %v12146_v53  ;;  %v9857_v36 = vld [vmem:[%s13121_s22 + $0x9c] sm:$0x1]  ;;  %v9858_v63 = vld [vmem:[%s13121_s22 + $0xb0] sm:$0xe]  ;;  %v9872_v23 = vrot.slane %v9856_v60, 9 }
 0x665   : > { %v9990_v19 = vcombine.low %v5757_v41, %v5761_v47  ;;  %v5765_v45 = vsel %vm14174_vm5, %v9978_v13, %v5764_v50  ;;  %11240 = vmatprep.subr.bf16.mxu1 %v12148_v14  ;;  %v9859_v61 = vld [vmem:[%s13121_s22 + $0xb4] sm:$0x1]  ;;  %v5245_v59 = vrot.slane %v9857_v36, 5  ;;  %v9873_v33 = vrot.slane %v9858_v63, 9  ;;  %v9860_v21 = vld [vmem:[%s13121_s22 + $0xc8] sm:$0xe] }
 0x666   : > { %v5769_v2 = vsel %vm14174_vm5, %v9979_v27, %v5768_v51  ;;  %v12149_v24 = vld [vmem:[%s13145_s0 + $0x98] sm:$0xff]   ;;  %v5249_v52 = vrot.slane %v9859_v61, 5  ;;  %v9861_v58 = vld [vmem:[%s13121_s22 + $0xcc] sm:$0x1]  ;;  %v9862_v17 = vld [vmem:[%s13121_s22 + $0xe0] sm:$0xe] }
 0x667   : > { %11289 = vmatpush3.bf16.msra.mxu0 %v12141_v32  ;;  %v9991_v62 = vcombine.low %v5765_v45, %v5769_v2  ;;  %v5246_v55 = vsel %vm14215_vm9, %v9872_v23, %v5245_v59  ;;  %v9863_v32 = vld [vmem:[%s13121_s22 + $0xe4] sm:$0x1]  ;;  %v9874_v18 = vrot.slane %v9860_v21, 9  ;;  %v5253_v43 = vrot.slane %v9861_v58, 5  ;;  %v12150_v5 = vld [vmem:[%s13145_s0] sm:$0xff]  }
 0x668   : > { %11298 = vmatprep.subr.bf16.mxu0 %v12143_v4  ;;  %11241 = vmatpush3.bf16.msra.mxu1 %v12148_v14  ;;  %v5250_v7 = vsel %vm14215_vm9, %v9873_v33, %v5249_v52  ;;  %v9875_v1 = vrot.slane %v9862_v17, 9  ;;  %v5257_v56 = vrot.slane %v9863_v32, 5  ;;  %v10000_v16 = vld [vmem:[%s13121_s22 + $0x1b8] sm:$0xe]  ;;  %v10001_v6 = vld [vmem:[%s13121_s22 + $0x1bc] sm:$0x1] }
 0x669   : > { %v9888_v9 = vcombine.low %v5246_v55, %v5250_v7  ;;  %v5254_v46 = vsel %vm14215_vm9, %v9874_v18, %v5253_v43  ;;  %v10002_v54 = vld [vmem:[%s13121_s22 + $0x1d0] sm:$0xe]  ;;  %v10003_v10 = vld [vmem:[%s13121_s22 + $0x1d4] sm:$0x1]  ;;  %v10016_v34 = vrot.slane %v10000_v16, 9  ;;  %v5934_v44 = vrot.slane %v10001_v6, 5  ;;  %11250 = vmatprep.subr.bf16.mxu1 %v12150_v5 }
 0x66a   : > { %11291 = vmatmul.mubr.msk.bf16.vlgmr.msra.gmra.mrb[0].mxu0 %vm5320_vm6, %v9989_v35  ;;  %v5258_v22 = vsel %vm14215_vm9, %v9875_v1, %v5257_v56  ;;  %v10017_v12 = vrot.slane %v10002_v54, 9  ;;  %v5938_v49 = vrot.slane %v10003_v10, 5  ;;  %v10004_v25 = vld [vmem:[%s13121_s22 + $0x1e8] sm:$0xe]  ;;  %v10005_v15 = vld [vmem:[%s13121_s22 + $0x1ec] sm:$0x1] }
 0x66b   : > { %11299 = vmatpush3.bf16.msra.mxu0 %v12143_v4  ;;  %11294 = vmatprep.mubr.msk.bf16.mxu0 %vm5320_vm6, %v9990_v19  ;;  %v9889_v26 = vcombine.low %v5254_v46, %v5258_v22  ;;  %v5935_v4 = vsel %vm14215_vm9, %v10016_v34, %v5934_v44  ;;  %v10006_v53 = vld [vmem:[%s13121_s22 + $0x200] sm:$0xe]  ;;  %v10007_v40 = vld [vmem:[%s13121_s22 + $0x204] sm:$0x1]  ;;  %v10018_v20 = vrot.slane %v10004_v25, 9  ;;  %v5942_v35 = vrot.slane %v10005_v15, 5 }
 0x66c   : > { %11300 = vmatprep.subr.bf16.mxu0 %v12145_v28  ;;  %11242 = vmatprep.mubr.msk.bf16.mxu1 %vm5320_vm6, %v9888_v9  ;;  %v10019_v3 = vrot.slane %v10006_v53, 9  ;;  %v5946_v11 = vrot.slane %v10007_v40, 5  ;;  %v12151_v37 = vld [vmem:[%s13145_s0 + $0xa0] sm:$0xff]   ;;  %v12152_v39 = vld [vmem:[%s13145_s0 + $0x8] sm:$0xff]   ;;  %v9866_v13 = vld [vmem:[%s13121_s22 + $0x110] sm:$0xe] }
 0x66d   : > { %11243 = vmatmul.mubr.msk.bf16.vlgmr.msra.gmra.mrb[0].mxu1 %vm5320_vm6, %v9889_v26  ;;  %v5943_v42 = vsel %vm14215_vm9, %v10018_v20, %v5942_v35  ;;  %v12153_v41 = vld [vmem:[%s13145_s0 + $0xa8] sm:$0xff]   ;;  %v9864_v30 = vld [vmem:[%s13121_s22 + $0xf8] sm:$0xe]  ;;  %v9865_v31 = vld [vmem:[%s13121_s22 + $0xfc] sm:$0x1]  ;;  %v9877_v51 = vrot.slane %v9866_v13, 9 }
 0x66e   : > { %11251 = vmatpush3.bf16.msra.mxu1 %v12150_v5  ;;  %v5947_v38 = vsel %vm14215_vm9, %v10019_v3, %v5946_v11  ;;  %v9867_v50 = vld [vmem:[%s13121_s22 + $0x114] sm:$0x1]  ;;  %v9876_v47 = vrot.slane %v9864_v30, 9  ;;  %v5261_v27 = vrot.slane %v9865_v31, 5  ;;  %v9868_v45 = vld [vmem:[%s13121_s22 + $0x128] sm:$0xe] }
 0x66f   : > { %11301 = vmatpush3.bf16.msra.mxu0 %v12145_v28  ;;  %v5939_v28 = vsel %vm14215_vm9, %v10017_v12, %v5938_v49  ;;  %v10033_v48 = vcombine.low %v5943_v42, %v5947_v38  ;;  %11252 = vmatprep.subr.bf16.mxu1 %v12152_v39  ;;  %v5265_v19 = vrot.slane %v9867_v50, 5  ;;  %v9869_v2 = vld [vmem:[%s13121_s22 + $0x12c] sm:$0x1]  ;;  %v9871_v60 = vld [vmem:[%s13121_s22 + $0x144] sm:$0x1]  ;;  %v9878_v36 = vrot.slane %v9868_v45, 9 }
 0x670   : > { %11302 = vmatprep.subr.bf16.mxu0 %v12147_v57  ;;  %v10032_v29 = vcombine.low %v5935_v4, %v5939_v28  ;;  %v5262_v14 = vsel %vm14215_vm9, %v9876_v47, %v5261_v27  ;;  %v5269_v63 = vrot.slane %v9869_v2, 5  ;;  %v5273_v59 = vrot.slane %v9871_v60, 5  ;;  %v12154_v33 = vld [vmem:[%s13145_s0 + $0x10] sm:$0xff]   ;;  %v10008_v52 = vld [vmem:[%s13121_s22 + $0x218] sm:$0xe]  ;;  %v12156_v25 = vld [vmem:[%s13145_s0 + $0x18] sm:$0xff]  }
 0x671   : > { %v5266_v61 = vsel %vm14215_vm9, %v9877_v51, %v5265_v19  ;;  %v10009_v21 = vld [vmem:[%s13121_s22 + $0x21c] sm:$0x1]  ;;  %v10010_v55 = vld [vmem:[%s13121_s22 + $0x230] sm:$0xe]  ;;  %v10011_v17 = vld [vmem:[%s13121_s22 + $0x234] sm:$0x1] }
 0x672   : > { %11295 = vmatmul.mubr.msk.bf16.gmra.mrb[4].mxu0 %vm5320_vm6, %v9991_v62  ;;  %11253 = vmatpush3.bf16.msra.mxu1 %v12152_v39  ;;  %v9890_v62 = vcombine.low %v5262_v14, %v5266_v61  ;;  %v10020_v32 = vrot.slane %v10008_v52, 9  ;;  %v5950_v18 = vrot.slane %v10009_v21, 5  ;;  %v10021_v7 = vrot.slane %v10010_v55, 9  ;;  %v10012_v56 = vld [vmem:[%s13121_s22 + $0x248] sm:$0xe]  ;;  %v12157_v4 = vld [vmem:[%s13145_s0 + $0xb8] sm:$0xff]  }
 0x673   : > { %11303 = vmatpush3.bf16.msra.mxu0 %v12147_v57  ;;  %11306 = vmatprep.mubr.msk.bf16.mxu0 %vm5320_vm6, %v10032_v29  ;;  %v9870_v57 = vld [vmem:[%s13121_s22 + $0x140] sm:$0xe]  ;;  %v5954_v1 = vrot.slane %v10011_v17, 5  ;;  %v10013_v9 = vld [vmem:[%s13121_s22 + $0x24c] sm:$0x1]  ;;  %v10022_v6 = vrot.slane %v10012_v56, 9 }
 0x674   : > { %11304 = vmatprep.subr.bf16.mxu0 %v12149_v24  ;;  %v9879_v23 = vrot.slane %v9870_v57, 9  ;;  %11246 = vmatprep.mubr.msk.bf16.mxu1 %vm5320_vm6, %v9890_v62  ;;  %v5951_v46 = vsel %vm14215_vm9, %v10020_v32, %v5950_v18  ;;  %v10014_v5 = vld [vmem:[%s13121_s22 + $0x260] sm:$0xe]  ;;  %v10015_v16 = vld [vmem:[%s13121_s22 + $0x264] sm:$0x1]  ;;  %v5958_v22 = vrot.slane %v10013_v9, 5 }
 0x675   : > { %11254 = vmatprep.subr.bf16.mxu1 %v12154_v33  ;;  %v5955_v54 = vsel %vm14215_vm9, %v10021_v7, %v5954_v1  ;;  %v10023_v10 = vrot.slane %v10014_v5, 9  ;;  %v5962_v34 = vrot.slane %v10015_v16, 5  ;;  %v12155_v12 = vld [vmem:[%s13145_s0 + $0xb0] sm:$0xff]   ;;  %v9832_v53 = vld [vmem:[%s13121_s22 + $0x90] sm:$0x8]  ;;  %v12158_v51 = vld [vmem:[%s13145_s0 + $0x40] sm:$0xff]  }
 0x676   : > { %v5274_v58 = vsel %vm14215_vm9, %v9879_v23, %v5273_v59  ;;  %11255 = vmatpush3.bf16.msra.mxu1 %v12154_v33  ;;  %v10034_v44 = vcombine.low %v5951_v46, %v5955_v54  ;;  %v5959_v26 = vsel %vm14215_vm9, %v10022_v6, %v5958_v22  ;;  %v9833_v40 = vld [vmem:[%s13121_s22 + $0x94] sm:$0x7]  ;;  %v9834_v20 = vld [vmem:[%s13121_s22 + $0xa8] sm:$0x8]  ;;  %v9835_v35 = vld [vmem:[%s13121_s22 + $0xac] sm:$0x7] }
 0x677   : > { %11305 = vmatpush3.bf16.msra.mxu0 %v12149_v24  ;;  %v5270_v24 = vsel %vm14215_vm9, %v9878_v36, %v5269_v63  ;;  %v5963_v49 = vsel %vm14215_vm9, %v10023_v10, %v5962_v34  ;;  %11256 = vmatprep.subr.bf16.mxu1 %v12156_v25  ;;  %v9848_v28 = vrot.slane %v9832_v53, 11  ;;  %v5170_v3 = vrot.slane %v9833_v40, 7  ;;  %v9836_v42 = vld [vmem:[%s13121_s22 + $0xc0] sm:$0x8]  ;;  %v9838_v39 = vld [vmem:[%s13121_s22 + $0xd8] sm:$0x8] }
 0x678   : > { %11314 = vmatprep.subr.bf16.mxu0 %v12151_v37  ;;  %v9891_v43 = vcombine.low %v5270_v24, %v5274_v58  ;;  %v10035_v15 = vcombine.low %v5959_v26, %v5963_v49  ;;  %v9849_v11 = vrot.slane %v9834_v20, 11  ;;  %v5174_v29 = vrot.slane %v9835_v35, 7  ;;  %v10044_v19 = vld [vmem:[%s13121_s22 + $0x1bc] sm:$0x8]  ;;  %v10045_v45 = vld [vmem:[%s13121_s22 + $0x1c0] sm:$0x7] }
 0x679   : > { %v5171_v38 = vsel %vm14174_vm5, %v9848_v28, %v5170_v3  ;;  %v9851_v13 = vrot.slane %v9838_v39, 11  ;;  %v10046_v14 = vld [vmem:[%s13121_s22 + $0x1d4] sm:$0x8]  ;;  %v10047_v57 = vld [vmem:[%s13121_s22 + $0x1d8] sm:$0x7]  ;;  %v10060_v60 = vrot.slane %v10044_v19, 11 }
 0x67a   : > { %11307 = vmatmul.mubr.msk.bf16.vlgmr.msra.gmra.mrb[0].mxu0 %vm5320_vm6, %v10033_v48  ;;  %11247 = vmatmul.mubr.msk.bf16.gmra.mrb[4].mxu1 %vm5320_vm6, %v9891_v43  ;;  %v9839_v48 = vld [vmem:[%s13121_s22 + $0xdc] sm:$0x7]  ;;  %v5175_v31 = vsel %vm14174_vm5, %v9849_v11, %v5174_v29  ;;  %v6128_v36 = vrot.slane %v10045_v45, 7  ;;  %v10061_v61 = vrot.slane %v10046_v14, 11  ;;  %v6132_v23 = vrot.slane %v10047_v57, 7  ;;  %v12162_v11 = vld [vmem:[%s13145_s0 + $0x50] sm:$0xff]  }
 0x67b   : > { %11315 = vmatpush3.bf16.msra.mxu0 %v12151_v37  ;;  %11310 = vmatprep.mubr.msk.bf16.mxu0 %vm5320_vm6, %v10034_v44  ;;  %v9837_v37 = vld [vmem:[%s13121_s22 + $0xc4] sm:$0x7]  ;;  %v5182_v50 = vrot.slane %v9839_v48, 7  ;;  %v9900_v47 = vcombine.low %v5171_v38, %v5175_v31  ;;  %v10048_v59 = vld [vmem:[%s13121_s22 + $0x1ec] sm:$0x8]  ;;  %v12159_v7 = vld [vmem:[%s13145_s0 + $0xc0] sm:$0xff]  }
 0x67c   : > { %11316 = vmatprep.subr.bf16.mxu0 %v12153_v41  ;;  %11257 = vmatpush3.bf16.msra.mxu1 %v12156_v25  ;;  %v5178_v30 = vrot.slane %v9837_v37, 7  ;;  %v10049_v62 = vld [vmem:[%s13121_s22 + $0x1f0] sm:$0x7]  ;;  %v6129_v24 = vsel %vm14174_vm5, %v10060_v60, %v6128_v36  ;;  %v10050_v33 = vld [vmem:[%s13121_s22 + $0x204] sm:$0x8]  ;;  %v10062_v21 = vrot.slane %v10048_v59, 11  ;;  %v6133_v55 = vsel %vm14174_vm5, %v10061_v61, %v6132_v23 }
 0x67d   : > { %v5183_v2 = vsel %vm14174_vm5, %v9851_v13, %v5182_v50  ;;  %11258 = vmatprep.mubr.msk.bf16.mxu1 %vm5320_vm6, %v9900_v47  ;;  %11266 = vmatprep.subr.bf16.mxu1 %v12158_v51  ;;  %v10051_v52 = vld [vmem:[%s13121_s22 + $0x208] sm:$0x7]  ;;  %v6136_v58 = vrot.slane %v10049_v62, 7  ;;  %v10063_v17 = vrot.slane %v10050_v33, 11  ;;  %v10076_v18 = vcombine.low %v6129_v24, %v6133_v55  ;;  %v12160_v56 = vld [vmem:[%s13145_s0 + $0x48] sm:$0xff]   ;;  %v12164_v59 = vld [vmem:[%s13145_s0 + $0x58] sm:$0xff]  }
 0x67e   : > { %v6140_v32 = vrot.slane %v10051_v52, 7  ;;  %v12161_v46 = vld [vmem:[%s13145_s0 + $0xc8] sm:$0xff]   ;;  %v9840_v5 = vld [vmem:[%s13121_s22 + $0xf0] sm:$0x8]  ;;  %v9841_v16 = vld [vmem:[%s13121_s22 + $0xf4] sm:$0x7] }
 0x67f   : > { %11317 = vmatpush3.bf16.msra.mxu0 %v12153_v41  ;;  %v9850_v41 = vrot.slane %v9836_v42, 11  ;;  %v6137_v43 = vsel %vm14174_vm5, %v10062_v21, %v6136_v58  ;;  %v9842_v6 = vld [vmem:[%s13121_s22 + $0x108] sm:$0x8]  ;;  %v9843_v22 = vld [vmem:[%s13121_s22 + $0x10c] sm:$0x7]  ;;  %v9852_v54 = vrot.slane %v9840_v5, 11 }
 0x680   : > { %11318 = vmatprep.subr.bf16.mxu0 %v12155_v12  ;;  %v6141_v1 = vsel %vm14174_vm5, %v10063_v17, %v6140_v32  ;;  %v5186_v10 = vrot.slane %v9841_v16, 7  ;;  %v9853_v34 = vrot.slane %v9842_v6, 11  ;;  %v5190_v44 = vrot.slane %v9843_v22, 7  ;;  %v9844_v26 = vld [vmem:[%s13121_s22 + $0x120] sm:$0x8]  ;;  %v12163_v61 = vld [vmem:[%s13145_s0 + $0xd0] sm:$0xff]  }
 0x681   : > { %v5179_v27 = vsel %vm14174_vm5, %v9850_v41, %v5178_v30  ;;  %v10077_v9 = vcombine.low %v6137_v43, %v6141_v1  ;;  %v9846_v25 = vld [vmem:[%s13121_s22 + $0x138] sm:$0x8]  ;;  %v10052_v29 = vld [vmem:[%s13121_s22 + $0x21c] sm:$0x8]  ;;  %v10053_v42 = vld [vmem:[%s13121_s22 + $0x220] sm:$0x7] }
 0x682   : > { %11311 = vmatmul.mubr.msk.bf16.gmra.mrb[4].mxu0 %vm5320_vm6, %v10035_v15  ;;  %v9901_v63 = vcombine.low %v5179_v27, %v5183_v2  ;;  %v5187_v49 = vsel %vm14174_vm5, %v9852_v54, %v5186_v10  ;;  %v9847_v15 = vld [vmem:[%s13121_s22 + $0x13c] sm:$0x7]  ;;  %v5191_v40 = vsel %vm14174_vm5, %v9853_v34, %v5190_v44  ;;  %v9855_v20 = vrot.slane %v9846_v25, 11  ;;  %v10054_v38 = vld [vmem:[%s13121_s22 + $0x234] sm:$0x8]  ;;  %v12165_v24 = vld [vmem:[%s13145_s0 + $0xd8] sm:$0xff]  }
 0x683   : > { %11319 = vmatpush3.bf16.msra.mxu0 %v12155_v12  ;;  %11322 = vmatprep.mubr.msk.bf16.mxu0 %vm5320_vm6, %v10076_v18  ;;  %v9845_v12 = vld [vmem:[%s13121_s22 + $0x124] sm:$0x7]  ;;  %v5198_v35 = vrot.slane %v9847_v15, 7  ;;  %v9902_v28 = vcombine.low %v5187_v49, %v5191_v40  ;;  %v10055_v39 = vld [vmem:[%s13121_s22 + $0x238] sm:$0x7]  ;;  %v10064_v48 = vrot.slane %v10052_v29, 11 }
 0x684   : > { %11320 = vmatprep.subr.bf16.mxu0 %v12157_v4  ;;  %11259 = vmatmul.mubr.msk.bf16.vlgmr.msra.gmra.mrb[0].mxu1 %vm5320_vm6, %v9901_v63  ;;  %v5194_v53 = vrot.slane %v9845_v12, 7  ;;  %v6144_v41 = vrot.slane %v10053_v42, 7  ;;  %v10065_v31 = vrot.slane %v10054_v38, 11  ;;  %v6148_v13 = vrot.slane %v10055_v39, 7  ;;  %v10056_v50 = vld [vmem:[%s13121_s22 + $0x24c] sm:$0x8] }
 0x685   : > { %11267 = vmatpush3.bf16.msra.mxu1 %v12158_v51  ;;  %v5199_v37 = vsel %vm14174_vm5, %v9855_v20, %v5198_v35  ;;  %11262 = vmatprep.mubr.msk.bf16.mxu1 %vm5320_vm6, %v9902_v28  ;;  %v10057_v47 = vld [vmem:[%s13121_s22 + $0x250] sm:$0x7]  ;;  %v10058_v51 = vld [vmem:[%s13121_s22 + $0x264] sm:$0x8]  ;;  %v10059_v19 = vld [vmem:[%s13121_s22 + $0x268] sm:$0x7] }
 0x686   : > { %11268 = vmatprep.subr.bf16.mxu1 %v12160_v56  ;;  %v6145_v27 = vsel %vm14174_vm5, %v10064_v48, %v6144_v41  ;;  %v10066_v45 = vrot.slane %v10056_v50, 11  ;;  %v6152_v2 = vrot.slane %v10057_v47, 7  ;;  %v6149_v14 = vsel %vm14174_vm5, %v10065_v31, %v6148_v13  ;;  %v9912_v33 = vld [vmem:[%s13121_s22 + $0x9c] sm:$0x8]  ;;  %v9913_v52 = vld [vmem:[%s13121_s22 + $0xa0] sm:$0x7] }
 0x687   : > { %11321 = vmatpush3.bf16.msra.mxu0 %v12157_v4  ;;  %v9854_v4 = vrot.slane %v9844_v26, 11  ;;  %v10067_v57 = vrot.slane %v10058_v51, 11  ;;  %v6156_v60 = vrot.slane %v10059_v19, 7  ;;  %v10078_v36 = vcombine.low %v6145_v27, %v6149_v14  ;;  %v9914_v21 = vld [vmem:[%s13121_s22 + $0xb4] sm:$0x8]  ;;  %v12167_v13 = vld [vmem:[%s13145_s0 + $0xe8] sm:$0xff]  }
 0x688   : > { %11330 = vmatprep.subr.bf16.mxu0 %v12159_v7  ;;  %v6153_v63 = vsel %vm14174_vm5, %v10066_v45, %v6152_v2  ;;  %v9915_v58 = vld [vmem:[%s13121_s22 + $0xb8] sm:$0x7]  ;;  %v9928_v55 = vrot.slane %v9912_v33, 11  ;;  %v5545_v17 = vrot.slane %v9913_v52, 7  ;;  %v9929_v32 = vrot.slane %v9914_v21, 11  ;;  %v12179_v8 = vld [vmem:[%s13157_s1 + $0x28] sm:$0xff]  }
 0x689   : > { %11269 = vmatpush3.bf16.msra.mxu1 %v12160_v56  ;;  %v5195_v3 = vsel %vm14174_vm5, %v9854_v4, %v5194_v53  ;;  %v6157_v23 = vsel %vm14174_vm5, %v10067_v57, %v6156_v60  ;;  %v5549_v18 = vrot.slane %v9915_v58, 7  ;;  %v9916_v43 = vld [vmem:[%s13121_s22 + $0xcc] sm:$0x8]  ;;  %v9918_v56 = vld [vmem:[%s13121_s22 + $0xe4] sm:$0x8]  ;;  %vm7043_vm10 = vcmask 261120  }
 0x68a   : > { %11323 = vmatmul.mubr.msk.bf16.vlgmr.msra.gmra.mrb[0].mxu0 %vm5320_vm6, %v10077_v9  ;;  %v9903_v30 = vcombine.low %v5195_v3, %v5199_v37  ;;  %11270 = vmatprep.subr.bf16.mxu1 %v12162_v11  ;;  %v10079_v62 = vcombine.low %v6153_v63, %v6157_v23  ;;  %v5546_v1 = vsel %vm14174_vm5, %v9928_v55, %v5545_v17  ;;  %v9919_v9 = vld [vmem:[%s13121_s22 + $0xe8] sm:$0x7]  ;;  %v9931_v6 = vrot.slane %v9918_v56, 11  ;;  %v10088_v54 = vld [vmem:[%s13121_s22 + $0x2d0] sm:$0x8] }
 0x68b   : > { %11331 = vmatpush3.bf16.msra.mxu0 %v12159_v7  ;;  %11326 = vmatprep.mubr.msk.bf16.mxu0 %vm5320_vm6, %v10078_v36  ;;  %v9917_v7 = vld [vmem:[%s13121_s22 + $0xd0] sm:$0x7]  ;;  %v5550_v16 = vsel %vm14174_vm5, %v9929_v32, %v5549_v18  ;;  %v5557_v22 = vrot.slane %v9919_v9, 7  ;;  %v10089_v10 = vld [vmem:[%s13121_s22 + $0x2d4] sm:$0x7]  ;;  %v10104_v49 = vrot.slane %v10088_v54, 11 }
 0x68c   : > { %11332 = vmatprep.subr.bf16.mxu0 %v12161_v46  ;;  %11263 = vmatmul.mubr.msk.bf16.gmra.mrb[4].mxu1 %vm5320_vm6, %v9903_v30  ;;  %v5553_v5 = vrot.slane %v9917_v7, 7  ;;  %v9944_v34 = vcombine.low %v5546_v1, %v5550_v16  ;;  %v10090_v26 = vld [vmem:[%s13121_s22 + $0x2e8] sm:$0x8]  ;;  %v10091_v12 = vld [vmem:[%s13121_s22 + $0x2ec] sm:$0x7]  ;;  %v6323_v25 = vrot.slane %v10089_v10, 7 }
 0x68d   : > { %11271 = vmatpush3.bf16.msra.mxu1 %v12162_v11  ;;  %v5558_v15 = vsel %vm14174_vm5, %v9931_v6, %v5557_v22  ;;  %v10105_v4 = vrot.slane %v10090_v26, 11  ;;  %v6327_v53 = vrot.slane %v10091_v12, 7  ;;  %v10092_v40 = vld [vmem:[%s13121_s22 + $0x300] sm:$0x8]  ;;  %v10093_v20 = vld [vmem:[%s13121_s22 + $0x304] sm:$0x7] }
 0x68e   : > { %11272 = vmatprep.subr.bf16.mxu1 %v12164_v59  ;;  %11274 = vmatprep.mubr.msk.bf16.mxu1 %vm5320_vm6, %v9944_v34  ;;  %v6324_v28 = vsel %vm14174_vm5, %v10104_v49, %v6323_v25  ;;  %v10094_v3 = vld [vmem:[%s13121_s22 + $0x318] sm:$0x8]  ;;  %v10095_v11 = vld [vmem:[%s13121_s22 + $0x31c] sm:$0x7]  ;;  %v10106_v29 = vrot.slane %v10092_v40, 11  ;;  %v6331_v42 = vrot.slane %v10093_v20, 7 }
 0x68f   : > { %11333 = vmatpush3.bf16.msra.mxu0 %v12161_v46  ;;  %v9930_v46 = vrot.slane %v9916_v43, 11  ;;  %v6328_v37 = vsel %vm14174_vm5, %v10105_v4, %v6327_v53  ;;  %v10107_v38 = vrot.slane %v10094_v3, 11  ;;  %v6335_v39 = vrot.slane %v10095_v11, 7  ;;  %v12166_v30 = vld [vmem:[%s13145_s0 + $0xe0] sm:$0xff]   ;;  %v9920_v50 = vld [vmem:[%s13121_s22 + $0xfc] sm:$0x8] }
 0x690   : > { %11334 = vmatprep.subr.bf16.mxu0 %v12163_v61  ;;  %v10120_v48 = vcombine.low %v6324_v28, %v6328_v37  ;;  %v6332_v41 = vsel %vm14174_vm5, %v10106_v29, %v6331_v42  ;;  %v9921_v47 = vld [vmem:[%s13121_s22 + $0x100] sm:$0x7]  ;;  %v9922_v51 = vld [vmem:[%s13121_s22 + $0x114] sm:$0x8]  ;;  %v9923_v19 = vld [vmem:[%s13121_s22 + $0x118] sm:$0x7] }
 0x691   : > { %11273 = vmatpush3.bf16.msra.mxu1 %v12164_v59  ;;  %v5554_v44 = vsel %vm14174_vm5, %v9930_v46, %v5553_v5  ;;  %v6336_v31 = vsel %vm14174_vm5, %v10107_v38, %v6335_v39  ;;  %v9932_v45 = vrot.slane %v9920_v50, 11  ;;  %v5561_v2 = vrot.slane %v9921_v47, 7  ;;  %v9924_v60 = vld [vmem:[%s13121_s22 + $0x12c] sm:$0x8]  ;;  %v9925_v36 = vld [vmem:[%s13121_s22 + $0x130] sm:$0x7] }
 0x692   : > { %11327 = vmatmul.mubr.msk.bf16.gmra.mrb[4].mxu0 %vm5320_vm6, %v10079_v62  ;;  %v9945_v35 = vcombine.low %v5554_v44, %v5558_v15  ;;  %v10121_v27 = vcombine.low %v6332_v41, %v6336_v31  ;;  %v9933_v14 = vrot.slane %v9922_v51, 11  ;;  %v5565_v57 = vrot.slane %v9923_v19, 7  ;;  %v9927_v23 = vld [vmem:[%s13121_s22 + $0x148] sm:$0x7]  ;;  %v10096_v21 = vld [vmem:[%s13121_s22 + $0x330] sm:$0x8] }
 0x693   : > { %11335 = vmatpush3.bf16.msra.mxu0 %v12163_v61  ;;  %11338 = vmatprep.mubr.msk.bf16.mxu0 %vm5320_vm6, %v10120_v48  ;;  %v5562_v63 = vsel %vm14174_vm5, %v9932_v45, %v5561_v2  ;;  %v9926_v61 = vld [vmem:[%s13121_s22 + $0x144] sm:$0x8]  ;;  %v9934_v59 = vrot.slane %v9924_v60, 11  ;;  %v5569_v62 = vrot.slane %v9925_v36, 7  ;;  %v5573_v52 = vrot.slane %v9927_v23, 7  ;;  %v12169_v53 = vld [vmem:[%s13145_s0 + $0xf8] sm:$0xff]  }
 0x694   : > { %11336 = vmatprep.subr.bf16.mxu0 %v12165_v24  ;;  %11275 = vmatmul.mubr.msk.bf16.vlgmr.msra.gmra.mrb[0].mxu1 %vm5320_vm6, %v9945_v35  ;;  %v9935_v33 = vrot.slane %v9926_v61, 11  ;;  %v10097_v58 = vld [vmem:[%s13121_s22 + $0x334] sm:$0x7]  ;;  %v10098_v32 = vld [vmem:[%s13121_s22 + $0x348] sm:$0x8]  ;;  %v10108_v43 = vrot.slane %v10096_v21, 11 }
 0x695   : > { %v5570_v17 = vsel %vm14174_vm5, %v9934_v59, %v5569_v62  ;;  %v10099_v18 = vld [vmem:[%s13121_s22 + $0x34c] sm:$0x7]  ;;  %v6339_v7 = vrot.slane %v10097_v58, 7  ;;  %v10109_v56 = vrot.slane %v10098_v32, 11  ;;  %v10100_v46 = vld [vmem:[%s13121_s22 + $0x360] sm:$0x8] }
 0x696   : > { %v5574_v1 = vsel %vm14174_vm5, %v9935_v33, %v5573_v52  ;;  %v6343_v9 = vrot.slane %v10099_v18, 7  ;;  %v10101_v5 = vld [vmem:[%s13121_s22 + $0x364] sm:$0x7]  ;;  %v10102_v22 = vld [vmem:[%s13121_s22 + $0x378] sm:$0x8]  ;;  %v10110_v10 = vrot.slane %v10100_v46, 11 }
 0x697   : > { %11337 = vmatpush3.bf16.msra.mxu0 %v12165_v24  ;;  %v5566_v24 = vsel %vm14174_vm5, %v9933_v14, %v5565_v57  ;;  %v9947_v16 = vcombine.low %v5570_v17, %v5574_v1  ;;  %v6340_v6 = vsel %vm14174_vm5, %v10108_v43, %v6339_v7  ;;  %v10103_v54 = vld [vmem:[%s13121_s22 + $0x37c] sm:$0x7]  ;;  %v6347_v34 = vrot.slane %v10101_v5, 7  ;;  %v12168_v15 = vld [vmem:[%s13145_s0 + $0xf0] sm:$0xff]   ;;  %v10132_v40 = vld [vmem:[%s13121_s22 + $0x2d8] sm:$0xe] }
 0x698   : > { %11346 = vmatprep.subr.bf16.mxu0 %v12166_v30  ;;  %v9946_v55 = vcombine.low %v5562_v63, %v5566_v24  ;;  %v6344_v44 = vsel %vm14174_vm5, %v10109_v56, %v6343_v9  ;;  %v10111_v26 = vrot.slane %v10102_v22, 11  ;;  %v6351_v12 = vrot.slane %v10103_v54, 7  ;;  %v10133_v20 = vld [vmem:[%s13121_s22 + $0x2dc] sm:$0x1]  ;;  %v10134_v28 = vld [vmem:[%s13121_s22 + $0x2f0] sm:$0xe] }
 0x699   : > { %v10122_v49 = vcombine.low %v6340_v6, %v6344_v44  ;;  %v6348_v25 = vsel %vm14174_vm5, %v10110_v10, %v6347_v34  ;;  %v10135_v3 = vld [vmem:[%s13121_s22 + $0x2f4] sm:$0x1]  ;;  %v10148_v11 = vrot.slane %v10132_v40, 9  ;;  %v6517_v29 = vrot.slane %v10133_v20, 5  ;;  %v10136_v38 = vld [vmem:[%s13121_s22 + $0x308] sm:$0xe] }
 0x69a   : > { %11339 = vmatmul.mubr.msk.bf16.vlgmr.msra.gmra.mrb[0].mxu0 %vm5320_vm6, %v10121_v27  ;;  %11278 = vmatprep.mubr.msk.bf16.mxu1 %vm5320_vm6, %v9946_v55  ;;  %v6352_v4 = vsel %vm14174_vm5, %v10111_v26, %v6351_v12  ;;  %v10149_v42 = vrot.slane %v10134_v28, 9  ;;  %v6521_v37 = vrot.slane %v10135_v3, 5  ;;  %v10137_v39 = vld [vmem:[%s13121_s22 + $0x30c] sm:$0x1]  ;;  %v10138_v41 = vld [vmem:[%s13121_s22 + $0x320] sm:$0xe] }
 0x69b   : > { %11347 = vmatpush3.bf16.msra.mxu0 %v12166_v30  ;;  %11342 = vmatprep.mubr.msk.bf16.mxu0 %vm5320_vm6, %v10122_v49  ;;  %v10123_v35 = vcombine.low %v6348_v25, %v6352_v4  ;;  %v6518_v48 = vsel %vm14215_vm9, %v10148_v11, %v6517_v29  ;;  %v10139_v30 = vld [vmem:[%s13121_s22 + $0x324] sm:$0x1]  ;;  %v10150_v31 = vrot.slane %v10136_v38, 9  ;;  %v10151_v47 = vrot.slane %v10138_v41, 9  ;;  %v12170_v45 = vld [vmem:[%s13145_s0 + $0x100] sm:$0xff]   ;;  %v12172_v46 = vld [vmem:[%s13145_s0 + $0x110] sm:$0xff]  }
 0x69c   : > { %11348 = vmatprep.subr.bf16.mxu0 %v12167_v13  ;;  %11279 = vmatmul.mubr.msk.bf16.gmra.mrb[4].mxu1 %vm5320_vm6, %v9947_v16  ;;  %v6522_v50 = vsel %vm14215_vm9, %v10149_v42, %v6521_v37  ;;  %v6529_v27 = vrot.slane %v10139_v30, 5  ;;  %v10140_v14 = vld [vmem:[%s13121_s22 + $0x338] sm:$0xe]  ;;  %v10141_v57 = vld [vmem:[%s13121_s22 + $0x33c] sm:$0x1]  ;;  %v12171_v36 = vld [vmem:[%s13145_s0 + $0x108] sm:$0xff]  }
 0x69d   : > { %v10164_v51 = vcombine.low %v6518_v48, %v6522_v50  ;;  %v10142_v63 = vld [vmem:[%s13121_s22 + $0x350] sm:$0xe]  ;;  %v10143_v61 = vld [vmem:[%s13121_s22 + $0x354] sm:$0x1]  ;;  %v10152_v23 = vrot.slane %v10140_v14, 9  ;;  %v6533_v59 = vrot.slane %v10141_v57, 5 }
 0x69e   : > { %v6530_v2 = vsel %vm14215_vm9, %v10151_v47, %v6529_v27  ;;  %v10153_v62 = vrot.slane %v10142_v63, 9  ;;  %v6537_v24 = vrot.slane %v10143_v61, 5  ;;  %v10144_v33 = vld [vmem:[%s13121_s22 + $0x368] sm:$0xe]  ;;  %v10145_v52 = vld [vmem:[%s13121_s22 + $0x36c] sm:$0x1] }
 0x69f   : > { %11349 = vmatpush3.bf16.msra.mxu0 %v12167_v13  ;;  %v6525_v13 = vrot.slane %v10137_v39, 5  ;;  %v6534_v21 = vsel %vm14215_vm9, %v10152_v23, %v6533_v59  ;;  %v10146_v58 = vld [vmem:[%s13121_s22 + $0x380] sm:$0xe]  ;;  %v10147_v55 = vld [vmem:[%s13121_s22 + $0x384] sm:$0x1]  ;;  %v10154_v17 = vrot.slane %v10144_v33, 9 }
 0x6a0   : > { %11350 = vmatprep.subr.bf16.mxu0 %v12168_v15  ;;  %v6541_v32 = vrot.slane %v10145_v52, 5  ;;  %v6538_v18 = vsel %vm14215_vm9, %v10153_v62, %v6537_v24  ;;  %v10155_v43 = vrot.slane %v10146_v58, 9  ;;  %v6545_v7 = vrot.slane %v10147_v55, 5  ;;  %v10176_v5 = vld [vmem:[%s13121_s22 + $0x2dc] sm:$0x8]  ;;  %v12173_v49 = vld [vmem:[%s13145_s0 + $0x118] sm:$0xff]  }
 0x6a1   : > { %v6526_v19 = vsel %vm14215_vm9, %v10150_v31, %v6525_v13  ;;  %v10166_v1 = vcombine.low %v6534_v21, %v6538_v18  ;;  %v10177_v16 = vld [vmem:[%s13121_s22 + $0x2e0] sm:$0x7]  ;;  %v10178_v6 = vld [vmem:[%s13121_s22 + $0x2f4] sm:$0x8]  ;;  %v10179_v22 = vld [vmem:[%s13121_s22 + $0x2f8] sm:$0x7] }
 0x6a2   : > { %11343 = vmatmul.mubr.msk.bf16.gmra.mrb[4].mxu0 %vm5320_vm6, %v10123_v35  ;;  %v10165_v60 = vcombine.low %v6526_v19, %v6530_v2  ;;  %v6542_v56 = vsel %vm14215_vm9, %v10154_v17, %v6541_v32  ;;  %v6546_v9 = vsel %vm14215_vm9, %v10155_v43, %v6545_v7  ;;  %v10192_v54 = vrot.slane %v10176_v5, 11  ;;  %v10180_v26 = vld [vmem:[%s13121_s22 + $0x30c] sm:$0x8]  ;;  %v10181_v0 = vld [vmem:[%s13121_s22 + $0x310] sm:$0x7]  ;;  %v12174_v59 = vld [vmem:[%s13157_s1] sm:$0xff]  }
 0x6a3   : > { %11351 = vmatpush3.bf16.msra.mxu0 %v12168_v15  ;;  %11354 = vmatprep.mubr.msk.bf16.mxu0 %vm5320_vm6, %v10164_v51  ;;  %v6711_v10 = vrot.slane %v10177_v16, 7  ;;  %v10193_v34 = vrot.slane %v10178_v6, 11  ;;  %v6715_v44 = vrot.slane %v10179_v22, 7  ;;  %v10167_v12 = vcombine.low %v6542_v56, %v6546_v9  ;;  %v10182_v15 = vld [vmem:[%s13121_s22 + $0x324] sm:$0x8]  ;;  %v12176_v24 = vld [vmem:[%s13157_s1 + $0x10] sm:$0xff]  }
 0x6a4   : > { %11352 = vmatprep.subr.bf16.mxu0 %v12169_v53  ;;  %v10183_v4 = vld [vmem:[%s13121_s22 + $0x328] sm:$0x7]  ;;  %v6719_v40 = vrot.slane %v10181_v0, 7  ;;  %v10195_v35 = vrot.slane %v10182_v15, 11  ;;  %v10184_v3 = vld [vmem:[%s13121_s22 + $0x33c] sm:$0x8]  ;;  %11378 = vmatprep.subr.bf16.mxu1 %v12174_v59 }
 0x6a5   : > { %v6712_v25 = vsel %vm14174_vm5, %v10192_v54, %v6711_v10  ;;  %v6716_v20 = vsel %vm14174_vm5, %v10193_v34, %v6715_v44  ;;  %v6723_v28 = vrot.slane %v10183_v4, 7  ;;  %v10185_v11 = vld [vmem:[%s13121_s22 + $0x340] sm:$0x7]  ;;  %v10186_v42 = vld [vmem:[%s13121_s22 + $0x354] sm:$0x8]  ;;  %v10196_v38 = vrot.slane %v10184_v3, 11  ;;  %11379 = vmatpush3.bf16.msra.mxu1 %v12174_v59 }
 0x6a6   : > { %v10208_v29 = vcombine.low %v6712_v25, %v6716_v20  ;;  %v10187_v37 = vld [vmem:[%s13121_s22 + $0x358] sm:$0x7]  ;;  %v6727_v39 = vrot.slane %v10185_v11, 7  ;;  %v10197_v48 = vrot.slane %v10186_v42, 11  ;;  %v10188_v30 = vld [vmem:[%s13121_s22 + $0x36c] sm:$0x8] }
 0x6a7   : > { %11353 = vmatpush3.bf16.msra.mxu0 %v12169_v53  ;;  %v10194_v53 = vrot.slane %v10180_v26, 11  ;;  %v6731_v41 = vrot.slane %v10187_v37, 7  ;;  %v10189_v31 = vld [vmem:[%s13121_s22 + $0x370] sm:$0x7]  ;;  %v10190_v13 = vld [vmem:[%s13121_s22 + $0x384] sm:$0x8]  ;;  %v6724_v19 = vsel %vm14174_vm5, %v10195_v35, %v6723_v28 }
 0x6a8   : > { %11362 = vmatprep.subr.bf16.mxu0 %v12170_v45  ;;  %v10191_v50 = vld [vmem:[%s13121_s22 + $0x388] sm:$0x7]  ;;  %v10198_v47 = vrot.slane %v10188_v30, 11  ;;  %v6735_v27 = vrot.slane %v10189_v31, 7  ;;  %v6728_v14 = vsel %vm14174_vm5, %v10196_v38, %v6727_v39  ;;  %v12175_v62 = vld [vmem:[%s13157_s1 + $0x8] sm:$0xff]   ;;  %v12177_v33 = vld [vmem:[%s13157_s1 + $0x18] sm:$0xff]  }
 0x6a9   : > { %v6720_v51 = vsel %vm14174_vm5, %v10194_v53, %v6719_v40  ;;  %v6739_v2 = vrot.slane %v10191_v50, 7  ;;  %v6732_v57 = vsel %vm14174_vm5, %v10197_v48, %v6731_v41  ;;  %11380 = vmatprep.subr.bf16.mxu1 %v12175_v62  ;;  %v12178_v52 = vld [vmem:[%s13157_s1 + $0x20] sm:$0xff]   ;;  %v12180_v21 = vld [vmem:[%s13157_s1 + $0x30] sm:$0xff]   ;;  %v12181_v58 = vld [vmem:[%s13157_s1 + $0x38] sm:$0xff]  }
 0x6aa   : > { %11355 = vmatmul.mubr.msk.bf16.vlgmr.msra.gmra.mrb[0].mxu0 %vm5320_vm6, %v10165_v60  ;;  %v10209_v60 = vcombine.low %v6720_v51, %v6724_v19  ;;  %v6736_v63 = vsel %vm14174_vm5, %v10198_v47, %v6735_v27  ;;  %11381 = vmatpush3.bf16.msra.mxu1 %v12175_v62  ;;  %v6900_v51 = vld [vmem:[#allocation2 + $0x10] sm:$0xff]  ;;  %v6898_v19 = vld [vmem:[#allocation2] sm:$0xff] }
 0x6ab   : > { %11363 = vmatpush3.bf16.msra.mxu0 %v12170_v45  ;;  %11358 = vmatprep.mubr.msk.bf16.mxu0 %vm5320_vm6, %v10166_v1  ;;  %v10199_v45 = vrot.slane %v10190_v13, 11  ;;  %v6904_v62 = vld [vmem:[#allocation2 + $0x30] sm:$0xff] }
 0x6ac   : > { %11364 = vmatprep.subr.bf16.mxu0 %v12171_v36  ;;  %11382 = vmatprep.subr.bf16.mxu1 %v12176_v24 }
 0x6ad   : > { %v6740_v61 = vsel %vm14174_vm5, %v10199_v45, %v6739_v2  ;;  %v6901_v2 = vld [vmem:[#allocation2 + $0x18] sm:$0xff] }
 0x6ae   : > { %v10211_v23 = vcombine.low %v6736_v63, %v6740_v61  ;;  %11383 = vmatpush3.bf16.msra.mxu1 %v12176_v24  ;;  %v6902_v24 = vld [vmem:[#allocation2 + $0x20] sm:$0xff] }
 0x6af   : > { %11365 = vmatpush3.bf16.msra.mxu0 %v12171_v36  ;;  %v10210_v36 = vcombine.low %v6728_v14, %v6732_v57  ;;  %11384 = vmatprep.subr.bf16.mxu1 %v12177_v33 }
 0x6b0   : > { %11366 = vmatprep.subr.bf16.mxu0 %v12172_v46 }
 0x6b2   : > { %11359 = vmatmul.mubr.msk.bf16.gmra.mrb[4].mxu0 %vm5320_vm6, %v10167_v12  ;;  %11385 = vmatpush3.bf16.msra.mxu1 %v12177_v33 }
 0x6b3   : > { %11367 = vmatpush3.bf16.msra.mxu0 %v12172_v46  ;;  %11370 = vmatprep.mubr.msk.bf16.mxu0 %vm5320_vm6, %v10208_v29  ;;  %v10220_v46 = vld [vmem:[%s13151_s23] ss:$0 sm:$0xff] }
 0x6b4   : > { %11368 = vmatprep.subr.bf16.mxu0 %v12173_v49  ;;  %11386 = vmatprep.subr.bf16.mxu1 %v12178_v52 }
 0x6b6   : > { %11387 = vmatpush3.bf16.msra.mxu1 %v12178_v52  ;;  %v6905_v52 = vld [vmem:[#allocation2 + $0x38] sm:$0xff] }
 0x6b7   : > { %11369 = vmatpush3.bf16.msra.mxu0 %v12173_v49  ;;  %11388 = vmatprep.subr.bf16.mxu1 %v12179_v8 }
 0x6ba   : > { %11371 = vmatmul.mubr.msk.bf16.vlgmr.msra.gmra.mrb[0].mxu0 %vm5320_vm6, %v10209_v60  ;;  %11389 = vmatpush3.bf16.msra.mxu1 %v12179_v8  ;;  %v6899_v60 = vld [vmem:[#allocation2 + $0x8] sm:$0xff] }
 0x6bb   : > { %11374 = vmatprep.mubr.msk.bf16.mxu0 %vm5320_vm6, %v10210_v36  ;;  %11390 = vmatprep.subr.bf16.mxu1 %v12180_v21 }
 0x6be   : > { %11391 = vmatpush3.bf16.msra.mxu1 %v12180_v21 }
 0x6bf   : > { %11392 = vmatprep.subr.bf16.mxu1 %v12181_v58 }
 0x6c2   : > { %11375 = vmatmul.mubr.msk.bf16.gmra.mrb[4].mxu0 %vm5320_vm6, %v10211_v23  ;;  %11393 = vmatpush3.bf16.msra.mxu1 %v12181_v58  ;;  %v6903_v58 = vld [vmem:[#allocation2 + $0x28] sm:$0xff] }
 0x767   : > { %v11276_v55 = vpop.f32.mrb[0].mxu1 }
 0x768   : > { %v5666_v17 = vpop.f32.mrb[1].mxu1 }
 0x769   : > { %v11277_v32 = vpop.f32.mrb[2].mxu1 }
 0x76a   : > { %v5669_v18 = vpop.f32.mrb[3].mxu1 }
 0x76f   : > { %v11280_v43 = vpop.f32.mrb[4].mxu1 }
 0x770   : > { %v5682_v7 = vpop.f32.mrb[5].mxu1 }
 0x771   : > { %v11281_v1 = vpop.f32.mrb[6].mxu1 }
 0x772   : > { %v5685_v56 = vpop.f32.mrb[7].mxu1 }
 0x78d   : > { %v11372_v9 = vpop.f32.mrb[0].mxu0 }
 0x78e   : > { %v11698_v5 = vadd.f32 %v11372_v9, %v11276_v55  ;;  %v6832_v16 = vpop.f32.mrb[1].mxu0 }
 0x78f   : > { %v11699_v6 = vadd.f32 %v6832_v16, %v5666_v17  ;;  %v11373_v22 = vpop.f32.mrb[2].mxu0 }
 0x790   : > { %v6880_v54 = vadd.f32 %v11698_v5, %v10220_v46  ;;  %v11700_v10 = vadd.f32 %v11373_v22, %v11277_v32  ;;  %v6835_v34 = vpop.f32.mrb[3].mxu0 }
 0x791   : > { %v6878_v44 = vadd.f32 %v11699_v6, %v10220_v46  ;;  %v11701_v26 = vadd.f32 %v6835_v34, %v5669_v18 }
 0x792   : > { %v6881_v0 = vadd.f32 %v11700_v10, %v10220_v46  ;;  %v6888_v49 = vmax.f32 %v6880_v54, 0.0 }
 0x793   : > { %v6879_v12 = vadd.f32 %v11701_v26, %v10220_v46  ;;  %v6886_v15 = vmax.f32 %v6878_v44, 0.0 }
 0x794   : > { %v6889_v25 = vmax.f32 %v6881_v0, 0.0 }
 0x795   : > { %v6887_v4 = vmax.f32 %v6879_v12, 0.0  ;;  %v11376_v53 = vpop.f32.mrb[4].mxu0 }
 0x796   : > { %v6895_v40 = vpack.c.bf16 %v6889_v25, %v6888_v49  ;;  %v11702_v20 = vadd.f32 %v11376_v53, %v11280_v43  ;;  %v6848_v35 = vpop.f32.mrb[5].mxu0 }
 0x797   : > { %v11703_v28 = vadd.f32 %v6848_v35, %v5682_v7  ;;  %v11377_v3 = vpop.f32.mrb[6].mxu0  ;;  %v6894_v11 = vpack.c.bf16 %v6887_v4, %v6886_v15 }
 0x798   : > { %v6884_v29 = vadd.f32 %v11702_v20, %v10220_v46  ;;  %v11704_v42 = vadd.f32 %v11377_v3, %v11281_v1  ;;  %v6851_v37 = vpop.f32.mrb[7].mxu0 }
 0x799   : > { %v6882_v38 = vadd.f32 %v11703_v28, %v10220_v46  ;;  %v11705_v39 = vadd.f32 %v6851_v37, %v5685_v56  ;;  %11394 = vmatprep.mubr.bf16.mxu1 %v6894_v11 }
 0x79a   : > { %v6885_v48 = vadd.f32 %v11704_v42, %v10220_v46  ;;  %11395 = vmatmul.mubr.bf16.vlgmr.msra.gmra.mrb[8].mxu1 %v6895_v40  ;;  %v6892_v30 = vmax.f32 %v6884_v29, 0.0 }
 0x79b   : > { %v6883_v41 = vadd.f32 %v11705_v39, %v10220_v46  ;;  %v6890_v13 = vmax.f32 %v6882_v38, 0.0 }
 0x79c   : > { %v6893_v31 = vmax.f32 %v6885_v48, 0.0 }
 0x79d   : > { %v6891_v50 = vmax.f32 %v6883_v41, 0.0 }
 0x79e   : > { %v6897_v47 = vpack.c.bf16 %v6893_v31, %v6892_v30 }
 0x79f   : > { %v6896_v27 = vpack.c.bf16 %v6891_v50, %v6890_v13 }
 0x7a1   : > { %11398 = vmatprep.mubr.bf16.mxu1 %v6896_v27 }
 0x7a2   : > { %11399 = vmatmul.mubr.bf16.gmra.mrb[12].mxu1 %v6897_v47 }
 0x86d   : > { %v11396_v45 = vpop.f32.mrb[8].mxu1 }
 0x86e   : > { %v7037_v14 = vadd.f32 %v11396_v45, %v6900_v51  ;;  %v7004_v57 = vpop.f32.mrb[9].mxu1 }
 0x86f   : > { %v7035_v36 = vadd.f32 %v7004_v57, %v6898_v19  ;;  %v11397_v63 = vpop.f32.mrb[10].mxu1 }
 0x870   : > { %7046 = vst.msk [vmem:[#allocation2 + $0x10] sm:$0xff] %vm7043_vm10, %v7037_v14  ;;  %v7038_v61 = vadd.f32 %v11397_v63, %v6901_v2  ;;  %v7007_v23 = vpop.f32.mrb[11].mxu1 }
 0x871   : > { %7044 = vst.msk [vmem:[#allocation2] sm:$0xff] %vm7043_vm10, %v7035_v36  ;;  %v7036_v59 = vadd.f32 %v7007_v23, %v6899_v60 }
 0x872   : > { %7047 = vst.msk [vmem:[#allocation2 + $0x18] sm:$0xff] %vm7043_vm10, %v7038_v61 }
 0x873   : > { %7045 = vst.msk [vmem:[#allocation2 + $0x8] sm:$0xff] %vm7043_vm10, %v7036_v59 }
 0x875   : > { %v11400_v33 = vpop.f32.mrb[12].mxu1 }
 0x876   : > { %v7041_v8 = vadd.f32 %v11400_v33, %v6904_v62  ;;  %v7020_v21 = vpop.f32.mrb[13].mxu1 }
 0x877   : > { %v7039_v55 = vadd.f32 %v7020_v21, %v6902_v24  ;;  %v11401_v17 = vpop.f32.mrb[14].mxu1 }
 0x878   : > { %7050 = vst.msk [vmem:[#allocation2 + $0x30] sm:$0xff] %vm7043_vm10, %v7041_v8  ;;  %v7042_v32 = vadd.f32 %v11401_v17, %v6905_v52  ;;  %v7023_v18 = vpop.f32.mrb[15].mxu1 }
 0x879   : > { %7048 = vst.msk [vmem:[#allocation2 + $0x20] sm:$0xff] %vm7043_vm10, %v7039_v55  ;;  %v7040_v43 = vadd.f32 %v7023_v18, %v6903_v58 }
 0x87a   : > { %7051 = vst.msk [vmem:[#allocation2 + $0x38] sm:$0xff] %vm7043_vm10, %v7042_v32 }
 0x87b   : > { %7049 = vst.msk [vmem:[#allocation2 + $0x28] sm:$0xff] %vm7043_vm10, %v7040_v43 }
 0x87c PF: > { %s15078_s18 = sld [smem:[#allocation30_spill]] }
 0x882   : > { %p10229_p6 = scmp.ne.s32.totalorder %s15078_s18, 3 }
 0x883   : > { %v12182_v7 = vld [vmem:[%s13145_s0 + $0x60] sm:$0xff] (!%p10229_p6)   ;;  %v12183_v1 = vld [vmem:[%s13145_s0 + $0x68] sm:$0xff] (!%p10229_p6)   ;;  %v12184_v56 = vld [vmem:[%s13145_s0 + $0x70] sm:$0xff] (!%p10229_p6)   ;;  %vm7184_vm11 = vcmask (!%p10229_p6), 523264   ;;  %vm7104_vm12 = vcmask (!%p10229_p6), 1042432   ;;  %vm7105_vm13 = vcmask (!%p10229_p6), 1046532  }
 0x884   : > { %7055 = sbr.rel (%p10229_p6) target bundleno = 2738 (0xab2), region = 108  ;;  %11450 = vmatprep.subr.bf16.mxu0 (!%p10229_p6), %v12182_v7  ;;  %v12186_v9 = vld [vmem:[%s13145_s0 + $0x20] sm:$0xff] (!%p10229_p6)   ;;  %v12187_v46 = vld [vmem:[%s13121_s22 + $0x1b0] ss:$24 sps:$4 sm:$0xff] (!%p10229_p6)   ;;  %v12190_v16 = vld [vmem:[%s13145_s0 + $0x28] sm:$0xff] (!%p10229_p6)   ;;  %vm7415_vm15 = vcmask (!%p10229_p6), 1041408  }
 0x885   : > { %11451 = vmatpush3.bf16.msra.mxu0 (!%p10229_p6), %v12182_v7  ;;  %11402 = vmatprep.subr.bf16.mxu1 (!%p10229_p6), %v12186_v9  ;;  %v12185_v5 = vld [vmem:[%s13145_s0 + $0x78] sm:$0xff] (!%p10229_p6)   ;;  %v12192_v6 = vld [vmem:[%s13145_s0 + $0x30] sm:$0xff] (!%p10229_p6)   ;;  %v12189_v22 = vld [vmem:[%s13145_s0 + $0x80] sm:$0xff] (!%p10229_p6)   ;;  %vm7416_vm0 = vcmask (!%p10229_p6), 1045508   ;;  %vm8822_vm2 = vcmask (!%p10229_p6), 261120   ;;  %vm8879_vm3 = vcmask (!%p10229_p6), 257024  }
 0x886   : > { %11452 = vmatprep.subr.bf16.mxu0 (!%p10229_p6), %v12183_v1  ;;  %11403 = vmatpush3.bf16.msra.mxu1 (!%p10229_p6), %v12186_v9  ;;  %v12188_v54 = vld [vmem:[%s13121_s22 + $0x1e0] ss:$24 sps:$4 sm:$0xff] (!%p10229_p6)   ;;  %v12196_v34 = vld [vmem:[%s13145_s0 + $0x38] sm:$0xff] (!%p10229_p6)   ;;  %v7072_v26 = vld [vmem:[%s13121_s22 + $0x8] sm:$0xe] (!%p10229_p6) }
 0x887   : > { %11458 = vmatprep.mubr.msk.bf16.mxu0 (!%p10229_p6), %vm7184_vm11, %v12187_v46  ;;  %11404 = vmatprep.subr.bf16.mxu1 (!%p10229_p6), %v12190_v16  ;;  %v12191_v10 = vld [vmem:[%s13145_s0 + $0x88] sm:$0xff] (!%p10229_p6)   ;;  %v12193_v44 = vld [vmem:[%s13121_s22 + $0x210] ss:$24 sps:$4 sm:$0xff] (!%p10229_p6)   ;;  %v7073_v0 = vld [vmem:[%s13121_s22 + $0xc] sm:$0x1] (!%p10229_p6)  ;;  %v10230_v15 = vrot.slane (!%p10229_p6), %v7072_v26, 9 }
 0x888   : > { %v7074_v12 = vld [vmem:[%s13121_s22 + $0x20] sm:$0xe] (!%p10229_p6)  ;;  %v7075_v49 = vld [vmem:[%s13121_s22 + $0x24] sm:$0x1] (!%p10229_p6)  ;;  %vm14576_vm14 = vmor (!%p10229_p6), %vm7104_vm12, %vm7105_vm13  ;;  %v7109_v4 = vrot.slane (!%p10229_p6), %v7073_v0, 5 }
 0x889   : > { %11453 = vmatpush3.bf16.msra.mxu0 (!%p10229_p6), %v12183_v1  ;;  %v10231_v53 = vrot.slane (!%p10229_p6), %v7074_v12, 9  ;;  %v12198_v40 = vld [vmem:[%s13145_s0] sm:$0xff] (!%p10229_p6)   ;;  %v12195_v20 = vld [vmem:[%s13145_s0 + $0x90] sm:$0xff] (!%p10229_p6)   ;;  %v7113_v35 = vrot.slane (!%p10229_p6), %v7075_v49, 5  ;;  %v7078_v29 = vld [vmem:[%s13121_s22 + $0x50] sm:$0xe] (!%p10229_p6) }
 0x88a   : > { %11454 = vmatprep.subr.bf16.mxu0 (!%p10229_p6), %v12184_v56  ;;  %11405 = vmatpush3.bf16.msra.mxu1 (!%p10229_p6), %v12190_v16  ;;  %v7076_v28 = vld [vmem:[%s13121_s22 + $0x38] sm:$0xe] (!%p10229_p6)  ;;  %v7077_v3 = vld [vmem:[%s13121_s22 + $0x3c] sm:$0x1] (!%p10229_p6)  ;;  %v7110_v11 = vsel (!%p10229_p6), %vm14576_vm14, %v10230_v15, %v7109_v4  ;;  %v7079_v42 = vld [vmem:[%s13121_s22 + $0x54] sm:$0x1] (!%p10229_p6) }
 0x88b   : > { %11406 = vmatprep.subr.bf16.mxu1 %v12192_v6  ;;  %v10232_v37 = vrot.slane %v7076_v28, 9  ;;  %v7117_v38 = vrot.slane %v7077_v3, 5  ;;  %v12194_v39 = vld [vmem:[%s13121_s22 + $0x240] ss:$24 sps:$4 sm:$0xff]   ;;  %v7114_v48 = vsel %vm14576_vm14, %v10231_v53, %v7113_v35  ;;  %v10233_v41 = vrot.slane %v7078_v29, 9  ;;  %v12197_v51 = vld [vmem:[%s13145_s0 + $0x98] sm:$0xff]   ;;  %vm14655_vm1 = vmor %vm7415_vm15, %vm7416_vm0 }
 0x88c   : > { %v7121_v30 = vrot.slane %v7079_v42, 5  ;;  %v10246_v31 = vcombine.low %v7110_v11, %v7114_v48  ;;  %v10326_v50 = vld [vmem:[%s13121_s22 + $0x1b8] sm:$0xe]  ;;  %v10327_v47 = vld [vmem:[%s13121_s22 + $0x1bc] sm:$0x1]  ;;  %v12200_v23 = vld [vmem:[%s13145_s0 + $0x8] sm:$0xff]  }
 0x88d   : > { %11455 = vmatpush3.bf16.msra.mxu0 %v12184_v56  ;;  %v7118_v13 = vsel %vm14576_vm14, %v10232_v37, %v7117_v38  ;;  %v10328_v27 = vld [vmem:[%s13121_s22 + $0x1d0] sm:$0xe]  ;;  %v10329_v45 = vld [vmem:[%s13121_s22 + $0x1d4] sm:$0x1]  ;;  %v10342_v2 = vrot.slane %v10326_v50, 9  ;;  %v7761_v14 = vrot.slane %v10327_v47, 5 }
 0x88e   : > { %11456 = vmatprep.subr.bf16.mxu0 %v12185_v5  ;;  %11407 = vmatpush3.bf16.msra.mxu1 %v12192_v6  ;;  %v7122_v19 = vsel %vm14576_vm14, %v10233_v41, %v7121_v30  ;;  %v10343_v57 = vrot.slane %v10328_v27, 9  ;;  %v7765_v36 = vrot.slane %v10329_v45, 5  ;;  %v10330_v63 = vld [vmem:[%s13121_s22 + $0x1e8] sm:$0xe]  ;;  %v10331_v61 = vld [vmem:[%s13121_s22 + $0x1ec] sm:$0x1] }
 0x88f   : > { %11408 = vmatprep.subr.bf16.mxu1 %v12196_v34  ;;  %11410 = vmatprep.mubr.msk.bf16.mxu1 %vm7184_vm11, %v10246_v31  ;;  %v10247_v60 = vcombine.low %v7118_v13, %v7122_v19  ;;  %v7762_v59 = vsel %vm14576_vm14, %v10342_v2, %v7761_v14  ;;  %v10332_v62 = vld [vmem:[%s13121_s22 + $0x200] sm:$0xe]  ;;  %v10333_v24 = vld [vmem:[%s13121_s22 + $0x204] sm:$0x1]  ;;  %v10344_v33 = vrot.slane %v10330_v63, 9  ;;  %v7769_v52 = vrot.slane %v10331_v61, 5 }
 0x890   : > { %v7766_v8 = vsel %vm14576_vm14, %v10343_v57, %v7765_v36  ;;  %v10345_v21 = vrot.slane %v10332_v62, 9  ;;  %v7773_v58 = vrot.slane %v10333_v24, 5  ;;  %v12199_v17 = vld [vmem:[%s13145_s0 + $0xa0] sm:$0xff]   ;;  %v7080_v43 = vld [vmem:[%s13121_s22 + $0x68] sm:$0xe]  ;;  %v12204_v63 = vld [vmem:[%s13145_s0 + $0x18] sm:$0xff]  }
 0x891   : > { %11457 = vmatpush3.bf16.msra.mxu0 %v12185_v5  ;;  %v10358_v55 = vcombine.low %v7762_v59, %v7766_v8  ;;  %v7770_v32 = vsel %vm14576_vm14, %v10344_v33, %v7769_v52  ;;  %v7081_v7 = vld [vmem:[%s13121_s22 + $0x6c] sm:$0x1]  ;;  %v7082_v1 = vld [vmem:[%s13121_s22 + $0x80] sm:$0xe]  ;;  %v7083_v56 = vld [vmem:[%s13121_s22 + $0x84] sm:$0x1] }
 0x892   : > { %11466 = vmatprep.subr.bf16.mxu0 %v12189_v22  ;;  %11409 = vmatpush3.bf16.msra.mxu1 %v12196_v34  ;;  %v7774_v18 = vsel %vm14576_vm14, %v10345_v21, %v7773_v58  ;;  %v10234_v9 = vrot.slane %v7080_v43, 9  ;;  %v7125_v46 = vrot.slane %v7081_v7, 5  ;;  %v10235_v5 = vrot.slane %v7082_v1, 9  ;;  %v7084_v6 = vld [vmem:[%s13121_s22 + $0x98] sm:$0xe]  ;;  %v12235_v2 = vld [vmem:[%s13157_s1 + $0x28] sm:$0xff]  }
 0x893   : > { %11418 = vmatprep.subr.bf16.mxu1 %v12198_v40  ;;  %v7129_v16 = vrot.slane %v7083_v56, 5  ;;  %v7087_v26 = vld [vmem:[%s13121_s22 + $0xb4] sm:$0x1]  ;;  %v10236_v0 = vrot.slane %v7084_v6, 9  ;;  %v10334_v35 = vld [vmem:[%s13121_s22 + $0x218] sm:$0xe] }
 0x894   : > { %11459 = vmatmul.mubr.msk.bf16.vlgmr.msra.gmra.mrb[0].mxu0 %vm7184_vm11, %v12188_v54  ;;  %v10359_v54 = vcombine.low %v7770_v32, %v7774_v18  ;;  %v7126_v34 = vsel %vm14576_vm14, %v10234_v9, %v7125_v46  ;;  %v7137_v4 = vrot.slane %v7087_v26, 5  ;;  %v10335_v28 = vld [vmem:[%s13121_s22 + $0x21c] sm:$0x1]  ;;  %v10336_v11 = vld [vmem:[%s13121_s22 + $0x230] sm:$0xe]  ;;  %v10346_v42 = vrot.slane %v10334_v35, 9 }
 0x895   : > { %11467 = vmatpush3.bf16.msra.mxu0 %v12189_v22  ;;  %11462 = vmatprep.mubr.msk.bf16.mxu0 %vm7184_vm11, %v12193_v44  ;;  %v7085_v22 = vld [vmem:[%s13121_s22 + $0x9c] sm:$0x1]  ;;  %v7086_v44 = vld [vmem:[%s13121_s22 + $0xb0] sm:$0xe]  ;;  %v7130_v49 = vsel %vm14576_vm14, %v10235_v5, %v7129_v16  ;;  %v10337_v29 = vld [vmem:[%s13121_s22 + $0x234] sm:$0x1] }
 0x896   : > { %11468 = vmatprep.subr.bf16.mxu0 %v12191_v10  ;;  %11411 = vmatmul.mubr.msk.bf16.vlgmr.msra.gmra.mrb[0].mxu1 %vm7184_vm11, %v10247_v60  ;;  %v7133_v12 = vrot.slane %v7085_v22, 5  ;;  %v10237_v15 = vrot.slane %v7086_v44, 9  ;;  %v10248_v53 = vcombine.low %v7126_v34, %v7130_v49  ;;  %v7777_v37 = vrot.slane %v10335_v28, 5  ;;  %v10338_v41 = vld [vmem:[%s13121_s22 + $0x248] sm:$0xe]  ;;  %v12208_v24 = vld [vmem:[%s13145_s0 + $0x40] sm:$0xff]  }
 0x897   : > { %11419 = vmatpush3.bf16.msra.mxu1 %v12198_v40  ;;  %v7781_v48 = vrot.slane %v10337_v29, 5  ;;  %v10339_v30 = vld [vmem:[%s13121_s22 + $0x24c] sm:$0x1]  ;;  %v10340_v13 = vld [vmem:[%s13121_s22 + $0x260] sm:$0xe]  ;;  %v10348_v47 = vrot.slane %v10338_v41, 9 }
 0x898   : > { %11420 = vmatprep.subr.bf16.mxu1 %v12200_v23  ;;  %v7134_v40 = vsel %vm14576_vm14, %v10236_v0, %v7133_v12  ;;  %v7138_v3 = vsel %vm14576_vm14, %v10237_v15, %v7137_v4  ;;  %11414 = vmatprep.mubr.msk.bf16.mxu1 %vm7184_vm11, %v10248_v53  ;;  %v7778_v31 = vsel %vm14576_vm14, %v10346_v42, %v7777_v37  ;;  %v10341_v50 = vld [vmem:[%s13121_s22 + $0x264] sm:$0x1]  ;;  %v7785_v27 = vrot.slane %v10339_v30, 5  ;;  %v12203_v60 = vld [vmem:[%s13145_s0 + $0xb0] sm:$0xff]   ;;  %v12206_v59 = vld [vmem:[%s13121_s22] ss:$24 sps:$4 sm:$0xff]  }
 0x899   : > { %11469 = vmatpush3.bf16.msra.mxu0 %v12191_v10  ;;  %v12201_v10 = vld [vmem:[%s13145_s0 + $0xa8] sm:$0xff]   ;;  %v10249_v38 = vcombine.low %v7134_v40, %v7138_v3  ;;  %v10349_v19 = vrot.slane %v10340_v13, 9  ;;  %v7789_v45 = vrot.slane %v10341_v50, 5  ;;  %v12207_v62 = vld [vmem:[%s13121_s22 + $0x30] ss:$24 sps:$4 sm:$0xff]  }
 0x89a   : > { %11470 = vmatprep.subr.bf16.mxu0 %v12195_v20  ;;  %v7786_v57 = vsel %vm14576_vm14, %v10348_v47, %v7785_v27  ;;  %v10370_v33 = vld [vmem:[%s13121_s22 + $0x1c0] sm:$0xc]  ;;  %v10371_v52 = vld [vmem:[%s13121_s22 + $0x1c4] sm:$0x3]  ;;  %v10372_v8 = vld [vmem:[%s13121_s22 + $0x1d8] sm:$0xc] }
 0x89b   : > { %11421 = vmatpush3.bf16.msra.mxu1 %v12200_v23  ;;  %v7790_v36 = vsel %vm14576_vm14, %v10349_v19, %v7789_v45  ;;  %v12205_v23 = vld [vmem:[%s13145_s0 + $0xb8] sm:$0xff]   ;;  %v10373_v21 = vld [vmem:[%s13121_s22 + $0x1dc] sm:$0x3]  ;;  %v10386_v58 = vrot.slane %v10370_v33, 10  ;;  %v10376_v1 = vld [vmem:[%s13121_s22 + $0x208] sm:$0xc] }
 0x89c   : > { %11463 = vmatmul.mubr.msk.bf16.gmra.mrb[4].mxu0 %vm7184_vm11, %v12194_v39  ;;  %v10347_v39 = vrot.slane %v10336_v11, 9  ;;  %v10361_v61 = vcombine.low %v7786_v57, %v7790_v36  ;;  %v7959_v32 = vrot.slane %v10373_v21, 6  ;;  %v10374_v18 = vld [vmem:[%s13121_s22 + $0x1f0] sm:$0xc]  ;;  %v10375_v43 = vld [vmem:[%s13121_s22 + $0x1f4] sm:$0x3] }
 0x89d   : > { %11471 = vmatpush3.bf16.msra.mxu0 %v12195_v20  ;;  %11474 = vmatprep.mubr.msk.bf16.mxu0 %vm7184_vm11, %v10358_v55  ;;  %v12202_v20 = vld [vmem:[%s13145_s0 + $0x10] sm:$0xff]   ;;  %v7955_v55 = vrot.slane %v10371_v52, 6  ;;  %v10388_v9 = vrot.slane %v10374_v18, 10  ;;  %v7963_v46 = vrot.slane %v10375_v43, 6  ;;  %v10389_v16 = vrot.slane %v10376_v1, 10  ;;  %v12210_v44 = vld [vmem:[%s13145_s0 + $0x48] sm:$0xff]  }
 0x89e   : > { %11472 = vmatprep.subr.bf16.mxu0 %v12197_v51  ;;  %11422 = vmatprep.subr.bf16.mxu1 %v12202_v20  ;;  %v10377_v56 = vld [vmem:[%s13121_s22 + $0x20c] sm:$0x3]  ;;  %v12211_v0 = vld [vmem:[%s13145_s0 + $0xc8] sm:$0xff]   ;;  %v12213_v49 = vld [vmem:[%s13121_s22 + $0x90] ss:$24 sps:$4 sm:$0xff]  }
 0x89f   : > { %11415 = vmatmul.mubr.msk.bf16.gmra.mrb[4].mxu1 %vm7184_vm11, %v10249_v38  ;;  %v7956_v7 = vsel %vm14655_vm1, %v10386_v58, %v7955_v55  ;;  %v7967_v6 = vrot.slane %v10377_v56, 6  ;;  %v12212_v12 = vld [vmem:[%s13121_s22 + $0x60] ss:$24 sps:$4 sm:$0xff]   ;;  %v12214_v15 = vld [vmem:[%s13145_s0 + $0x50] sm:$0xff]   ;;  %v10379_v53 = vld [vmem:[%s13121_s22 + $0x224] sm:$0x3] }
 0x8a0   : > { %11423 = vmatpush3.bf16.msra.mxu1 %v12202_v20  ;;  %11426 = vmatprep.mubr.msk.bf16.mxu1 %vm7184_vm11, %v12206_v59  ;;  %v10378_v4 = vld [vmem:[%s13121_s22 + $0x220] sm:$0xc]  ;;  %v10380_v40 = vld [vmem:[%s13121_s22 + $0x238] sm:$0xc]  ;;  %v10381_v20 = vld [vmem:[%s13121_s22 + $0x23c] sm:$0x3] }
 0x8a1   : > { %11473 = vmatpush3.bf16.msra.mxu0 %v12197_v51  ;;  %v7782_v51 = vsel %vm14576_vm14, %v10347_v39, %v7781_v48  ;;  %11424 = vmatprep.subr.bf16.mxu1 %v12204_v63  ;;  %v7968_v34 = vsel %vm14655_vm1, %v10389_v16, %v7967_v6  ;;  %v10390_v35 = vrot.slane %v10378_v4, 10  ;;  %v7971_v28 = vrot.slane %v10379_v53, 6  ;;  %v10382_v29 = vld [vmem:[%s13121_s22 + $0x250] sm:$0xc]  ;;  %v10383_v42 = vld [vmem:[%s13121_s22 + $0x254] sm:$0x3] }
 0x8a2   : > { %11482 = vmatprep.subr.bf16.mxu0 %v12199_v17  ;;  %v10360_v14 = vcombine.low %v7778_v31, %v7782_v51  ;;  %v10391_v3 = vrot.slane %v10380_v40, 10  ;;  %v7975_v11 = vrot.slane %v10381_v20, 6  ;;  %v10384_v38 = vld [vmem:[%s13121_s22 + $0x268] sm:$0xc]  ;;  %v10385_v39 = vld [vmem:[%s13121_s22 + $0x26c] sm:$0x3] }
 0x8a3   : > { %v7972_v37 = vsel %vm14655_vm1, %v10390_v35, %v7971_v28  ;;  %v10392_v48 = vrot.slane %v10382_v29, 10  ;;  %v7979_v41 = vrot.slane %v10383_v42, 6  ;;  %v10393_v31 = vrot.slane %v10384_v38, 10  ;;  %v12215_v27 = vld [vmem:[%s13145_s0 + $0xd0] sm:$0xff]   ;;  %v12216_v19 = vld [vmem:[%s13145_s0 + $0x58] sm:$0xff]   ;;  %v12221_v16 = vld [vmem:[%s13145_s0 + $0xe8] sm:$0xff]  }
 0x8a4   : > { %11475 = vmatmul.mubr.msk.bf16.vlgmr.msra.gmra.mrb[0].mxu0 %vm7184_vm11, %v10359_v54  ;;  %11425 = vmatpush3.bf16.msra.mxu1 %v12204_v63  ;;  %v7964_v54 = vsel %vm14655_vm1, %v10388_v9, %v7963_v46  ;;  %v7976_v30 = vsel %vm14655_vm1, %v10391_v3, %v7975_v11  ;;  %v7983_v13 = vrot.slane %v10385_v39, 6  ;;  %v7383_v57 = vld [vmem:[%s13121_s22 + $0x10] sm:$0xc]  ;;  %v7385_v36 = vld [vmem:[%s13121_s22 + $0x28] sm:$0xc] }
 0x8a5   : > { %11483 = vmatpush3.bf16.msra.mxu0 %v12199_v17  ;;  %11478 = vmatprep.mubr.msk.bf16.mxu0 %vm7184_vm11, %v10360_v14  ;;  %v10387_v17 = vrot.slane %v10372_v8, 10  ;;  %v10403_v26 = vcombine.low %v7964_v54, %v7968_v34  ;;  %v10404_v50 = vcombine.low %v7972_v37, %v7976_v30  ;;  %v7980_v47 = vsel %vm14655_vm1, %v10392_v48, %v7979_v41  ;;  %v12217_v14 = vld [vmem:[%s13145_s0 + $0xd8] sm:$0xff]   ;;  %v7386_v63 = vld [vmem:[%s13121_s22 + $0x2c] sm:$0x3]  ;;  %v7388_v33 = vld [vmem:[%s13121_s22 + $0x44] sm:$0x3] }
 0x8a6   : > { %11484 = vmatprep.subr.bf16.mxu0 %v12201_v10  ;;  %11434 = vmatprep.subr.bf16.mxu1 %v12208_v24  ;;  %v7984_v51 = vsel %vm14655_vm1, %v10393_v31, %v7983_v13  ;;  %v10271_v59 = vrot.slane %v7385_v36, 10  ;;  %v7389_v8 = vld [vmem:[%s13121_s22 + $0x58] sm:$0xc]  ;;  %v7390_v21 = vld [vmem:[%s13121_s22 + $0x5c] sm:$0x3]  ;;  %v7428_v55 = vrot.slane %v7388_v33, 6 }
 0x8a7   : > { %11427 = vmatmul.mubr.msk.bf16.vlgmr.msra.gmra.mrb[0].mxu1 %vm7184_vm11, %v12207_v62  ;;  %v7960_v5 = vsel %vm14655_vm1, %v10387_v17, %v7959_v32  ;;  %v10405_v45 = vcombine.low %v7980_v47, %v7984_v51  ;;  %v7424_v62 = vrot.slane %v7386_v63, 6  ;;  %v10273_v32 = vrot.slane %v7389_v8, 10  ;;  %v12218_v1 = vld [vmem:[%s13121_s22 + $0x360] ss:$24 sps:$4 sm:$0xff]   ;;  %v12219_v9 = vld [vmem:[%s13121_s22 + $0x390] ss:$24 sps:$4 sm:$0xff]  }
 0x8a8   : > { %11435 = vmatpush3.bf16.msra.mxu1 %v12208_v24  ;;  %v10402_v22 = vcombine.low %v7956_v7, %v7960_v5  ;;  %11430 = vmatprep.mubr.msk.bf16.mxu1 %vm7184_vm11, %v12212_v12  ;;  %v7387_v24 = vld [vmem:[%s13121_s22 + $0x40] sm:$0xc]  ;;  %v7432_v18 = vrot.slane %v7390_v21, 6  ;;  %v12220_v5 = vld [vmem:[%s13145_s0 + $0xe0] sm:$0xff]   ;;  %v7391_v6 = vld [vmem:[%s13121_s22 + $0x70] sm:$0xc] }
 0x8a9   : > { %11485 = vmatpush3.bf16.msra.mxu0 %v12201_v10  ;;  %v12209_v10 = vld [vmem:[%s13145_s0 + $0xc0] sm:$0xff]   ;;  %11436 = vmatprep.subr.bf16.mxu1 %v12210_v44  ;;  %v10272_v58 = vrot.slane %v7387_v24, 10  ;;  %v7425_v17 = vsel %vm14655_vm1, %v10271_v59, %v7424_v62  ;;  %v7393_v54 = vld [vmem:[%s13121_s22 + $0x88] sm:$0xc]  ;;  %v10274_v34 = vrot.slane %v7391_v6, 10  ;;  %v12225_v41 = vld [vmem:[%s13145_s0 + $0xf8] sm:$0xff]  }
 0x8aa   : > { %11486 = vmatprep.subr.bf16.mxu0 %v12203_v60  ;;  %v7433_v56 = vsel %vm14655_vm1, %v10273_v32, %v7432_v18  ;;  %v7395_v12 = vld [vmem:[%s13121_s22 + $0xa0] sm:$0xc]  ;;  %v7397_v4 = vld [vmem:[%s13121_s22 + $0xb8] sm:$0xc]  ;;  %v7398_v53 = vld [vmem:[%s13121_s22 + $0xbc] sm:$0x3] }
 0x8ab   : > { %v7429_v7 = vsel %vm14655_vm1, %v10272_v58, %v7428_v55  ;;  %v10276_v40 = vrot.slane %v7395_v12, 10  ;;  %v10277_v28 = vrot.slane %v7397_v4, 10  ;;  %v7448_v3 = vrot.slane %v7398_v53, 6  ;;  %v12222_v42 = vld [vmem:[%s13121_s22 + $0x3c0] ss:$24 sps:$4 sm:$0xff]   ;;  %v12224_v48 = vld [vmem:[%s13145_s0 + $0xf0] sm:$0xff]  }
 0x8ac   : > { %11479 = vmatmul.mubr.msk.bf16.gmra.mrb[4].mxu0 %vm7184_vm11, %v10361_v61  ;;  %11437 = vmatpush3.bf16.msra.mxu1 %v12210_v44  ;;  %v10270_v61 = vrot.slane %v7383_v57, 10  ;;  %v10287_v46 = vcombine.low %v7429_v7, %v7433_v56  ;;  %v12223_v38 = vld [vmem:[%s13121_s22 + $0x3f0] ss:$24 sps:$4 sm:$0xff]   ;;  %v10443_v31 = vld [vmem:[%s13121_s22 + $0x36c] sm:$0x1]  ;;  %v12227_v21 = vld [vmem:[%s13145_s0 + $0x108] sm:$0xff]  }
 0x8ad   : > { %11487 = vmatpush3.bf16.msra.mxu0 %v12203_v60  ;;  %11490 = vmatprep.mubr.msk.bf16.mxu0 %vm7184_vm11, %v10402_v22  ;;  %v7384_v60 = vld [vmem:[%s13121_s22 + $0x14] sm:$0x3]  ;;  %v7449_v37 = vsel %vm14655_vm1, %v10277_v28, %v7448_v3  ;;  %v10442_v30 = vld [vmem:[%s13121_s22 + $0x368] sm:$0xe]  ;;  %v10444_v13 = vld [vmem:[%s13121_s22 + $0x380] sm:$0xe] }
 0x8ae   : > { %11488 = vmatprep.subr.bf16.mxu0 %v12205_v23  ;;  %11438 = vmatprep.subr.bf16.mxu1 %v12214_v15  ;;  %v7392_v22 = vld [vmem:[%s13121_s22 + $0x74] sm:$0x3]  ;;  %v10458_v47 = vrot.slane %v10442_v30, 9  ;;  %v10459_v51 = vrot.slane %v10444_v13, 9  ;;  %v10450_v58 = vld [vmem:[%s13121_s22 + $0x3c8] sm:$0xe] }
 0x8af   : > { %11431 = vmatmul.mubr.msk.bf16.gmra.mrb[4].mxu1 %vm7184_vm11, %v12213_v49  ;;  %v7436_v44 = vrot.slane %v7392_v22, 6  ;;  %v7396_v49 = vld [vmem:[%s13121_s22 + $0xa4] sm:$0x3]  ;;  %v10449_v36 = vld [vmem:[%s13121_s22 + $0x3b4] sm:$0x1] }
 0x8b0   : > { %11439 = vmatpush3.bf16.msra.mxu1 %v12214_v15  ;;  %v7444_v20 = vrot.slane %v7396_v49, 6  ;;  %v8308_v62 = vrot.slane %v10449_v36, 5  ;;  %v10451_v55 = vld [vmem:[%s13121_s22 + $0x3cc] sm:$0x1]  ;;  %v10452_v32 = vld [vmem:[%s13121_s22 + $0x3e0] sm:$0xe] }
 0x8b1   : > { %11489 = vmatpush3.bf16.msra.mxu0 %v12205_v23  ;;  %11440 = vmatprep.subr.bf16.mxu1 %v12216_v19  ;;  %v7420_v23 = vrot.slane %v7384_v60, 6  ;;  %v7437_v15 = vsel %vm14655_vm1, %v10274_v34, %v7436_v44  ;;  %v10448_v60 = vld [vmem:[%s13121_s22 + $0x3b0] sm:$0xe]  ;;  %v10453_v18 = vld [vmem:[%s13121_s22 + $0x3e4] sm:$0x1]  ;;  %v8312_v7 = vrot.slane %v10451_v55, 5 }
 0x8b2   : > { %11498 = vmatprep.subr.bf16.mxu0 %v12209_v10  ;;  %v7445_v29 = vsel %vm14655_vm1, %v10276_v40, %v7444_v20  ;;  %v10461_v59 = vrot.slane %v10448_v60, 9  ;;  %v8316_v56 = vrot.slane %v10453_v18, 5  ;;  %v10457_v6 = vld [vmem:[%s13121_s22 + $0x414] sm:$0x1]  ;;  %v12228_v49 = vld [vmem:[%s13145_s0 + $0x110] sm:$0xff]  }
 0x8b3   : > { %v7421_v52 = vsel %vm14655_vm1, %v10270_v61, %v7420_v23  ;;  %v10289_v39 = vcombine.low %v7445_v29, %v7449_v37  ;;  %v8324_v44 = vrot.slane %v10457_v6, 5  ;;  %v10487_v4 = vld [vmem:[%s13121_s22 + $0x374] sm:$0x3]  ;;  %v10488_v53 = vld [vmem:[%s13121_s22 + $0x388] sm:$0xc] }
 0x8b4   : > { %11491 = vmatmul.mubr.msk.bf16.vlgmr.msra.gmra.mrb[0].mxu0 %vm7184_vm11, %v10403_v26  ;;  %11441 = vmatpush3.bf16.msra.mxu1 %v12216_v19  ;;  %v10286_v43 = vcombine.low %v7421_v52, %v7425_v17  ;;  %v10275_v26 = vrot.slane %v7393_v54, 10  ;;  %v12226_v52 = vld [vmem:[%s13145_s0 + $0x100] sm:$0xff]   ;;  %v8309_v8 = vsel %vm14576_vm14, %v10461_v59, %v8308_v62  ;;  %v10489_v40 = vld [vmem:[%s13121_s22 + $0x38c] sm:$0x3]  ;;  %v12229_v3 = vld [vmem:[%s13145_s0 + $0x118] sm:$0xff]  }
 0x8b5   : > { %11499 = vmatpush3.bf16.msra.mxu0 %v12209_v10  ;;  %11494 = vmatprep.mubr.msk.bf16.mxu0 %vm7184_vm11, %v10404_v50  ;;  %v7394_v10 = vld [vmem:[%s13121_s22 + $0x8c] sm:$0x3]  ;;  %v10445_v50 = vld [vmem:[%s13121_s22 + $0x384] sm:$0x1]  ;;  %v8494_v29 = vrot.slane %v10489_v40, 6 }
 0x8b6   : > { %11500 = vmatprep.subr.bf16.mxu0 %v12211_v0  ;;  %11442 = vmatprep.mubr.msk.bf16.mxu1 %vm7184_vm11, %v10286_v43  ;;  %v8300_v19 = vrot.slane %v10445_v50, 5  ;;  %v10462_v43 = vrot.slane %v10450_v58, 9  ;;  %v10490_v25 = vld [vmem:[%s13121_s22 + $0x3a0] sm:$0xc]  ;;  %v10494_v50 = vld [vmem:[%s13121_s22 + $0x3d0] sm:$0xc] }
 0x8b7   : > { %11443 = vmatmul.mubr.msk.bf16.vlgmr.msra.gmra.mrb[0].mxu1 %vm7184_vm11, %v10287_v46  ;;  %v10455_v46 = vld [vmem:[%s13121_s22 + $0x3fc] sm:$0x1]  ;;  %v10498_v36 = vld [vmem:[%s13121_s22 + $0x400] sm:$0xc]  ;;  %v10500_v59 = vld [vmem:[%s13121_s22 + $0x418] sm:$0xc] }
 0x8b8   : > { %v8301_v23 = vsel %vm14576_vm14, %v10459_v51, %v8300_v19  ;;  %v8320_v54 = vrot.slane %v10455_v46, 5  ;;  %v10496_v51 = vld [vmem:[%s13121_s22 + $0x3e8] sm:$0xc]  ;;  %v10497_v19 = vld [vmem:[%s13121_s22 + $0x3ec] sm:$0x3]  ;;  %v12234_v46 = vld [vmem:[%s13157_s1 + $0x20] sm:$0xff]  }
 0x8b9   : > { %11501 = vmatpush3.bf16.msra.mxu0 %v12211_v0  ;;  %v7440_v0 = vrot.slane %v7394_v10, 6  ;;  %v8510_v60 = vrot.slane %v10497_v19, 6  ;;  %v10501_v62 = vld [vmem:[%s13121_s22 + $0x41c] sm:$0x3] }
 0x8ba   : > { %11502 = vmatprep.subr.bf16.mxu0 %v12215_v27  ;;  %v8518_v58 = vrot.slane %v10501_v62, 6 }
 0x8bb   : > { %v7441_v35 = vsel %vm14655_vm1, %v10275_v26, %v7440_v0 }
 0x8bc   : > { %11495 = vmatmul.mubr.msk.bf16.gmra.mrb[4].mxu0 %vm7184_vm11, %v10405_v45  ;;  %v10288_v11 = vcombine.low %v7437_v15, %v7441_v35  ;;  %v10446_v45 = vld [vmem:[%s13121_s22 + $0x398] sm:$0xe]  ;;  %v10486_v15 = vld [vmem:[%s13121_s22 + $0x370] sm:$0xc]  ;;  %v8490_v35 = vrot.slane %v10487_v4, 6 }
 0x8bd   : > { %11503 = vmatpush3.bf16.msra.mxu0 %v12215_v27  ;;  %11506 = vmatprep.mubr.msk.bf16.mxu0 %vm7184_vm11, %v12218_v1  ;;  %v8296_v27 = vrot.slane %v10443_v31, 5  ;;  %v10460_v63 = vrot.slane %v10446_v45, 9  ;;  %v10463_v1 = vrot.slane %v10452_v32, 9  ;;  %v10502_v20 = vrot.slane %v10486_v15, 10 }
 0x8be   : > { %11504 = vmatprep.subr.bf16.mxu0 %v12217_v14  ;;  %11446 = vmatprep.mubr.msk.bf16.mxu1 %vm7184_vm11, %v10288_v11  ;;  %v10503_v11 = vrot.slane %v10488_v53, 10  ;;  %v10506_v45 = vrot.slane %v10494_v50, 10 }
 0x8bf   : > { %11447 = vmatmul.mubr.msk.bf16.gmra.mrb[4].mxu1 %vm7184_vm11, %v10289_v39  ;;  %v8297_v57 = vsel %vm14576_vm14, %v10458_v47, %v8296_v27  ;;  %v8317_v10 = vsel %vm14576_vm14, %v10463_v1, %v8316_v56  ;;  %v8491_v37 = vsel %vm14655_vm1, %v10502_v20, %v8490_v35  ;;  %v10493_v39 = vld [vmem:[%s13121_s22 + $0x3bc] sm:$0x3]  ;;  %v10495_v47 = vld [vmem:[%s13121_s22 + $0x3d4] sm:$0x3]  ;;  %v12231_v1 = vld [vmem:[%s13157_s1 + $0x8] sm:$0xff]  }
 0x8c0   : > { %v10474_v24 = vcombine.low %v8297_v57, %v8301_v23  ;;  %v8495_v30 = vsel %vm14655_vm1, %v10503_v11, %v8494_v29  ;;  %v8502_v13 = vrot.slane %v10493_v39, 6  ;;  %v10507_v57 = vrot.slane %v10496_v51, 10  ;;  %v12232_v56 = vld [vmem:[%s13157_s1 + $0x10] sm:$0xff]  }
 0x8c1   : > { %11505 = vmatpush3.bf16.msra.mxu0 %v12217_v14  ;;  %v10447_v14 = vld [vmem:[%s13121_s22 + $0x39c] sm:$0x1]  ;;  %v10518_v27 = vcombine.low %v8491_v37, %v8495_v30 }
 0x8c2   : > { %11514 = vmatprep.subr.bf16.mxu0 %v12220_v5  ;;  %v8304_v61 = vrot.slane %v10447_v14, 5  ;;  %v8506_v14 = vrot.slane %v10495_v47, 6 }
 0x8c4   : > { %11507 = vmatmul.mubr.msk.bf16.vlgmr.msra.gmra.mrb[0].mxu0 %vm7184_vm11, %v12219_v9  ;;  %v8305_v33 = vsel %vm14576_vm14, %v10460_v63, %v8304_v61  ;;  %v10454_v9 = vld [vmem:[%s13121_s22 + $0x3f8] sm:$0xe]  ;;  %v10499_v63 = vld [vmem:[%s13121_s22 + $0x404] sm:$0x3] }
 0x8c5   : > { %11515 = vmatpush3.bf16.msra.mxu0 %v12220_v5  ;;  %11510 = vmatprep.mubr.msk.bf16.mxu0 %vm7184_vm11, %v12222_v42  ;;  %v10475_v17 = vcombine.low %v8305_v33, %v8309_v8  ;;  %v8313_v5 = vsel %vm14576_vm14, %v10462_v43, %v8312_v7  ;;  %v10464_v22 = vrot.slane %v10454_v9, 9  ;;  %v10491_v42 = vld [vmem:[%s13121_s22 + $0x3a4] sm:$0x3]  ;;  %v8514_v33 = vrot.slane %v10499_v63, 6  ;;  %v12230_v7 = vld [vmem:[%s13157_s1] sm:$0xff]   ;;  %v12233_v9 = vld [vmem:[%s13157_s1 + $0x18] sm:$0xff]  }
 0x8c6   : > { %11516 = vmatprep.subr.bf16.mxu0 %v12221_v16  ;;  %v10476_v26 = vcombine.low %v8313_v5, %v8317_v10  ;;  %v8511_v8 = vsel %vm14655_vm1, %v10507_v57, %v8510_v60  ;;  %11546 = vmatprep.subr.bf16.mxu1 %v12230_v7  ;;  %v12236_v5 = vld [vmem:[%s13157_s1 + $0x30] sm:$0xff]  }
 0x8c7   : > { %v8321_v0 = vsel %vm14576_vm14, %v10464_v22, %v8320_v54  ;;  %11547 = vmatpush3.bf16.msra.mxu1 %v12230_v7 }
 0x8c8   : > { %11548 = vmatprep.subr.bf16.mxu1 %v12231_v1 }
 0x8c9   : > { %11517 = vmatpush3.bf16.msra.mxu0 %v12221_v16  ;;  %v10456_v16 = vld [vmem:[%s13121_s22 + $0x410] sm:$0xe] }
 0x8ca   : > { %11518 = vmatprep.subr.bf16.mxu0 %v12224_v48  ;;  %v10465_v34 = vrot.slane %v10456_v16, 9  ;;  %v12237_v16 = vld [vmem:[%s13157_s1 + $0x38] sm:$0xff]  }
 0x8cb   : > { %11549 = vmatpush3.bf16.msra.mxu1 %v12231_v1  ;;  %v8683_v1 = vld [vmem:[#allocation2 + $0x30] sm:$0xff] }
 0x8cc   : > { %11511 = vmatmul.mubr.msk.bf16.gmra.mrb[4].mxu0 %vm7184_vm11, %v12223_v38  ;;  %v8325_v12 = vsel %vm14576_vm14, %v10465_v34, %v8324_v44  ;;  %v10492_v38 = vld [vmem:[%s13121_s22 + $0x3b8] sm:$0xc]  ;;  %11550 = vmatprep.subr.bf16.mxu1 %v12232_v56 }
 0x8cd   : > { %11519 = vmatpush3.bf16.msra.mxu0 %v12224_v48  ;;  %11522 = vmatprep.mubr.msk.bf16.mxu0 %vm7184_vm11, %v10474_v24  ;;  %v10477_v28 = vcombine.low %v8321_v0, %v8325_v12  ;;  %v10504_v48 = vrot.slane %v10490_v25, 10  ;;  %v10505_v31 = vrot.slane %v10492_v38, 10  ;;  %v10508_v24 = vrot.slane %v10498_v36, 10 }
 0x8ce   : > { %11520 = vmatprep.subr.bf16.mxu0 %v12225_v41 }
 0x8cf   : > { %v8503_v23 = vsel %vm14655_vm1, %v10505_v31, %v8502_v13  ;;  %v8515_v32 = vsel %vm14655_vm1, %v10508_v24, %v8514_v33  ;;  %11551 = vmatpush3.bf16.msra.mxu1 %v12232_v56  ;;  %v8679_v24 = vld [vmem:[#allocation2 + $0x10] sm:$0xff]  ;;  %v8677_v33 = vld [vmem:[#allocation2] sm:$0xff] }
 0x8d0   : > { %11552 = vmatprep.subr.bf16.mxu1 %v12233_v9  ;;  %v8681_v56 = vld [vmem:[#allocation2 + $0x20] sm:$0xff] }
 0x8d1   : > { %11521 = vmatpush3.bf16.msra.mxu0 %v12225_v41  ;;  %v8498_v41 = vrot.slane %v10491_v42, 6 }
 0x8d2   : > { %11530 = vmatprep.subr.bf16.mxu0 %v12226_v52 }
 0x8d3   : > { %v8499_v61 = vsel %vm14655_vm1, %v10504_v48, %v8498_v41  ;;  %11553 = vmatpush3.bf16.msra.mxu1 %v12233_v9 }
 0x8d4   : > { %11523 = vmatmul.mubr.msk.bf16.vlgmr.msra.gmra.mrb[0].mxu0 %vm7184_vm11, %v10475_v17  ;;  %v10519_v55 = vcombine.low %v8499_v61, %v8503_v23  ;;  %11554 = vmatprep.subr.bf16.mxu1 %v12234_v46 }
 0x8d5   : > { %11531 = vmatpush3.bf16.msra.mxu0 %v12226_v52  ;;  %11526 = vmatprep.mubr.msk.bf16.mxu0 %vm7184_vm11, %v10476_v26  ;;  %v8507_v52 = vsel %vm14655_vm1, %v10506_v45, %v8506_v14 }
 0x8d6   : > { %11532 = vmatprep.subr.bf16.mxu0 %v12227_v21  ;;  %v10520_v17 = vcombine.low %v8507_v52, %v8511_v8  ;;  %v8680_v8 = vld [vmem:[#allocation2 + $0x18] sm:$0xff] }
 0x8d7   : > { %11555 = vmatpush3.bf16.msra.mxu1 %v12234_v46  ;;  %v8684_v46 = vld [vmem:[#allocation2 + $0x38] sm:$0xff] }
 0x8d8   : > { %11556 = vmatprep.subr.bf16.mxu1 %v12235_v2 }
 0x8d9   : > { %11533 = vmatpush3.bf16.msra.mxu0 %v12227_v21  ;;  %v10509_v21 = vrot.slane %v10500_v59, 10 }
 0x8da   : > { %11534 = vmatprep.subr.bf16.mxu0 %v12228_v49 }
 0x8db   : > { %v8519_v18 = vsel %vm14655_vm1, %v10509_v21, %v8518_v58  ;;  %11557 = vmatpush3.bf16.msra.mxu1 %v12235_v2 }
 0x8dc   : > { %11527 = vmatmul.mubr.msk.bf16.gmra.mrb[4].mxu0 %vm7184_vm11, %v10477_v28  ;;  %v10521_v43 = vcombine.low %v8515_v32, %v8519_v18  ;;  %11558 = vmatprep.subr.bf16.mxu1 %v12236_v5 }
 0x8dd   : > { %11535 = vmatpush3.bf16.msra.mxu0 %v12228_v49  ;;  %11538 = vmatprep.mubr.msk.bf16.mxu0 %vm7184_vm11, %v10518_v27  ;;  %v10530_v49 = vld [vmem:[%s13151_s23] ss:$0 sm:$0xff] }
 0x8de   : > { %11536 = vmatprep.subr.bf16.mxu0 %v12229_v3 }
 0x8df   : > { %11559 = vmatpush3.bf16.msra.mxu1 %v12236_v5 }
 0x8e0   : > { %11560 = vmatprep.subr.bf16.mxu1 %v12237_v16 }
 0x8e1   : > { %11537 = vmatpush3.bf16.msra.mxu0 %v12229_v3 }
 0x8e3   : > { %11561 = vmatpush3.bf16.msra.mxu1 %v12237_v16  ;;  %v8682_v16 = vld [vmem:[#allocation2 + $0x28] sm:$0xff] }
 0x8e4   : > { %11539 = vmatmul.mubr.msk.bf16.vlgmr.msra.gmra.mrb[0].mxu0 %vm7184_vm11, %v10519_v55  ;;  %v8678_v55 = vld [vmem:[#allocation2 + $0x8] sm:$0xff] }
 0x8e5   : > { %11542 = vmatprep.mubr.msk.bf16.mxu0 %vm7184_vm11, %v10520_v17 }
 0x8ec   : > { %11543 = vmatmul.mubr.msk.bf16.gmra.mrb[4].mxu0 %vm7184_vm11, %v10521_v43 }
 0x98a   : > { %v11444_v6 = vpop.f32.mrb[0].mxu1 }
 0x98b   : > { %v7541_v22 = vpop.f32.mrb[1].mxu1 }
 0x98c   : > { %v11445_v54 = vpop.f32.mrb[2].mxu1 }
 0x98d   : > { %v7544_v10 = vpop.f32.mrb[3].mxu1 }
 0x992   : > { %v11448_v34 = vpop.f32.mrb[4].mxu1 }
 0x993   : > { %v7557_v44 = vpop.f32.mrb[5].mxu1 }
 0x994   : > { %v11449_v26 = vpop.f32.mrb[6].mxu1 }
 0x995   : > { %v7560_v0 = vpop.f32.mrb[7].mxu1 }
 0x9b7   : > { %v11540_v12 = vpop.f32.mrb[0].mxu0 }
 0x9b8   : > { %v11762_v15 = vadd.f32 %v11540_v12, %v11444_v6  ;;  %v8611_v4 = vpop.f32.mrb[1].mxu0 }
 0x9b9   : > { %v11763_v53 = vadd.f32 %v8611_v4, %v7541_v22  ;;  %v11541_v40 = vpop.f32.mrb[2].mxu0 }
 0x9ba   : > { %v8659_v20 = vadd.f32 %v11762_v15, %v10530_v49  ;;  %v11764_v35 = vadd.f32 %v11541_v40, %v11445_v54  ;;  %v8614_v28 = vpop.f32.mrb[3].mxu0 }
 0x9bb   : > { %v8657_v3 = vadd.f32 %v11763_v53, %v10530_v49  ;;  %v11765_v11 = vadd.f32 %v8614_v28, %v7544_v10 }
 0x9bc   : > { %v8660_v29 = vadd.f32 %v11764_v35, %v10530_v49  ;;  %v8667_v42 = vmax.f32 %v8659_v20, 0.0 }
 0x9bd   : > { %v8658_v25 = vadd.f32 %v11765_v11, %v10530_v49  ;;  %v8665_v38 = vmax.f32 %v8657_v3, 0.0 }
 0x9be   : > { %v8668_v37 = vmax.f32 %v8660_v29, 0.0 }
 0x9bf   : > { %v8666_v39 = vmax.f32 %v8658_v25, 0.0  ;;  %v11544_v48 = vpop.f32.mrb[4].mxu0 }
 0x9c0   : > { %v8674_v41 = vpack.c.bf16 %v8668_v37, %v8667_v42  ;;  %v11766_v30 = vadd.f32 %v11544_v48, %v11448_v34  ;;  %v8627_v31 = vpop.f32.mrb[5].mxu0 }
 0x9c1   : > { %v11767_v13 = vadd.f32 %v8627_v31, %v7557_v44  ;;  %v11545_v50 = vpop.f32.mrb[6].mxu0  ;;  %v8673_v47 = vpack.c.bf16 %v8666_v39, %v8665_v38 }
 0x9c2   : > { %v8663_v27 = vadd.f32 %v11766_v30, %v10530_v49  ;;  %v11768_v51 = vadd.f32 %v11545_v50, %v11449_v26  ;;  %v8630_v19 = vpop.f32.mrb[7].mxu0 }
 0x9c3   : > { %v8661_v45 = vadd.f32 %v11767_v13, %v10530_v49  ;;  %v11769_v14 = vadd.f32 %v8630_v19, %v7560_v0  ;;  %11562 = vmatprep.mubr.bf16.mxu1 %v8673_v47 }
 0x9c4   : > { %v8664_v57 = vadd.f32 %v11768_v51, %v10530_v49  ;;  %11563 = vmatmul.mubr.bf16.vlgmr.msra.gmra.mrb[8].mxu1 %v8674_v41  ;;  %v8671_v36 = vmax.f32 %v8663_v27, 0.0 }
 0x9c5   : > { %v8662_v60 = vadd.f32 %v11769_v14, %v10530_v49  ;;  %v8669_v61 = vmax.f32 %v8661_v45, 0.0 }
 0x9c6   : > { %v8672_v63 = vmax.f32 %v8664_v57, 0.0 }
 0x9c7   : > { %v8670_v23 = vmax.f32 %v8662_v60, 0.0 }
 0x9c8   : > { %v8676_v59 = vpack.c.bf16 %v8672_v63, %v8671_v36 }
 0x9c9   : > { %v8675_v62 = vpack.c.bf16 %v8670_v23, %v8669_v61 }
 0x9cb   : > { %11566 = vmatprep.mubr.bf16.mxu1 %v8675_v62 }
 0x9cc   : > { %11567 = vmatmul.mubr.bf16.gmra.mrb[12].mxu1 %v8676_v59 }
 0xa97   : > { %v11564_v52 = vpop.f32.mrb[8].mxu1 }
 0xa98   : > { %v8816_v21 = vadd.f32 %v11564_v52, %v8679_v24  ;;  %v8783_v58 = vpop.f32.mrb[9].mxu1 }
 0xa99   : > { %v8814_v17 = vadd.f32 %v8783_v58, %v8677_v33  ;;  %v11565_v32 = vpop.f32.mrb[10].mxu1 }
 0xa9a   : > { %8825 = vst.msk [vmem:[#allocation2 + $0x10] sm:$0xff] %vm8822_vm2, %v8816_v21  ;;  %v8817_v18 = vadd.f32 %v11565_v32, %v8680_v8  ;;  %v8786_v43 = vpop.f32.mrb[11].mxu1 }
 0xa9b   : > { %8823 = vst.msk [vmem:[#allocation2] sm:$0xff] %vm8822_vm2, %v8814_v17  ;;  %v8815_v7 = vadd.f32 %v8786_v43, %v8678_v55 }
 0xa9c   : > { %8826 = vst.msk [vmem:[#allocation2 + $0x18] sm:$0xff] %vm8822_vm2, %v8817_v18 }
 0xa9d   : > { %8824 = vst.msk [vmem:[#allocation2 + $0x8] sm:$0xff] %vm8822_vm2, %v8815_v7 }
 0xa9f   : > { %v11568_v9 = vpop.f32.mrb[12].mxu1 }
 0xaa0   : > { %v8820_v2 = vadd.f32 %v11568_v9, %v8683_v1  ;;  %v8799_v5 = vpop.f32.mrb[13].mxu1 }
 0xaa1   : > { %v8833_v6 = vld [vmem:[#allocation2 + $0x10] sm:$0xff]  ;;  %v8818_v22 = vadd.f32 %v8799_v5, %v8681_v56  ;;  %v11569_v54 = vpop.f32.mrb[14].mxu1 }
 0xaa2   : > { %v8841_v10 = vmax.f32 %v8833_v6, 0.0  ;;  %v8831_v34 = vld [vmem:[#allocation2] sm:$0xff]  ;;  %8829 = vst.msk [vmem:[#allocation2 + $0x30] sm:$0xff] %vm8822_vm2, %v8820_v2  ;;  %v8821_v44 = vadd.f32 %v11569_v54, %v8684_v46  ;;  %v8802_v26 = vpop.f32.mrb[15].mxu1 }
 0xaa3   : > { %v8839_v0 = vmax.f32 %v8831_v34, 0.0  ;;  %v8834_v12 = vld [vmem:[#allocation2 + $0x18] sm:$0xff]  ;;  %8827 = vst.msk [vmem:[#allocation2 + $0x20] sm:$0xff] %vm8822_vm2, %v8818_v22  ;;  %v8819_v49 = vadd.f32 %v8802_v26, %v8682_v16 }
 0xaa4   : > { %v10555_v15 = vpack.c.bf16 %v8841_v10, %v8841_v10  ;;  %v8842_v4 = vmax.f32 %v8834_v12, 0.0  ;;  %v8832_v53 = vld [vmem:[#allocation2 + $0x8] sm:$0xff]  ;;  %8830 = vst.msk [vmem:[#allocation2 + $0x38] sm:$0xff] %vm8822_vm2, %v8821_v44 }
 0xaa5   : > { %v10553_v40 = vpack.c.bf16 %v8839_v0, %v8839_v0  ;;  %v8840_v20 = vmax.f32 %v8832_v53, 0.0  ;;  %8828 = vst.msk [vmem:[#allocation2 + $0x28] sm:$0xff] %vm8822_vm2, %v8819_v49 }
 0xaa6   : > { %8882 = vst.msk [vmem:[%s13164_s26 + $0x8] sm:$0xf] %vm8879_vm3, %v10555_v15  ;;  %v10556_v35 = vpack.c.bf16 %v8842_v4, %v8842_v4 }
 0xaa7   : > { %8880 = vst.msk [vmem:[%s13164_s26] sm:$0xf] %vm8879_vm3, %v10553_v40  ;;  %v10554_v28 = vpack.c.bf16 %v8840_v20, %v8840_v20 }
 0xaa8   : > { %8883 = vst.msk [vmem:[%s13164_s26 + $0xc] sm:$0xf] %vm8879_vm3, %v10556_v35 }
 0xaa9   : > { %8881 = vst.msk [vmem:[%s13164_s26 + $0x4] sm:$0xf] %vm8879_vm3, %v10554_v28  ;;  %v8837_v3 = vld [vmem:[#allocation2 + $0x30] sm:$0xff] }
 0xaaa   : > { %v8845_v11 = vmax.f32 %v8837_v3, 0.0  ;;  %v8835_v29 = vld [vmem:[#allocation2 + $0x20] sm:$0xff] }
 0xaab   : > { %v8843_v25 = vmax.f32 %v8835_v29, 0.0  ;;  %v8838_v42 = vld [vmem:[#allocation2 + $0x38] sm:$0xff] }
 0xaac   : > { %v10559_v37 = vpack.c.bf16 %v8845_v11, %v8845_v11  ;;  %v8846_v38 = vmax.f32 %v8838_v42, 0.0  ;;  %v8836_v39 = vld [vmem:[#allocation2 + $0x28] sm:$0xff] }
 0xaad   : > { %v10557_v48 = vpack.c.bf16 %v8843_v25, %v8843_v25  ;;  %v8844_v41 = vmax.f32 %v8836_v39, 0.0 }
 0xaae   : > { %8886 = vst.msk [vmem:[%s13164_s26 + $0x18] sm:$0xf] %vm8879_vm3, %v10559_v37  ;;  %v10560_v30 = vpack.c.bf16 %v8846_v38, %v8846_v38 }
 0xaaf   : > { %8884 = vst.msk [vmem:[%s13164_s26 + $0x10] sm:$0xf] %vm8879_vm3, %v10557_v48  ;;  %v10558_v31 = vpack.c.bf16 %v8844_v41, %v8844_v41 }
 0xab0   : > { %8887 = vst.msk [vmem:[%s13164_s26 + $0x1c] sm:$0xf] %vm8879_vm3, %v10560_v30 }
 0xab1   : > { %8885 = vst.msk [vmem:[%s13164_s26 + $0x14] sm:$0xf] %vm8879_vm3, %v10558_v31 }
 0xab2 PF: > { %s15083_s30 = sld [smem:[#allocation31_spill]]  ;;  %s15084_s2 = sld [smem:[#allocation37_spill]] }
 0xab3   : > { %s15085_s22 = sld [smem:[#allocation47_spill]]  ;;  %s8902_s20 = sshll.u32 %s13164_s26, 4  ;;  %s14884_s20 = int_to_ptr.vmem [resolvable:$true] %s8902_s20 }
 0xab4   : > { %s8889_s12 = scalar_lea.sflag [#allocation5], %s13118_s16  ;;  %s12500_s25 = scalar_lea.vmem %s14884_s20, 512 }
 0xab5   : > { %p12501_p13 = scmp.ne.s32.totalorder %s14884_s20, %s12500_s25  ;;  %s12666_s29 = smov [#allocation17]  }
 0xab6   : > { %s12504_s0 = sshll.u32 %s12666_s29, 4  ;;  %s12505_s0 = int_to_ptr.vmem [resolvable:$false] %s12504_s0 }
 0xab7   : > { %s12506_s23 = scalar_lea.vmem %s12505_s0, 1024  ;;  %p12507_p2 = scmp.lt.s32.totalorder %s14884_s20, %s12505_s0 }
 0xab8   : > { %s10561_s15 = sshll.u32 %s15083_s30, 9  ;;  %p15086_p7 = scmp.ne.s32.totalorder %s15084_s2, 0 }
 0xab9   : > { %s14881_s13 = scalar_lea.hbm %s15085_s22, %s10561_s15  ;;  %p12508_p5 = scmp.lt.s32.totalorder %s12506_s23, %s12500_s25 }
 0xaba   : > { %p12502_p8 = pnand %p12501_p13, %p15086_p7 }
 0xabb   : > { %p12509_p12 = por %p12508_p5, %p12507_p2 }
 0xabc   : > { %p12503_p9 = pneg %p12502_p8 }
 0xabe   : > { %p12510_p3 = pnand %p12509_p12, %p12503_p9 }
 0xac0   : > { %12513 = shalt.err (!%p12510_p3)
}
 0xac1   : > { %s12514_s9 = scalar_lea.hbm %s14881_s13, 512  ;;  %s12518_s26 = scalar_lea.hbm %s15085_s22, 1024 }
 0xac2   : > { %p12515_p0 = scmp.ne.s32.totalorder %s14881_s13, %s12514_s9  ;;  %p12519_p4 = scmp.lt.u32.totalorder %s14881_s13, %s15085_s22 }
 0xac3   : > { %p12520_p10 = scmp.lt.u32.totalorder %s12518_s26, %s12514_s9  ;;  %p12522_p13 = scmp.lt.u32.totalorder %s12514_s9, %s14881_s13 }
 0xac4   : > { %p12516_p11 = pnand %p12515_p0, %p15086_p7 }
 0xac5   : > { %p12521_p6 = por %p12520_p10, %p12519_p4 }
 0xac6   : > { %p12517_p1 = pneg %p12516_p11 }
 0xac7   : > { %p12523_p8 = por %p12522_p13, %p12521_p6 }
 0xac9   : > { %p12524_p9 = pnand %p12523_p8, %p12517_p1 }
 0xacb   : > { %12527 = shalt.err (!%p12524_p9)
}
 0xacc   : > { %s12667_s28 = smov 64   ;;  %s12668_s18 = smov 4  }
 0xacd   : > { %11858 = dma.vmem_to_hbm [thread:$0]  (%p15086_p7), %s14884_s20, 512, %s14881_s13, %s8889_s12, %s12667_s28, %s12667_s28, %s12668_s18  }
 0xace PF: > { %s15087_s30 = sld [smem:[#allocation27_spill]]  ;;  %p11902_p2 = scmp.ge.s32.totalorder %s12650_s19, 2 }
 0xacf   : > { %s15088_s15 = sld [smem:[#allocation40_spill]] }
 0xad4   : > { %s8917_s24 = sand.u32 1, %s15087_s30  }
 0xad5   : > { %p15089_p5 = scmp.ne.s32.totalorder %s15088_s15, 0  ;;  %s8918_s27 = scalar_lea.sflag [#allocation5], %s8917_s24 }
 0xad7   : > { %p11890_p12 = pnand %p11902_p2, %p15089_p5 }
 0xad9   : > { %12605 = dma.done.wait (!%p11890_p12), %s8918_s27, 512  }
 0xada   : > { %12607 = vsyncadd (!%p11890_p12), %s8918_s27, 4294966784  ;;  %s30_s19 = sadd.s32 1, %s12650_s19   ;;  %s15090_s12 = sld [smem:[#allocation28_spill]] }
 0xadb   : > { %p27_p3 = scmp.ge.s32.totalorder %s30_s19, 10   ;;  %s15091_s13 = sld [smem:[#allocation29_spill]] }
 0xadc   : > { %s15092_s14 = sld [smem:[#allocation41_spill]]  ;;  %s15093_s16 = sld [smem:[#allocation32_spill]] }
 0xadd   : > { %s15094_s2 = sld [smem:[#allocation36_spill]]  ;;  %s15095_s18 = sld [smem:[#allocation39_spill]] }
 0xade   : > { %s15096_s30 = smov %s12614_s10  ;;  %s15097_s10 = smov %s12618_s11 }
 0xadf   : > { %s15098_s11 = smov %s12973_s21  ;;  %s15099_s15 = smov %s12642_s17 }
 0xae0   :  { %29 = sbr.rel (!%p27_p3) target bundleno = 20 (0x14), region = 222 }
 0xae3   : > { %s15100_s17 = smov %s15094_s2 }
 0xae7   :  { %8923 = vsyncpa [#allocation4], 1 }
 0xae8   :  { %8925 = vsyncpa [#allocation4 + $0x1], 1 }
 0xae9   :  { %8926 = vsyncpa [#allocation7], 1 }
 0xaea   :  { %8928 = vsyncpa [#allocation7 + $0x1], 1 }
 0xaeb   :  { %8929 = vsyncpa [#allocation10], 1 }
 0xaec   :  { %8930 = vsyncpa [#allocation13], 1 }
 0xaed   :  { %8931 = vsyncpa [#allocation5], 1 }
 0xaee   :  { %8933 = vsyncpa [#allocation5 + $0x1], 1 }

</bundles_post_ra>
